<compile_context>
chip_gen: v6e
topology: v6e:2x2x1
jax: 0.10.0
libtpu: 0.0.40
codegen_flags: <defaults>
</compile_context>

<pallas_src>
from functools import partial

import jax
import jax.numpy as jnp
from jax import lax
from jax.experimental import pallas as pl
from jax.experimental.pallas import tpu as pltpu

_DILATIONS = (1, 2, 4, 8)
_PAD = 8  # max dilation; one halo covers every conv in the block


# ---------------------------------------------------------------------------
# Fused Pallas kernel: 4 dilated convs + ReLUs + residual sum, one batch
# element per grid step. Everything except the final sum stays in VMEM.
# ---------------------------------------------------------------------------
def _dblock_fused_kernel(x_ref, w_ref, b_ref, o_ref, xp_ref, *, H, W, C):
    """
    x_ref : (1, C, H*W)        input activation (lane-dense)
    w_ref : (4, C, 9*C)        per-conv matmul weights, rows=C_out, cols=tap*C+ci
    b_ref : (4, C, 1)          per-conv biases
    o_ref : (1, C, H*W)        fused output (x + d1 + d2 + d3 + d4)
    xp_ref: (C, H+2P, W+2P)    VMEM scratch holding the zero-padded activation
    """
    P = _PAD
    HW = H * W

    # Zero the padded scratch every step (borders must be zero; cheap VPU memset,
    # and safe under megacore sharding of the "parallel" grid axis).
    xp_ref[...] = jnp.zeros_like(xp_ref)

    x = x_ref[0].astype(jnp.float32)                        # (C, HW)
    xp_ref[:, P:P + H, P:P + W] = x.reshape(C, H, W)

    acc = x                                                  # residual starts at x
    for k, d in enumerate(_DILATIONS):
        # Build im2col (9*C, HW) from the padded scratch with static tap slices.
        cols = []
        for dy in range(3):
            for dx in range(3):
                rs = P + (dy - 1) * d
                cs = P + (dx - 1) * d
                cols.append(xp_ref[:, rs:rs + H, cs:cs + W].reshape(C, HW))
        im2col = jnp.concatenate(cols, axis=0)               # (9C, HW)

        # One MXU matmul per conv: (C, 9C) @ (9C, HW) -> (C, HW), f32 accumulate.
        y = jnp.dot(w_ref[k], im2col, preferred_element_type=jnp.float32)
        y = jnp.maximum(y + b_ref[k], 0.0)                   # bias (C,1) + ReLU

        acc = acc + y
        if k < len(_DILATIONS) - 1:
            # Feed this conv's output to the next conv (borders stay zero).
            xp_ref[:, P:P + H, P:P + W] = y.reshape(C, H, W)

    o_ref[0] = acc.astype(o_ref.dtype)


# ---------------------------------------------------------------------------
# Wrapper: stacks the parallel list along batch, packs weights, one pallas_call.
# ---------------------------------------------------------------------------
def dblock_parallel_forward(x_list_nchw, weights_hwio, biases):
    """x_list_nchw: list (len num_parallel) of (N, C, H, W). Returns same structure."""
    L = len(x_list_nchw)
    x_all = jnp.stack(x_list_nchw, axis=0)                   # (L, N, C, H, W)
    _, N, C, H, W = x_all.shape
    HW = H * W
    B = L * N
    x_flat = x_all.reshape(B, C, HW)                         # lane-dense, no transpose

    # Weights: HWIO (3,3,Ci,Co) -> (Co, 3,3,Ci) -> (Co, 9*Ci); column = tap*C + ci
    # (tap = 3*dy + dx), matching the im2col row order inside the kernel.
    w_mat = jnp.stack(
        [w.transpose(3, 0, 1, 2).reshape(C, 9 * C) for w in weights_hwio], axis=0
    )                                                        # (4, C, 9C)
    b_all = jnp.stack(biases, axis=0).reshape(4, C, 1)       # (4, C, 1)

    kernel = partial(_dblock_fused_kernel, H=H, W=W, C=C)

    # NOTE: at production image sizes, tile H into row strips with a 2*d halo and
    # set vmem_limit_bytes (v7x has 64 MiB VMEM); whole-image blocks are fine here.
    out = pl.pallas_call(
        kernel,
        out_shape=jax.ShapeDtypeStruct((B, C, HW), x_flat.dtype),
        grid=(B,),
        in_specs=[
            pl.BlockSpec((1, C, HW), lambda b: (b, 0, 0)),
            pl.BlockSpec((4, C, 9 * C), lambda b: (0, 0, 0)),
            pl.BlockSpec((4, C, 1), lambda b: (0, 0, 0)),
        ],
        out_specs=pl.BlockSpec((1, C, HW), lambda b: (b, 0, 0)),
        scratch_shapes=[pltpu.VMEM((C, H + 2 * _PAD, W + 2 * _PAD), jnp.float32)],
        compiler_params=pltpu.CompilerParams(dimension_semantics=("parallel",)),
    )(x_flat, w_mat, b_all)

    out = out.reshape(L, N, C, H, W)
    return [out[l] for l in range(L)]


# ---------------------------------------------------------------------------
# Pure-JAX reference (correctness check only)
# ---------------------------------------------------------------------------
def _ref_conv_relu(x_nchw, w_hwio, bias, dilation):
    y = lax.conv_general_dilated(
        x_nchw, w_hwio,
        window_strides=(1, 1),
        padding=[(dilation, dilation), (dilation, dilation)],
        rhs_dilation=(dilation, dilation),
        dimension_numbers=("NCHW", "HWIO", "NCHW"),
    )
    return jnp.maximum(y + bias[None, :, None, None], 0.0)


def _ref_forward(x_list_nchw, weights_hwio, biases):
    outs = []
    for x in x_list_nchw:
        d1 = _ref_conv_relu(x, weights_hwio[0], biases[0], 1)
        d2 = _ref_conv_relu(d1, weights_hwio[1], biases[1], 2)
        d3 = _ref_conv_relu(d2, weights_hwio[2], biases[2], 4)
        d4 = _ref_conv_relu(d3, weights_hwio[3], biases[3], 8)
        outs.append(x + d1 + d2 + d3 + d4)
    return outs


# ---------------------------------------------------------------------------
if __name__ == "__main__":
    key = jax.random.PRNGKey(0)

    channel = 8
    num_parallel = 2
    N, H, W = 2, 16, 16

    # Deterministic parameter init (PyTorch-like kaiming-uniform bound), biases zeroed.
    keys = jax.random.split(key, 1 + 4)
    bound = 1.0 / jnp.sqrt(jnp.float32(channel * 9))
    weights_hwio = [
        jax.random.uniform(keys[1 + i], (3, 3, channel, channel),
                           minval=-bound, maxval=bound, dtype=jnp.float32)
        for i in range(4)
    ]
    biases = [jnp.zeros((channel,), jnp.float32) for _ in range(4)]

    # Parallel input list (NCHW, matching the PyTorch module).
    xkeys = jax.random.split(keys[0], num_parallel)
    x_list = [
        jax.random.normal(xkeys[l], (N, channel, H, W), dtype=jnp.float32)
        for l in range(num_parallel)
    ]

    outs = dblock_parallel_forward(x_list, weights_hwio, biases)
    outs = [jax.block_until_ready(o) for o in outs]

    refs = _ref_forward(x_list, weights_hwio, biases)
    for o, r in zip(outs, refs):
        assert o.shape == r.shape and o.dtype == r.dtype
        assert jnp.allclose(o, r, atol=1e-4, rtol=1e-4), "mismatch vs reference"

    print("KERNEL_OK")
</pallas_src>

<mosaic_0001>
module attributes {stable_mosaic.version = 11 : i64} {
  func.func @_dblock_fused_kernel(%arg0: i32, %arg1: memref<1x8x256xf32, #tpu.memory_space<vmem>>, %arg2: memref<4x8x72xf32, #tpu.memory_space<vmem>>, %arg3: memref<4x8x1xf32, #tpu.memory_space<vmem>>, %arg4: memref<1x8x256xf32, #tpu.memory_space<vmem>>, %arg5: memref<8x32x32xf32, #tpu.memory_space<vmem>>) attributes {dimension_semantics = [#tpu.dimension_semantics<parallel>], iteration_bounds = array<i64: 4>, scalar_prefetch = 0 : i64, scratch_operands = 1 : i64, tpu.core_type = #tpu.core_type<tc>, window_params = [{transform_indices = @transform_0, window_bounds = array<i64: 1, 8, 256>}, {pipeline_mode = #tpu.pipeline_mode<synchronous>, transform_indices = @transform_1, window_bounds = array<i64: 4, 8, 72>}, {pipeline_mode = #tpu.pipeline_mode<synchronous>, transform_indices = @transform_2, window_bounds = array<i64: 4, 8, 1>}, {transform_indices = @transform_3, window_bounds = array<i64: 1, 8, 256>}]} {
    %cst = arith.constant 0.000000e+00 : f32
    %0 = vector.broadcast %cst : f32 to vector<8x32x32xf32>
    %c0 = arith.constant 0 : index
    %c0_0 = arith.constant 0 : index
    %c0_1 = arith.constant 0 : index
    %1 = vector.load %arg5[%c0, %c0_0, %c0_1] : memref<8x32x32xf32, #tpu.memory_space<vmem>>, vector<8x32x32xf32>
    tpu.vector_store %arg5[%c0, %c0_0, %c0_1], %0 {strides = array<i32>} : memref<8x32x32xf32, #tpu.memory_space<vmem>>, vector<8x32x32xf32>,
    %c0_2 = arith.constant 0 : index
    %c0_3 = arith.constant 0 : index
    %c0_4 = arith.constant 0 : index
    %2 = vector.load %arg1[%c0_2, %c0_3, %c0_4] : memref<1x8x256xf32, #tpu.memory_space<vmem>>, vector<1x8x256xf32>
    %3 = vector.shape_cast %2 : vector<1x8x256xf32> to vector<8x256xf32>
    %4 = vector.shape_cast %3 : vector<8x256xf32> to vector<8x16x16xf32>
    %c0_5 = arith.constant 0 : index
    %c8 = arith.constant 8 : index
    %c8_6 = arith.constant 8 : index
    %5 = vector.load %arg5[%c0_5, %c8, %c8_6] : memref<8x32x32xf32, #tpu.memory_space<vmem>>, vector<8x16x16xf32>
    tpu.vector_store %arg5[%c0_5, %c8, %c8_6], %4 {strides = array<i32>} : memref<8x32x32xf32, #tpu.memory_space<vmem>>, vector<8x16x16xf32>,
    %c0_7 = arith.constant 0 : index
    %c7 = arith.constant 7 : index
    %c7_8 = arith.constant 7 : index
    %6 = vector.load %arg5[%c0_7, %c7, %c7_8] : memref<8x32x32xf32, #tpu.memory_space<vmem>>, vector<8x16x16xf32>
    %7 = vector.shape_cast %6 : vector<8x16x16xf32> to vector<8x256xf32>
    %c0_9 = arith.constant 0 : index
    %c7_10 = arith.constant 7 : index
    %c8_11 = arith.constant 8 : index
    %8 = vector.load %arg5[%c0_9, %c7_10, %c8_11] : memref<8x32x32xf32, #tpu.memory_space<vmem>>, vector<8x16x16xf32>
    %9 = vector.shape_cast %8 : vector<8x16x16xf32> to vector<8x256xf32>
    %c0_12 = arith.constant 0 : index
    %c7_13 = arith.constant 7 : index
    %c9 = arith.constant 9 : index
    %10 = vector.load %arg5[%c0_12, %c7_13, %c9] : memref<8x32x32xf32, #tpu.memory_space<vmem>>, vector<8x16x16xf32>
    %11 = vector.shape_cast %10 : vector<8x16x16xf32> to vector<8x256xf32>
    %c0_14 = arith.constant 0 : index
    %c8_15 = arith.constant 8 : index
    %c7_16 = arith.constant 7 : index
    %12 = vector.load %arg5[%c0_14, %c8_15, %c7_16] : memref<8x32x32xf32, #tpu.memory_space<vmem>>, vector<8x16x16xf32>
    %13 = vector.shape_cast %12 : vector<8x16x16xf32> to vector<8x256xf32>
    %c0_17 = arith.constant 0 : index
    %c8_18 = arith.constant 8 : index
    %c8_19 = arith.constant 8 : index
    %14 = vector.load %arg5[%c0_17, %c8_18, %c8_19] : memref<8x32x32xf32, #tpu.memory_space<vmem>>, vector<8x16x16xf32>
    %15 = vector.shape_cast %14 : vector<8x16x16xf32> to vector<8x256xf32>
    %c0_20 = arith.constant 0 : index
    %c8_21 = arith.constant 8 : index
    %c9_22 = arith.constant 9 : index
    %16 = vector.load %arg5[%c0_20, %c8_21, %c9_22] : memref<8x32x32xf32, #tpu.memory_space<vmem>>, vector<8x16x16xf32>
    %17 = vector.shape_cast %16 : vector<8x16x16xf32> to vector<8x256xf32>
    %c0_23 = arith.constant 0 : index
    %c9_24 = arith.constant 9 : index
    %c7_25 = arith.constant 7 : index
    %18 = vector.load %arg5[%c0_23, %c9_24, %c7_25] : memref<8x32x32xf32, #tpu.memory_space<vmem>>, vector<8x16x16xf32>
    %19 = vector.shape_cast %18 : vector<8x16x16xf32> to vector<8x256xf32>
    %c0_26 = arith.constant 0 : index
    %c9_27 = arith.constant 9 : index
    %c8_28 = arith.constant 8 : index
    %20 = vector.load %arg5[%c0_26, %c9_27, %c8_28] : memref<8x32x32xf32, #tpu.memory_space<vmem>>, vector<8x16x16xf32>
    %21 = vector.shape_cast %20 : vector<8x16x16xf32> to vector<8x256xf32>
    %c0_29 = arith.constant 0 : index
    %c9_30 = arith.constant 9 : index
    %c9_31 = arith.constant 9 : index
    %22 = vector.load %arg5[%c0_29, %c9_30, %c9_31] : memref<8x32x32xf32, #tpu.memory_space<vmem>>, vector<8x16x16xf32>
    %23 = vector.shape_cast %22 : vector<8x16x16xf32> to vector<8x256xf32>
    %24 = tpu.concatenate %7, %9, %11, %13, %15, %17, %19, %21, %23 in 0 : vector<8x256xf32>, vector<8x256xf32>, vector<8x256xf32>, vector<8x256xf32>, vector<8x256xf32>, vector<8x256xf32>, vector<8x256xf32>, vector<8x256xf32>, vector<8x256xf32> -> vector<72x256xf32>
    %c0_32 = arith.constant 0 : index
    %c0_33 = arith.constant 0 : index
    %c0_34 = arith.constant 0 : index
    %25 = vector.load %arg2[%c0_32, %c0_33, %c0_34] : memref<4x8x72xf32, #tpu.memory_space<vmem>>, vector<1x8x72xf32>
    %26 = vector.shape_cast %25 : vector<1x8x72xf32> to vector<8x72xf32>
    %cst_35 = arith.constant dense<0.000000e+00> : vector<8x256xf32>
    %27 = tpu.matmul %26, %24, %cst_35 {dimension_numbers = #tpu.dot_dimension_numbers<[1], [0], [0], [1], [0, 0, 1, 1], [], []>} : vector<8x72xf32>, vector<72x256xf32>, vector<8x256xf32> -> vector<8x256xf32>
    %c0_36 = arith.constant 0 : index
    %c0_37 = arith.constant 0 : index
    %c0_38 = arith.constant 0 : index
    %28 = vector.load %arg3[%c0_36, %c0_37, %c0_38] : memref<4x8x1xf32, #tpu.memory_space<vmem>>, vector<1x8x1xf32>
    %29 = vector.shape_cast %28 : vector<1x8x1xf32> to vector<8x1xf32>
    %30 = vector.broadcast %29 : vector<8x1xf32> to vector<8x256xf32>
    %31 = arith.addf %27, %30 : vector<8x256xf32>
    %cst_39 = arith.constant 0.000000e+00 : f32
    %32 = vector.broadcast %cst_39 : f32 to vector<8x256xf32>
    %33 = arith.maximumf %31, %32 : vector<8x256xf32>
    %34 = arith.addf %3, %33 : vector<8x256xf32>
    %35 = vector.shape_cast %33 : vector<8x256xf32> to vector<8x16x16xf32>
    %c0_40 = arith.constant 0 : index
    %c8_41 = arith.constant 8 : index
    %c8_42 = arith.constant 8 : index
    %36 = vector.load %arg5[%c0_40, %c8_41, %c8_42] : memref<8x32x32xf32, #tpu.memory_space<vmem>>, vector<8x16x16xf32>
    tpu.vector_store %arg5[%c0_40, %c8_41, %c8_42], %35 {strides = array<i32>} : memref<8x32x32xf32, #tpu.memory_space<vmem>>, vector<8x16x16xf32>,
    %c0_43 = arith.constant 0 : index
    %c6 = arith.constant 6 : index
    %c6_44 = arith.constant 6 : index
    %37 = vector.load %arg5[%c0_43, %c6, %c6_44] : memref<8x32x32xf32, #tpu.memory_space<vmem>>, vector<8x16x16xf32>
    %38 = vector.shape_cast %37 : vector<8x16x16xf32> to vector<8x256xf32>
    %c0_45 = arith.constant 0 : index
    %c6_46 = arith.constant 6 : index
    %c8_47 = arith.constant 8 : index
    %39 = vector.load %arg5[%c0_45, %c6_46, %c8_47] : memref<8x32x32xf32, #tpu.memory_space<vmem>>, vector<8x16x16xf32>
    %40 = vector.shape_cast %39 : vector<8x16x16xf32> to vector<8x256xf32>
    %c0_48 = arith.constant 0 : index
    %c6_49 = arith.constant 6 : index
    %c10 = arith.constant 10 : index
    %41 = vector.load %arg5[%c0_48, %c6_49, %c10] : memref<8x32x32xf32, #tpu.memory_space<vmem>>, vector<8x16x16xf32>
    %42 = vector.shape_cast %41 : vector<8x16x16xf32> to vector<8x256xf32>
    %c0_50 = arith.constant 0 : index
    %c8_51 = arith.constant 8 : index
    %c6_52 = arith.constant 6 : index
    %43 = vector.load %arg5[%c0_50, %c8_51, %c6_52] : memref<8x32x32xf32, #tpu.memory_space<vmem>>, vector<8x16x16xf32>
    %44 = vector.shape_cast %43 : vector<8x16x16xf32> to vector<8x256xf32>
    %c0_53 = arith.constant 0 : index
    %c8_54 = arith.constant 8 : index
    %c8_55 = arith.constant 8 : index
    %45 = vector.load %arg5[%c0_53, %c8_54, %c8_55] : memref<8x32x32xf32, #tpu.memory_space<vmem>>, vector<8x16x16xf32>
    %46 = vector.shape_cast %45 : vector<8x16x16xf32> to vector<8x256xf32>
    %c0_56 = arith.constant 0 : index
    %c8_57 = arith.constant 8 : index
    %c10_58 = arith.constant 10 : index
    %47 = vector.load %arg5[%c0_56, %c8_57, %c10_58] : memref<8x32x32xf32, #tpu.memory_space<vmem>>, vector<8x16x16xf32>
    %48 = vector.shape_cast %47 : vector<8x16x16xf32> to vector<8x256xf32>
    %c0_59 = arith.constant 0 : index
    %c10_60 = arith.constant 10 : index
    %c6_61 = arith.constant 6 : index
    %49 = vector.load %arg5[%c0_59, %c10_60, %c6_61] : memref<8x32x32xf32, #tpu.memory_space<vmem>>, vector<8x16x16xf32>
    %50 = vector.shape_cast %49 : vector<8x16x16xf32> to vector<8x256xf32>
    %c0_62 = arith.constant 0 : index
    %c10_63 = arith.constant 10 : index
    %c8_64 = arith.constant 8 : index
    %51 = vector.load %arg5[%c0_62, %c10_63, %c8_64] : memref<8x32x32xf32, #tpu.memory_space<vmem>>, vector<8x16x16xf32>
    %52 = vector.shape_cast %51 : vector<8x16x16xf32> to vector<8x256xf32>
    %c0_65 = arith.constant 0 : index
    %c10_66 = arith.constant 10 : index
    %c10_67 = arith.constant 10 : index
    %53 = vector.load %arg5[%c0_65, %c10_66, %c10_67] : memref<8x32x32xf32, #tpu.memory_space<vmem>>, vector<8x16x16xf32>
    %54 = vector.shape_cast %53 : vector<8x16x16xf32> to vector<8x256xf32>
    %55 = tpu.concatenate %38, %40, %42, %44, %46, %48, %50, %52, %54 in 0 : vector<8x256xf32>, vector<8x256xf32>, vector<8x256xf32>, vector<8x256xf32>, vector<8x256xf32>, vector<8x256xf32>, vector<8x256xf32>, vector<8x256xf32>, vector<8x256xf32> -> vector<72x256xf32>
    %c1 = arith.constant 1 : index
    %c0_68 = arith.constant 0 : index
    %c0_69 = arith.constant 0 : index
    %56 = vector.load %arg2[%c1, %c0_68, %c0_69] : memref<4x8x72xf32, #tpu.memory_space<vmem>>, vector<1x8x72xf32>
    %57 = vector.shape_cast %56 : vector<1x8x72xf32> to vector<8x72xf32>
    %cst_70 = arith.constant dense<0.000000e+00> : vector<8x256xf32>
    %58 = tpu.matmul %57, %55, %cst_70 {dimension_numbers = #tpu.dot_dimension_numbers<[1], [0], [0], [1], [0, 0, 1, 1], [], []>} : vector<8x72xf32>, vector<72x256xf32>, vector<8x256xf32> -> vector<8x256xf32>
    %c1_71 = arith.constant 1 : index
    %c0_72 = arith.constant 0 : index
    %c0_73 = arith.constant 0 : index
    %59 = vector.load %arg3[%c1_71, %c0_72, %c0_73] : memref<4x8x1xf32, #tpu.memory_space<vmem>>, vector<1x8x1xf32>
    %60 = vector.shape_cast %59 : vector<1x8x1xf32> to vector<8x1xf32>
    %61 = vector.broadcast %60 : vector<8x1xf32> to vector<8x256xf32>
    %62 = arith.addf %58, %61 : vector<8x256xf32>
    %cst_74 = arith.constant 0.000000e+00 : f32
    %63 = vector.broadcast %cst_74 : f32 to vector<8x256xf32>
    %64 = arith.maximumf %62, %63 : vector<8x256xf32>
    %65 = arith.addf %34, %64 : vector<8x256xf32>
    %66 = vector.shape_cast %64 : vector<8x256xf32> to vector<8x16x16xf32>
    %c0_75 = arith.constant 0 : index
    %c8_76 = arith.constant 8 : index
    %c8_77 = arith.constant 8 : index
    %67 = vector.load %arg5[%c0_75, %c8_76, %c8_77] : memref<8x32x32xf32, #tpu.memory_space<vmem>>, vector<8x16x16xf32>
    tpu.vector_store %arg5[%c0_75, %c8_76, %c8_77], %66 {strides = array<i32>} : memref<8x32x32xf32, #tpu.memory_space<vmem>>, vector<8x16x16xf32>,
    %c0_78 = arith.constant 0 : index
    %c4 = arith.constant 4 : index
    %c4_79 = arith.constant 4 : index
    %68 = vector.load %arg5[%c0_78, %c4, %c4_79] : memref<8x32x32xf32, #tpu.memory_space<vmem>>, vector<8x16x16xf32>
    %69 = vector.shape_cast %68 : vector<8x16x16xf32> to vector<8x256xf32>
    %c0_80 = arith.constant 0 : index
    %c4_81 = arith.constant 4 : index
    %c8_82 = arith.constant 8 : index
    %70 = vector.load %arg5[%c0_80, %c4_81, %c8_82] : memref<8x32x32xf32, #tpu.memory_space<vmem>>, vector<8x16x16xf32>
    %71 = vector.shape_cast %70 : vector<8x16x16xf32> to vector<8x256xf32>
    %c0_83 = arith.constant 0 : index
    %c4_84 = arith.constant 4 : index
    %c12 = arith.constant 12 : index
    %72 = vector.load %arg5[%c0_83, %c4_84, %c12] : memref<8x32x32xf32, #tpu.memory_space<vmem>>, vector<8x16x16xf32>
    %73 = vector.shape_cast %72 : vector<8x16x16xf32> to vector<8x256xf32>
    %c0_85 = arith.constant 0 : index
    %c8_86 = arith.constant 8 : index
    %c4_87 = arith.constant 4 : index
    %74 = vector.load %arg5[%c0_85, %c8_86, %c4_87] : memref<8x32x32xf32, #tpu.memory_space<vmem>>, vector<8x16x16xf32>
    %75 = vector.shape_cast %74 : vector<8x16x16xf32> to vector<8x256xf32>
    %c0_88 = arith.constant 0 : index
    %c8_89 = arith.constant 8 : index
    %c8_90 = arith.constant 8 : index
    %76 = vector.load %arg5[%c0_88, %c8_89, %c8_90] : memref<8x32x32xf32, #tpu.memory_space<vmem>>, vector<8x16x16xf32>
    %77 = vector.shape_cast %76 : vector<8x16x16xf32> to vector<8x256xf32>
    %c0_91 = arith.constant 0 : index
    %c8_92 = arith.constant 8 : index
    %c12_93 = arith.constant 12 : index
    %78 = vector.load %arg5[%c0_91, %c8_92, %c12_93] : memref<8x32x32xf32, #tpu.memory_space<vmem>>, vector<8x16x16xf32>
    %79 = vector.shape_cast %78 : vector<8x16x16xf32> to vector<8x256xf32>
    %c0_94 = arith.constant 0 : index
    %c12_95 = arith.constant 12 : index
    %c4_96 = arith.constant 4 : index
    %80 = vector.load %arg5[%c0_94, %c12_95, %c4_96] : memref<8x32x32xf32, #tpu.memory_space<vmem>>, vector<8x16x16xf32>
    %81 = vector.shape_cast %80 : vector<8x16x16xf32> to vector<8x256xf32>
    %c0_97 = arith.constant 0 : index
    %c12_98 = arith.constant 12 : index
    %c8_99 = arith.constant 8 : index
    %82 = vector.load %arg5[%c0_97, %c12_98, %c8_99] : memref<8x32x32xf32, #tpu.memory_space<vmem>>, vector<8x16x16xf32>
    %83 = vector.shape_cast %82 : vector<8x16x16xf32> to vector<8x256xf32>
    %c0_100 = arith.constant 0 : index
    %c12_101 = arith.constant 12 : index
    %c12_102 = arith.constant 12 : index
    %84 = vector.load %arg5[%c0_100, %c12_101, %c12_102] : memref<8x32x32xf32, #tpu.memory_space<vmem>>, vector<8x16x16xf32>
    %85 = vector.shape_cast %84 : vector<8x16x16xf32> to vector<8x256xf32>
    %86 = tpu.concatenate %69, %71, %73, %75, %77, %79, %81, %83, %85 in 0 : vector<8x256xf32>, vector<8x256xf32>, vector<8x256xf32>, vector<8x256xf32>, vector<8x256xf32>, vector<8x256xf32>, vector<8x256xf32>, vector<8x256xf32>, vector<8x256xf32> -> vector<72x256xf32>
    %c2 = arith.constant 2 : index
    %c0_103 = arith.constant 0 : index
    %c0_104 = arith.constant 0 : index
    %87 = vector.load %arg2[%c2, %c0_103, %c0_104] : memref<4x8x72xf32, #tpu.memory_space<vmem>>, vector<1x8x72xf32>
    %88 = vector.shape_cast %87 : vector<1x8x72xf32> to vector<8x72xf32>
    %cst_105 = arith.constant dense<0.000000e+00> : vector<8x256xf32>
    %89 = tpu.matmul %88, %86, %cst_105 {dimension_numbers = #tpu.dot_dimension_numbers<[1], [0], [0], [1], [0, 0, 1, 1], [], []>} : vector<8x72xf32>, vector<72x256xf32>, vector<8x256xf32> -> vector<8x256xf32>
    %c2_106 = arith.constant 2 : index
    %c0_107 = arith.constant 0 : index
    %c0_108 = arith.constant 0 : index
    %90 = vector.load %arg3[%c2_106, %c0_107, %c0_108] : memref<4x8x1xf32, #tpu.memory_space<vmem>>, vector<1x8x1xf32>
    %91 = vector.shape_cast %90 : vector<1x8x1xf32> to vector<8x1xf32>
    %92 = vector.broadcast %91 : vector<8x1xf32> to vector<8x256xf32>
    %93 = arith.addf %89, %92 : vector<8x256xf32>
    %cst_109 = arith.constant 0.000000e+00 : f32
    %94 = vector.broadcast %cst_109 : f32 to vector<8x256xf32>
    %95 = arith.maximumf %93, %94 : vector<8x256xf32>
    %96 = arith.addf %65, %95 : vector<8x256xf32>
    %97 = vector.shape_cast %95 : vector<8x256xf32> to vector<8x16x16xf32>
    %c0_110 = arith.constant 0 : index
    %c8_111 = arith.constant 8 : index
    %c8_112 = arith.constant 8 : index
    %98 = vector.load %arg5[%c0_110, %c8_111, %c8_112] : memref<8x32x32xf32, #tpu.memory_space<vmem>>, vector<8x16x16xf32>
    tpu.vector_store %arg5[%c0_110, %c8_111, %c8_112], %97 {strides = array<i32>} : memref<8x32x32xf32, #tpu.memory_space<vmem>>, vector<8x16x16xf32>,
    %c0_113 = arith.constant 0 : index
    %c0_114 = arith.constant 0 : index
    %c0_115 = arith.constant 0 : index
    %99 = vector.load %arg5[%c0_113, %c0_114, %c0_115] : memref<8x32x32xf32, #tpu.memory_space<vmem>>, vector<8x16x16xf32>
    %100 = vector.shape_cast %99 : vector<8x16x16xf32> to vector<8x256xf32>
    %c0_116 = arith.constant 0 : index
    %c0_117 = arith.constant 0 : index
    %c8_118 = arith.constant 8 : index
    %101 = vector.load %arg5[%c0_116, %c0_117, %c8_118] : memref<8x32x32xf32, #tpu.memory_space<vmem>>, vector<8x16x16xf32>
    %102 = vector.shape_cast %101 : vector<8x16x16xf32> to vector<8x256xf32>
    %c0_119 = arith.constant 0 : index
    %c0_120 = arith.constant 0 : index
    %c16 = arith.constant 16 : index
    %103 = vector.load %arg5[%c0_119, %c0_120, %c16] : memref<8x32x32xf32, #tpu.memory_space<vmem>>, vector<8x16x16xf32>
    %104 = vector.shape_cast %103 : vector<8x16x16xf32> to vector<8x256xf32>
    %c0_121 = arith.constant 0 : index
    %c8_122 = arith.constant 8 : index
    %c0_123 = arith.constant 0 : index
    %105 = vector.load %arg5[%c0_121, %c8_122, %c0_123] : memref<8x32x32xf32, #tpu.memory_space<vmem>>, vector<8x16x16xf32>
    %106 = vector.shape_cast %105 : vector<8x16x16xf32> to vector<8x256xf32>
    %c0_124 = arith.constant 0 : index
    %c8_125 = arith.constant 8 : index
    %c8_126 = arith.constant 8 : index
    %107 = vector.load %arg5[%c0_124, %c8_125, %c8_126] : memref<8x32x32xf32, #tpu.memory_space<vmem>>, vector<8x16x16xf32>
    %108 = vector.shape_cast %107 : vector<8x16x16xf32> to vector<8x256xf32>
    %c0_127 = arith.constant 0 : index
    %c8_128 = arith.constant 8 : index
    %c16_129 = arith.constant 16 : index
    %109 = vector.load %arg5[%c0_127, %c8_128, %c16_129] : memref<8x32x32xf32, #tpu.memory_space<vmem>>, vector<8x16x16xf32>
    %110 = vector.shape_cast %109 : vector<8x16x16xf32> to vector<8x256xf32>
    %c0_130 = arith.constant 0 : index
    %c16_131 = arith.constant 16 : index
    %c0_132 = arith.constant 0 : index
    %111 = vector.load %arg5[%c0_130, %c16_131, %c0_132] : memref<8x32x32xf32, #tpu.memory_space<vmem>>, vector<8x16x16xf32>
    %112 = vector.shape_cast %111 : vector<8x16x16xf32> to vector<8x256xf32>
    %c0_133 = arith.constant 0 : index
    %c16_134 = arith.constant 16 : index
    %c8_135 = arith.constant 8 : index
    %113 = vector.load %arg5[%c0_133, %c16_134, %c8_135] : memref<8x32x32xf32, #tpu.memory_space<vmem>>, vector<8x16x16xf32>
    %114 = vector.shape_cast %113 : vector<8x16x16xf32> to vector<8x256xf32>
    %c0_136 = arith.constant 0 : index
    %c16_137 = arith.constant 16 : index
    %c16_138 = arith.constant 16 : index
    %115 = vector.load %arg5[%c0_136, %c16_137, %c16_138] : memref<8x32x32xf32, #tpu.memory_space<vmem>>, vector<8x16x16xf32>
    %116 = vector.shape_cast %115 : vector<8x16x16xf32> to vector<8x256xf32>
    %117 = tpu.concatenate %100, %102, %104, %106, %108, %110, %112, %114, %116 in 0 : vector<8x256xf32>, vector<8x256xf32>, vector<8x256xf32>, vector<8x256xf32>, vector<8x256xf32>, vector<8x256xf32>, vector<8x256xf32>, vector<8x256xf32>, vector<8x256xf32> -> vector<72x256xf32>
    %c3 = arith.constant 3 : index
    %c0_139 = arith.constant 0 : index
    %c0_140 = arith.constant 0 : index
    %118 = vector.load %arg2[%c3, %c0_139, %c0_140] : memref<4x8x72xf32, #tpu.memory_space<vmem>>, vector<1x8x72xf32>
    %119 = vector.shape_cast %118 : vector<1x8x72xf32> to vector<8x72xf32>
    %cst_141 = arith.constant dense<0.000000e+00> : vector<8x256xf32>
    %120 = tpu.matmul %119, %117, %cst_141 {dimension_numbers = #tpu.dot_dimension_numbers<[1], [0], [0], [1], [0, 0, 1, 1], [], []>} : vector<8x72xf32>, vector<72x256xf32>, vector<8x256xf32> -> vector<8x256xf32>
    %c3_142 = arith.constant 3 : index
    %c0_143 = arith.constant 0 : index
    %c0_144 = arith.constant 0 : index
    %121 = vector.load %arg3[%c3_142, %c0_143, %c0_144] : memref<4x8x1xf32, #tpu.memory_space<vmem>>, vector<1x8x1xf32>
    %122 = vector.shape_cast %121 : vector<1x8x1xf32> to vector<8x1xf32>
    %123 = vector.broadcast %122 : vector<8x1xf32> to vector<8x256xf32>
    %124 = arith.addf %120, %123 : vector<8x256xf32>
    %cst_145 = arith.constant 0.000000e+00 : f32
    %125 = vector.broadcast %cst_145 : f32 to vector<8x256xf32>
    %126 = arith.maximumf %124, %125 : vector<8x256xf32>
    %127 = arith.addf %96, %126 : vector<8x256xf32>
    %c0_146 = arith.constant 0 : index
    %c0_147 = arith.constant 0 : index
    %c0_148 = arith.constant 0 : index
    %128 = vector.load %arg4[%c0_146, %c0_147, %c0_148] : memref<1x8x256xf32, #tpu.memory_space<vmem>>, vector<1x8x256xf32>
    %129 = vector.shape_cast %128 : vector<1x8x256xf32> to vector<8x256xf32>
    %130 = vector.shape_cast %127 : vector<8x256xf32> to vector<1x8x256xf32>
    tpu.vector_store %arg4[%c0_146, %c0_147, %c0_148], %130 {strides = array<i32>} : memref<1x8x256xf32, #tpu.memory_space<vmem>>, vector<1x8x256xf32>,
    return
  }
  func.func @transform_0(%arg0: i32) -> (i32, i32, i32) {
    %c0_i32 = arith.constant 0 : i32
    %c0_i32_0 = arith.constant 0 : i32
    %c0_i32_1 = arith.constant 0 : i32
    return %arg0, %c0_i32, %c0_i32_0 : i32, i32, i32
  }
  func.func @transform_1(%arg0: i32) -> (i32, i32, i32) {
    %c0_i32 = arith.constant 0 : i32
    %c0_i32_0 = arith.constant 0 : i32
    %c0_i32_1 = arith.constant 0 : i32
    %c0_i32_2 = arith.constant 0 : i32
    return %c0_i32, %c0_i32_0, %c0_i32_1 : i32, i32, i32
  }
  func.func @transform_2(%arg0: i32) -> (i32, i32, i32) {
    %c0_i32 = arith.constant 0 : i32
    %c0_i32_0 = arith.constant 0 : i32
    %c0_i32_1 = arith.constant 0 : i32
    %c0_i32_2 = arith.constant 0 : i32
    return %c0_i32, %c0_i32_0, %c0_i32_1 : i32, i32, i32
  }
  func.func @transform_3(%arg0: i32) -> (i32, i32, i32) {
    %c0_i32 = arith.constant 0 : i32
    %c0_i32_0 = arith.constant 0 : i32
    %c0_i32_1 = arith.constant 0 : i32
    return %arg0, %c0_i32, %c0_i32_0 : i32, i32, i32
  }
}

</mosaic_0001>

<bundles_post_ra>
// kernel: tpu_custom_call.1
= control target key start
LH: loop header
LB: loop body
LE: loop exit
PB: predicated region body
PF: predicated region fallthrough
CT: control target
= control target key end

     0   :  { %8 = vsyncpa [#allocation4], 0  ;;  %s23872_s0 = inlined_call_operand.hbm [shape: f32[4,8,256], index: 0, kind: input, shape index: {}]   ;;  %s23873_s1 = inlined_call_operand.vmem [shape: f32[4,8,72], index: 1, kind: input, shape index: {}]   ;;  %s23874_s2 = inlined_call_operand.vmem [shape: f32[4,8,1], index: 2, kind: input, shape index: {}]   ;;  %s23875_s3 = inlined_call_operand.hbm [shape: f32[4,8,256], index: 3, kind: output, shape index: {}]  }
   0x1   :  { %10 = vsyncpa [#allocation4 + $0x1], 0 }
   0x2   :  { %11 = vsyncpa [#allocation5], 0 }
   0x3   :  { %13 = vsyncpa [#allocation5 + $0x1], 0  ;;  %s15022_s12 = smov 0   ;;  %s15024_s13 = smov 0  }
   0x4   :  { %s15026_s14 = smov 0   ;;  %s15028_s15 = smov 0  }
   0x5 LB: > { %s15043_s16 = sadd.s32 4294967295, %s14979_s15   ;;  %s14772_s17 = sadd.s32 4294967294, %s14979_s15   ;;  %s14979_s15 = sphi %s15028_s15, %s25492_s15   ;;  %s14975_s14 = sphi %s15026_s14, %s25491_s14   ;;  %s14971_s13 = sphi %s15024_s13, %s25490_s13   ;;  %s14967_s12 = sphi %s15022_s12, %s25489_s12  }
   0x6   : > { %s15047_s18 = sadd.s32 1, %s14979_s15   ;;  %s26_s19 = sadd.s32 1, %s14975_s14 }
   0x7   : > { %s23_s20 = ssub.s32 %s14979_s15, %s15047_s18  ;;  %p33_p0 = scmp.ne.s32.totalorder %s14975_s14, %s14971_s13 }
   0x8   : > { %p24_p1 = scmp.eq.s32.totalorder %s23_s20, 0  ;;  %p34_p2 = scmp.eq.s32.totalorder %s14979_s15, 0 }
   0x9   : > { %p39_p3 = scmp.ne.s32.totalorder %s14971_s13, %s14967_s12  ;;  %p40_p4 = scmp.eq.s32.totalorder %s15043_s16, 0 }
   0xa   : > { %s15059_s21 = scalar_select %p24_p1, %s14975_s14, %s26_s19  }
   0xb   : > { %p15061_p5 = por %p34_p2, %p33_p0  ;;  %p15065_p6 = por %p40_p4, %p39_p3 }
   0xc   : > { %p105_p7 = scmp.eq.s32.totalorder %s15043_s16, 3  ;;  %p111_p8 = scmp.eq.s32.totalorder %s14772_s17, 3 }
   0xd   : > { %s24341_s23 = scalar_select %p15065_p6, 1, 0 }
   0xe   : > { %p14810_p9 = scmp.lt.s32.totalorder %s14979_s15, 4  ;;  %p15071_p10 = por %p105_p7, %p33_p0 }
   0xf   : > { %p15075_p11 = por %p111_p8, %p39_p3  ;;  %s137_s26 = sand.u32 1, %s14975_s14  }
  0x10   : > { %s24342_s24 = scalar_select %p15071_p10, 1, 0 }
  0x11   : > { %s24343_s25 = scalar_select %p15075_p11, 1, 0 }
  0x12   : > { %s14796_s27 = sshll.u32 %s14979_s15, 8  ;;  %s14775_s28 = sshll.u32 %s137_s26, 4 }
  0x13   : > { %s15084_s4 = scalar_lea.hbm %s23872_s0, %s14796_s27  ;;  %s141_s5 = scalar_lea.vmem [#allocation3], %s14775_s28 }
  0x14   : > { %s149_s6 = sshll.u32 %s141_s5, 4  ;;  %p15088_p12 = pnand %p14810_p9, %p15061_p5  ;;  %s15092_s6 = int_to_ptr.vmem [resolvable:$true] %s149_s6 }
  0x15   : > { %s138_s8 = scalar_lea.sflag [#allocation4], %s137_s26  ;;  %s14887_s9 = scalar_lea.hbm %s15084_s4, 256 }
  0x16   : > { %p14888_p1 = scmp.ne.s32.totalorder %s15084_s4, %s14887_s9  ;;  %p14889_p2 = pneg %p15088_p12 }
  0x17   : > { %s14892_s17 = scalar_lea.hbm %s23872_s0, 1024  ;;  %p14893_p5 = scmp.lt.s32.totalorder %s15084_s4, %s23872_s0 }
  0x18   : > { %p14890_p3 = pnand %p14889_p2, %p14888_p1  ;;  %p14894_p7 = scmp.lt.s32.totalorder %s14892_s17, %s14887_s9 }
  0x1a   : > { %p14891_p4 = pneg %p14890_p3  ;;  %p14895_p8 = por %p14894_p7, %p14893_p5 }
  0x1c   : > { %p14896_p9 = pnand %p14895_p8, %p14891_p4 }
  0x1e   : > { %14899 = shalt.err (!%p14896_p9)
}
  0x1f   : > { %s14900_s22 = scalar_lea.vmem %s15092_s6, 256  ;;  %s14981_s26 = smov [#allocation3]  }
  0x20   : > { %p14901_p13 = scmp.ne.s32.totalorder %s15092_s6, %s14900_s22  ;;  %s14905_s27 = sshll.u32 %s14981_s26, 4  ;;  %s14906_s27 = int_to_ptr.vmem [resolvable:$false] %s14905_s27 }
  0x21   : > { %s14907_s28 = scalar_lea.vmem %s14906_s27, 512  ;;  %p14908_p3 = scmp.lt.s32.totalorder %s15092_s6, %s14906_s27 }
  0x22   : > { %p14903_p0 = pnand %p14901_p13, %p14889_p2  ;;  %p14909_p11 = scmp.lt.s32.totalorder %s14907_s28, %s14900_s22 }
  0x24   : > { %p14904_p1 = pneg %p14903_p0  ;;  %p14910_p10 = por %p14909_p11, %p14908_p3 }
  0x26   : > { %p14911_p6 = pnand %p14910_p10, %p14904_p1 }
  0x28   : > { %14914 = shalt.err (!%p14911_p6)
}
  0x29   : > { %14805 = dma.hbm_to_vmem [thread:$0]  (!%p15088_p12), %s15084_s4, 256, %s15092_s6, %s138_s8  }
  0x2a   : > { %p24345_p4 = scmp.lt.s32.totalorder %s14979_s15, 5  ;;  %p24346_p5 = scmp.ge.s32.totalorder %s14979_s15, 1 }
  0x2c   : > { %p155_p13 = pnand %p24346_p5, %p24345_p4 }
  0x2e   : > { %158 = sbr.rel (%p155_p13) target bundleno = 4191 (0x105f), region = 32 }
  0x33   : > { %s15119_s29 = sand.u32 1, %s14971_s13   ;;  %p24347_p6 = scmp.ne.s32.totalorder %s24341_s23, 0 }
  0x34   : > { %s14779_s30 = sshll.u32 %s15119_s29, 4  ;;  %s161_s5 = scalar_lea.sflag [#allocation4], %s15119_s29 }
  0x35   : > { %s15125_s7 = scalar_lea.vmem [#allocation3], %s14779_s30 }
  0x36   : > { %14958 = dma.done.wait (%p24347_p6), %s161_s5, 256  }
  0x37   : > { %14960 = vsyncadd (%p24347_p6), %s161_s5, 4294967040  ;;  %v15132_v0 = vld [vmem:[%s15125_s7] sm:$0xff]  ;;  %s14982_s4 = smov 80   ;;  %s14983_s6 = smov 112   ;;  %v15147_v1 = vld [vmem:[%s15125_s7 + $0x8] sm:$0xff]  ;;  %vm187_vm0 = vcmask 261120   ;;  %v271_v7 = vlaneseq }
  0x38   : > { %229 = vrot.lane.b32.xlu1 %v15132_v0, %s14982_s4  ;;  %223 = vrot.lane.b32.xlu0 %v15132_v0, %s14983_s6  ;;  %s14984_s8 = smov 64   ;;  %s14985_s9 = smov 96   ;;  %v23878_v2 = vmov 0.0   ;;  %v14990_v5 = vmov 1983009808   ;;  %vm602_vm1 = vcmask 195648  }
  0x39   : > { %s14986_s23 = smov 32   ;;  %s14987_s10 = smov 48   ;;  %189 = vst.msk [vmem:[#allocation2 + $0x8] sm:$0xff] %vm187_vm0, %v23878_v2  ;;  %188 = vst.msk [vmem:[#allocation2] sm:$0xff] %vm187_vm0, %v23878_v2  ;;  %4306 = vmatprep.mubr.f32.mxu0 %v23878_v2  ;;  %8395 = vmatprep.mubr.f32.mxu1 %v23878_v2  ;;  %v269_v6 = vunpack.c.l.s4 %v14990_v5  ;;  %v272_v11 = vshrl.u32 %v271_v7, 7  ;;  %vm1027_vm2 = vcmask 130048  }
  0x3a   : > { %s14988_s11 = smov 16   ;;  %190 = vst.msk [vmem:[#allocation2 + $0x10] sm:$0xff] %vm187_vm0, %v23878_v2  ;;  %191 = vst.msk [vmem:[#allocation2 + $0x18] sm:$0xff] %vm187_vm0, %v23878_v2  ;;  %v14991_v13 = vmov 1934713408   ;;  %s14992_s17 = smov 8  }
  0x3b   : > { %192 = vst.msk [vmem:[#allocation2 + $0x20] sm:$0xff] %vm187_vm0, %v23878_v2  ;;  %193 = vst.msk [vmem:[#allocation2 + $0x28] sm:$0xff] %vm187_vm0, %v23878_v2  ;;  %v270_v10 = vunpack.c.0.s8 %v269_v6  ;;  %v333_v14 = vunpack.c.l.s4 %v14991_v13  ;;  %s14993_s19 = smov 121   ;;  %s14994_s20 = smov 120   ;;  %vm1030_vm3 = vcmask 392192   ;;  %vm1032_vm4 = vcmask 523264  }
  0x3c   : > { %232 = vrot.lane.b32.xlu1 %v15132_v0, %s14984_s8  ;;  %226 = vrot.lane.b32.xlu0 %v15132_v0, %s14985_s9  ;;  %194 = vst.msk [vmem:[#allocation2 + $0x30] sm:$0xff] %vm187_vm0, %v23878_v2  ;;  %195 = vst.msk [vmem:[#allocation2 + $0x38] sm:$0xff] %vm187_vm0, %v23878_v2  ;;  %s14995_s22 = smov 119   ;;  %vm1034_vm5 = vcmask 654336   ;;  %vm1036_vm6 = vcmask 785408   ;;  %vm1038_vm7 = vcmask 916480  }
  0x3d   : > { %196 = vst.msk [vmem:[#allocation2 + $0x40] sm:$0xff] %vm187_vm0, %v23878_v2  ;;  %197 = vst.msk [vmem:[#allocation2 + $0x48] sm:$0xff] %vm187_vm0, %v23878_v2  ;;  %v15232_v17 = vsub.s32 %v270_v10, %v272_v11  ;;  %v334_v21 = vunpack.c.0.s8 %v333_v14  ;;  %vm4238_vm8 = vcmask 588800   ;;  %p25487_p11 = scmp.ne.s32.totalorder %s24342_s24, 0 }
  0x3e   : > { %198 = vst.msk [vmem:[#allocation2 + $0x50] sm:$0xff] %vm187_vm0, %v23878_v2  ;;  %199 = vst.msk [vmem:[#allocation2 + $0x58] sm:$0xff] %vm187_vm0, %v23878_v2 }
  0x3f   : > { %200 = vst.msk [vmem:[#allocation2 + $0x60] sm:$0xff] %vm187_vm0, %v23878_v2  ;;  %201 = vst.msk [vmem:[#allocation2 + $0x68] sm:$0xff] %vm187_vm0, %v23878_v2  ;;  %v15240_v29 = vsub.s32 %v334_v21, %v272_v11 }
  0x40   : > { %238 = vrot.lane.b32.xlu1 %v15132_v0, %s14986_s23  ;;  %235 = vrot.lane.b32.xlu0 %v15132_v0, %s14987_s10  ;;  %202 = vst.msk [vmem:[#allocation2 + $0x70] sm:$0xff] %vm187_vm0, %v23878_v2  ;;  %203 = vst.msk [vmem:[#allocation2 + $0x78] sm:$0xff] %vm187_vm0, %v23878_v2 }
  0x41   : > { %204 = vst.msk [vmem:[#allocation2 + $0x80] sm:$0xff] %vm187_vm0, %v23878_v2  ;;  %205 = vst.msk [vmem:[#allocation2 + $0x88] sm:$0xff] %vm187_vm0, %v23878_v2 }
  0x42   : > { %206 = vst.msk [vmem:[#allocation2 + $0x90] sm:$0xff] %vm187_vm0, %v23878_v2  ;;  %207 = vst.msk [vmem:[#allocation2 + $0x98] sm:$0xff] %vm187_vm0, %v23878_v2 }
  0x43   : > { %208 = vst.msk [vmem:[#allocation2 + $0xa0] sm:$0xff] %vm187_vm0, %v23878_v2  ;;  %209 = vst.msk [vmem:[#allocation2 + $0xa8] sm:$0xff] %vm187_vm0, %v23878_v2 }
  0x44   : > { %245 = vrot.lane.b32.xlu1 %v15147_v1, %s14983_s6  ;;  %241 = vrot.lane.b32.xlu0 %v15132_v0, %s14988_s11  ;;  %210 = vst.msk [vmem:[#allocation2 + $0xb0] sm:$0xff] %vm187_vm0, %v23878_v2  ;;  %211 = vst.msk [vmem:[#allocation2 + $0xb8] sm:$0xff] %vm187_vm0, %v23878_v2 }
  0x45   : > { %212 = vst.msk [vmem:[#allocation2 + $0xc0] sm:$0xff] %vm187_vm0, %v23878_v2  ;;  %213 = vst.msk [vmem:[#allocation2 + $0xc8] sm:$0xff] %vm187_vm0, %v23878_v2 }
  0x46   : > { %214 = vst.msk [vmem:[#allocation2 + $0xd0] sm:$0xff] %vm187_vm0, %v23878_v2  ;;  %215 = vst.msk [vmem:[#allocation2 + $0xd8] sm:$0xff] %vm187_vm0, %v23878_v2 }
  0x47   : > { %216 = vst.msk [vmem:[#allocation2 + $0xe0] sm:$0xff] %vm187_vm0, %v23878_v2  ;;  %217 = vst.msk [vmem:[#allocation2 + $0xe8] sm:$0xff] %vm187_vm0, %v23878_v2 }
  0x48   : > { %251 = vrot.lane.b32.xlu1 %v15147_v1, %s14982_s4  ;;  %248 = vrot.lane.b32.xlu0 %v15147_v1, %s14985_s9  ;;  %218 = vst.msk [vmem:[#allocation2 + $0xf0] sm:$0xff] %vm187_vm0, %v23878_v2  ;;  %219 = vst.msk [vmem:[#allocation2 + $0xf8] sm:$0xff] %vm187_vm0, %v23878_v2 }
  0x49   : > { %24348 = vst [vmem:[#allocation9_spill] sm:$0xff] %v15232_v17  ;;  %24349 = vst [vmem:[#allocation10_spill] sm:$0xff] %v15240_v29 }
  0x4c   : > { %257 = vrot.lane.b32.xlu1 %v15147_v1, %s14987_s10  ;;  %254 = vrot.lane.b32.xlu0 %v15147_v1, %s14984_s8 }
  0x50   : > { %263 = vrot.lane.b32.xlu1 %v15147_v1, %s14988_s11  ;;  %260 = vrot.lane.b32.xlu0 %v15147_v1, %s14986_s23 }
  0xaa   : > { %v230_v3 = vpop.permute.xlu1 %229  ;;  %v224_v4 = vpop.permute.xlu0 %223 }
  0xab   : > { %v282_v18 = vcombine.low %v224_v4, %v230_v3  ;;  %v283_v47 = vcombine.high %v224_v4, %v230_v3 }
  0xad   : > { %v290_v24 = vrot.slane %v282_v18, %v15232_v17  ;;  %v297_v61 = vrot.slane %v283_v47, %v15232_v17 }
  0xae   : > { %v233_v8 = vpop.permute.xlu1 %232  ;;  %v227_v9 = vpop.permute.xlu0 %226 }
  0xaf   : > { %v266_v12 = vcombine.low %v15132_v0, %v227_v9  ;;  %v267_v42 = vcombine.high %v15132_v0, %v227_v9 }
  0xb1   : > { %v274_v19 = vrot.slane %v266_v12, %v15232_v17  ;;  %v281_v55 = vrot.slane %v267_v42, %v15232_v17 }
  0xb2   : > { %v239_v15 = vpop.permute.xlu1 %238  ;;  %v236_v16 = vpop.permute.xlu0 %235 }
  0xb3   : > { %v298_v20 = vcombine.low %v233_v8, %v239_v15  ;;  %v330_v26 = vcombine.low %v274_v19, %v290_v24  ;;  %v299_v43 = vcombine.high %v233_v8, %v239_v15  ;;  %v331_v44 = vcombine.high %v274_v19, %v290_v24 }
  0xb4   : > { %v346_v3 = vcombine.low %v281_v55, %v297_v61  ;;  %v347_v24 = vcombine.high %v281_v55, %v297_v61 }
  0xb5   : > { %v306_v27 = vrot.slane %v298_v20, %v15232_v17  ;;  %v338_v35 = vrot.slane %v330_v26, %v15240_v29  ;;  %v313_v56 = vrot.slane %v299_v43, %v15232_v17  ;;  %v345_v60 = vrot.slane %v331_v44, %v15240_v29 }
  0xb6   : > { %v15235_v22 = vpop.permute.xlu1 %245  ;;  %v242_v23 = vpop.permute.xlu0 %241  ;;  %v354_v12 = vrot.slane %v346_v3, %v15240_v29 }
  0xb7   : > { %v314_v25 = vcombine.low %v236_v16, %v242_v23  ;;  %v315_v37 = vcombine.high %v236_v16, %v242_v23 }
  0xb9   : > { %v322_v28 = vrot.slane %v314_v25, %v15232_v17  ;;  %v329_v48 = vrot.slane %v315_v37, %v15232_v17 }
  0xba   : > { %v252_v30 = vpop.permute.xlu1 %251  ;;  %v249_v31 = vpop.permute.xlu0 %248 }
  0xbb   : > { %v362_v32 = vcombine.low %v306_v27, %v322_v28  ;;  %v418_v33 = vcombine.low %v15235_v22, %v252_v30  ;;  %v402_v34 = vcombine.low %v15147_v1, %v249_v31  ;;  %v363_v40 = vcombine.high %v306_v27, %v322_v28 }
  0xbc   : > { %v378_v62 = vcombine.low %v313_v56, %v329_v48  ;;  %v419_v13 = vcombine.high %v15235_v22, %v252_v30  ;;  %v403_v14 = vcombine.high %v15147_v1, %v249_v31  ;;  %v379_v16 = vcombine.high %v313_v56, %v329_v48 }
  0xbd   : > { %v370_v36 = vrot.slane %v362_v32, %v15240_v29  ;;  %v426_v45 = vrot.slane %v418_v33, %v15232_v17  ;;  %v410_v46 = vrot.slane %v402_v34, %v15232_v17  ;;  %v377_v54 = vrot.slane %v363_v40, %v15240_v29 }
  0xbe   : > { %v258_v38 = vpop.permute.xlu1 %257  ;;  %v255_v39 = vpop.permute.xlu0 %254  ;;  %v386_v7 = vrot.slane %v378_v62, %v15240_v29  ;;  %v433_v25 = vrot.slane %v419_v13, %v15232_v17  ;;  %v417_v22 = vrot.slane %v403_v14, %v15232_v17  ;;  %v393_v30 = vrot.slane %v379_v16, %v15240_v29 }
  0xbf   : > { %v394_v41 = vcombine.low %v338_v35, %v370_v36  ;;  %v395_v53 = vcombine.high %v338_v35, %v370_v36  ;;  %v466_v57 = vcombine.low %v410_v46, %v426_v45  ;;  %v396_v0 = vcombine.low %v345_v60, %v377_v54 }
  0xc0   : > { %v397_v6 = vcombine.high %v345_v60, %v377_v54  ;;  %v467_v15 = vcombine.high %v410_v46, %v426_v45  ;;  %v398_v18 = vcombine.low %v354_v12, %v386_v7  ;;  %v399_v27 = vcombine.high %v354_v12, %v386_v7 }
  0xc1   : > { %554 = vrot.lane.b32.xlu0 %v394_v41, %s14992_s17  ;;  %v474_v4 = vrot.slane %v466_v57, %v15240_v29  ;;  %v482_v31 = vcombine.low %v417_v22, %v433_v25  ;;  %v361_v32 = vrot.slane %v347_v24, %v15240_v29  ;;  %v483_v40 = vcombine.high %v417_v22, %v433_v25 }
  0xc2   : > { %v264_v49 = vpop.permute.xlu1 %263  ;;  %v261_v50 = vpop.permute.xlu0 %260  ;;  %v481_v1 = vrot.slane %v467_v15, %v15240_v29 }
  0xc3   : > { %v450_v51 = vcombine.low %v258_v38, %v264_v49  ;;  %v434_v52 = vcombine.low %v255_v39, %v261_v50  ;;  %v451_v8 = vcombine.high %v258_v38, %v264_v49  ;;  %v435_v9 = vcombine.high %v255_v39, %v261_v50 }
  0xc4   : > { %v400_v33 = vcombine.low %v361_v32, %v393_v30  ;;  %v490_v36 = vrot.slane %v482_v31, %v15240_v29  ;;  %v401_v38 = vcombine.high %v361_v32, %v393_v30  ;;  %v497_v43 = vrot.slane %v483_v40, %v15240_v29 }
  0xc5   : > { %v458_v58 = vrot.slane %v450_v51, %v15232_v17  ;;  %v442_v59 = vrot.slane %v434_v52, %v15232_v17  ;;  %558 = vrot.lane.b32.xlu0 %v395_v53, %s14992_s17  ;;  %v465_v19 = vrot.slane %v451_v8, %v15232_v17  ;;  %v449_v20 = vrot.slane %v435_v9, %v15232_v17 }
  0xc7   : > { %v498_v63 = vcombine.low %v442_v59, %v458_v58  ;;  %v499_v10 = vcombine.high %v442_v59, %v458_v58  ;;  %v514_v26 = vcombine.low %v449_v20, %v465_v19  ;;  %v515_v37 = vcombine.high %v449_v20, %v465_v19 }
  0xc9   : > { %562 = vrot.lane.b32.xlu0 %v396_v0, %s14992_s17  ;;  %v506_v5 = vrot.slane %v498_v63, %v15240_v29  ;;  %v513_v23 = vrot.slane %v499_v10, %v15240_v29  ;;  %v522_v35 = vrot.slane %v514_v26, %v15240_v29  ;;  %v529_v42 = vrot.slane %v515_v37, %v15240_v29 }
  0xcb   : > { %v530_v11 = vcombine.low %v474_v4, %v506_v5  ;;  %v531_v21 = vcombine.high %v474_v4, %v506_v5  ;;  %v532_v28 = vcombine.low %v481_v1, %v513_v23  ;;  %v533_v34 = vcombine.high %v481_v1, %v513_v23 }
  0xcc   : > { %v534_v39 = vcombine.low %v490_v36, %v522_v35  ;;  %v535_v41 = vcombine.high %v490_v36, %v522_v35  ;;  %v536_v44 = vcombine.low %v497_v43, %v529_v42  ;;  %v537_v45 = vcombine.high %v497_v43, %v529_v42 }
  0xcd   : > { %566 = vrot.lane.b32.xlu0 %v397_v6, %s14992_s17  ;;  %556 = vrot.lane.b32.xlu1 %v530_v11, %s14992_s17 }
  0xd1   : > { %570 = vrot.lane.b32.xlu0 %v398_v18, %s14992_s17  ;;  %560 = vrot.lane.b32.xlu1 %v531_v21, %s14992_s17 }
  0xd5   : > { %574 = vrot.lane.b32.xlu0 %v399_v27, %s14992_s17  ;;  %564 = vrot.lane.b32.xlu1 %v532_v28, %s14992_s17 }
  0xd9   : > { %578 = vrot.lane.b32.xlu0 %v400_v33, %s14992_s17  ;;  %568 = vrot.lane.b32.xlu1 %v533_v34, %s14992_s17 }
  0xdd   : > { %582 = vrot.lane.b32.xlu0 %v401_v38, %s14992_s17  ;;  %572 = vrot.lane.b32.xlu1 %v534_v39, %s14992_s17 }
  0xe1   : > { %576 = vrot.lane.b32.xlu1 %v535_v41, %s14992_s17 }
  0xe5   : > { %580 = vrot.lane.b32.xlu1 %v536_v44, %s14992_s17 }
  0xe9   : > { %584 = vrot.lane.b32.xlu1 %v537_v45, %s14992_s17 }
 0x133   : > { %v555_v46 = vpop.permute.xlu0 %554 }
 0x134   : > { %603 = vst.msk [vmem:[#allocation2 + $0x8] sm:$0xff] %vm602_vm1, %v555_v46 }
 0x137   : > { %v559_v47 = vpop.permute.xlu0 %558 }
 0x138   : > { %605 = vst.msk [vmem:[#allocation2 + $0x28] sm:$0xff] %vm602_vm1, %v559_v47 }
 0x13b   : > { %v563_v48 = vpop.permute.xlu0 %562  ;;  %v15293_v49 = vld [vmem:[#allocation2 + $0x7] sm:$0xff] }
 0x13c   : > { %607 = vst.msk [vmem:[#allocation2 + $0x48] sm:$0xff] %vm602_vm1, %v563_v48  ;;  %651 = vrot.lane.b32.xlu0 %v15293_v49, %s14993_s19  ;;  %v1827_v16 = vld [vmem:[#allocation2 + $0x8] sm:$0xff] }
 0x13f   : > { %v557_v50 = vpop.permute.xlu1 %556  ;;  %v567_v51 = vpop.permute.xlu0 %566  ;;  %v15298_v52 = vld [vmem:[#allocation2 + $0x27] sm:$0xff] }
 0x140   : > { %604 = vst.msk [vmem:[#allocation2 + $0x10] sm:$0xff] %vm602_vm1, %v557_v50  ;;  %609 = vst.msk [vmem:[#allocation2 + $0x68] sm:$0xff] %vm602_vm1, %v567_v51  ;;  %655 = vrot.lane.b32.xlu0 %v15298_v52, %s14993_s19  ;;  %v1829_v18 = vld [vmem:[#allocation2 + $0x28] sm:$0xff] }
 0x143   : > { %v561_v53 = vpop.permute.xlu1 %560  ;;  %v571_v54 = vpop.permute.xlu0 %570  ;;  %v15304_v55 = vld [vmem:[#allocation2 + $0x47] sm:$0xff] }
 0x144   : > { %606 = vst.msk [vmem:[#allocation2 + $0x30] sm:$0xff] %vm602_vm1, %v561_v53  ;;  %611 = vst.msk [vmem:[#allocation2 + $0x88] sm:$0xff] %vm602_vm1, %v571_v54  ;;  %659 = vrot.lane.b32.xlu0 %v15304_v55, %s14993_s19  ;;  %v1831_v19 = vld [vmem:[#allocation2 + $0x48] sm:$0xff] }
 0x147   : > { %v565_v56 = vpop.permute.xlu1 %564  ;;  %v575_v57 = vpop.permute.xlu0 %574  ;;  %v620_v58 = vld [vmem:[#allocation2 + $0xf] sm:$0xff]  ;;  %v625_v59 = vld [vmem:[#allocation2 + $0x67] sm:$0xff] }
 0x148   : > { %608 = vst.msk [vmem:[#allocation2 + $0x50] sm:$0xff] %vm602_vm1, %v565_v56  ;;  %613 = vst.msk [vmem:[#allocation2 + $0xa8] sm:$0xff] %vm602_vm1, %v575_v57  ;;  %653 = vrot.lane.b32.xlu1 %v620_v58, %s14993_s19  ;;  %663 = vrot.lane.b32.xlu0 %v625_v59, %s14993_s19  ;;  %v15373_v20 = vld [vmem:[#allocation2 + $0x10] sm:$0xff]  ;;  %v1833_v21 = vld [vmem:[#allocation2 + $0x68] sm:$0xff] }
 0x149   : > { %v15435_v47 = vld [vmem:[#allocation2 + $0x11] sm:$0xff] }
 0x14b   : > { %v569_v60 = vpop.permute.xlu1 %568  ;;  %v579_v61 = vpop.permute.xlu0 %578  ;;  %v622_v62 = vld [vmem:[#allocation2 + $0x2f] sm:$0xff]  ;;  %v627_v63 = vld [vmem:[#allocation2 + $0x87] sm:$0xff] }
 0x14c   : > { %610 = vst.msk [vmem:[#allocation2 + $0x70] sm:$0xff] %vm602_vm1, %v569_v60  ;;  %615 = vst.msk [vmem:[#allocation2 + $0xc8] sm:$0xff] %vm602_vm1, %v579_v61  ;;  %657 = vrot.lane.b32.xlu1 %v622_v62, %s14993_s19  ;;  %667 = vrot.lane.b32.xlu0 %v627_v63, %s14993_s19  ;;  %v15378_v23 = vld [vmem:[#allocation2 + $0x30] sm:$0xff]  ;;  %v1835_v24 = vld [vmem:[#allocation2 + $0x88] sm:$0xff] }
 0x14d   : > { %v15408_v36 = vld [vmem:[#allocation2 + $0x31] sm:$0xff] }
 0x14f   : > { %v573_v0 = vpop.permute.xlu1 %572  ;;  %v583_v3 = vpop.permute.xlu0 %582  ;;  %v624_v4 = vld [vmem:[#allocation2 + $0x4f] sm:$0xff]  ;;  %v629_v5 = vld [vmem:[#allocation2 + $0xa7] sm:$0xff] }
 0x150   : > { %612 = vst.msk [vmem:[#allocation2 + $0x90] sm:$0xff] %vm602_vm1, %v573_v0  ;;  %617 = vst.msk [vmem:[#allocation2 + $0xe8] sm:$0xff] %vm602_vm1, %v583_v3  ;;  %661 = vrot.lane.b32.xlu1 %v624_v4, %s14993_s19  ;;  %671 = vrot.lane.b32.xlu0 %v629_v5, %s14993_s19  ;;  %v15385_v22 = vld [vmem:[#allocation2 + $0x50] sm:$0xff]  ;;  %v1837_v1 = vld [vmem:[#allocation2 + $0xa8] sm:$0xff] }
 0x151   : > { %v15453_v54 = vld [vmem:[#allocation2 + $0x51] sm:$0xff] }
 0x153   : > { %v577_v6 = vpop.permute.xlu1 %576  ;;  %v626_v7 = vld [vmem:[#allocation2 + $0x6f] sm:$0xff]  ;;  %v631_v8 = vld [vmem:[#allocation2 + $0xc7] sm:$0xff] }
 0x154   : > { %614 = vst.msk [vmem:[#allocation2 + $0xb0] sm:$0xff] %vm602_vm1, %v577_v6  ;;  %665 = vrot.lane.b32.xlu1 %v626_v7, %s14993_s19  ;;  %675 = vrot.lane.b32.xlu0 %v631_v8, %s14993_s19  ;;  %v15392_v27 = vld [vmem:[#allocation2 + $0x70] sm:$0xff]  ;;  %v1839_v28 = vld [vmem:[#allocation2 + $0xc8] sm:$0xff] }
 0x155   : > { %v15417_v40 = vld [vmem:[#allocation2 + $0x71] sm:$0xff] }
 0x157   : > { %v581_v9 = vpop.permute.xlu1 %580  ;;  %v628_v10 = vld [vmem:[#allocation2 + $0x8f] sm:$0xff]  ;;  %v633_v11 = vld [vmem:[#allocation2 + $0xe7] sm:$0xff] }
 0x158   : > { %616 = vst.msk [vmem:[#allocation2 + $0xd0] sm:$0xff] %vm602_vm1, %v581_v9  ;;  %669 = vrot.lane.b32.xlu1 %v628_v10, %s14993_s19  ;;  %679 = vrot.lane.b32.xlu0 %v633_v11, %s14993_s19  ;;  %v15399_v31 = vld [vmem:[#allocation2 + $0x90] sm:$0xff]  ;;  %v1841_v32 = vld [vmem:[#allocation2 + $0xe8] sm:$0xff] }
 0x159   : > { %24350 = vst [vmem:[#allocation11_spill] sm:$0xff] %v15399_v31 }
 0x15b   : > { %v585_v12 = vpop.permute.xlu1 %584  ;;  %v630_v13 = vld [vmem:[#allocation2 + $0xaf] sm:$0xff] }
 0x15c   : > { %618 = vst.msk [vmem:[#allocation2 + $0xf0] sm:$0xff] %vm602_vm1, %v585_v12  ;;  %673 = vrot.lane.b32.xlu1 %v630_v13, %s14993_s19  ;;  %1047 = vrot.lane.b32.xlu0 %v15293_v49, %s14994_s20  ;;  %v1838_v35 = vld [vmem:[#allocation2 + $0xb0] sm:$0xff] }
 0x15d   : > { %v15426_v44 = vld [vmem:[#allocation2 + $0xb1] sm:$0xff] }
 0x15f   : > { %v632_v14 = vld [vmem:[#allocation2 + $0xcf] sm:$0xff] }
 0x160   : > { %677 = vrot.lane.b32.xlu1 %v632_v14, %s14993_s19  ;;  %1051 = vrot.lane.b32.xlu0 %v15298_v52, %s14994_s20  ;;  %v1840_v39 = vld [vmem:[#allocation2 + $0xd0] sm:$0xff] }
 0x161   : > { %v15500_v9 = vld [vmem:[#allocation2 + $0xd1] sm:$0xff] }
 0x163   : > { %v634_v15 = vld [vmem:[#allocation2 + $0xef] sm:$0xff] }
 0x164   : > { %681 = vrot.lane.b32.xlu1 %v634_v15, %s14993_s19  ;;  %1055 = vrot.lane.b32.xlu0 %v15304_v55, %s14994_s20  ;;  %v1842_v43 = vld [vmem:[#allocation2 + $0xf0] sm:$0xff] }
 0x165   : > { %v15437_v48 = vld [vmem:[#allocation2 + $0xf1] sm:$0xff] }
 0x168   : > { %1049 = vrot.lane.b32.xlu1 %v620_v58, %s14994_s20  ;;  %1059 = vrot.lane.b32.xlu0 %v625_v59, %s14994_s20 }
 0x16c   : > { %1053 = vrot.lane.b32.xlu1 %v622_v62, %s14994_s20  ;;  %1063 = vrot.lane.b32.xlu0 %v627_v63, %s14994_s20 }
 0x170   : > { %1057 = vrot.lane.b32.xlu1 %v624_v4, %s14994_s20  ;;  %1067 = vrot.lane.b32.xlu0 %v629_v5, %s14994_s20 }
 0x174   : > { %1061 = vrot.lane.b32.xlu1 %v626_v7, %s14994_s20  ;;  %1071 = vrot.lane.b32.xlu0 %v631_v8, %s14994_s20 }
 0x178   : > { %1065 = vrot.lane.b32.xlu1 %v628_v10, %s14994_s20  ;;  %1075 = vrot.lane.b32.xlu0 %v633_v11, %s14994_s20 }
 0x17c   : > { %1069 = vrot.lane.b32.xlu1 %v630_v13, %s14994_s20  ;;  %1437 = vrot.lane.b32.xlu0 %v15293_v49, %s14995_s22 }
 0x180   : > { %1073 = vrot.lane.b32.xlu1 %v632_v14, %s14994_s20  ;;  %1441 = vrot.lane.b32.xlu0 %v15298_v52, %s14995_s22 }
 0x184   : > { %1077 = vrot.lane.b32.xlu1 %v634_v15, %s14994_s20  ;;  %1445 = vrot.lane.b32.xlu0 %v15304_v55, %s14995_s22  ;;  %v15455_v55 = vld [vmem:[#allocation2 + $0x29] sm:$0xff] }
 0x188   : > { %1439 = vrot.lane.b32.xlu1 %v620_v58, %s14995_s22  ;;  %1449 = vrot.lane.b32.xlu0 %v625_v59, %s14995_s22 }
 0x18c   : > { %1443 = vrot.lane.b32.xlu1 %v622_v62, %s14995_s22  ;;  %1453 = vrot.lane.b32.xlu0 %v627_v63, %s14995_s22  ;;  %v15479_v63 = vld [vmem:[#allocation2 + $0x91] sm:$0xff] }
 0x190   : > { %1447 = vrot.lane.b32.xlu1 %v624_v4, %s14995_s22  ;;  %1457 = vrot.lane.b32.xlu0 %v629_v5, %s14995_s22  ;;  %v15487_v4 = vld [vmem:[#allocation2 + $0x69] sm:$0xff] }
 0x194   : > { %1451 = vrot.lane.b32.xlu1 %v626_v7, %s14995_s22  ;;  %1461 = vrot.lane.b32.xlu0 %v631_v8, %s14995_s22 }
 0x198   : > { %1455 = vrot.lane.b32.xlu1 %v628_v10, %s14995_s22  ;;  %1465 = vrot.lane.b32.xlu0 %v633_v11, %s14995_s22  ;;  %v15504_v10 = vld [vmem:[#allocation2 + $0xa9] sm:$0xff] }
 0x19c   : > { %1459 = vrot.lane.b32.xlu1 %v630_v13, %s14995_s22  ;;  %1859 = vrot.lane.b32.xlu0 %v1827_v16, %s14993_s19 }
 0x1a0   : > { %1463 = vrot.lane.b32.xlu1 %v632_v14, %s14995_s22  ;;  %1863 = vrot.lane.b32.xlu0 %v1829_v18, %s14993_s19 }
 0x1a4   : > { %1467 = vrot.lane.b32.xlu1 %v634_v15, %s14995_s22  ;;  %1867 = vrot.lane.b32.xlu0 %v1831_v19, %s14993_s19 }
 0x1a8   : > { %1861 = vrot.lane.b32.xlu1 %v15373_v20, %s14993_s19  ;;  %1871 = vrot.lane.b32.xlu0 %v1833_v21, %s14993_s19  ;;  %v15526_v21 = vld [vmem:[#allocation2 + $0x9] sm:$0xff] }
 0x1ac   : > { %1865 = vrot.lane.b32.xlu1 %v15378_v23, %s14993_s19  ;;  %1875 = vrot.lane.b32.xlu0 %v1835_v24, %s14993_s19  ;;  %v15530_v24 = vld [vmem:[#allocation2 + $0xe9] sm:$0xff] }
 0x1ae   : > { %v15383_v25 = vpop.permute.xlu0 %651 }
 0x1b0   : > { %1869 = vrot.lane.b32.xlu1 %v15385_v22, %s14993_s19  ;;  %1879 = vrot.lane.b32.xlu0 %v1837_v1, %s14993_s19 }
 0x1b2   : > { %v15390_v26 = vpop.permute.xlu0 %655 }
 0x1b4   : > { %1873 = vrot.lane.b32.xlu1 %v15392_v27, %s14993_s19  ;;  %1883 = vrot.lane.b32.xlu0 %v1839_v28, %s14993_s19 }
 0x1b6   : > { %v15397_v30 = vpop.permute.xlu0 %659 }
 0x1b7   : > { %v699_v50 = vcombine.low %v15383_v25, %v15397_v30 }
 0x1b8   : > { %1877 = vrot.lane.b32.xlu1 %v15399_v31, %s14993_s19  ;;  %1887 = vrot.lane.b32.xlu0 %v1841_v32, %s14993_s19 }
 0x1b9   : > { %v15467_v58 = vrot.slane %v699_v50, %v15232_v17  ;;  %v15551_v50 = vld [vmem:[#allocation2 + $0x49] sm:$0xff] }
 0x1ba   : > { %v15404_v33 = vpop.permute.xlu1 %653  ;;  %v15406_v34 = vpop.permute.xlu0 %663 }
 0x1bb   : > { %v715_v49 = vcombine.low %v15390_v26, %v15406_v34 }
 0x1bc   : > { %1881 = vrot.lane.b32.xlu1 %v1838_v35, %s14993_s19  ;;  %3847 = vrot.lane.b32.xlu0 %v15408_v36, %s14995_s22 }
 0x1bd   : > { %v15458_v56 = vrot.slane %v715_v49, %v15232_v17 }
 0x1be   : > { %v15413_v37 = vpop.permute.xlu1 %657  ;;  %v15415_v38 = vpop.permute.xlu0 %667 }
 0x1bf   : > { %v763_v0 = vcombine.low %v15467_v58, %v15458_v56 }
 0x1c0   : > { %1885 = vrot.lane.b32.xlu1 %v1840_v39, %s14993_s19  ;;  %3855 = vrot.lane.b32.xlu0 %v15417_v40, %s14995_s22 }
 0x1c1   : > { %v15507_v11 = vrot.slane %v763_v0, %v15240_v29 }
 0x1c2   : > { %v15422_v41 = vpop.permute.xlu1 %661  ;;  %v15424_v42 = vpop.permute.xlu0 %671 }
 0x1c3   : > { %24354 = vst [vmem:[#allocation15_spill] sm:$0xff] %v15507_v11  ;;  %v835_v12 = vcombine.low %v15404_v33, %v15422_v41 }
 0x1c4   : > { %1889 = vrot.lane.b32.xlu1 %v1842_v43, %s14993_s19  ;;  %3863 = vrot.lane.b32.xlu0 %v15426_v44, %s14995_s22 }
 0x1c5   : > { %v15533_v1 = vrot.slane %v835_v12, %v15232_v17 }
 0x1c6   : > { %v15431_v45 = vpop.permute.xlu1 %665  ;;  %v15433_v46 = vpop.permute.xlu0 %675 }
 0x1c7   : > { %v731_v51 = vcombine.low %v15415_v38, %v15433_v46  ;;  %v851_v8 = vcombine.low %v15413_v37, %v15431_v45  ;;  %24356 = vst [vmem:[#allocation17_spill] sm:$0xff] %v15533_v1 }
 0x1c8   : > { %3843 = vrot.lane.b32.xlu1 %v15435_v47, %s14995_s22  ;;  %3871 = vrot.lane.b32.xlu0 %v15437_v48, %s14995_s22 }
 0x1c9   : > { %v15470_v59 = vrot.slane %v731_v51, %v15232_v17  ;;  %v15522_v18 = vrot.slane %v851_v8, %v15232_v17 }
 0x1ca   : > { %v15449_v52 = vpop.permute.xlu1 %669  ;;  %v15451_v53 = vpop.permute.xlu0 %679 }
 0x1cb   : > { %v747_v57 = vcombine.low %v15424_v42, %v15451_v53  ;;  %v899_v43 = vcombine.low %v15533_v1, %v15522_v18 }
 0x1cc   : > { %3851 = vrot.lane.b32.xlu1 %v15453_v54, %s14995_s22  ;;  %3845 = vrot.lane.b32.xlu0 %v15455_v55, %s14995_s22 }
 0x1cd   : > { %v15473_v60 = vrot.slane %v747_v57, %v15232_v17  ;;  %v15567_v8 = vrot.slane %v899_v43, %v15240_v29 }
 0x1ce   : > { %v15475_v61 = vpop.permute.xlu1 %673  ;;  %v15477_v62 = vpop.permute.xlu0 %1047 }
 0x1cf   : > { %24351 = vst [vmem:[#allocation12_spill] sm:$0xff] %v15477_v62  ;;  %v795_v3 = vcombine.low %v15470_v59, %v15473_v60  ;;  %24362 = vst [vmem:[#allocation23_spill] sm:$0xff] %v15567_v8 }
 0x1d0   : > { %3859 = vrot.lane.b32.xlu1 %v15479_v63, %s14995_s22  ;;  %3853 = vrot.lane.b32.xlu0 %v15487_v4, %s14995_s22 }
 0x1d1   : > { %v15496_v7 = vrot.slane %v795_v3, %v15240_v29  ;;  %v15564_v3 = vld [vmem:[#allocation2 + $0x89] sm:$0xff] }
 0x1d2   : > { %v15491_v5 = vpop.permute.xlu1 %677  ;;  %v15493_v6 = vpop.permute.xlu0 %1051 }
 0x1d3   : > { %24352 = vst [vmem:[#allocation13_spill] sm:$0xff] %v15493_v6  ;;  %24353 = vst [vmem:[#allocation14_spill] sm:$0xff] %v15496_v7  ;;  %v867_v13 = vcombine.low %v15449_v52, %v15491_v5 }
 0x1d4   : > { %3867 = vrot.lane.b32.xlu1 %v15500_v9, %s14995_s22  ;;  %3861 = vrot.lane.b32.xlu0 %v15504_v10, %s14995_s22 }
 0x1d5   : > { %v15536_v28 = vrot.slane %v867_v13, %v15232_v17 }
 0x1d6   : > { %v15515_v14 = vpop.permute.xlu1 %681  ;;  %v15517_v15 = vpop.permute.xlu0 %1055 }
 0x1d7   : > { %24355 = vst [vmem:[#allocation16_spill] sm:$0xff] %v15517_v15  ;;  %v883_v19 = vcombine.low %v15475_v61, %v15515_v14  ;;  %v1095_v12 = vcombine.low %v15477_v62, %v15517_v15 }
 0x1d8   : > { %3841 = vrot.lane.b32.xlu1 %v15526_v21, %s14995_s22  ;;  %3869 = vrot.lane.b32.xlu0 %v15530_v24, %s14995_s22 }
 0x1d9   : > { %v15539_v32 = vrot.slane %v883_v19, %v15232_v17  ;;  %v15613_v62 = vrot.slane %v1095_v12, %v15232_v17 }
 0x1da   : > { %v15543_v35 = vpop.permute.xlu1 %1049  ;;  %v15545_v39 = vpop.permute.xlu0 %1059 }
 0x1db   : > { %24357 = vst [vmem:[#allocation18_spill] sm:$0xff] %v15543_v35  ;;  %24358 = vst [vmem:[#allocation19_spill] sm:$0xff] %v15545_v39  ;;  %v931_v49 = vcombine.low %v15536_v28, %v15539_v32  ;;  %v1111_v16 = vcombine.low %v15493_v6, %v15545_v39 }
 0x1dc   : > { %3849 = vrot.lane.b32.xlu1 %v15551_v50, %s14995_s22  ;;  %3457 = vrot.lane.b32.xlu0 %v15408_v36, %s14994_s20  ;;  %24370 = vst [vmem:[#allocation31_spill] sm:$0xff] %v15613_v62 }
 0x1dd   : > { %v15558_v51 = vrot.slane %v931_v49, %v15240_v29  ;;  %v15579_v49 = vld [vmem:[#allocation2 + $0xc9] sm:$0xff]  ;;  %v15604_v1 = vrot.slane %v1111_v16, %v15232_v17 }
 0x1de   : > { %v15560_v57 = vpop.permute.xlu1 %1053  ;;  %v15562_v0 = vpop.permute.xlu0 %1063 }
 0x1df   : > { %24359 = vst [vmem:[#allocation20_spill] sm:$0xff] %v15558_v51  ;;  %24360 = vst [vmem:[#allocation21_spill] sm:$0xff] %v15560_v57  ;;  %v1159_v39 = vcombine.low %v15613_v62, %v15604_v1 }
 0x1e0   : > { %24361 = vst [vmem:[#allocation22_spill] sm:$0xff] %v15562_v0  ;;  %3857 = vrot.lane.b32.xlu1 %v15564_v3, %s14995_s22  ;;  %3465 = vrot.lane.b32.xlu0 %v15417_v40, %s14994_s20  ;;  %24369 = vst [vmem:[#allocation30_spill] sm:$0xff] %v15604_v1 }
 0x1e1   : > { %v15645_v62 = vrot.slane %v1159_v39, %v15240_v29 }
 0x1e2   : > { %v15575_v13 = vpop.permute.xlu1 %1057  ;;  %v15577_v19 = vpop.permute.xlu0 %1067 }
 0x1e3   : > { %24363 = vst [vmem:[#allocation24_spill] sm:$0xff] %v15575_v13  ;;  %24364 = vst [vmem:[#allocation25_spill] sm:$0xff] %v15577_v19  ;;  %v1231_v1 = vcombine.low %v15543_v35, %v15575_v13 }
 0x1e4   : > { %3865 = vrot.lane.b32.xlu1 %v15579_v49, %s14995_s22  ;;  %3473 = vrot.lane.b32.xlu0 %v15426_v44, %s14994_s20  ;;  %24378 = vst [vmem:[#allocation39_spill] sm:$0xff] %v15645_v62 }
 0x1e5   : > { %v15667_v35 = vrot.slane %v1231_v1, %v15232_v17 }
 0x1e6   : > { %v15585_v43 = vpop.permute.xlu1 %1061  ;;  %v15587_v2 = vpop.permute.xlu0 %1071 }
 0x1e7   : > { %24365 = vst [vmem:[#allocation26_spill] sm:$0xff] %v15585_v43  ;;  %24366 = vst [vmem:[#allocation27_spill] sm:$0xff] %v15587_v2  ;;  %v1127_v8 = vcombine.low %v15562_v0, %v15587_v2 }
 0x1e8   : > { %3453 = vrot.lane.b32.xlu1 %v15435_v47, %s14994_s20  ;;  %3481 = vrot.lane.b32.xlu0 %v15437_v48, %s14994_s20  ;;  %24382 = vst [vmem:[#allocation43_spill] sm:$0xff] %v15667_v35 }
 0x1e9   : > { %v15616_v15 = vrot.slane %v1127_v8, %v15232_v17 }
 0x1ea   : > { %v15599_v51 = vpop.permute.xlu1 %1065  ;;  %v15601_v31 = vpop.permute.xlu0 %1075 }
 0x1eb   : > { %24367 = vst [vmem:[#allocation28_spill] sm:$0xff] %v15599_v51  ;;  %24368 = vst [vmem:[#allocation29_spill] sm:$0xff] %v15601_v31  ;;  %v1143_v6 = vcombine.low %v15577_v19, %v15601_v31  ;;  %v1247_v31 = vcombine.low %v15560_v57, %v15585_v43 }
 0x1ec   : > { %3461 = vrot.lane.b32.xlu1 %v15453_v54, %s14994_s20  ;;  %3455 = vrot.lane.b32.xlu0 %v15455_v55, %s14994_s20  ;;  %24371 = vst [vmem:[#allocation32_spill] sm:$0xff] %v15616_v15 }
 0x1ed   : > { %v15619_v0 = vrot.slane %v1143_v6, %v15232_v17  ;;  %v15660_v43 = vrot.slane %v1247_v31, %v15232_v17 }
 0x1ee   : > { %v15621_v16 = vpop.permute.xlu1 %1069  ;;  %v15623_v2 = vpop.permute.xlu0 %1437 }
 0x1ef   : > { %24372 = vst [vmem:[#allocation33_spill] sm:$0xff] %v15619_v0  ;;  %24373 = vst [vmem:[#allocation34_spill] sm:$0xff] %v15621_v16  ;;  %v1191_v19 = vcombine.low %v15616_v15, %v15619_v0 }
 0x1f0   : > { %24374 = vst [vmem:[#allocation35_spill] sm:$0xff] %v15623_v2  ;;  %3469 = vrot.lane.b32.xlu1 %v15479_v63, %s14994_s20  ;;  %3463 = vrot.lane.b32.xlu0 %v15487_v4, %s14994_s20  ;;  %24381 = vst [vmem:[#allocation42_spill] sm:$0xff] %v15660_v43 }
 0x1f1   : > { %v15638_v12 = vrot.slane %v1191_v19, %v15240_v29 }
 0x1f2   : > { %v15633_v8 = vpop.permute.xlu1 %1073  ;;  %v15635_v6 = vpop.permute.xlu0 %1441 }
 0x1f3   : > { %24375 = vst [vmem:[#allocation36_spill] sm:$0xff] %v15633_v8  ;;  %24376 = vst [vmem:[#allocation37_spill] sm:$0xff] %v15635_v6  ;;  %v1263_v15 = vcombine.low %v15599_v51, %v15633_v8  ;;  %v1295_v8 = vcombine.low %v15667_v35, %v15660_v43 }
 0x1f4   : > { %24377 = vst [vmem:[#allocation38_spill] sm:$0xff] %v15638_v12  ;;  %3477 = vrot.lane.b32.xlu1 %v15500_v9, %s14994_s20  ;;  %3471 = vrot.lane.b32.xlu0 %v15504_v10, %s14994_s20 }
 0x1f5   : > { %v15670_v13 = vrot.slane %v1263_v15, %v15232_v17 }
 0x1f6   : > { %v15653_v19 = vpop.permute.xlu1 %1077  ;;  %v15655_v0 = vpop.permute.xlu0 %1445 }
 0x1f7   : > { %24379 = vst [vmem:[#allocation40_spill] sm:$0xff] %v15653_v19  ;;  %24380 = vst [vmem:[#allocation41_spill] sm:$0xff] %v15655_v0  ;;  %v1279_v39 = vcombine.low %v15621_v16, %v15653_v19  ;;  %v15697_v19 = vrot.slane %v1295_v8, %v15240_v29  ;;  %v1485_v35 = vcombine.low %v15623_v2, %v15655_v0 }
 0x1f8   : > { %3451 = vrot.lane.b32.xlu1 %v15526_v21, %s14994_s20  ;;  %24383 = vst [vmem:[#allocation44_spill] sm:$0xff] %v15670_v13  ;;  %3479 = vrot.lane.b32.xlu0 %v15530_v24, %s14994_s20 }
 0x1f9   : > { %v15673_v51 = vrot.slane %v1279_v39, %v15232_v17  ;;  %24388 = vst [vmem:[#allocation49_spill] sm:$0xff] %v15697_v19 }
 0x1fa   : > { %v15677_v31 = vpop.permute.xlu1 %1439  ;;  %v15679_v57 = vpop.permute.xlu0 %1449 }
 0x1fb   : > { %24384 = vst [vmem:[#allocation45_spill] sm:$0xff] %v15677_v31  ;;  %v1327_v1 = vcombine.low %v15670_v13, %v15673_v51 }
 0x1fc   : > { %3459 = vrot.lane.b32.xlu1 %v15551_v50, %s14994_s20  ;;  %3067 = vrot.lane.b32.xlu0 %v15408_v36, %s14993_s19 }
 0x1fd   : > { %v15690_v15 = vrot.slane %v1327_v1, %v15240_v29 }
 0x1fe   : > { %v15692_v39 = vpop.permute.xlu1 %1443  ;;  %v15694_v16 = vpop.permute.xlu0 %1453 }
 0x1ff   : > { %24385 = vst [vmem:[#allocation46_spill] sm:$0xff] %v15690_v15  ;;  %24386 = vst [vmem:[#allocation47_spill] sm:$0xff] %v15692_v39 }
 0x200   : > { %24387 = vst [vmem:[#allocation48_spill] sm:$0xff] %v15694_v16  ;;  %3467 = vrot.lane.b32.xlu1 %v15564_v3, %s14994_s20  ;;  %3075 = vrot.lane.b32.xlu0 %v15417_v40, %s14993_s19  ;;  %v1501_v40 = vcombine.low %v15635_v6, %v15679_v57 }
 0x202   : > { %v15705_v36 = vpop.permute.xlu1 %1447  ;;  %v15707_v1 = vpop.permute.xlu0 %1457  ;;  %v15732_v13 = vrot.slane %v1501_v40, %v15232_v17 }
 0x203   : > { %24389 = vst [vmem:[#allocation50_spill] sm:$0xff] %v15705_v36 }
 0x204   : > { %3475 = vrot.lane.b32.xlu1 %v15579_v49, %s14994_s20  ;;  %3083 = vrot.lane.b32.xlu0 %v15426_v44, %s14993_s19  ;;  %24391 = vst [vmem:[#allocation52_spill] sm:$0xff] %v15732_v13 }
 0x206   : > { %v15713_v8 = vpop.permute.xlu1 %1451  ;;  %v15715_v43 = vpop.permute.xlu0 %1461 }
 0x207   : > { %v1517_v19 = vcombine.low %v15694_v16, %v15715_v43 }
 0x208   : > { %3063 = vrot.lane.b32.xlu1 %v15435_v47, %s14993_s19  ;;  %3091 = vrot.lane.b32.xlu0 %v15437_v48, %s14993_s19  ;;  %v15741_v47 = vrot.slane %v1485_v35, %v15232_v17 }
 0x209   : > { %v15744_v48 = vrot.slane %v1517_v19, %v15232_v17  ;;  %v1637_v19 = vcombine.low %v15692_v39, %v15713_v8 }
 0x20a   : > { %v15727_v44 = vpop.permute.xlu1 %1455  ;;  %v15729_v15 = vpop.permute.xlu0 %1465  ;;  %24392 = vst [vmem:[#allocation53_spill] sm:$0xff] %v15741_v47  ;;  %v1549_v16 = vcombine.low %v15741_v47, %v15732_v13 }
 0x20b   : > { %24390 = vst [vmem:[#allocation51_spill] sm:$0xff] %v15727_v44  ;;  %v1533_v6 = vcombine.low %v15707_v1, %v15729_v15 }
 0x20c   : > { %3071 = vrot.lane.b32.xlu1 %v15453_v54, %s14993_s19  ;;  %3065 = vrot.lane.b32.xlu0 %v15455_v55, %s14993_s19  ;;  %v15773_v47 = vrot.slane %v1549_v16, %v15240_v29 }
 0x20d   : > { %v15747_v2 = vrot.slane %v1533_v6, %v15232_v17 }
 0x20e   : > { %v15749_v40 = vpop.permute.xlu1 %1459  ;;  %v15751_v0 = vpop.permute.xlu0 %1859  ;;  %24396 = vst [vmem:[#allocation57_spill] sm:$0xff] %v15773_v47 }
 0x20f   : > { %24393 = vst [vmem:[#allocation54_spill] sm:$0xff] %v15751_v0  ;;  %v1581_v54 = vcombine.low %v15744_v48, %v15747_v2 }
 0x210   : > { %3079 = vrot.lane.b32.xlu1 %v15479_v63, %s14993_s19  ;;  %3073 = vrot.lane.b32.xlu0 %v15487_v4, %s14993_s19  ;;  %v1621_v63 = vcombine.low %v15677_v31, %v15705_v36 }
 0x211   : > { %v15766_v6 = vrot.slane %v1581_v54, %v15240_v29 }
 0x212   : > { %v15761_v55 = vpop.permute.xlu1 %1463  ;;  %v15763_v35 = vpop.permute.xlu0 %1863  ;;  %v15795_v31 = vrot.slane %v1621_v63, %v15232_v17 }
 0x213   : > { %24394 = vst [vmem:[#allocation55_spill] sm:$0xff] %v15763_v35  ;;  %24395 = vst [vmem:[#allocation56_spill] sm:$0xff] %v15766_v6  ;;  %v1653_v4 = vcombine.low %v15727_v44, %v15761_v55  ;;  %v748_v44 = vcombine.high %v15424_v42, %v15451_v53 }
 0x214   : > { %3087 = vrot.lane.b32.xlu1 %v15500_v9, %s14993_s19  ;;  %3081 = vrot.lane.b32.xlu0 %v15504_v10, %s14993_s19  ;;  %v15788_v9 = vrot.slane %v1637_v19, %v15232_v17  ;;  %24398 = vst [vmem:[#allocation59_spill] sm:$0xff] %v15795_v31 }
 0x215   : > { %v15798_v10 = vrot.slane %v1653_v4, %v15232_v17  ;;  %v716_v4 = vcombine.high %v15390_v26, %v15406_v34  ;;  %v796_v26 = vcombine.high %v15470_v59, %v15473_v60 }
 0x216   : > { %v15781_v54 = vpop.permute.xlu1 %1467  ;;  %v15783_v13 = vpop.permute.xlu0 %1867 }
 0x217   : > { %24397 = vst [vmem:[#allocation58_spill] sm:$0xff] %v15783_v13  ;;  %v1669_v16 = vcombine.low %v15749_v40, %v15781_v54 }
 0x218   : > { %3061 = vrot.lane.b32.xlu1 %v15526_v21, %s14993_s19  ;;  %3089 = vrot.lane.b32.xlu0 %v15530_v24, %s14993_s19  ;;  %v1685_v21 = vcombine.low %v15795_v31, %v15788_v9  ;;  %v732_v24 = vcombine.high %v15415_v38, %v15433_v46  ;;  %v700_v31 = vcombine.high %v15383_v25, %v15397_v30 }
 0x219   : > { %v15801_v36 = vrot.slane %v1669_v16, %v15232_v17  ;;  %v764_v38 = vcombine.high %v15467_v58, %v15458_v56  ;;  %v810_v56 = vrot.slane %v796_v26, %v15240_v29 }
 0x21a   : > { %v15805_v19 = vpop.permute.xlu1 %1861  ;;  %v15807_v39 = vpop.permute.xlu0 %1871  ;;  %v15836_v34 = vrot.slane %v1685_v21, %v15240_v29  ;;  %v746_v46 = vrot.slane %v732_v24, %v15232_v17  ;;  %v714_v60 = vrot.slane %v700_v31, %v15232_v17  ;;  %v884_v24 = vcombine.high %v15475_v61, %v15515_v14 }
 0x21b   : > { %24399 = vst [vmem:[#allocation60_spill] sm:$0xff] %v15805_v19  ;;  %24400 = vst [vmem:[#allocation61_spill] sm:$0xff] %v15807_v39  ;;  %v1717_v63 = vcombine.low %v15798_v10, %v15801_v36  ;;  %v1923_v21 = vcombine.low %v15763_v35, %v15807_v39  ;;  %v836_v14 = vcombine.high %v15404_v33, %v15422_v41  ;;  %v24423_v35 = vld [vmem:[#allocation19_spill] sm:$0xff] }
 0x21c   : > { %3069 = vrot.lane.b32.xlu1 %v15551_v50, %s14993_s19  ;;  %2645 = vrot.lane.b32.xlu0 %v15378_v23, %s14995_s22  ;;  %v762_v50 = vrot.slane %v748_v44, %v15232_v17  ;;  %24404 = vst [vmem:[#allocation65_spill] sm:$0xff] %v15836_v34  ;;  %v730_v23 = vrot.slane %v716_v4, %v15232_v17  ;;  %v24425_v39 = vld [vmem:[#allocation27_spill] sm:$0xff] }
 0x21d   : > { %v15824_v42 = vrot.slane %v1717_v63, %v15240_v29  ;;  %v828_v44 = vcombine.high %v15507_v11, %v15496_v7 }
 0x21e   : > { %v15826_v53 = vpop.permute.xlu1 %1865  ;;  %v15828_v16 = vpop.permute.xlu0 %1875  ;;  %v779_v58 = vcombine.low %v714_v60, %v730_v23  ;;  %v812_v4 = vcombine.high %v746_v46, %v762_v50 }
 0x21f   : > { %24401 = vst [vmem:[#allocation62_spill] sm:$0xff] %v15824_v42  ;;  %24402 = vst [vmem:[#allocation63_spill] sm:$0xff] %v15826_v53 }
 0x220   : > { %24403 = vst [vmem:[#allocation64_spill] sm:$0xff] %v15828_v16  ;;  %3077 = vrot.lane.b32.xlu1 %v15564_v3, %s14993_s19  ;;  %2653 = vrot.lane.b32.xlu0 %v15392_v27, %s14995_s22  ;;  %v811_v3 = vcombine.low %v746_v46, %v762_v50  ;;  %v778_v27 = vrot.slane %v764_v38, %v15240_v29 }
 0x221   : > { %v780_v38 = vcombine.high %v714_v60, %v730_v23  ;;  %v868_v50 = vcombine.high %v15449_v52, %v15491_v5  ;;  %v787_v61 = vrot.slane %v779_v58, %v15240_v29  ;;  %v15884_v46 = vrot.slane %v1923_v21, %v15232_v17  ;;  %v24411_v58 = vld [vmem:[#allocation17_spill] sm:$0xff] }
 0x222   : > { %v15848_v30 = vpop.permute.xlu1 %1869  ;;  %v15850_v59 = vpop.permute.xlu0 %1879  ;;  %v830_v26 = vcombine.high %v778_v27, %v810_v56  ;;  %v15869_v25 = vrot.slane %v811_v3, %v15240_v29  ;;  %v15897_v5 = vrot.slane %v812_v4, %v15240_v29  ;;  %v900_v21 = vcombine.high %v24411_v58, %v15522_v18 }
 0x223   : > { %24405 = vst [vmem:[#allocation66_spill] sm:$0xff] %v15848_v30  ;;  %24406 = vst [vmem:[#allocation67_spill] sm:$0xff] %v15850_v59  ;;  %v850_v18 = vrot.slane %v836_v14, %v15232_v17  ;;  %v829_v11 = vcombine.low %v778_v27, %v810_v56 }
 0x224   : > { %3085 = vrot.lane.b32.xlu1 %v15579_v49, %s14993_s19  ;;  %972 = vrot.lane.b32.xlu0 %v828_v44, %s14988_s11  ;;  %v1907_v49 = vcombine.low %v15751_v0, %v15783_v13  ;;  %v852_v44 = vcombine.high %v15413_v37, %v15431_v45  ;;  %v898_v37 = vrot.slane %v884_v24, %v15232_v17  ;;  %s14997_s19 = smov 122  }
 0x225   : > { %v932_v45 = vcombine.high %v15536_v28, %v15539_v32  ;;  %v832_v52 = vcombine.high %v787_v61, %v15869_v25  ;;  %v882_v28 = vrot.slane %v868_v50, %v15232_v17  ;;  %v794_v32 = vrot.slane %v780_v38, %v15240_v29 }
 0x226   : > { %v15862_v63 = vpop.permute.xlu1 %1873  ;;  %v15864_v31 = vpop.permute.xlu0 %1883  ;;  %v15900_v33 = vrot.slane %v1907_v49, %v15232_v17  ;;  %v866_v3 = vrot.slane %v852_v44, %v15232_v17  ;;  %v15935_v58 = vrot.slane %v900_v21, %v15240_v29 }
 0x227   : > { %24407 = vst [vmem:[#allocation68_spill] sm:$0xff] %v15862_v63  ;;  %24408 = vst [vmem:[#allocation69_spill] sm:$0xff] %v15864_v31  ;;  %v947_v44 = vcombine.low %v882_v28, %v898_v37  ;;  %v834_v50 = vcombine.high %v794_v32, %v15897_v5  ;;  %v15927_v38 = vrot.slane %v932_v45, %v15240_v29 }
 0x228   : > { %2641 = vrot.lane.b32.xlu1 %v15373_v20, %s14995_s22  ;;  %980 = vrot.lane.b32.xlu0 %v830_v26, %s14987_s10  ;;  %v1939_v20 = vcombine.low %v15828_v16, %v15864_v31  ;;  %v1971_v4 = vcombine.low %v15900_v33, %v15884_v46  ;;  %v948_v13 = vcombine.high %v882_v28, %v898_v37 }
 0x229   : > { %v15952_v21 = vrot.slane %v947_v44, %v15240_v29  ;;  %v916_v27 = vcombine.high %v850_v18, %v866_v3  ;;  %v24420_v44 = vld [vmem:[#allocation25_spill] sm:$0xff] }
 0x22a   : > { %v15888_v23 = vpop.permute.xlu1 %1877  ;;  %v15890_v60 = vpop.permute.xlu0 %1887  ;;  %v15915_v24 = vrot.slane %v1939_v20, %v15232_v17  ;;  %v24414_v20 = vld [vmem:[#allocation11_spill] sm:$0xff]  ;;  %v15942_v45 = vrot.slane %v1971_v4, %v15240_v29  ;;  %v2043_v4 = vcombine.low %v15805_v19, %v15848_v30  ;;  %v24433_v30 = vld [vmem:[#allocation32_spill] sm:$0xff] }
 0x22b   : > { %24409 = vst [vmem:[#allocation70_spill] sm:$0xff] %v15888_v23  ;;  %24410 = vst [vmem:[#allocation71_spill] sm:$0xff] %v15890_v60  ;;  %v1955_v41 = vcombine.low %v15850_v59, %v15890_v60  ;;  %v24426_v59 = vld [vmem:[#allocation22_spill] sm:$0xff] }
 0x22c   : > { %2649 = vrot.lane.b32.xlu1 %v15385_v22, %s14995_s22  ;;  %988 = vrot.lane.b32.xlu0 %v832_v52, %s14982_s4  ;;  %24417 = vst [vmem:[#allocation74_spill] sm:$0xff] %v15942_v45  ;;  %v1128_v60 = vcombine.high %v24426_v59, %v24425_v39 }
 0x22d   : > { %v15918_v26 = vrot.slane %v1955_v41, %v15232_v17  ;;  %v915_v41 = vcombine.low %v850_v18, %v866_v3  ;;  %v831_v3 = vcombine.low %v787_v61, %v15869_v25  ;;  %v15988_v25 = vrot.slane %v2043_v4, %v15232_v17 }
 0x22e   : > { %v15920_v22 = vpop.permute.xlu1 %1881  ;;  %v15922_v49 = vpop.permute.xlu0 %3847 }
 0x22f   : > { %24412 = vst [vmem:[#allocation17_spill] sm:$0xff] %v15920_v22  ;;  %24413 = vst [vmem:[#allocation72_spill] sm:$0xff] %v15922_v49  ;;  %v2003_v52 = vcombine.low %v15915_v24, %v15918_v26  ;;  %v15963_v28 = vrot.slane %v915_v41, %v15240_v29  ;;  %v15980_v41 = vrot.slane %v948_v13, %v15240_v29 }
 0x230   : > { %2657 = vrot.lane.b32.xlu1 %v24414_v20, %s14995_s22  ;;  %996 = vrot.lane.b32.xlu0 %v834_v50, %s14983_s6  ;;  %v2059_v20 = vcombine.low %v15826_v53, %v15862_v63  ;;  %v965_v50 = vcombine.low %v15935_v58, %v15927_v38  ;;  %24427 = vst [vmem:[#allocation19_spill] sm:$0xff] %v15988_v25 }
 0x231   : > { %v15945_v0 = vrot.slane %v2003_v52, %v15240_v29  ;;  %v24419_v52 = vld [vmem:[#allocation29_spill] sm:$0xff]  ;;  %v15998_v13 = vrot.slane %v916_v27, %v15240_v29 }
 0x232   : > { %v15937_v7 = vpop.permute.xlu1 %1885  ;;  %v15939_v14 = vpop.permute.xlu0 %3855  ;;  %v1144_v16 = vcombine.high %v24420_v44, %v24419_v52  ;;  %v15973_v18 = vrot.slane %v2059_v20, %v15232_v17  ;;  %v24424_v52 = vld [vmem:[#allocation13_spill] sm:$0xff] }
 0x233   : > { %24415 = vst [vmem:[#allocation11_spill] sm:$0xff] %v15937_v7  ;;  %24416 = vst [vmem:[#allocation73_spill] sm:$0xff] %v15939_v14  ;;  %v2075_v37 = vcombine.low %v15888_v23, %v15937_v7  ;;  %v1112_v44 = vcombine.high %v24424_v52, %v24423_v35  ;;  %v24430_v35 = vld [vmem:[#allocation16_spill] sm:$0xff]  ;;  %v24434_v23 = vld [vmem:[#allocation30_spill] sm:$0xff] }
 0x234   : > { %24418 = vst [vmem:[#allocation75_spill] sm:$0xff] %v15945_v0  ;;  %976 = vrot.lane.b32.xlu1 %v829_v11, %s14986_s23  ;;  %1004 = vrot.lane.b32.xlu0 %v965_v50, %s14986_s23  ;;  %24422 = vst [vmem:[#allocation25_spill] sm:$0xff] %v15973_v18  ;;  %v967_v50 = vcombine.low %v15963_v28, %v15952_v21  ;;  %v24431_v52 = vld [vmem:[#allocation12_spill] sm:$0xff]  ;;  %v1158_v39 = vrot.slane %v1144_v16, %v15232_v17 }
 0x235   : > { %v15991_v61 = vrot.slane %v2075_v37, %v15232_v17  ;;  %v1096_v19 = vcombine.high %v24431_v52, %v24430_v35  ;;  %v833_v37 = vcombine.low %v794_v32, %v15897_v5  ;;  %v969_v35 = vcombine.low %v15998_v13, %v15980_v41  ;;  %v24435_v5 = vld [vmem:[#allocation31_spill] sm:$0xff] }
 0x236   : > { %v15967_v31 = vpop.permute.xlu1 %1889  ;;  %v15969_v11 = vpop.permute.xlu0 %3863  ;;  %v1126_v16 = vrot.slane %v1112_v44, %v15232_v17  ;;  %v1142_v52 = vrot.slane %v1128_v60, %v15232_v17  ;;  %v1160_v32 = vcombine.high %v24435_v5, %v24434_v23  ;;  %v24438_v44 = vld [vmem:[#allocation20_spill] sm:$0xff] }
 0x237   : > { %24421 = vst [vmem:[#allocation29_spill] sm:$0xff] %v15967_v31  ;;  %v2091_v56 = vcombine.low %v15920_v22, %v15967_v31  ;;  %24428 = vst [vmem:[#allocation13_spill] sm:$0xff] %v15991_v61  ;;  %v24439_v22 = vld [vmem:[#allocation23_spill] sm:$0xff] }
 0x238   : > { %984 = vrot.lane.b32.xlu1 %v831_v3, %s14984_s8  ;;  %1012 = vrot.lane.b32.xlu0 %v967_v50, %s14984_s8  ;;  %v24432_v3 = vld [vmem:[#allocation33_spill] sm:$0xff]  ;;  %v2107_v50 = vcombine.low %v15988_v25, %v15973_v18  ;;  %v1207_v7 = vcombine.low %v1142_v52, %v1158_v39  ;;  %v964_v60 = vcombine.high %v24439_v22, %v24438_v44 }
 0x239   : > { %v15994_v20 = vrot.slane %v2091_v56, %v15232_v17  ;;  %v1192_v56 = vcombine.high %v24433_v30, %v24432_v3  ;;  %v1110_v3 = vrot.slane %v1096_v19, %v15232_v17  ;;  %v1174_v19 = vrot.slane %v1160_v32, %v15240_v29 }
 0x23a   : > { %v16003_v59 = vpop.permute.xlu1 %3843  ;;  %v16005_v4 = vpop.permute.xlu0 %3871  ;;  %v1208_v44 = vcombine.high %v1142_v52, %v1158_v39  ;;  %v24444_v39 = vld [vmem:[#allocation26_spill] sm:$0xff]  ;;  %v24445_v52 = vld [vmem:[#allocation21_spill] sm:$0xff] }
 0x23b   : > { %24429 = vst [vmem:[#allocation27_spill] sm:$0xff] %v15994_v20  ;;  %v2139_v27 = vcombine.low %v15991_v61, %v15994_v20  ;;  %v16035_v23 = vrot.slane %v1192_v56, %v15240_v29  ;;  %v966_v56 = vcombine.high %v15935_v58, %v15927_v38  ;;  %v1176_v5 = vcombine.high %v1110_v3, %v1126_v16  ;;  %v24447_v58 = vld [vmem:[#allocation28_spill] sm:$0xff] }
 0x23c   : > { %992 = vrot.lane.b32.xlu1 %v833_v37, %s14985_s9  ;;  %1020 = vrot.lane.b32.xlu0 %v969_v35, %s14985_s9  ;;  %v1224_v37 = vcombine.high %v15645_v62, %v15638_v12  ;;  %v16038_v35 = vrot.slane %v2107_v50, %v15240_v29  ;;  %v16050_v12 = vrot.slane %v1207_v7, %v15240_v29  ;;  %v24441_v50 = vld [vmem:[#allocation40_spill] sm:$0xff]  ;;  %v24442_v62 = vld [vmem:[#allocation34_spill] sm:$0xff] }
 0x23d   : > { %v16023_v30 = vrot.slane %v2139_v27, %v15240_v29  ;;  %v1175_v27 = vcombine.low %v1110_v3, %v1126_v16  ;;  %v1280_v31 = vcombine.high %v24442_v62, %v24441_v50  ;;  %v1226_v32 = vcombine.high %v1174_v19, %v16035_v23  ;;  %v24446_v7 = vld [vmem:[#allocation36_spill] sm:$0xff]  ;;  %v24449_v16 = vld [vmem:[#allocation18_spill] sm:$0xff] }
 0x23e   : > { %v16026_v53 = vpop.permute.xlu1 %3851  ;;  %v16028_v63 = vpop.permute.xlu0 %3845  ;;  %24440 = vst [vmem:[#allocation12_spill] sm:$0xff] %v16038_v35  ;;  %v1248_v25 = vcombine.high %v24445_v52, %v24444_v39  ;;  %v1264_v18 = vcombine.high %v24447_v58, %v24446_v7  ;;  %v4041_v62 = vcombine.low %v15922_v49, %v15939_v14  ;;  %v4073_v50 = vcombine.low %v15969_v11, %v16005_v4  ;;  %v24448_v61 = vld [vmem:[#allocation24_spill] sm:$0xff]  ;;  %v24454_v35 = vld [vmem:[#allocation43_spill] sm:$0xff] }
 0x23f   : > { %24436 = vst [vmem:[#allocation22_spill] sm:$0xff] %v16023_v30  ;;  %24437 = vst [vmem:[#allocation16_spill] sm:$0xff] %v16028_v63  ;;  %v1183_v38 = vrot.slane %v1175_v27, %v15240_v29  ;;  %v1232_v3 = vcombine.high %v24449_v16, %v24448_v61  ;;  %v16078_v39 = vrot.slane %v1208_v44, %v15240_v29  ;;  %v24450_v7 = vld [vmem:[#allocation44_spill] sm:$0xff] }
 0x240   : > { %1000 = vrot.lane.b32.xlu1 %v964_v60, %s14988_s11  ;;  %1368 = vrot.lane.b32.xlu0 %v1224_v37, %s14988_s11  ;;  %v4025_v60 = vcombine.low %v16003_v59, %v16026_v53  ;;  %v1294_v52 = vrot.slane %v1280_v31, %v15232_v17  ;;  %v1328_v58 = vcombine.high %v24450_v7, %v15673_v51 }
 0x241   : > { %v1228_v27 = vcombine.high %v1183_v38, %v16050_v12  ;;  %v1190_v31 = vrot.slane %v1176_v5, %v15240_v29  ;;  %v1278_v44 = vrot.slane %v1264_v18, %v15232_v17  ;;  %v16097_v51 = vrot.slane %v4041_v62, %v15232_v17 }
 0x242   : > { %v16045_v22 = vpop.permute.xlu1 %3859  ;;  %v16056_v37 = vpop.permute.xlu0 %3853  ;;  %v970_v5 = vcombine.high %v15998_v13, %v15980_v41  ;;  %v1225_v49 = vcombine.low %v1174_v19, %v16035_v23  ;;  %v1534_v19 = vcombine.high %v15707_v1, %v15729_v15  ;;  %v24463_v15 = vld [vmem:[#allocation48_spill] sm:$0xff]  ;;  %v24465_v23 = vld [vmem:[#allocation35_spill] sm:$0xff] }
 0x243   : > { %24443 = vst [vmem:[#allocation33_spill] sm:$0xff] %v16056_v37  ;;  %v1230_v18 = vcombine.high %v1190_v31, %v16078_v39  ;;  %v1344_v14 = vcombine.high %v1278_v44, %v1294_v52  ;;  %v1518_v1 = vcombine.high %v24463_v15, %v15715_v43  ;;  %v1229_v43 = vcombine.low %v1190_v31, %v16078_v39  ;;  %v24467_v39 = vld [vmem:[#allocation52_spill] sm:$0xff]  ;;  %v24468_v31 = vld [vmem:[#allocation53_spill] sm:$0xff] }
 0x244   : > { %1008 = vrot.lane.b32.xlu1 %v966_v56, %s14987_s10  ;;  %1376 = vrot.lane.b32.xlu0 %v1226_v32, %s14987_s10  ;;  %v968_v56 = vcombine.high %v15963_v28, %v15952_v21  ;;  %v16084_v32 = vrot.slane %v4025_v60, %v15232_v17  ;;  %v1262_v21 = vrot.slane %v1248_v25, %v15232_v17  ;;  %v24453_v28 = vld [vmem:[#allocation42_spill] sm:$0xff] }
 0x245   : > { %v1296_v30 = vcombine.high %v24454_v35, %v24453_v28  ;;  %v16100_v60 = vrot.slane %v4073_v50, %v15232_v17  ;;  %v1246_v25 = vrot.slane %v1232_v3, %v15232_v17 }
 0x246   : > { %v16072_v20 = vpop.permute.xlu1 %3867  ;;  %24451 = vst [vmem:[#allocation32_spill] sm:$0xff] %v16084_v32  ;;  %v16088_v16 = vpop.permute.xlu0 %3861  ;;  %v4089_v62 = vcombine.low %v16084_v32, %v16097_v51 }
 0x247   : > { %v4057_v61 = vcombine.low %v16045_v22, %v16072_v20  ;;  %24452 = vst [vmem:[#allocation30_spill] sm:$0xff] %v16088_v16  ;;  %v1311_v3 = vcombine.low %v1246_v25, %v1262_v21  ;;  %v16124_v41 = vrot.slane %v1296_v30, %v15240_v29  ;;  %v1312_v30 = vcombine.high %v1246_v25, %v1262_v21 }
 0x248   : > { %1016 = vrot.lane.b32.xlu1 %v968_v56, %s14982_s4  ;;  %1384 = vrot.lane.b32.xlu0 %v1228_v27, %s14982_s4  ;;  %v1343_v56 = vcombine.low %v1278_v44, %v1294_v52  ;;  %v16119_v27 = vrot.slane %v1328_v58, %v15240_v29  ;;  %v1227_v44 = vcombine.low %v1183_v38, %v16050_v12 }
 0x249   : > { %v16103_v7 = vrot.slane %v4057_v61, %v15232_v17  ;;  %v16161_v25 = vrot.slane %v1344_v14, %v15240_v29  ;;  %v3905_v12 = vcombine.low %v16028_v63, %v16056_v37  ;;  %v24464_v14 = vld [vmem:[#allocation41_spill] sm:$0xff] }
 0x24a   : > { %v16107_v35 = vpop.permute.xlu1 %3841  ;;  %v16116_v61 = vpop.permute.xlu0 %3869  ;;  %v1361_v58 = vcombine.low %v16124_v41, %v16119_v27 }
 0x24b   : > { %24455 = vst [vmem:[#allocation31_spill] sm:$0xff] %v16107_v35  ;;  %v4121_v50 = vcombine.low %v16103_v7, %v16100_v60  ;;  %24456 = vst [vmem:[#allocation40_spill] sm:$0xff] %v16116_v61  ;;  %v3937_v38 = vcombine.low %v16088_v16, %v16116_v61 }
 0x24c   : > { %1024 = vrot.lane.b32.xlu1 %v970_v5, %s14983_s6  ;;  %1392 = vrot.lane.b32.xlu0 %v1230_v18, %s14983_s6  ;;  %v16137_v5 = vrot.slane %v1343_v56, %v15240_v29  ;;  %v16140_v18 = vrot.slane %v4089_v62, %v15240_v29  ;;  %v24462_v62 = vld [vmem:[#allocation37_spill] sm:$0xff] }
 0x24d   : > { %v16127_v13 = vrot.slane %v4121_v50, %v15240_v29  ;;  %v16145_v50 = vrot.slane %v1311_v3, %v15240_v29  ;;  %v1502_v3 = vcombine.high %v24462_v62, %v15679_v57  ;;  %v1548_v57 = vrot.slane %v1534_v19, %v15232_v17 }
 0x24e   : > { %v16129_v28 = vpop.permute.xlu1 %3849  ;;  %v16132_v32 = vpop.permute.xlu0 %3457  ;;  %24460 = vst [vmem:[#allocation36_spill] sm:$0xff] %v16140_v18 }
 0x24f   : > { %24457 = vst [vmem:[#allocation34_spill] sm:$0xff] %v16127_v13  ;;  %24458 = vst [vmem:[#allocation26_spill] sm:$0xff] %v16129_v28  ;;  %v3889_v56 = vcombine.low %v16107_v35, %v16129_v28  ;;  %v1363_v21 = vcombine.low %v16145_v50, %v16137_v5  ;;  %v1486_v35 = vcombine.high %v24465_v23, %v24464_v14  ;;  %v24472_v28 = vld [vmem:[#allocation49_spill] sm:$0xff] }
 0x250   : > { %24459 = vst [vmem:[#allocation21_spill] sm:$0xff] %v16132_v32  ;;  %1372 = vrot.lane.b32.xlu1 %v1225_v49, %s14986_s23  ;;  %1400 = vrot.lane.b32.xlu0 %v1361_v58, %s14986_s23  ;;  %v16174_v58 = vrot.slane %v1312_v30, %v15240_v29  ;;  %v1516_v19 = vrot.slane %v1502_v3, %v15232_v17 }
 0x251   : > { %v16185_v15 = vrot.slane %v3889_v56, %v15232_v17  ;;  %v1532_v14 = vrot.slane %v1518_v1, %v15232_v17  ;;  %v16202_v56 = vrot.slane %v3937_v38, %v15232_v17  ;;  %v1500_v3 = vrot.slane %v1486_v35, %v15232_v17 }
 0x252   : > { %v16151_v52 = vpop.permute.xlu1 %3857  ;;  %v16156_v49 = vpop.permute.xlu0 %3465  ;;  %v1365_v23 = vcombine.low %v16174_v58, %v16161_v25 }
 0x253   : > { %24461 = vst [vmem:[#allocation28_spill] sm:$0xff] %v16156_v49  ;;  %24466 = vst [vmem:[#allocation24_spill] sm:$0xff] %v16185_v15  ;;  %v1597_v37 = vcombine.low %v1532_v14, %v1548_v57  ;;  %v1565_v35 = vcombine.low %v1500_v3, %v1516_v19 }
 0x254   : > { %1380 = vrot.lane.b32.xlu1 %v1227_v44, %s14984_s8  ;;  %1408 = vrot.lane.b32.xlu0 %v1363_v21, %s14984_s8  ;;  %v1582_v44 = vcombine.high %v15744_v48, %v15747_v2  ;;  %v1550_v2 = vcombine.high %v24468_v31, %v24467_v39  ;;  %v16199_v48 = vrot.slane %v3905_v12, %v15232_v17 }
 0x256   : > { %v16179_v62 = vpop.permute.xlu1 %3865  ;;  %v16189_v30 = vpop.permute.xlu0 %3473  ;;  %24469 = vst [vmem:[#allocation18_spill] sm:$0xff] %v16199_v48  ;;  %v3953_v12 = vcombine.low %v16185_v15, %v16199_v48  ;;  %v1564_v31 = vrot.slane %v1550_v2, %v15240_v29  ;;  %v1362_v15 = vcombine.high %v16124_v41, %v16119_v27  ;;  %v24477_v27 = vld [vmem:[#allocation51_spill] sm:$0xff] }
 0x257   : > { %v3921_v21 = vcombine.low %v16151_v52, %v16179_v62  ;;  %v1654_v41 = vcombine.high %v24477_v27, %v15761_v55 }
 0x258   : > { %1388 = vrot.lane.b32.xlu1 %v1229_v43, %s14985_s9  ;;  %1416 = vrot.lane.b32.xlu0 %v1365_v23, %s14985_s9  ;;  %v24471_v43 = vld [vmem:[#allocation46_spill] sm:$0xff]  ;;  %v1596_v23 = vrot.slane %v1582_v44, %v15240_v29  ;;  %v16240_v2 = vrot.slane %v3953_v12, %v15240_v29 }
 0x259   : > { %v16205_v63 = vrot.slane %v3921_v21, %v15232_v17  ;;  %v1360_v16 = vcombine.high %v24472_v28, %v24471_v43  ;;  %v1614_v21 = vcombine.high %v15773_v47, %v15766_v6  ;;  %v1598_v28 = vcombine.high %v1532_v14, %v1548_v57  ;;  %v24476_v57 = vld [vmem:[#allocation47_spill] sm:$0xff] }
 0x25a   : > { %v16209_v1 = vpop.permute.xlu1 %3453  ;;  %v16217_v39 = vpop.permute.xlu0 %3481  ;;  %v1670_v6 = vcombine.high %v15749_v40, %v15781_v54  ;;  %v16237_v47 = vrot.slane %v1597_v37, %v15240_v29  ;;  %24475 = vst [vmem:[#allocation37_spill] sm:$0xff] %v16240_v2  ;;  %v1638_v14 = vcombine.high %v24476_v57, %v15713_v8  ;;  %v1573_v40 = vrot.slane %v1565_v35, %v15240_v29  ;;  %v24478_v37 = vld [vmem:[#allocation50_spill] sm:$0xff] }
 0x25b   : > { %24470 = vst [vmem:[#allocation44_spill] sm:$0xff] %v16209_v1  ;;  %v3985_v38 = vcombine.low %v16205_v63, %v16202_v56  ;;  %v1364_v8 = vcombine.high %v16145_v50, %v16137_v5 }
 0x25c   : > { %1396 = vrot.lane.b32.xlu1 %v1360_v16, %s14988_s11  ;;  %1758 = vrot.lane.b32.xlu0 %v1614_v21, %s14988_s11  ;;  %v1616_v16 = vcombine.high %v1564_v31, %v1596_v23  ;;  %v24479_v21 = vld [vmem:[#allocation45_spill] sm:$0xff]  ;;  %v1684_v55 = vrot.slane %v1670_v6, %v15232_v17  ;;  %v1652_v57 = vrot.slane %v1638_v14, %v15232_v17 }
 0x25d   : > { %v16226_v43 = vrot.slane %v3985_v38, %v15240_v29  ;;  %v1566_v38 = vcombine.high %v1500_v3, %v1516_v19  ;;  %v1622_v12 = vcombine.high %v24479_v21, %v24478_v37  ;;  %v1718_v19 = vcombine.high %v15798_v10, %v15801_v36 }
 0x25e   : > { %v16228_v61 = vpop.permute.xlu1 %3461  ;;  %v16234_v44 = vpop.permute.xlu0 %3455  ;;  %v1668_v6 = vrot.slane %v1654_v41, %v15232_v17  ;;  %v3651_v36 = vcombine.low %v16132_v32, %v16156_v49  ;;  %v3683_v10 = vcombine.low %v16189_v30, %v16217_v39  ;;  %v1615_v32 = vcombine.low %v1564_v31, %v1596_v23 }
 0x25f   : > { %24473 = vst [vmem:[#allocation42_spill] sm:$0xff] %v16226_v43  ;;  %24474 = vst [vmem:[#allocation43_spill] sm:$0xff] %v16228_v61  ;;  %v3635_v3 = vcombine.low %v16209_v1, %v16228_v61  ;;  %v1580_v5 = vrot.slane %v1566_v38, %v15240_v29  ;;  %v1636_v27 = vrot.slane %v1622_v12, %v15232_v17 }
 0x260   : > { %1404 = vrot.lane.b32.xlu1 %v1362_v15, %s14987_s10  ;;  %1766 = vrot.lane.b32.xlu0 %v1616_v16, %s14987_s10  ;;  %v16258_v15 = vrot.slane %v1598_v28, %v15240_v29  ;;  %v1618_v16 = vcombine.high %v1573_v40, %v16237_v47  ;;  %v24480_v28 = vld [vmem:[#allocation59_spill] sm:$0xff]  ;;  %v1366_v38 = vcombine.high %v16174_v58, %v16161_v25 }
 0x261   : > { %v1686_v50 = vcombine.high %v24480_v28, %v15788_v9  ;;  %v1733_v9 = vcombine.low %v1668_v6, %v1684_v55  ;;  %v16286_v41 = vrot.slane %v3635_v3, %v15232_v17  ;;  %v16291_v28 = vrot.slane %v1718_v19, %v15240_v29 }
 0x262   : > { %v16253_v48 = vpop.permute.xlu1 %3469  ;;  %v16265_v35 = vpop.permute.xlu0 %3463  ;;  %v1620_v37 = vcombine.high %v1580_v5, %v16258_v15  ;;  %v16295_v12 = vrot.slane %v3651_v36, %v15232_v17  ;;  %v16298_v25 = vrot.slane %v3683_v10, %v15232_v17  ;;  %v1734_v54 = vcombine.high %v1668_v6, %v1684_v55 }
 0x263   : > { %v16305_v3 = vrot.slane %v1686_v50, %v15240_v29  ;;  %v1702_v50 = vcombine.high %v1636_v27, %v1652_v57  ;;  %v3516_v55 = vcombine.high %v16234_v44, %v16265_v35 }
 0x264   : > { %1412 = vrot.lane.b32.xlu1 %v1364_v8, %s14982_s4  ;;  %1774 = vrot.lane.b32.xlu0 %v1618_v16, %s14982_s4  ;;  %v1701_v16 = vcombine.low %v1636_v27, %v1652_v57 }
 0x265   : > { %v1751_v10 = vcombine.low %v16305_v3, %v16291_v28  ;;  %v16336_v27 = vrot.slane %v3516_v55, %v15232_v17 }
 0x266   : > { %v16280_v14 = vpop.permute.xlu1 %3477  ;;  %v3472_v8 = vpop.permute.xlu0 %3471  ;;  %v1709_v23 = vrot.slane %v1701_v16, %v15240_v29 }
 0x267   : > { %v3667_v21 = vcombine.low %v16253_v48, %v16280_v14  ;;  %24484 = vst [vmem:[#allocation52_spill] sm:$0xff] %v16336_v27 }
 0x268   : > { %1420 = vrot.lane.b32.xlu1 %v1366_v38, %s14983_s6  ;;  %1782 = vrot.lane.b32.xlu0 %v1620_v37, %s14983_s6  ;;  %v3699_v38 = vcombine.low %v16286_v41, %v16295_v12  ;;  %v1617_v37 = vcombine.low %v1573_v40, %v16237_v47  ;;  %v1716_v47 = vrot.slane %v1702_v50, %v15240_v29 }
 0x269   : > { %v16301_v58 = vrot.slane %v3667_v21, %v15232_v17  ;;  %v16314_v21 = vrot.slane %v1733_v9, %v15240_v29  ;;  %v1972_v50 = vcombine.high %v15900_v33, %v15884_v46 }
 0x26a   : > { %v3452_v19 = vpop.permute.xlu1 %3451  ;;  %v3480_v49 = vpop.permute.xlu0 %3479  ;;  %v16332_v57 = vrot.slane %v3699_v38, %v15240_v29 }
 0x26b   : > { %v3731_v36 = vcombine.low %v16301_v58, %v16298_v25  ;;  %v1753_v9 = vcombine.low %v1709_v23, %v16314_v21 }
 0x26c   : > { %1762 = vrot.lane.b32.xlu1 %v1615_v32, %s14986_s23  ;;  %1790 = vrot.lane.b32.xlu0 %v1751_v10, %s14986_s23  ;;  %v16329_v32 = vrot.slane %v1734_v54, %v15240_v29  ;;  %24483 = vst [vmem:[#allocation35_spill] sm:$0xff] %v16332_v57  ;;  %v2004_v54 = vcombine.high %v15915_v24, %v15918_v26 }
 0x26d   : > { %v16322_v31 = vrot.slane %v3731_v36, %v15240_v29  ;;  %v1619_v36 = vcombine.low %v1580_v5, %v16258_v15  ;;  %v3547_v24 = vcombine.low %v3472_v8, %v3480_v49  ;;  %v3548_v26 = vcombine.high %v3472_v8, %v3480_v49 }
 0x26e   : > { %v3460_v6 = vpop.permute.xlu1 %3459  ;;  %v16325_v61 = vpop.permute.xlu0 %3067  ;;  %v1750_v5 = vcombine.high %v15836_v34, %v15824_v42 }
 0x26f   : > { %24481 = vst [vmem:[#allocation48_spill] sm:$0xff] %v16322_v31  ;;  %v3500_v1 = vcombine.high %v3452_v19, %v3460_v6  ;;  %24482 = vst [vmem:[#allocation41_spill] sm:$0xff] %v16325_v61  ;;  %v3499_v10 = vcombine.low %v3452_v19, %v3460_v6  ;;  %v2018_v19 = vrot.slane %v2004_v54, %v15240_v29 }
 0x270   : > { %1770 = vrot.lane.b32.xlu1 %v1617_v37, %s14984_s8  ;;  %1798 = vrot.lane.b32.xlu0 %v1753_v9, %s14984_s8  ;;  %v3515_v9 = vcombine.low %v16234_v44, %v16265_v35  ;;  %v2036_v44 = vcombine.high %v15942_v45, %v15945_v0  ;;  %v1986_v35 = vrot.slane %v1972_v50, %v15240_v29 }
 0x271   : > { %v16339_v16 = vrot.slane %v3500_v1, %v15232_v17  ;;  %v1755_v1 = vcombine.low %v1716_v47, %v16329_v32  ;;  %v16363_v6 = vrot.slane %v3499_v10, %v15232_v17  ;;  %v16375_v8 = vrot.slane %v3547_v24, %v15232_v17 }
 0x272   : > { %v3468_v38 = vpop.permute.xlu1 %3467  ;;  %v16350_v37 = vpop.permute.xlu0 %3075  ;;  %v16370_v49 = vrot.slane %v3515_v9, %v15232_v17  ;;  %v16378_v54 = vrot.slane %v3548_v26, %v15232_v17  ;;  %v2038_v26 = vcombine.high %v1986_v35, %v2018_v19 }
 0x273   : > { %24485 = vst [vmem:[#allocation53_spill] sm:$0xff] %v16339_v16  ;;  %v3580_v55 = vcombine.high %v16339_v16, %v16336_v27  ;;  %24486 = vst [vmem:[#allocation47_spill] sm:$0xff] %v16350_v37  ;;  %v14873_v27 = vld [vmem:[#allocation2 + $0xe8] sm:$0xff] }
 0x274   : > { %1778 = vrot.lane.b32.xlu1 %v1619_v36, %s14985_s9  ;;  %1806 = vrot.lane.b32.xlu0 %v1755_v1, %s14985_s9  ;;  %24488 = vst [vmem:[#allocation50_spill] sm:$0xff] %v16378_v54  ;;  %v1752_v1 = vcombine.high %v16305_v3, %v16291_v28  ;;  %v3563_v50 = vcombine.low %v16363_v6, %v16370_v49 }
 0x276   : > { %v3476_v15 = vpop.permute.xlu1 %3475  ;;  %v16365_v33 = vpop.permute.xlu0 %3083  ;;  %v16416_v0 = vrot.slane %v3563_v50, %v15240_v29  ;;  %v1756_v50 = vcombine.high %v1716_v47, %v16329_v32  ;;  %v2037_v32 = vcombine.low %v1986_v35, %v2018_v19  ;;  %v16464_v19 = vld [vmem:[#allocation2 + $0x28] sm:$0xff] }
 0x277   : > { %v3531_v40 = vcombine.low %v3468_v38, %v3476_v15  ;;  %v3532_v46 = vcombine.high %v3468_v38, %v3476_v15  ;;  %24487 = vst [vmem:[#allocation51_spill] sm:$0xff] %v16365_v33 }
 0x278   : > { %1786 = vrot.lane.b32.xlu1 %v1750_v5, %s14988_s11  ;;  %2180 = vrot.lane.b32.xlu0 %v2036_v44, %s14988_s11  ;;  %v1754_v5 = vcombine.high %v1709_v23, %v16314_v21  ;;  %24497 = vst [vmem:[#allocation82_spill] sm:$0xff] %v16416_v0 }
 0x279   : > { %v16381_v38 = vrot.slane %v3531_v40, %v15232_v17  ;;  %v16384_v36 = vrot.slane %v3532_v46, %v15232_v17  ;;  %v16411_v46 = vrot.slane %v3580_v55, %v15240_v29 }
 0x27a   : > { %v16387_v10 = vpop.permute.xlu1 %3063  ;;  %v16397_v24 = vpop.permute.xlu0 %3091 }
 0x27b   : > { %24489 = vst [vmem:[#allocation45_spill] sm:$0xff] %v16384_v36  ;;  %24490 = vst [vmem:[#allocation59_spill] sm:$0xff] %v16387_v10  ;;  %v3595_v9 = vcombine.low %v16381_v38, %v16375_v8  ;;  %v3612_v40 = vcombine.high %v16384_v36, %v16378_v54  ;;  %v3293_v21 = vcombine.low %v16365_v33, %v16397_v24  ;;  %v14871_v33 = vld [vmem:[#allocation2 + $0xa8] sm:$0xff] }
 0x27c   : > { %24491 = vst [vmem:[#allocation76_spill] sm:$0xff] %v16397_v24  ;;  %1794 = vrot.lane.b32.xlu1 %v1752_v1, %s14987_s10  ;;  %2188 = vrot.lane.b32.xlu0 %v2038_v26, %s14987_s10  ;;  %24495 = vst [vmem:[#allocation80_spill] sm:$0xff] %v16411_v46  ;;  %v16441_v1 = vld [vmem:[#allocation2 + $0xf0] sm:$0xff]  ;;  %v14876_v36 = vld [vmem:[#allocation2 + $0xc8] sm:$0xff] }
 0x27d   : > { %v16402_v15 = vrot.slane %v3595_v9, %v15240_v29  ;;  %v16405_v28 = vrot.slane %v3612_v40, %v15240_v29  ;;  %v16421_v9 = vld [vmem:[#allocation2 + $0xb0] sm:$0xff]  ;;  %v16459_v34 = vrot.slane %v3293_v21, %v15232_v17 }
 0x27e   : > { %v16407_v3 = vpop.permute.xlu1 %3071  ;;  %v16413_v44 = vpop.permute.xlu0 %3065  ;;  %v14868_v21 = vld [vmem:[#allocation2 + $0xd0] sm:$0xff] }
 0x27f   : > { %24492 = vst [vmem:[#allocation77_spill] sm:$0xff] %v16402_v15  ;;  %24493 = vst [vmem:[#allocation78_spill] sm:$0xff] %v16405_v28  ;;  %v3245_v40 = vcombine.low %v16387_v10, %v16407_v3 }
 0x280   : > { %24494 = vst [vmem:[#allocation79_spill] sm:$0xff] %v16407_v3  ;;  %24496 = vst [vmem:[#allocation81_spill] sm:$0xff] %v16413_v44  ;;  %1802 = vrot.lane.b32.xlu1 %v1754_v5, %s14982_s4  ;;  %2661 = vrot.lane.b32.xlu0 %v16421_v9, %s14995_s22  ;;  %v3261_v5 = vcombine.low %v16325_v61, %v16350_v37  ;;  %v14870_v3 = vld [vmem:[#allocation2 + $0x8] sm:$0xff] }
 0x281   : > { %v16448_v47 = vrot.slane %v3245_v40, %v15232_v17 }
 0x282   : > { %v16429_v55 = vpop.permute.xlu1 %3079  ;;  %v16434_v26 = vpop.permute.xlu0 %3073  ;;  %v16456_v42 = vrot.slane %v3261_v5, %v15232_v17 }
 0x283   : > { %24498 = vst [vmem:[#allocation83_spill] sm:$0xff] %v16429_v55  ;;  %24499 = vst [vmem:[#allocation84_spill] sm:$0xff] %v16434_v26 }
 0x284   : > { %1810 = vrot.lane.b32.xlu1 %v1756_v50, %s14983_s6  ;;  %2669 = vrot.lane.b32.xlu0 %v16441_v1, %s14995_s22  ;;  %v3309_v40 = vcombine.low %v16448_v47, %v16456_v42 }
 0x286   : > { %v16445_v23 = vpop.permute.xlu1 %3087  ;;  %v16452_v45 = vpop.permute.xlu0 %3081  ;;  %v16486_v10 = vrot.slane %v3309_v40, %v15240_v29  ;;  %v3125_v40 = vcombine.low %v16413_v44, %v16434_v26  ;;  %v14874_v26 = vld [vmem:[#allocation2 + $0x88] sm:$0xff] }
 0x287   : > { %24500 = vst [vmem:[#allocation85_spill] sm:$0xff] %v16445_v23  ;;  %v3277_v50 = vcombine.low %v16429_v55, %v16445_v23  ;;  %24501 = vst [vmem:[#allocation86_spill] sm:$0xff] %v16452_v45 }
 0x288   : > { %2184 = vrot.lane.b32.xlu1 %v2037_v32, %s14986_s23  ;;  %2643 = vrot.lane.b32.xlu0 %v16464_v19, %s14995_s22  ;;  %24507 = vst [vmem:[#allocation92_spill] sm:$0xff] %v16486_v10  ;;  %v16514_v44 = vrot.slane %v3125_v40, %v15232_v17 }
 0x289   : > { %v16462_v28 = vrot.slane %v3277_v50, %v15232_v17  ;;  %v14869_v50 = vld [vmem:[#allocation2 + $0x68] sm:$0xff] }
 0x28a   : > { %v16468_v35 = vpop.permute.xlu1 %3061  ;;  %v16474_v32 = vpop.permute.xlu0 %3089  ;;  %24513 = vst [vmem:[#allocation98_spill] sm:$0xff] %v16514_v44 }
 0x28b   : > { %24502 = vst [vmem:[#allocation87_spill] sm:$0xff] %v16468_v35  ;;  %v3341_v5 = vcombine.low %v16462_v28, %v16459_v34  ;;  %24503 = vst [vmem:[#allocation88_spill] sm:$0xff] %v16474_v32  ;;  %v3157_v16 = vcombine.low %v16452_v45, %v16474_v32 }
 0x28c   : > { %2665 = vrot.lane.b32.xlu1 %v14868_v21, %s14995_s22  ;;  %2651 = vrot.lane.b32.xlu0 %v14869_v50, %s14995_s22 }
 0x28d   : > { %v16479_v46 = vrot.slane %v3341_v5, %v15240_v29  ;;  %v16518_v45 = vrot.slane %v3157_v16, %v15232_v17  ;;  %v14877_v16 = vld [vmem:[#allocation2 + $0x70] sm:$0xff] }
 0x28e   : > { %v16481_v61 = vpop.permute.xlu1 %3069  ;;  %v16483_v37 = vpop.permute.xlu0 %2645 }
 0x28f   : > { %24504 = vst [vmem:[#allocation89_spill] sm:$0xff] %v16479_v46  ;;  %24505 = vst [vmem:[#allocation90_spill] sm:$0xff] %v16481_v61  ;;  %v3109_v5 = vcombine.low %v16468_v35, %v16481_v61 }
 0x290   : > { %24506 = vst [vmem:[#allocation91_spill] sm:$0xff] %v16483_v37  ;;  %2639 = vrot.lane.b32.xlu1 %v14870_v3, %s14995_s22  ;;  %2659 = vrot.lane.b32.xlu0 %v14871_v33, %s14995_s22  ;;  %v14872_v37 = vld [vmem:[#allocation2 + $0x48] sm:$0xff] }
 0x291   : > { %v16505_v24 = vrot.slane %v3109_v5, %v15232_v17  ;;  %v14875_v5 = vld [vmem:[#allocation2 + $0x30] sm:$0xff] }
 0x292   : > { %v16494_v55 = vpop.permute.xlu1 %3077  ;;  %v16496_v23 = vpop.permute.xlu0 %2653 }
 0x293   : > { %24508 = vst [vmem:[#allocation93_spill] sm:$0xff] %v16494_v55  ;;  %24509 = vst [vmem:[#allocation94_spill] sm:$0xff] %v16496_v23 }
 0x294   : > { %2647 = vrot.lane.b32.xlu1 %v14872_v37, %s14995_s22  ;;  %2667 = vrot.lane.b32.xlu0 %v14873_v27, %s14995_s22  ;;  %24510 = vst [vmem:[#allocation95_spill] sm:$0xff] %v16505_v24 }
 0x296   : > { %v16507_v35 = vpop.permute.xlu1 %3085  ;;  %v16511_v23 = vpop.permute.xlu0 %972 }
 0x297   : > { %24511 = vst [vmem:[#allocation96_spill] sm:$0xff] %v16507_v35  ;;  %v3141_v61 = vcombine.low %v16494_v55, %v16507_v35  ;;  %24512 = vst [vmem:[#allocation97_spill] sm:$0xff] %v16511_v23  ;;  %v3173_v55 = vcombine.low %v16505_v24, %v16514_v44  ;;  %v14878_v24 = vld [vmem:[#allocation2 + $0x10] sm:$0xff] }
 0x298   : > { %2655 = vrot.lane.b32.xlu1 %v14874_v26, %s14995_s22  ;;  %2255 = vrot.lane.b32.xlu0 %v14875_v5, %s14994_s20  ;;  %v14879_v44 = vld [vmem:[#allocation2 + $0x50] sm:$0xff] }
 0x299   : > { %v16521_v32 = vrot.slane %v3141_v61, %v15232_v17  ;;  %v16540_v54 = vrot.slane %v3173_v55, %v15240_v29 }
 0x29a   : > { %v16526_v35 = vpop.permute.xlu1 %2641  ;;  %v16530_v23 = vpop.permute.xlu0 %980 }
 0x29b   : > { %24514 = vst [vmem:[#allocation99_spill] sm:$0xff] %v16526_v35  ;;  %v3205_v40 = vcombine.low %v16521_v32, %v16518_v45  ;;  %24515 = vst [vmem:[#allocation100_spill] sm:$0xff] %v16530_v23 }
 0x29c   : > { %2663 = vrot.lane.b32.xlu1 %v14876_v36, %s14995_s22  ;;  %2263 = vrot.lane.b32.xlu0 %v14877_v16, %s14994_s20  ;;  %24517 = vst [vmem:[#allocation102_spill] sm:$0xff] %v16540_v54  ;;  %s14998_s22 = smov 118  }
 0x29d   : > { %v16535_v61 = vrot.slane %v3205_v40, %v15240_v29 }
 0x29e   : > { %v16537_v5 = vpop.permute.xlu1 %2649  ;;  %v16542_v35 = vpop.permute.xlu0 %988 }
 0x29f   : > { %24516 = vst [vmem:[#allocation101_spill] sm:$0xff] %v16535_v61  ;;  %24518 = vst [vmem:[#allocation103_spill] sm:$0xff] %v16542_v35 }
 0x2a0   : > { %2251 = vrot.lane.b32.xlu1 %v14878_v24, %s14994_s20  ;;  %2271 = vrot.lane.b32.xlu0 %v16421_v9, %s14994_s20  ;;  %v14880_v24 = vld [vmem:[#allocation2 + $0x90] sm:$0xff] }
 0x2a2   : > { %v16549_v16 = vpop.permute.xlu1 %2657  ;;  %v16551_v40 = vpop.permute.xlu0 %996 }
 0x2a3   : > { %24519 = vst [vmem:[#allocation104_spill] sm:$0xff] %v16551_v40 }
 0x2a4   : > { %2259 = vrot.lane.b32.xlu1 %v14879_v44, %s14994_s20  ;;  %2279 = vrot.lane.b32.xlu0 %v16441_v1, %s14994_s20 }
 0x2a6   : > { %v16556_v55 = vpop.permute.xlu1 %976  ;;  %v16558_v35 = vpop.permute.xlu0 %1004 }
 0x2a7   : > { %24520 = vst [vmem:[#allocation105_spill] sm:$0xff] %v16556_v55  ;;  %24521 = vst [vmem:[#allocation106_spill] sm:$0xff] %v16558_v35 }
 0x2a8   : > { %2267 = vrot.lane.b32.xlu1 %v14880_v24, %s14994_s20  ;;  %2253 = vrot.lane.b32.xlu0 %v16464_v19, %s14994_s20 }
 0x2aa   : > { %v16563_v9 = vpop.permute.xlu1 %984  ;;  %v16565_v23 = vpop.permute.xlu0 %1012 }
 0x2ab   : > { %24522 = vst [vmem:[#allocation107_spill] sm:$0xff] %v16563_v9  ;;  %24523 = vst [vmem:[#allocation108_spill] sm:$0xff] %v16565_v23 }
 0x2ac   : > { %2275 = vrot.lane.b32.xlu1 %v14868_v21, %s14994_s20  ;;  %2261 = vrot.lane.b32.xlu0 %v14869_v50, %s14994_s20  ;;  %v4058_v21 = vcombine.high %v16045_v22, %v16072_v20  ;;  %v4122_v50 = vcombine.high %v16103_v7, %v16100_v60  ;;  %v24531_v22 = vld [vmem:[#allocation73_spill] sm:$0xff]  ;;  %v24532_v20 = vld [vmem:[#allocation72_spill] sm:$0xff] }
 0x2ad   : > { %v4042_v60 = vcombine.high %v24532_v20, %v24531_v22  ;;  %v24538_v22 = vld [vmem:[#allocation24_spill] sm:$0xff] }
 0x2ae   : > { %v16569_v44 = vpop.permute.xlu1 %992  ;;  %v16571_v1 = vpop.permute.xlu0 %1020  ;;  %v16604_v23 = vrot.slane %v4058_v21, %v15232_v17  ;;  %v3700_v21 = vcombine.high %v16286_v41, %v16295_v12  ;;  %v3922_v41 = vcombine.high %v16151_v52, %v16179_v62  ;;  %v24539_v20 = vld [vmem:[#allocation40_spill] sm:$0xff] }
 0x2af   : > { %24524 = vst [vmem:[#allocation109_spill] sm:$0xff] %v16569_v44  ;;  %24525 = vst [vmem:[#allocation110_spill] sm:$0xff] %v16571_v1 }
 0x2b0   : > { %2249 = vrot.lane.b32.xlu1 %v14870_v3, %s14994_s20  ;;  %2269 = vrot.lane.b32.xlu0 %v14871_v33, %s14994_s20  ;;  %v4018_v33 = vcombine.high %v16240_v2, %v16226_v43  ;;  %v24530_v3 = vld [vmem:[#allocation32_spill] sm:$0xff]  ;;  %v3714_v62 = vrot.slane %v3700_v21, %v15240_v29 }
 0x2b1   : > { %v4090_v44 = vcombine.high %v24530_v3, %v16097_v51  ;;  %v24537_v3 = vld [vmem:[#allocation18_spill] sm:$0xff] }
 0x2b2   : > { %v16575_v24 = vpop.permute.xlu1 %1000  ;;  %v16577_v40 = vpop.permute.xlu0 %1368 }
 0x2b3   : > { %24526 = vst [vmem:[#allocation111_spill] sm:$0xff] %v16575_v24  ;;  %24527 = vst [vmem:[#allocation112_spill] sm:$0xff] %v16577_v40  ;;  %v24590_v40 = vld [vmem:[#allocation51_spill] sm:$0xff] }
 0x2b4   : > { %2257 = vrot.lane.b32.xlu1 %v14872_v37, %s14994_s20  ;;  %2277 = vrot.lane.b32.xlu0 %v14873_v27, %s14994_s20  ;;  %v4074_v37 = vcombine.high %v15969_v11, %v16005_v4  ;;  %v4026_v27 = vcombine.high %v16003_v59, %v16026_v53  ;;  %v3764_v53 = vcombine.high %v16332_v57, %v16322_v31  ;;  %v24592_v24 = vld [vmem:[#allocation59_spill] sm:$0xff]  ;;  %v24601_v57 = vld [vmem:[#allocation90_spill] sm:$0xff] }
 0x2b5   : > { %v4136_v59 = vrot.slane %v4122_v50, %v15240_v29  ;;  %v3986_v50 = vcombine.high %v16205_v63, %v16202_v56  ;;  %v3954_v63 = vcombine.high %v24538_v22, %v24537_v3  ;;  %v16659_v22 = vrot.slane %v3922_v41, %v15232_v17 }
 0x2b6   : > { %v16581_v19 = vpop.permute.xlu1 %1008  ;;  %v16587_v1 = vpop.permute.xlu0 %1376  ;;  %v16615_v4 = vrot.slane %v4074_v37, %v15232_v17  ;;  %v16618_v51 = vrot.slane %v4026_v27, %v15232_v17 }
 0x2b7   : > { %24528 = vst [vmem:[#allocation113_spill] sm:$0xff] %v16581_v19  ;;  %24529 = vst [vmem:[#allocation114_spill] sm:$0xff] %v16587_v1 }
 0x2b8   : > { %2265 = vrot.lane.b32.xlu1 %v14874_v26, %s14994_s20  ;;  %4162 = vrot.lane.b32.xlu0 %v4018_v33, %s14988_s11  ;;  %v3732_v26 = vcombine.high %v16301_v58, %v16298_v25  ;;  %v4104_v25 = vrot.slane %v4090_v44, %v15240_v29  ;;  %v16625_v58 = vrot.slane %v4042_v60, %v15232_v17  ;;  %v24540_v60 = vld [vmem:[#allocation30_spill] sm:$0xff] }
 0x2b9   : > { %v4154_v33 = vcombine.high %v16140_v18, %v16127_v13  ;;  %v4137_v37 = vcombine.low %v16604_v23, %v16615_v4 }
 0x2ba   : > { %v16601_v7 = vpop.permute.xlu1 %1016  ;;  %v16608_v11 = vpop.permute.xlu0 %1384  ;;  %v4156_v44 = vcombine.high %v4104_v25, %v4136_v59  ;;  %v16640_v27 = vrot.slane %v3732_v26, %v15240_v29  ;;  %v4105_v56 = vcombine.low %v16618_v51, %v16625_v58  ;;  %v24543_v26 = vld [vmem:[#allocation33_spill] sm:$0xff]  ;;  %v4155_v3 = vcombine.low %v4104_v25, %v4136_v59 }
 0x2bb   : > { %24533 = vst [vmem:[#allocation32_spill] sm:$0xff] %v16601_v7  ;;  %24534 = vst [vmem:[#allocation73_spill] sm:$0xff] %v16608_v11  ;;  %v24542_v7 = vld [vmem:[#allocation31_spill] sm:$0xff]  ;;  %v4145_v21 = vrot.slane %v4137_v37, %v15240_v29 }
 0x2bc   : > { %2273 = vrot.lane.b32.xlu1 %v14876_v36, %s14994_s20  ;;  %3800 = vrot.lane.b32.xlu0 %v3764_v53, %s14988_s11  ;;  %v3938_v53 = vcombine.high %v24540_v60, %v24539_v20  ;;  %v3596_v20 = vcombine.high %v16381_v38, %v16375_v8  ;;  %v4113_v8 = vrot.slane %v4105_v56, %v15240_v29 }
 0x2be   : > { %v16629_v36 = vpop.permute.xlu1 %1024  ;;  %v16637_v12 = vpop.permute.xlu0 %1392  ;;  %v16670_v59 = vrot.slane %v3938_v53, %v15232_v17  ;;  %v3610_v53 = vrot.slane %v3596_v20, %v15240_v29 }
 0x2bf   : > { %24535 = vst [vmem:[#allocation72_spill] sm:$0xff] %v16629_v36  ;;  %24536 = vst [vmem:[#allocation115_spill] sm:$0xff] %v16637_v12  ;;  %v24541_v36 = vld [vmem:[#allocation26_spill] sm:$0xff]  ;;  %v24544_v12 = vld [vmem:[#allocation16_spill] sm:$0xff] }
 0x2c0   : > { %4190 = vrot.lane.b32.xlu1 %v4154_v33, %s14988_s11  ;;  %v3890_v52 = vcombine.high %v24542_v7, %v24541_v36  ;;  %4198 = vrot.lane.b32.xlu0 %v4156_v44, %s14987_s10  ;;  %v3906_v11 = vcombine.high %v24544_v12, %v24543_v26  ;;  %v4000_v33 = vrot.slane %v3986_v50, %v15240_v29 }
 0x2c1   : > { %v3765_v7 = vcombine.low %v3714_v62, %v16640_v27  ;;  %v3968_v36 = vrot.slane %v3954_v63, %v15240_v29  ;;  %v3564_v50 = vcombine.high %v16363_v6, %v16370_v49  ;;  %v4001_v12 = vcombine.low %v16659_v22, %v16670_v59 }
 0x2c2   : > { %v16655_v9 = vpop.permute.xlu1 %1372  ;;  %v16663_v60 = vpop.permute.xlu0 %1400  ;;  %v16673_v25 = vrot.slane %v3890_v52, %v15232_v17  ;;  %v16682_v41 = vrot.slane %v3906_v11, %v15232_v17  ;;  %v4157_v63 = vcombine.low %v4113_v8, %v4145_v21  ;;  %v3628_v11 = vcombine.high %v16416_v0, %v16402_v15  ;;  %v24600_v0 = vld [vmem:[#allocation86_spill] sm:$0xff] }
 0x2c3   : > { %24545 = vst [vmem:[#allocation18_spill] sm:$0xff] %v16655_v9  ;;  %24546 = vst [vmem:[#allocation24_spill] sm:$0xff] %v16663_v60  ;;  %v4019_v37 = vcombine.low %v3968_v36, %v4000_v33  ;;  %v3578_v49 = vrot.slane %v3564_v50, %v15240_v29  ;;  %v24587_v9 = vld [vmem:[#allocation85_spill] sm:$0xff] }
 0x2c4   : > { %4194 = vrot.lane.b32.xlu1 %v4155_v3, %s14986_s23  ;;  %3804 = vrot.lane.b32.xlu0 %v3765_v7, %s14986_s23  ;;  %v3969_v6 = vcombine.low %v16673_v25, %v16682_v41  ;;  %v4009_v3 = vrot.slane %v4001_v12, %v15240_v29 }
 0x2c5   : > { %v3629_v26 = vcombine.low %v3578_v49, %v3610_v53 }
 0x2c6   : > { %v16679_v38 = vpop.permute.xlu1 %1380  ;;  %v16686_v44 = vpop.permute.xlu0 %1408  ;;  %v3977_v20 = vrot.slane %v3969_v6, %v15240_v29  ;;  %v24555_v6 = vld [vmem:[#allocation43_spill] sm:$0xff] }
 0x2c7   : > { %24547 = vst [vmem:[#allocation40_spill] sm:$0xff] %v16679_v38  ;;  %24548 = vst [vmem:[#allocation30_spill] sm:$0xff] %v16686_v44  ;;  %v3342_v38 = vcombine.high %v16462_v28, %v16459_v34 }
 0x2c8   : > { %4166 = vrot.lane.b32.xlu1 %v4019_v37, %s14986_s23  ;;  %4202 = vrot.lane.b32.xlu0 %v4157_v63, %s14984_s8  ;;  %v4020_v37 = vcombine.high %v3968_v36, %v4000_v33  ;;  %v4021_v63 = vcombine.low %v3977_v20, %v4009_v3  ;;  %v3238_v33 = vcombine.high %v16540_v54, %v16535_v61 }
 0x2c9   : > { %v3684_v36 = vcombine.high %v16189_v30, %v16217_v39  ;;  %v3766_v30 = vcombine.high %v3714_v62, %v16640_v27  ;;  %v4158_v62 = vcombine.high %v4113_v8, %v4145_v21 }
 0x2ca   : > { %v16694_v56 = vpop.permute.xlu1 %1388  ;;  %v16698_v52 = vpop.permute.xlu0 %1416 }
 0x2cb   : > { %24549 = vst [vmem:[#allocation26_spill] sm:$0xff] %v16694_v56  ;;  %24550 = vst [vmem:[#allocation31_spill] sm:$0xff] %v16698_v52  ;;  %v3668_v52 = vcombine.high %v16253_v48, %v16280_v14  ;;  %v24557_v48 = vld [vmem:[#allocation28_spill] sm:$0xff]  ;;  %v24558_v14 = vld [vmem:[#allocation21_spill] sm:$0xff] }
 0x2cc   : > { %3772 = vrot.lane.b32.xlu1 %v3628_v11, %s14988_s11  ;;  %3776 = vrot.lane.b32.xlu0 %v3629_v26, %s14986_s23  ;;  %v3374_v11 = vcombine.high %v16486_v10, %v16479_v46  ;;  %v24598_v10 = vld [vmem:[#allocation93_spill] sm:$0xff] }
 0x2cd   : > { %v16729_v44 = vrot.slane %v3668_v52, %v15232_v17  ;;  %v3310_v52 = vcombine.high %v16448_v47, %v16456_v42 }
 0x2ce   : > { %v16704_v7 = vpop.permute.xlu1 %1396  ;;  %v16706_v50 = vpop.permute.xlu0 %1758 }
 0x2cf   : > { %24551 = vst [vmem:[#allocation33_spill] sm:$0xff] %v16704_v7  ;;  %24552 = vst [vmem:[#allocation16_spill] sm:$0xff] %v16706_v50  ;;  %v16764_v47 = vrot.slane %v3310_v52, %v15240_v29  ;;  %v24569_v52 = vld [vmem:[#allocation50_spill] sm:$0xff]  ;;  %v24589_v50 = vld [vmem:[#allocation76_spill] sm:$0xff] }
 0x2d0   : > { %4170 = vrot.lane.b32.xlu1 %v4020_v37, %s14987_s10  ;;  %4174 = vrot.lane.b32.xlu0 %v4021_v63, %s14984_s8  ;;  %v24556_v37 = vld [vmem:[#allocation44_spill] sm:$0xff]  ;;  %v3652_v63 = vcombine.high %v24558_v14, %v24557_v48 }
 0x2d1   : > { %v3636_v56 = vcombine.high %v24556_v37, %v24555_v6  ;;  %v3630_v6 = vcombine.high %v3578_v49, %v3610_v53  ;;  %v16756_v53 = vrot.slane %v3342_v38, %v15240_v29 }
 0x2d2   : > { %v16712_v12 = vpop.permute.xlu1 %1404  ;;  %v16716_v26 = vpop.permute.xlu0 %1766  ;;  %v16749_v34 = vrot.slane %v3652_v63, %v15232_v17 }
 0x2d3   : > { %24553 = vst [vmem:[#allocation116_spill] sm:$0xff] %v16712_v12  ;;  %24554 = vst [vmem:[#allocation117_spill] sm:$0xff] %v16716_v26  ;;  %v3375_v8 = vcombine.low %v16764_v47, %v16756_v53  ;;  %v3376_v7 = vcombine.high %v16764_v47, %v16756_v53 }
 0x2d4   : > { %3410 = vrot.lane.b32.xlu1 %v3374_v11, %s14988_s11  ;;  %3382 = vrot.lane.b32.xlu0 %v3238_v33, %s14988_s11  ;;  %v16739_v11 = vrot.slane %v3684_v36, %v15232_v17  ;;  %v16742_v33 = vrot.slane %v3636_v56, %v15232_v17  ;;  %v4022_v56 = vcombine.high %v3977_v20, %v4009_v3 }
 0x2d5   : > { %v4138_v36 = vcombine.high %v16604_v23, %v16615_v4  ;;  %v4106_v20 = vcombine.high %v16618_v51, %v16625_v58  ;;  %v3206_v23 = vcombine.high %v16521_v32, %v16518_v45  ;;  %v24568_v51 = vld [vmem:[#allocation95_spill] sm:$0xff]  ;;  %v24570_v45 = vld [vmem:[#allocation45_spill] sm:$0xff] }
 0x2d6   : > { %v16733_v19 = vpop.permute.xlu1 %1412  ;;  %v16736_v39 = vpop.permute.xlu0 %1774  ;;  %v3747_v28 = vcombine.low %v16729_v44, %v16739_v11  ;;  %v3715_v42 = vcombine.low %v16742_v33, %v16749_v34  ;;  %v3611_v32 = vcombine.low %v24570_v45, %v24569_v52 }
 0x2d7   : > { %24559 = vst [vmem:[#allocation43_spill] sm:$0xff] %v16733_v19  ;;  %24560 = vst [vmem:[#allocation44_spill] sm:$0xff] %v16736_v39  ;;  %v16791_v14 = vrot.slane %v4138_v36, %v15240_v29  ;;  %v24573_v36 = vld [vmem:[#allocation52_spill] sm:$0xff] }
 0x2d8   : > { %3808 = vrot.lane.b32.xlu1 %v3766_v30, %s14987_s10  ;;  %3780 = vrot.lane.b32.xlu0 %v3630_v6, %s14987_s10  ;;  %v16774_v38 = vrot.slane %v3747_v28, %v15240_v29  ;;  %v16782_v37 = vrot.slane %v3715_v42, %v15240_v29  ;;  %v24567_v30 = vld [vmem:[#allocation98_spill] sm:$0xff]  ;;  %v16799_v6 = vrot.slane %v4106_v20, %v15240_v29 }
 0x2d9   : > { %v3174_v58 = vcombine.high %v24568_v51, %v24567_v30 }
 0x2da   : > { %v16753_v27 = vpop.permute.xlu1 %1420  ;;  %v16758_v49 = vpop.permute.xlu0 %1782  ;;  %v3767_v48 = vcombine.low %v16782_v37, %v16774_v38  ;;  %v3768_v53 = vcombine.high %v16782_v37, %v16774_v38 }
 0x2db   : > { %24561 = vst [vmem:[#allocation28_spill] sm:$0xff] %v16753_v27  ;;  %24562 = vst [vmem:[#allocation21_spill] sm:$0xff] %v16758_v49  ;;  %v16816_v20 = vrot.slane %v3174_v58, %v15240_v29  ;;  %v24581_v27 = vld [vmem:[#allocation99_spill] sm:$0xff] }
 0x2dc   : > { %4206 = vrot.lane.b32.xlu1 %v4158_v62, %s14982_s4  ;;  %4178 = vrot.lane.b32.xlu0 %v4022_v56, %s14982_s4  ;;  %v4159_v62 = vcombine.low %v16799_v6, %v16791_v14  ;;  %v16808_v56 = vrot.slane %v3206_v23, %v15240_v29  ;;  %v16825_v23 = vrot.slane %v3611_v32, %v15240_v29 }
 0x2dd   : > { %v2823_v49 = vcombine.low %v24581_v27, %v16537_v5 }
 0x2de   : > { %v16769_v21 = vpop.permute.xlu1 %1762  ;;  %v16776_v3 = vpop.permute.xlu0 %1790  ;;  %v3239_v52 = vcombine.low %v16816_v20, %v16808_v56 }
 0x2df   : > { %24563 = vst [vmem:[#allocation118_spill] sm:$0xff] %v16769_v21  ;;  %24564 = vst [vmem:[#allocation119_spill] sm:$0xff] %v16776_v3  ;;  %v2831_v39 = vrot.slane %v2823_v49, %v15232_v17 }
 0x2e0   : > { %3414 = vrot.lane.b32.xlu1 %v3375_v8, %s14986_s23  ;;  %v24574_v8 = vld [vmem:[#allocation53_spill] sm:$0xff] }
 0x2e1   : > { %v3579_v30 = vcombine.low %v24574_v8, %v24573_v36  ;;  %v3970_v36 = vcombine.high %v16673_v25, %v16682_v41 }
 0x2e2   : > { %v16786_v4 = vpop.permute.xlu1 %1770  ;;  %v16793_v63 = vpop.permute.xlu0 %1798 }
 0x2e3   : > { %24565 = vst [vmem:[#allocation120_spill] sm:$0xff] %v16786_v4  ;;  %24566 = vst [vmem:[#allocation121_spill] sm:$0xff] %v16793_v63  ;;  %v16833_v58 = vrot.slane %v3579_v30, %v15240_v29  ;;  %v16846_v8 = vrot.slane %v3970_v36, %v15240_v29  ;;  %v24583_v36 = vld [vmem:[#allocation94_spill] sm:$0xff] }
 0x2e4   : > { %3812 = vrot.lane.b32.xlu1 %v3767_v48, %s14984_s8  ;;  %v4002_v48 = vcombine.high %v16659_v22, %v16670_v59 }
 0x2e5   : > { %v3631_v22 = vcombine.low %v16833_v58, %v16825_v23 }
 0x2e6   : > { %v16803_v28 = vpop.permute.xlu1 %1778  ;;  %v16810_v42 = vpop.permute.xlu0 %1806  ;;  %v16840_v59 = vrot.slane %v4002_v48, %v15240_v29 }
 0x2e7   : > { %24571 = vst [vmem:[#allocation98_spill] sm:$0xff] %v16803_v28  ;;  %24572 = vst [vmem:[#allocation95_spill] sm:$0xff] %v16810_v42  ;;  %v24584_v42 = vld [vmem:[#allocation91_spill] sm:$0xff] }
 0x2e8   : > { %4210 = vrot.lane.b32.xlu1 %v4159_v62, %s14985_s9  ;;  %v4023_v41 = vcombine.low %v16846_v8, %v16840_v59  ;;  %v2839_v28 = vcombine.low %v24584_v42, %v24583_v36 }
 0x2ea   : > { %v16820_v51 = vpop.permute.xlu1 %1786  ;;  %v16827_v45 = vpop.permute.xlu0 %2180 }
 0x2eb   : > { %24575 = vst [vmem:[#allocation50_spill] sm:$0xff] %v16820_v51  ;;  %24576 = vst [vmem:[#allocation45_spill] sm:$0xff] %v16827_v45  ;;  %v3294_v51 = vcombine.high %v24590_v40, %v24589_v50 }
 0x2ec   : > { %3386 = vrot.lane.b32.xlu1 %v3239_v52, %s14986_s23 }
 0x2ee   : > { %v16835_v62 = vpop.permute.xlu1 %1794  ;;  %v16842_v32 = vpop.permute.xlu0 %2188 }
 0x2ef   : > { %24577 = vst [vmem:[#allocation52_spill] sm:$0xff] %v16835_v62  ;;  %24578 = vst [vmem:[#allocation53_spill] sm:$0xff] %v16842_v32 }
 0x2f0   : > { %3784 = vrot.lane.b32.xlu1 %v3631_v22, %s14984_s8 }
 0x2f2   : > { %v16848_v25 = vpop.permute.xlu1 %1802  ;;  %v16852_v30 = vpop.permute.xlu0 %2661 }
 0x2f3   : > { %24579 = vst [vmem:[#allocation122_spill] sm:$0xff] %v16848_v25 }
 0x2f4   : > { %4182 = vrot.lane.b32.xlu1 %v4023_v41, %s14985_s9 }
 0x2f6   : > { %v16855_v52 = vpop.permute.xlu1 %1810  ;;  %v16857_v48 = vpop.permute.xlu0 %2669 }
 0x2f7   : > { %24580 = vst [vmem:[#allocation123_spill] sm:$0xff] %v16855_v52  ;;  %v2871_v25 = vcombine.low %v16852_v30, %v16857_v48  ;;  %v2847_v52 = vrot.slane %v2839_v28, %v15232_v17 }
 0x2f9   : > { %v2887_v1 = vcombine.low %v2831_v39, %v2847_v52  ;;  %v2879_v4 = vrot.slane %v2871_v25, %v15232_v17 }
 0x2fa   : > { %v16861_v22 = vpop.permute.xlu1 %2184  ;;  %v16865_v19 = vpop.permute.xlu0 %2643 }
 0x2fb   : > { %24582 = vst [vmem:[#allocation99_spill] sm:$0xff] %v16861_v22  ;;  %v16884_v60 = vrot.slane %v2887_v1, %v15240_v29  ;;  %v24594_v1 = vld [vmem:[#allocation41_spill] sm:$0xff] }
 0x2fd   : > { %24585 = vst [vmem:[#allocation94_spill] sm:$0xff] %v16884_v60 }
 0x2fe   : > { %v16870_v41 = vpop.permute.xlu1 %2665  ;;  %v16875_v63 = vpop.permute.xlu0 %2651 }
 0x2ff   : > { %v2855_v32 = vcombine.low %v16549_v16, %v16870_v41  ;;  %v2703_v45 = vcombine.low %v16865_v19, %v16875_v63 }
 0x301   : > { %v2863_v12 = vrot.slane %v2855_v32, %v15232_v17  ;;  %v16930_v50 = vrot.slane %v2703_v45, %v15232_v17 }
 0x302   : > { %v16879_v35 = vpop.permute.xlu1 %2639  ;;  %v16881_v26 = vpop.permute.xlu0 %2659 }
 0x303   : > { %v2919_v49 = vcombine.low %v2863_v12, %v2879_v4 }
 0x305   : > { %v16887_v28 = vrot.slane %v2919_v49, %v15240_v29  ;;  %v24588_v49 = vld [vmem:[#allocation83_spill] sm:$0xff] }
 0x306   : > { %v16889_v55 = vpop.permute.xlu1 %2647  ;;  %v16891_v22 = vpop.permute.xlu0 %2667  ;;  %v3278_v3 = vcombine.high %v24588_v49, %v24587_v9  ;;  %v24593_v49 = vld [vmem:[#allocation47_spill] sm:$0xff] }
 0x307   : > { %24586 = vst [vmem:[#allocation91_spill] sm:$0xff] %v16887_v28  ;;  %v2952_v25 = vcombine.high %v16884_v60, %v16887_v28  ;;  %v2687_v32 = vcombine.low %v16879_v35, %v16889_v55  ;;  %v2735_v9 = vcombine.low %v16881_v26, %v16891_v22  ;;  %v3262_v28 = vcombine.high %v24594_v1, %v24593_v49 }
 0x308   : > { %v16927_v40 = vrot.slane %v3278_v3, %v15232_v17  ;;  %v3748_v49 = vcombine.high %v16729_v44, %v16739_v11 }
 0x309   : > { %2988 = vrot.lane.b32.xlu0 %v2952_v25, %s14988_s11  ;;  %v24591_v25 = vld [vmem:[#allocation79_spill] sm:$0xff]  ;;  %v16915_v54 = vrot.slane %v2687_v32, %v15232_v17 }
 0x30a   : > { %v16898_v62 = vpop.permute.xlu1 %2655  ;;  %v16906_v21 = vpop.permute.xlu0 %2255  ;;  %v3246_v61 = vcombine.high %v24592_v24, %v24591_v25  ;;  %v2920_v24 = vcombine.high %v2863_v12, %v2879_v4  ;;  %v2888_v25 = vcombine.high %v2831_v39, %v2847_v52  ;;  %v16945_v12 = vrot.slane %v2735_v9, %v15232_v17 }
 0x30b   : > { %v2751_v38 = vcombine.low %v16915_v54, %v16930_v50  ;;  %v4160_v4 = vcombine.high %v16799_v6, %v16791_v14  ;;  %v17004_v46 = vrot.slane %v3748_v49, %v15240_v29  ;;  %v24602_v49 = vld [vmem:[#allocation87_spill] sm:$0xff] }
 0x30c   : > { %v16940_v1 = vrot.slane %v3246_v61, %v15232_v17  ;;  %v16956_v61 = vrot.slane %v3262_v28, %v15232_v17  ;;  %v16965_v52 = vrot.slane %v2920_v24, %v15240_v29  ;;  %v16971_v14 = vrot.slane %v2888_v25, %v15240_v29 }
 0x30d   : > { %3418 = vrot.lane.b32.xlu0 %v3376_v7, %s14987_s10  ;;  %v16937_v7 = vrot.slane %v3294_v51, %v15232_v17  ;;  %v16974_v6 = vrot.slane %v2751_v38, %v15240_v29  ;;  %v3716_v38 = vcombine.high %v16742_v33, %v16749_v34  ;;  %v3110_v43 = vcombine.high %v24602_v49, %v24601_v57 }
 0x30e   : > { %v16922_v60 = vpop.permute.xlu1 %2663  ;;  %v16934_v32 = vpop.permute.xlu0 %2263  ;;  %v3325_v9 = vcombine.low %v16940_v1, %v16956_v61 }
 0x30f   : > { %v2719_v47 = vcombine.low %v16898_v62, %v16922_v60  ;;  %v3357_v39 = vcombine.low %v16927_v40, %v16937_v7  ;;  %24595 = vst [vmem:[#allocation85_spill] sm:$0xff] %v16974_v6  ;;  %v2449_v33 = vcombine.low %v16906_v21, %v16934_v32  ;;  %v17021_v2 = vrot.slane %v3716_v38, %v15240_v29 }
 0x310   : > { %v16999_v44 = vrot.slane %v3325_v9, %v15240_v29  ;;  %v3240_v9 = vcombine.high %v16816_v20, %v16808_v56  ;;  %v24604_v56 = vld [vmem:[#allocation81_spill] sm:$0xff] }
 0x311   : > { %v16948_v3 = vrot.slane %v2719_v47, %v15232_v17  ;;  %3816 = vrot.lane.b32.xlu0 %v3768_v53, %s14982_s4  ;;  %v2953_v47 = vcombine.low %v16971_v14, %v16965_v52  ;;  %v3769_v38 = vcombine.low %v17021_v2, %v17004_v46 }
 0x312   : > { %v16951_v37 = vpop.permute.xlu1 %2251  ;;  %v16962_v45 = vpop.permute.xlu0 %2271 }
 0x313   : > { %v2783_v51 = vcombine.low %v16948_v3, %v16945_v12  ;;  %v2784_v49 = vcombine.high %v16948_v3, %v16945_v12 }
 0x315   : > { %4214 = vrot.lane.b32.xlu0 %v4160_v4, %s14983_s6  ;;  %v16977_v28 = vrot.slane %v2783_v51, %v15240_v29  ;;  %v16990_v4 = vrot.slane %v3357_v39, %v15240_v29  ;;  %v24597_v39 = vld [vmem:[#allocation96_spill] sm:$0xff] }
 0x316   : > { %v16981_v53 = vpop.permute.xlu1 %2259  ;;  %v16983_v24 = vpop.permute.xlu0 %2279  ;;  %v3142_v15 = vcombine.high %v24598_v10, %v24597_v39  ;;  %v17056_v10 = vrot.slane %v3110_v43, %v15232_v17  ;;  %v4024_v43 = vcombine.high %v16846_v8, %v16840_v59 }
 0x317   : > { %24596 = vst [vmem:[#allocation83_spill] sm:$0xff] %v16977_v28  ;;  %v2816_v25 = vcombine.high %v16974_v6, %v16977_v28  ;;  %v2433_v51 = vcombine.low %v16951_v37, %v16981_v53  ;;  %v2481_v13 = vcombine.low %v16962_v45, %v16983_v24  ;;  %v2856_v6 = vcombine.high %v16549_v16, %v16870_v41 }
 0x319   : > { %2992 = vrot.lane.b32.xlu0 %v2953_v47, %s14986_s23  ;;  %2960 = vrot.lane.b32.xlu1 %v2816_v25, %s14988_s11  ;;  %v3377_v47 = vcombine.low %v16999_v44, %v16990_v4  ;;  %v24599_v25 = vld [vmem:[#allocation88_spill] sm:$0xff]  ;;  %v17026_v39 = vrot.slane %v2433_v51, %v15232_v17  ;;  %v17041_v51 = vrot.slane %v3142_v15, %v15232_v17 }
 0x31a   : > { %v17001_v11 = vpop.permute.xlu1 %2267  ;;  %v17010_v34 = vpop.permute.xlu0 %2253  ;;  %v3158_v31 = vcombine.high %v24600_v0, %v24599_v25  ;;  %v24603_v0 = vld [vmem:[#allocation84_spill] sm:$0xff]  ;;  %v3632_v25 = vcombine.high %v16833_v58, %v16825_v23  ;;  %v2752_v15 = vcombine.high %v16915_v54, %v16930_v50  ;;  %v2489_v58 = vrot.slane %v2481_v13, %v15232_v17 }
 0x31b   : > { %v3126_v20 = vcombine.high %v24604_v56, %v24603_v0  ;;  %v17076_v13 = vrot.slane %v2784_v49, %v15240_v29 }
 0x31c   : > { %v17053_v56 = vrot.slane %v3158_v31, %v15232_v17 }
 0x31d   : > { %3422 = vrot.lane.b32.xlu0 %v3377_v47, %s14984_s8  ;;  %3390 = vrot.lane.b32.xlu1 %v3240_v9, %s14987_s10  ;;  %v17046_v47 = vrot.slane %v2449_v33, %v15232_v17  ;;  %v17071_v31 = vrot.slane %v3126_v20, %v15232_v17 }
 0x31e   : > { %v17034_v57 = vpop.permute.xlu1 %2275  ;;  %v17050_v0 = vpop.permute.xlu0 %2261  ;;  %v3221_v54 = vcombine.low %v17041_v51, %v17053_v56 }
 0x31f   : > { %v2465_v9 = vcombine.low %v17001_v11, %v17034_v57  ;;  %v2497_v23 = vcombine.low %v17026_v39, %v17046_v47 }
 0x320   : > { %v17099_v28 = vrot.slane %v3221_v54, %v15240_v29  ;;  %v2313_v54 = vcombine.low %v17010_v34, %v17050_v0 }
 0x321   : > { %v2473_v12 = vrot.slane %v2465_v9, %v15232_v17  ;;  %3820 = vrot.lane.b32.xlu0 %v3769_v38, %s14985_s9  ;;  %3788 = vrot.lane.b32.xlu1 %v3632_v25, %s14982_s4  ;;  %v3189_v38 = vcombine.low %v17056_v10, %v17071_v31  ;;  %v17084_v25 = vrot.slane %v2752_v15, %v15240_v29 }
 0x322   : > { %v17066_v3 = vpop.permute.xlu1 %2249  ;;  %v17078_v33 = vpop.permute.xlu0 %2269  ;;  %v17087_v59 = vrot.slane %v2497_v23, %v15240_v29 }
 0x323   : > { %24605 = vst [vmem:[#allocation76_spill] sm:$0xff] %v17066_v3  ;;  %v2529_v50 = vcombine.low %v2473_v12, %v2489_v58  ;;  %v2817_v49 = vcombine.low %v17084_v25, %v17076_v13  ;;  %v17106_v23 = vrot.slane %v3189_v38, %v15240_v29  ;;  %v2824_v38 = vcombine.high %v24581_v27, %v16537_v5 }
 0x324   : > { %v3378_v27 = vcombine.high %v16999_v44, %v16990_v4  ;;  %v24606_v44 = vld [vmem:[#allocation80_spill] sm:$0xff] }
 0x325   : > { %4186 = vrot.lane.b32.xlu1 %v4024_v43, %s14983_s6  ;;  %v17090_v8 = vrot.slane %v2529_v50, %v15240_v29  ;;  %v3241_v18 = vcombine.low %v17106_v23, %v17099_v28 }
 0x326   : > { %v17092_v20 = vpop.permute.xlu1 %2257  ;;  %v17108_v43 = vpop.permute.xlu0 %2277 }
 0x327   : > { %v2562_v9 = vcombine.high %v17087_v59, %v17090_v8  ;;  %v2297_v15 = vcombine.low %v17066_v3, %v17092_v20  ;;  %v2345_v41 = vcombine.low %v17078_v33, %v17108_v43 }
 0x329   : > { %2964 = vrot.lane.b32.xlu1 %v2817_v49, %s14986_s23  ;;  %2598 = vrot.lane.b32.xlu0 %v2562_v9, %s14988_s11  ;;  %v2954_v49 = vcombine.high %v16971_v14, %v16965_v52  ;;  %v2872_v9 = vcombine.high %v16852_v30, %v16857_v48  ;;  %v17127_v16 = vrot.slane %v2297_v15, %v15232_v17 }
 0x32a   : > { %v17110_v50 = vpop.permute.xlu1 %2265  ;;  %v2840_v52 = vcombine.high %v24584_v42, %v24583_v36  ;;  %v17140_v30 = vrot.slane %v2856_v6, %v15232_v17  ;;  %v2530_v48 = vcombine.high %v2473_v12, %v2489_v58  ;;  %v2321_v14 = vrot.slane %v2313_v54, %v15232_v17  ;;  %v24607_v58 = vld [vmem:[#allocation78_spill] sm:$0xff] }
 0x32b   : > { %v2498_v42 = vcombine.high %v17026_v39, %v17046_v47  ;;  %v2353_v6 = vrot.slane %v2345_v41, %v15232_v17  ;;  %v24608_v12 = vcombine.low %v24606_v44, %v24607_v58  ;;  %v3770_v54 = vcombine.high %v17021_v2, %v17004_v46 }
 0x32c   : > { %v2361_v36 = vcombine.low %v17127_v16, %v2321_v14  ;;  %v3358_v46 = vcombine.high %v16927_v40, %v16937_v7 }
 0x32d   : > { %3394 = vrot.lane.b32.xlu1 %v3241_v18, %s14984_s8  ;;  %2996 = vrot.lane.b32.xlu0 %v2954_v49, %s14987_s10  ;;  %v17146_v18 = vrot.slane %v2824_v38, %v15232_v17  ;;  %v17149_v49 = vrot.slane %v2872_v9, %v15232_v17  ;;  %v17164_v38 = vrot.slane %v2840_v52, %v15232_v17 }
 0x32e   : > { %v17135_v5 = vpop.permute.xlu1 %2273  ;;  %v2544_v9 = vrot.slane %v2530_v48, %v15240_v29  ;;  %v17194_v7 = vrot.slane %v3358_v46, %v15240_v29 }
 0x32f   : > { %v2329_v15 = vcombine.low %v17110_v50, %v17135_v5  ;;  %v2935_v39 = vcombine.low %v17140_v30, %v17149_v49  ;;  %v2903_v41 = vcombine.low %v17146_v18, %v17164_v38 }
 0x331   : > { %v2337_v4 = vrot.slane %v2329_v15, %v15232_v17  ;;  %3792 = vrot.lane.b32.xlu1 %v24608_v12, %s14985_s9  ;;  %3426 = vrot.lane.b32.xlu0 %v3378_v27, %s14982_s4  ;;  %v2512_v15 = vrot.slane %v2498_v42, %v15240_v29  ;;  %v17174_v27 = vrot.slane %v2361_v36, %v15240_v29 }
 0x332   : > { %v2943_v12 = vrot.slane %v2935_v39, %v15240_v29  ;;  %v17186_v3 = vpop.permute.xlu1 %4190  ;;  %v2911_v42 = vrot.slane %v2903_v41, %v15240_v29  ;;  %v2720_v36 = vcombine.high %v16898_v62, %v16922_v60  ;;  %v2736_v41 = vcombine.high %v16881_v26, %v16891_v22 }
 0x333   : > { %v2393_v47 = vcombine.low %v2337_v4, %v2353_v6  ;;  %v2563_v52 = vcombine.low %v2512_v15, %v2544_v9  ;;  %v2704_v62 = vcombine.high %v16865_v19, %v16875_v63  ;;  %v2362_v22 = vcombine.high %v17127_v16, %v2321_v14 }
 0x334   : > { %v2955_v39 = vcombine.low %v2911_v42, %v2943_v12  ;;  %v17224_v26 = vrot.slane %v2736_v41, %v15232_v17 }
 0x335   : > { %3824 = vrot.lane.b32.xlu0 %v3770_v54, %s14983_s6  ;;  %v17177_v2 = vrot.slane %v2393_v47, %v15240_v29  ;;  %v3326_v54 = vcombine.high %v16940_v1, %v16956_v61  ;;  %v2818_v1 = vcombine.high %v17084_v25, %v17076_v13  ;;  %v2688_v47 = vcombine.high %v16879_v35, %v16889_v55 }
 0x336   : > { %v17214_v13 = vrot.slane %v2720_v36, %v15232_v17  ;;  %v2394_v25 = vcombine.high %v2337_v4, %v2353_v6  ;;  %v17216_v46 = vpop.permute.xlu1 %4194  ;;  %v3242_v35 = vcombine.high %v17106_v23, %v17099_v28  ;;  %v17232_v19 = vrot.slane %v2704_v62, %v15232_v17  ;;  %v24609_v28 = vld [vmem:[#allocation22_spill] sm:$0xff]  ;;  %v24610_v23 = vld [vmem:[#allocation12_spill] sm:$0xff] }
 0x337   : > { %v2426_v48 = vcombine.high %v17174_v27, %v17177_v2  ;;  %v2425_v40 = vcombine.low %v17174_v27, %v17177_v2  ;;  %v17201_v61 = vrot.slane %v3326_v54, %v15240_v29  ;;  %v17221_v55 = vrot.slane %v2688_v47, %v15232_v17  ;;  %v24662_v2 = vld [vmem:[#allocation111_spill] sm:$0xff] }
 0x338   : > { %v2799_v63 = vcombine.low %v17214_v13, %v17224_v26  ;;  %v2172_v6 = vcombine.high %v24610_v23, %v24609_v28  ;;  %v2408_v4 = vrot.slane %v2394_v25, %v15240_v29  ;;  %v2376_v54 = vrot.slane %v2362_v22, %v15240_v29 }
 0x339   : > { %2602 = vrot.lane.b32.xlu0 %v2563_v52, %s14986_s23  ;;  %2570 = vrot.lane.b32.xlu1 %v2426_v48, %s14988_s11  ;;  %v3379_v60 = vcombine.low %v17201_v61, %v17194_v7  ;;  %v17227_v52 = vpop.permute.xlu0 %4162  ;;  %v2767_v16 = vcombine.low %v17221_v55, %v17232_v19  ;;  %v24611_v48 = vcombine.high %v24606_v44, %v24607_v58 }
 0x33a   : > { %v17241_v14 = vpop.permute.xlu1 %4166  ;;  %v3222_v36 = vcombine.high %v17041_v51, %v17053_v56  ;;  %v2564_v47 = vcombine.high %v2512_v15, %v2544_v9  ;;  %v2427_v41 = vcombine.low %v2376_v54, %v2408_v4  ;;  %v3190_v62 = vcombine.high %v17056_v10, %v17071_v31  ;;  %v24613_v51 = vld [vmem:[#allocation13_spill] sm:$0xff]  ;;  %v24615_v15 = vld [vmem:[#allocation19_spill] sm:$0xff] }
 0x33b   : > { %v2434_v44 = vcombine.high %v16951_v37, %v16981_v53  ;;  %v2482_v58 = vcombine.high %v16962_v45, %v16983_v24  ;;  %v2450_v10 = vcombine.high %v16906_v21, %v16934_v32  ;;  %v2956_v45 = vcombine.high %v2911_v42, %v2943_v12  ;;  %v24614_v31 = vld [vmem:[#allocation25_spill] sm:$0xff] }
 0x33c   : > { %v17268_v9 = vrot.slane %v3222_v36, %v15240_v29  ;;  %v2108_v25 = vcombine.high %v24615_v15, %v24614_v31  ;;  %v3204_v21 = vrot.slane %v3190_v62, %v15240_v29  ;;  %v3380_v32 = vcombine.high %v17201_v61, %v17194_v7  ;;  %v24616_v7 = vld [vmem:[#allocation76_spill] sm:$0xff]  ;;  %v24621_v15 = vld [vmem:[#allocation11_spill] sm:$0xff] }
 0x33d   : > { %3000 = vrot.lane.b32.xlu0 %v2955_v39, %s14984_s8  ;;  %2968 = vrot.lane.b32.xlu1 %v2818_v1, %s14987_s10  ;;  %v2466_v39 = vcombine.high %v17001_v11, %v17034_v57  ;;  %v17253_v1 = vpop.permute.xlu0 %3800  ;;  %v2775_v11 = vrot.slane %v2767_v16, %v15240_v29  ;;  %v24612_v57 = vld [vmem:[#allocation27_spill] sm:$0xff]  ;;  %v17283_v22 = vrot.slane %v2482_v58, %v15232_v17 }
 0x33e   : > { %v2140_v56 = vcombine.high %v24613_v51, %v24612_v57  ;;  %v17275_v53 = vpop.permute.xlu1 %3772  ;;  %v17296_v42 = vrot.slane %v2450_v10, %v15232_v17  ;;  %v2330_v16 = vcombine.high %v17110_v50, %v17135_v5  ;;  %v2122_v36 = vrot.slane %v2108_v25, %v15240_v29  ;;  %v24622_v25 = vld [vmem:[#allocation70_spill] sm:$0xff] }
 0x33f   : > { %v17273_v37 = vrot.slane %v2466_v39, %v15232_v17  ;;  %v2298_v61 = vcombine.high %v24616_v7, %v17092_v20  ;;  %v2936_v50 = vcombine.high %v17140_v30, %v17149_v49  ;;  %v2314_v62 = vcombine.high %v17010_v34, %v17050_v0  ;;  %v24617_v0 = vld [vmem:[#allocation29_spill] sm:$0xff] }
 0x340   : > { %v17293_v12 = vrot.slane %v2140_v56, %v15240_v29  ;;  %v2904_v58 = vcombine.high %v17146_v18, %v17164_v38  ;;  %v24618_v49 = vld [vmem:[#allocation17_spill] sm:$0xff] }
 0x341   : > { %3430 = vrot.lane.b32.xlu0 %v3379_v60, %s14985_s9  ;;  %3398 = vrot.lane.b32.xlu1 %v3242_v35, %s14982_s4  ;;  %v2807_v60 = vrot.slane %v2799_v63, %v15240_v29  ;;  %v17280_v35 = vrot.slane %v2434_v44, %v15232_v17  ;;  %v17285_v63 = vpop.permute.xlu0 %4198  ;;  %v17320_v44 = vrot.slane %v2330_v16, %v15232_v17 }
 0x342   : > { %v2173_v5 = vcombine.low %v2122_v36, %v17293_v12  ;;  %v17328_v57 = vrot.slane %v2298_v61, %v15232_v17  ;;  %v17340_v51 = vrot.slane %v2314_v62, %v15232_v17  ;;  %v2800_v61 = vcombine.high %v17214_v13, %v17224_v26 }
 0x343   : > { %v2819_v24 = vcombine.low %v2775_v11, %v2807_v60  ;;  %v2513_v39 = vcombine.low %v17280_v35, %v17296_v42  ;;  %v2820_v56 = vcombine.high %v2775_v11, %v2807_v60  ;;  %v24624_v60 = vld [vmem:[#allocation60_spill] sm:$0xff] }
 0x345   : > { %2208 = vrot.lane.b32.xlu0 %v2172_v6, %s14988_s11  ;;  %3796 = vrot.lane.b32.xlu1 %v24611_v48, %s14983_s6  ;;  %v2545_v6 = vcombine.low %v17273_v37, %v17283_v22  ;;  %v3243_v48 = vcombine.low %v3204_v21, %v17268_v9  ;;  %v17322_v20 = vpop.permute.xlu0 %3804  ;;  %v2521_v34 = vrot.slane %v2513_v39, %v15240_v29  ;;  %v24623_v39 = vld [vmem:[#allocation66_spill] sm:$0xff] }
 0x346   : > { %v2044_v11 = vcombine.high %v24624_v60, %v24623_v39  ;;  %v24631_v39 = vld [vmem:[#allocation58_spill] sm:$0xff] }
 0x347   : > { %v24632_v60 = vld [vmem:[#allocation54_spill] sm:$0xff] }
 0x348   : > { %v17380_v26 = vrot.slane %v2044_v11, %v15232_v17  ;;  %v2546_v11 = vcombine.high %v17273_v37, %v17283_v22 }
 0x349   : > { %2606 = vrot.lane.b32.xlu0 %v2564_v47, %s14987_s10  ;;  %2574 = vrot.lane.b32.xlu1 %v2427_v41, %s14986_s23  ;;  %v2346_v47 = vcombine.high %v17078_v33, %v17108_v43  ;;  %v17310_v41 = vpop.permute.xlu1 %4170  ;;  %v2428_v33 = vcombine.high %v2376_v54, %v2408_v4  ;;  %v2553_v43 = vrot.slane %v2545_v6, %v15240_v29  ;;  %v17352_v16 = vpop.permute.xlu0 %4202 }
 0x34a   : > { %v2092_v4 = vcombine.high %v24618_v49, %v24617_v0  ;;  %v2950_v54 = vrot.slane %v2936_v50, %v15240_v29  ;;  %v2377_v6 = vcombine.low %v17328_v57, %v17340_v51 }
 0x34b   : > { %v17331_v30 = vrot.slane %v2346_v47, %v15232_v17  ;;  %v2565_v10 = vcombine.low %v2521_v34, %v2553_v43  ;;  %v3244_v47 = vcombine.high %v3204_v21, %v17268_v9  ;;  %v24625_v9 = vld [vmem:[#allocation71_spill] sm:$0xff] }
 0x34c   : > { %v17360_v7 = vrot.slane %v2092_v4, %v15232_v17  ;;  %v2385_v13 = vrot.slane %v2377_v6, %v15240_v29  ;;  %v24626_v21 = vld [vmem:[#allocation67_spill] sm:$0xff] }
 0x34d   : > { %3004 = vrot.lane.b32.xlu0 %v2956_v45, %s14982_s4  ;;  %2972 = vrot.lane.b32.xlu1 %v2819_v24, %s14984_s8  ;;  %v2409_v18 = vcombine.low %v17320_v44, %v17331_v30  ;;  %v17344_v38 = vpop.permute.xlu1 %3410  ;;  %v24619_v45 = vld [vmem:[#allocation68_spill] sm:$0xff]  ;;  %v24620_v24 = vld [vmem:[#allocation63_spill] sm:$0xff]  ;;  %v1956_v49 = vcombine.high %v24626_v21, %v24625_v9 }
 0x34e   : > { %v2060_v31 = vcombine.high %v24620_v24, %v24619_v45  ;;  %v24628_v45 = vld [vmem:[#allocation55_spill] sm:$0xff] }
 0x350   : > { %v17367_v62 = vrot.slane %v2060_v31, %v15232_v17 }
 0x351   : > { %3434 = vrot.lane.b32.xlu0 %v3380_v32, %s14983_s6  ;;  %3402 = vrot.lane.b32.xlu1 %v3243_v48, %s14985_s9  ;;  %v2076_v32 = vcombine.high %v24622_v25, %v24621_v15  ;;  %v2918_v48 = vrot.slane %v2904_v58, %v15240_v29  ;;  %v2768_v58 = vcombine.high %v17221_v55, %v17232_v19  ;;  %v17374_v0 = vpop.permute.xlu1 %3808  ;;  %v24629_v15 = vld [vmem:[#allocation69_spill] sm:$0xff]  ;;  %v24630_v25 = vld [vmem:[#allocation64_spill] sm:$0xff] }
 0x352   : > { %v2174_v19 = vcombine.high %v2122_v36, %v17293_v12  ;;  %v2123_v31 = vcombine.low %v17380_v26, %v17367_v62  ;;  %v1908_v12 = vcombine.high %v24632_v60, %v24631_v39  ;;  %v1970_v36 = vrot.slane %v1956_v49, %v15232_v17 }
 0x353   : > { %v2957_v50 = vcombine.low %v2918_v48, %v2950_v54  ;;  %v2782_v6 = vrot.slane %v2768_v58, %v15240_v29  ;;  %v2514_v58 = vcombine.high %v17280_v35, %v17296_v42  ;;  %v2958_v49 = vcombine.high %v2918_v48, %v2950_v54 }
 0x354   : > { %v2131_v37 = vrot.slane %v2123_v31, %v15240_v29  ;;  %v1922_v22 = vrot.slane %v1908_v12, %v15232_v17  ;;  %v2410_v42 = vcombine.high %v17320_v44, %v17331_v30  ;;  %v2378_v48 = vcombine.high %v17328_v57, %v17340_v51 }
 0x355   : > { %2578 = vrot.lane.b32.xlu0 %v2428_v33, %s14987_s10  ;;  %2212 = vrot.lane.b32.xlu1 %v2173_v5, %s14986_s23  ;;  %v2417_v5 = vrot.slane %v2409_v18, %v15240_v29  ;;  %v17370_v33 = vrot.slane %v2076_v32, %v15232_v17  ;;  %v17386_v18 = vpop.permute.xlu0 %3776  ;;  %v1940_v32 = vcombine.high %v24630_v25, %v24629_v15 }
 0x356   : > { %v2528_v35 = vrot.slane %v2514_v58, %v15240_v29  ;;  %v2424_v44 = vrot.slane %v2410_v42, %v15240_v29  ;;  %v2392_v57 = vrot.slane %v2378_v48, %v15240_v29  ;;  %v2124_v12 = vcombine.high %v17380_v26, %v17367_v62 }
 0x357   : > { %v2155_v4 = vcombine.low %v17370_v33, %v17360_v7  ;;  %v2429_v55 = vcombine.low %v2385_v13, %v2417_v5  ;;  %v2430_v15 = vcombine.high %v2385_v13, %v2417_v5  ;;  %v2156_v51 = vcombine.high %v17370_v33, %v17360_v7 }
 0x358   : > { %v2431_v5 = vcombine.low %v2392_v57, %v2424_v44  ;;  %v2138_v7 = vrot.slane %v2124_v12, %v15240_v29  ;;  %v2432_v26 = vcombine.high %v2392_v57, %v2424_v44 }
 0x359   : > { %2976 = vrot.lane.b32.xlu0 %v2820_v56, %s14982_s4  ;;  %2610 = vrot.lane.b32.xlu1 %v2565_v10, %s14984_s8  ;;  %v2814_v56 = vrot.slane %v2800_v61, %v15240_v29  ;;  %v24627_v10 = vld [vmem:[#allocation61_spill] sm:$0xff]  ;;  %v17404_v61 = vpop.permute.xlu1 %4206  ;;  %v2163_v9 = vrot.slane %v2155_v4, %v15240_v29  ;;  %v2560_v4 = vrot.slane %v2546_v11, %v15240_v29 }
 0x35a   : > { %v1924_v24 = vcombine.high %v24628_v45, %v24627_v10  ;;  %v2170_v58 = vrot.slane %v2156_v51, %v15240_v29 }
 0x35b   : > { %v2567_v31 = vcombine.low %v2528_v35, %v2560_v4  ;;  %v2822_v60 = vcombine.high %v2782_v6, %v2814_v56  ;;  %v2176_v13 = vcombine.high %v2131_v37, %v2163_v9 }
 0x35c   : > { %v1938_v21 = vrot.slane %v1924_v24, %v15232_v17 }
 0x35d   : > { %3406 = vrot.lane.b32.xlu0 %v3244_v47, %s14983_s6  ;;  %3008 = vrot.lane.b32.xlu1 %v2957_v50, %s14985_s9  ;;  %v2821_v47 = vcombine.low %v2782_v6, %v2814_v56  ;;  %v2566_v50 = vcombine.high %v2521_v34, %v2553_v43  ;;  %v2175_v34 = vcombine.low %v2131_v37, %v2163_v9  ;;  %v17418_v45 = vpop.permute.xlu1 %3414 }
 0x35e   : > { %v1987_v10 = vcombine.low %v1922_v22, %v1938_v21  ;;  %v2177_v9 = vcombine.low %v2138_v7, %v2170_v58  ;;  %v2178_v37 = vcombine.high %v2138_v7, %v2170_v58 }
 0x360   : > { %v1995_v25 = vrot.slane %v1987_v10, %v15240_v29 }
 0x361   : > { %2582 = vrot.lane.b32.xlu0 %v2429_v55, %s14984_s8  ;;  %2216 = vrot.lane.b32.xlu1 %v2174_v19, %s14987_s10  ;;  %v1954_v55 = vrot.slane %v1940_v32, %v15232_v17  ;;  %v17411_v19 = vpop.permute.xlu0 %4174  ;;  %v17433_v32 = vpop.permute.xlu1 %3812 }
 0x363   : > { %v2019_v43 = vcombine.low %v1954_v55, %v1970_v36  ;;  %v2020_v56 = vcombine.high %v1954_v55, %v1970_v36 }
 0x365   : > { %2980 = vrot.lane.b32.xlu0 %v2821_v47, %s14985_s9  ;;  %2614 = vrot.lane.b32.xlu1 %v2566_v50, %s14982_s4  ;;  %v17425_v24 = vpop.permute.xlu0 %3382  ;;  %v2027_v54 = vrot.slane %v2019_v43, %v15240_v29  ;;  %v4211_v11 = vpop.permute.xlu1 %4210  ;;  %v2568_v50 = vcombine.high %v2528_v35, %v2560_v4  ;;  %v1988_v43 = vcombine.high %v1922_v22, %v1938_v21 }
 0x366   : > { %v2034_v36 = vrot.slane %v2020_v56, %v15240_v29 }
 0x367   : > { %v2039_v39 = vcombine.low %v1995_v25, %v2027_v54  ;;  %v2040_v47 = vcombine.high %v1995_v25, %v2027_v54  ;;  %v2002_v21 = vrot.slane %v1988_v43, %v15240_v29 }
 0x369   : > { %2220 = vrot.lane.b32.xlu0 %v2175_v34, %s14984_s8  ;;  %3012 = vrot.lane.b32.xlu1 %v2958_v49, %s14983_s6  ;;  %v17436_v30 = vpop.permute.xlu0 %3780  ;;  %v17451_v33 = vpop.permute.xlu1 %3386  ;;  %v2041_v22 = vcombine.low %v2002_v21, %v2034_v36  ;;  %v24633_v34 = vld [vmem:[#allocation36_spill] sm:$0xff]  ;;  %v24634_v49 = vld [vmem:[#allocation34_spill] sm:$0xff]  ;;  %v2042_v48 = vcombine.high %v2002_v21, %v2034_v36 }
 0x36a   : > { %v24635_v4 = vcombine.low %v24633_v34, %v24634_v49 }
 0x36c   : > { %v4224_v10 = vsel %vm1027_vm2, %v24635_v4, %v17186_v3 }
 0x36d   : > { %2618 = vrot.lane.b32.xlu0 %v2567_v31, %s14985_s9  ;;  %2586 = vrot.lane.b32.xlu1 %v2430_v15, %s14982_s4  ;;  %v4179_v6 = vpop.permute.xlu0 %4178  ;;  %v4225_v35 = vsel %vm187_vm0, %v4224_v10, %v17216_v46  ;;  %v17468_v42 = vpop.permute.xlu1 %3784  ;;  %v14996_v31 = vmov 0   ;;  %v4232_v15 = vld [vmem:[%s23874_s2] sm:$0xff] }
 0x36e   : > { %14863 = vset.pattern.permute.xlu0 %v14996_v31  ;;  %14864 = vset.pattern.permute.xlu1 %v14996_v31  ;;  %v4226_v3 = vsel %vm1030_vm3, %v4225_v35, %v17285_v63 }
 0x36f   : > { %v4227_v46 = vsel %vm1032_vm4, %v4226_v3, %v17352_v16 }
 0x370   : > { %v4228_v25 = vsel %vm1034_vm5, %v4227_v46, %v17404_v61 }
 0x371   : > { %2192 = vrot.lane.b32.xlu0 %v2039_v39, %s14984_s8  ;;  %2984 = vrot.lane.b32.xlu1 %v2822_v60, %s14983_s6  ;;  %v4229_v39 = vsel %vm1036_vm6, %v4228_v25, %v4211_v11  ;;  %v4183_v60 = vpop.permute.xlu1 %4182 }
 0x375   : > { %2590 = vrot.lane.b32.xlu0 %v2431_v5, %s14985_s9  ;;  %2224 = vrot.lane.b32.xlu1 %v2176_v13, %s14982_s4  ;;  %v24636_v5 = vld [vmem:[#allocation37_spill] sm:$0xff]  ;;  %v24637_v13 = vld [vmem:[#allocation42_spill] sm:$0xff] }
 0x376   : > { %v24638_v12 = vcombine.low %v24636_v5, %v24637_v13 }
 0x378   : > { %v4217_v61 = vsel %vm1027_vm2, %v24638_v12, %v17227_v52 }
 0x379   : > { %2196 = vrot.lane.b32.xlu0 %v2040_v47, %s14982_s4  ;;  %2622 = vrot.lane.b32.xlu1 %v2568_v50, %s14983_s6  ;;  %v4218_v11 = vsel %vm187_vm0, %v4217_v61, %v17241_v14 }
 0x37a   : > { %v4219_v47 = vsel %vm1030_vm3, %v4218_v11, %v17310_v41 }
 0x37b   : > { %v17453_v62 = vpop.permute.xlu0 %2988  ;;  %v4220_v58 = vsel %vm1032_vm4, %v4219_v47, %v17411_v19 }
 0x37c   : > { %v4221_v43 = vsel %vm1034_vm5, %v4220_v58, %v4179_v6 }
 0x37d   : > { %2594 = vrot.lane.b32.xlu0 %v2432_v26, %s14983_s6  ;;  %2228 = vrot.lane.b32.xlu1 %v2177_v9, %s14985_s9  ;;  %v4222_v7 = vsel %vm1036_vm6, %v4221_v43, %v4183_v60  ;;  %v24645_v43 = vld [vmem:[#allocation92_spill] sm:$0xff] }
 0x37f   : > { %v17459_v55 = vpop.permute.xlu0 %3418 }
 0x381   : > { %2232 = vrot.lane.b32.xlu0 %v2178_v37, %s14983_s6  ;;  %2200 = vrot.lane.b32.xlu1 %v2041_v22, %s14985_s9  ;;  %v24639_v37 = vld [vmem:[#allocation35_spill] sm:$0xff]  ;;  %v24640_v22 = vld [vmem:[#allocation48_spill] sm:$0xff] }
 0x382   : > { %v24641_v19 = vcombine.low %v24639_v37, %v24640_v22 }
 0x383   : > { %v3817_v54 = vpop.permute.xlu0 %3816 }
 0x384   : > { %v3834_v6 = vsel %vm1027_vm2, %v24641_v19, %v17253_v1 }
 0x385   : > { %2204 = vrot.lane.b32.xlu1 %v2042_v48, %s14983_s6  ;;  %4235 = vperm.xlu0 %14863, %v4232_v15   ;;  %v3835_v34 = vsel %vm187_vm0, %v3834_v6, %v17322_v20 }
 0x386   : > { %v3836_v4 = vsel %vm1030_vm3, %v3835_v34, %v17374_v0  ;;  %v24642_v0 = vld [vmem:[#allocation82_spill] sm:$0xff] }
 0x387   : > { %v4215_v44 = vpop.permute.xlu0 %4214  ;;  %v3837_v10 = vsel %vm1032_vm4, %v3836_v4, %v17433_v32 }
 0x388   : > { %v4230_v57 = vsel %vm1038_vm7, %v4229_v39, %v4215_v44  ;;  %v3838_v35 = vsel %vm1034_vm5, %v3837_v10, %v3817_v54  ;;  %v24643_v39 = vld [vmem:[#allocation77_spill] sm:$0xff] }
 0x389   : > { %4256 = vmatprep.subr.mxu0 %v4230_v57  ;;  %v24644_v60 = vcombine.low %v24642_v0, %v24643_v39 }
 0x38b   : > { %v17484_v63 = vpop.permute.xlu1 %2960  ;;  %v17486_v51 = vpop.permute.xlu0 %2992  ;;  %v3827_v32 = vsel %vm1027_vm2, %v24644_v60, %v17275_v53 }
 0x38c   : > { %v3828_v54 = vsel %vm187_vm0, %v3827_v32, %v17386_v18 }
 0x38d   : > { %v3829_v5 = vsel %vm1030_vm3, %v3828_v54, %v17436_v30 }
 0x38e   : > { %v3830_v13 = vsel %vm1032_vm4, %v3829_v5, %v17468_v42  ;;  %v24652_v5 = vld [vmem:[#allocation91_spill] sm:$0xff] }
 0x38f   : > { %v17488_v16 = vpop.permute.xlu1 %3390  ;;  %v3423_v56 = vpop.permute.xlu0 %3422 }
 0x393   : > { %v3789_v50 = vpop.permute.xlu1 %3788  ;;  %v3821_v26 = vpop.permute.xlu0 %3820 }
 0x394   : > { %v3839_v31 = vsel %vm1036_vm6, %v3838_v35, %v3821_v26  ;;  %v3831_v12 = vsel %vm1034_vm5, %v3830_v13, %v3789_v50  ;;  %v24649_v35 = vld [vmem:[#allocation101_spill] sm:$0xff] }
 0x397   : > { %v4187_v9 = vpop.permute.xlu1 %4186 }
 0x398   : > { %v4223_v36 = vsel %vm1038_vm7, %v4222_v7, %v4187_v9  ;;  %v24646_v7 = vld [vmem:[#allocation89_spill] sm:$0xff] }
 0x399   : > { %4257 = vmatpush1.msra.mxu0 %v4223_v36  ;;  %v24647_v30 = vcombine.low %v24645_v43, %v24646_v7 }
 0x39b   : > { %v17504_v52 = vpop.permute.xlu1 %2964  ;;  %v17506_v14 = vpop.permute.xlu0 %2598  ;;  %v3444_v26 = vsel %vm1027_vm2, %v24647_v30, %v17344_v38 }
 0x39c   : > { %v3445_v42 = vsel %vm187_vm0, %v3444_v26, %v17418_v45  ;;  %v24648_v45 = vld [vmem:[#allocation102_spill] sm:$0xff] }
 0x39d   : > { %v3446_v36 = vsel %vm1030_vm3, %v3445_v42, %v17459_v55  ;;  %v24655_v42 = vld [vmem:[#allocation83_spill] sm:$0xff] }
 0x39e   : > { %v3447_v37 = vsel %vm1032_vm4, %v3446_v36, %v3423_v56 }
 0x39f   : > { %v17508_v21 = vpop.permute.xlu0 %2996  ;;  %v3395_v41 = vpop.permute.xlu1 %3394 }
 0x3a3   : > { %v3427_v49 = vpop.permute.xlu0 %3426  ;;  %v3793_v15 = vpop.permute.xlu1 %3792 }
 0x3a4   : > { %v3832_v61 = vsel %vm1036_vm6, %v3831_v12, %v3793_v15  ;;  %v3448_v22 = vsel %vm1034_vm5, %v3447_v37, %v3427_v49 }
 0x3a7   : > { %v3825_v48 = vpop.permute.xlu0 %3824 }
 0x3a8   : > { %v3840_v3 = vsel %vm1038_vm7, %v3839_v31, %v3825_v48  ;;  %v24650_v31 = vcombine.low %v24648_v45, %v24649_v35 }
 0x3a9   : > { %4258 = vmatprep.subr.mxu0 %v3840_v3 }
 0x3aa   : > { %v3437_v55 = vsel %vm1027_vm2, %v24650_v31, %v17425_v24 }
 0x3ab   : > { %v17524_v1 = vpop.permute.xlu1 %2570  ;;  %v17526_v46 = vpop.permute.xlu0 %2602  ;;  %v3438_v56 = vsel %vm187_vm0, %v3437_v55, %v17451_v33  ;;  %v24651_v33 = vld [vmem:[#allocation94_spill] sm:$0xff] }
 0x3ac   : > { %v3439_v48 = vsel %vm1030_vm3, %v3438_v56, %v17488_v16  ;;  %v24653_v13 = vcombine.low %v24651_v33, %v24652_v5  ;;  %v2625_v56 = vsel %vm1027_vm2, %v2425_v40, %v17524_v1  ;;  %v24663_v40 = vld [vmem:[#allocation23_spill] sm:$0xff]  ;;  %v24664_v1 = vld [vmem:[#allocation20_spill] sm:$0xff]  ;;  %v24668_v33 = vld [vmem:[#allocation62_spill] sm:$0xff] }
 0x3ad   : > { %v3440_v3 = vsel %vm1032_vm4, %v3439_v48, %v3395_v41 }
 0x3ae   : > { %v3022_v12 = vsel %vm1027_vm2, %v24653_v13, %v17453_v62  ;;  %v24654_v62 = vld [vmem:[#allocation85_spill] sm:$0xff] }
 0x3af   : > { %v2969_v20 = vpop.permute.xlu1 %2968  ;;  %v3001_v25 = vpop.permute.xlu0 %3000  ;;  %v3023_v16 = vsel %vm187_vm0, %v3022_v12, %v17486_v51  ;;  %v24656_v51 = vcombine.low %v24654_v62, %v24655_v42  ;;  %v24670_v12 = vld [vmem:[#allocation112_spill] sm:$0xff]  ;;  %v24678_v62 = vcombine.low %v24610_v23, %v24609_v28  ;;  %v24684_v23 = vld [vmem:[#allocation45_spill] sm:$0xff] }
 0x3b1   : > { %v3015_v36 = vsel %vm1027_vm2, %v24656_v51, %v17484_v63  ;;  %v24657_v63 = vcombine.low %v17087_v59, %v17090_v8  ;;  %v24679_v51 = vld [vmem:[#allocation33_spill] sm:$0xff] }
 0x3b3   : > { %v3399_v44 = vpop.permute.xlu1 %3398  ;;  %v3431_v57 = vpop.permute.xlu0 %3430 }
 0x3b4   : > { %v3449_v19 = vsel %vm1036_vm6, %v3448_v22, %v3431_v57  ;;  %v3441_v0 = vsel %vm1034_vm5, %v3440_v3, %v3399_v44  ;;  %v24659_v3 = vld [vmem:[#allocation15_spill] sm:$0xff] }
 0x3b7   : > { %v3797_v11 = vpop.permute.xlu1 %3796  ;;  %v17541_v47 = vpop.permute.xlu0 %2208 }
 0x3b8   : > { %v3833_v53 = vsel %vm1038_vm7, %v3832_v61, %v3797_v11  ;;  %v3024_v61 = vsel %vm1030_vm3, %v3023_v16, %v17508_v21  ;;  %v3016_v21 = vsel %vm187_vm0, %v3015_v36, %v17504_v52  ;;  %v2632_v52 = vsel %vm1027_vm2, %v24657_v63, %v17506_v14  ;;  %v24671_v16 = vld [vmem:[#allocation39_spill] sm:$0xff]  ;;  %v24680_v36 = vld [vmem:[#allocation49_spill] sm:$0xff] }
 0x3b9   : > { %4259 = vmatpush1.msra.mxu0 %v3833_v53  ;;  %v3025_v11 = vsel %vm1032_vm4, %v3024_v61, %v3001_v25  ;;  %v2242_v42 = vsel %vm1027_vm2, %v24678_v62, %v17541_v47  ;;  %v24685_v47 = vld [vmem:[#allocation74_spill] sm:$0xff]  ;;  %v24686_v63 = vld [vmem:[#allocation75_spill] sm:$0xff]  ;;  %v24704_v62 = vld [vmem:[#allocation100_spill] sm:$0xff] }
 0x3bb   : > { %v17544_v58 = vpop.permute.xlu1 %2574  ;;  %v2607_v18 = vpop.permute.xlu0 %2606 }
 0x3bc   : > { %v2626_v59 = vsel %vm187_vm0, %v2625_v56, %v17544_v58 }
 0x3bf   : > { %v2973_v50 = vpop.permute.xlu1 %2972  ;;  %v3005_v9 = vpop.permute.xlu0 %3004 }
 0x3c0   : > { %v3026_v53 = vsel %vm1034_vm5, %v3025_v11, %v3005_v9  ;;  %v3017_v9 = vsel %vm1030_vm3, %v3016_v21, %v2969_v20  ;;  %v2633_v20 = vsel %vm187_vm0, %v2632_v52, %v17526_v46  ;;  %v24674_v11 = vld [vmem:[#allocation16_spill] sm:$0xff]  ;;  %v24681_v21 = vld [vmem:[#allocation46_spill] sm:$0xff] }
 0x3c1   : > { %v3018_v22 = vsel %vm1032_vm4, %v3017_v9, %v2973_v50  ;;  %v2634_v31 = vsel %vm1030_vm3, %v2633_v20, %v2607_v18  ;;  %v24688_v20 = vld [vmem:[#allocation119_spill] sm:$0xff] }
 0x3c3   : > { %v3403_v6 = vpop.permute.xlu1 %3402  ;;  %v3435_v34 = vpop.permute.xlu0 %3434 }
 0x3c4   : > { %v3450_v4 = vsel %vm1038_vm7, %v3449_v19, %v3435_v34  ;;  %v3442_v39 = vsel %vm1036_vm6, %v3441_v0, %v3403_v6  ;;  %v24660_v0 = vld [vmem:[#allocation14_spill] sm:$0xff] }
 0x3c5   : > { %4260 = vmatprep.subr.mxu0 %v3450_v4 }
 0x3c7   : > { %v17559_v38 = vpop.permute.xlu1 %2212  ;;  %v2579_v10 = vpop.permute.xlu0 %2578 }
 0x3c8   : > { %v2627_v48 = vsel %vm1030_vm3, %v2626_v59, %v2579_v10  ;;  %v24690_v59 = vld [vmem:[#allocation52_spill] sm:$0xff] }
 0x3cb   : > { %v2611_v49 = vpop.permute.xlu1 %2610  ;;  %v2977_v15 = vpop.permute.xlu0 %2976 }
 0x3cc   : > { %v3019_v19 = vsel %vm1034_vm5, %v3018_v22, %v2977_v15  ;;  %v2635_v55 = vsel %vm1032_vm4, %v2634_v31, %v2611_v49  ;;  %v24658_v49 = vld [vmem:[#allocation97_spill] sm:$0xff]  ;;  %v24683_v22 = vld [vmem:[#allocation118_spill] sm:$0xff] }
 0x3cf   : > { %v3009_v60 = vpop.permute.xlu1 %3008  ;;  %v3407_v32 = vpop.permute.xlu0 %3406 }
 0x3d0   : > { %v3443_v54 = vsel %vm1038_vm7, %v3442_v39, %v3407_v32  ;;  %v3027_v43 = vsel %vm1036_vm6, %v3026_v53, %v3009_v60  ;;  %v24661_v39 = vcombine.low %v24659_v3, %v24660_v0  ;;  %v24665_v60 = vcombine.low %v24663_v40, %v24664_v1  ;;  %v24666_v32 = vld [vmem:[#allocation50_spill] sm:$0xff]  ;;  %v24675_v53 = vld [vmem:[#allocation57_spill] sm:$0xff]  ;;  %v24693_v3 = vld [vmem:[#allocation24_spill] sm:$0xff] }
 0x3d1   : > { %4261 = vmatpush1.msra.mxu0 %v3443_v54  ;;  %v24667_v54 = vld [vmem:[#allocation65_spill] sm:$0xff]  ;;  %v24695_v40 = vld [vmem:[#allocation106_spill] sm:$0xff] }
 0x3d2   : > { %v1028_v27 = vsel %vm1027_vm2, %v24661_v39, %v24658_v49  ;;  %v1040_v58 = vsel %vm1027_vm2, %v24665_v60, %v24662_v2  ;;  %v24669_v5 = vcombine.low %v24667_v54, %v24668_v33  ;;  %v24694_v0 = vld [vmem:[#allocation117_spill] sm:$0xff]  ;;  %v24696_v60 = vld [vmem:[#allocation116_spill] sm:$0xff] }
 0x3d3   : > { %v2217_v24 = vpop.permute.xlu1 %2216  ;;  %v2583_v57 = vpop.permute.xlu0 %2582  ;;  %v1041_v1 = vsel %vm187_vm0, %v1040_v58, %v24695_v40  ;;  %v24697_v54 = vld [vmem:[#allocation120_spill] sm:$0xff] }
 0x3d4   : > { %v1820_v10 = vsel %vm1027_vm2, %v24669_v5, %v24666_v32  ;;  %v2628_v13 = vsel %vm1032_vm4, %v2627_v48, %v2583_v57 }
 0x3d5   : > { %v1821_v31 = vsel %vm187_vm0, %v1820_v10, %v24688_v20  ;;  %v24698_v10 = vld [vmem:[#allocation114_spill] sm:$0xff] }
 0x3d7   : > { %v2615_v41 = vpop.permute.xlu1 %2614  ;;  %v2981_v44 = vpop.permute.xlu0 %2980 }
 0x3d8   : > { %v3020_v6 = vsel %vm1036_vm6, %v3019_v19, %v2981_v44  ;;  %v2636_v15 = vsel %vm1034_vm5, %v2635_v55, %v2615_v41  ;;  %v24672_v41 = vld [vmem:[#allocation38_spill] sm:$0xff] }
 0x3d9   : > { %v24673_v44 = vcombine.low %v24671_v16, %v24672_v41 }
 0x3db   : > { %v3013_v7 = vpop.permute.xlu1 %3012  ;;  %v2221_v30 = vpop.permute.xlu0 %2220  ;;  %v1423_v61 = vsel %vm1027_vm2, %v24673_v44, %v24670_v12  ;;  %v24699_v12 = vld [vmem:[#allocation121_spill] sm:$0xff] }
 0x3dc   : > { %v3028_v26 = vsel %vm1038_vm7, %v3027_v43, %v3013_v7  ;;  %v24676_v43 = vld [vmem:[#allocation56_spill] sm:$0xff]  ;;  %v24701_v44 = vld [vmem:[#allocation113_spill] sm:$0xff] }
 0x3dd   : > { %4262 = vmatprep.subr.mxu0 %v3028_v26  ;;  %v24677_v7 = vcombine.low %v24675_v53, %v24676_v43  ;;  %v24703_v43 = vld [vmem:[#allocation122_spill] sm:$0xff] }
 0x3df   : > { %v2587_v37 = vpop.permute.xlu1 %2586  ;;  %v2619_v25 = vpop.permute.xlu0 %2618  ;;  %v1813_v26 = vsel %vm1027_vm2, %v24677_v7, %v24674_v11  ;;  %v24702_v11 = vld [vmem:[#allocation40_spill] sm:$0xff] }
 0x3e0   : > { %v2637_v8 = vsel %vm1036_vm6, %v2636_v15, %v2619_v25  ;;  %v2629_v57 = vsel %vm1034_vm5, %v2628_v13, %v2587_v37  ;;  %v24682_v25 = vcombine.low %v24680_v36, %v24681_v21  ;;  %v1814_v19 = vsel %vm187_vm0, %v1813_v26, %v24683_v22  ;;  %v24689_v15 = vld [vmem:[#allocation18_spill] sm:$0xff]  ;;  %v24706_v36 = vld [vmem:[#allocation44_spill] sm:$0xff] }
 0x3e1   : > { %v24687_v37 = vcombine.low %v24685_v47, %v24686_v63  ;;  %v1815_v39 = vsel %vm1030_vm3, %v1814_v19, %v24694_v0  ;;  %v24708_v19 = vld [vmem:[#allocation43_spill] sm:$0xff]  ;;  %v24711_v63 = vld [vmem:[#allocation73_spill] sm:$0xff]  ;;  %v24720_v0 = vld [vmem:[#allocation28_spill] sm:$0xff] }
 0x3e2   : > { %v1430_v9 = vsel %vm1027_vm2, %v24682_v25, %v24679_v51 }
 0x3e3   : > { %v2985_v34 = vpop.permute.xlu1 %2984  ;;  %v2193_v4 = vpop.permute.xlu0 %2192  ;;  %v2235_v52 = vsel %vm1027_vm2, %v24687_v37, %v24684_v23  ;;  %v24710_v23 = vld [vmem:[#allocation108_spill] sm:$0xff] }
 0x3e4   : > { %v3021_v45 = vsel %vm1038_vm7, %v3020_v6, %v2985_v34  ;;  %v2243_v6 = vsel %vm187_vm0, %v2242_v42, %v17559_v38  ;;  %v1424_v38 = vsel %vm187_vm0, %v1423_v61, %v24689_v15  ;;  %v1042_v61 = vsel %vm1030_vm3, %v1041_v1, %v24701_v44  ;;  %v24722_v1 = vld [vmem:[#allocation110_spill] sm:$0xff] }
 0x3e5   : > { %4263 = vmatpush1.msra.mxu0 %v3021_v45  ;;  %v2244_v55 = vsel %vm1030_vm3, %v2243_v6, %v2217_v24  ;;  %v1431_v24 = vsel %vm187_vm0, %v1430_v9, %v24693_v3  ;;  %v1425_v13 = vsel %vm1030_vm3, %v1424_v38, %v24698_v10  ;;  %v24707_v9 = vld [vmem:[#allocation107_spill] sm:$0xff]  ;;  %v1043_v47 = vsel %vm1032_vm4, %v1042_v61, %v24710_v23  ;;  %v24719_v3 = vld [vmem:[#allocation109_spill] sm:$0xff] }
 0x3e6   : > { %v2245_v48 = vsel %vm1032_vm4, %v2244_v55, %v2221_v30  ;;  %v1432_v32 = vsel %vm1030_vm3, %v1431_v24, %v24696_v60  ;;  %v1816_v30 = vsel %vm1032_vm4, %v1815_v39, %v24697_v54  ;;  %v1426_v53 = vsel %vm1032_vm4, %v1425_v13, %v24702_v11  ;;  %v24715_v38 = vld [vmem:[#allocation123_spill] sm:$0xff] }
 0x3e7   : > { %v2225_v35 = vpop.permute.xlu1 %2224  ;;  %v2591_v50 = vpop.permute.xlu0 %2590  ;;  %v1817_v21 = vsel %vm1034_vm5, %v1816_v30, %v24706_v36  ;;  %v1427_v37 = vsel %vm1034_vm5, %v1426_v53, %v24711_v63  ;;  %v4231_v30 = vld [vmem:[%s23873_s1] sm:$0xff] }
 0x3e8   : > { %v2630_v34 = vsel %vm1036_vm6, %v2629_v57, %v2591_v50  ;;  %v1822_v50 = vsel %vm1030_vm3, %v1821_v31, %v24690_v59  ;;  %v2246_v2 = vsel %vm1034_vm5, %v2245_v48, %v2225_v35  ;;  %v24700_v35 = vld [vmem:[#allocation53_spill] sm:$0xff]  ;;  %v24705_v57 = vld [vmem:[#allocation30_spill] sm:$0xff]  ;;  %v24713_v31 = vld [vmem:[#allocation32_spill] sm:$0xff] }
 0x3e9   : > { %v1823_v16 = vsel %vm1032_vm4, %v1822_v50, %v24699_v12  ;;  %v1433_v51 = vsel %vm1032_vm4, %v1432_v32, %v24705_v57  ;;  %v1044_v55 = vsel %vm1034_vm5, %v1043_v47, %v24713_v31  ;;  %v24716_v50 = vld [vmem:[#allocation103_spill] sm:$0xff]  ;;  %v24723_v32 = vld [vmem:[#allocation72_spill] sm:$0xff] }
 0x3ea   : > { %v1824_v7 = vsel %vm1034_vm5, %v1823_v16, %v24703_v43  ;;  %v1434_v6 = vsel %vm1034_vm5, %v1433_v51, %v24708_v19  ;;  %v1045_v60 = vsel %vm1036_vm6, %v1044_v55, %v24722_v1 }
 0x3eb   : > { %v2623_v14 = vpop.permute.xlu1 %2622  ;;  %v2197_v46 = vpop.permute.xlu0 %2196  ;;  %v1046_v54 = vsel %vm1038_vm7, %v1045_v60, %v24723_v32 }
 0x3ec   : > { %v2638_v18 = vsel %vm1038_vm7, %v2637_v8, %v2623_v14  ;;  %v24691_v8 = vld [vmem:[#allocation99_spill] sm:$0xff] }
 0x3ed   : > { %4264 = vmatprep.subr.mxu0 %v2638_v18  ;;  %v2236_v14 = vsel %vm187_vm0, %v2235_v52, %v24691_v8  ;;  %v24692_v18 = vld [vmem:[#allocation105_spill] sm:$0xff]  ;;  %v24712_v52 = vld [vmem:[#allocation95_spill] sm:$0xff] }
 0x3ee   : > { %v1029_v49 = vsel %vm187_vm0, %v1028_v27, %v24692_v18  ;;  %v2237_v41 = vsel %vm1030_vm3, %v2236_v14, %v24700_v35  ;;  %v1825_v20 = vsel %vm1036_vm6, %v1824_v7, %v24712_v52  ;;  %v24717_v14 = vld [vmem:[#allocation21_spill] sm:$0xff]  ;;  %v24718_v18 = vld [vmem:[#allocation31_spill] sm:$0xff] }
 0x3ef   : > { %v2229_v45 = vpop.permute.xlu1 %2228  ;;  %v2595_v28 = vpop.permute.xlu0 %2594  ;;  %v2238_v26 = vsel %vm1032_vm4, %v2237_v41, %v2193_v4  ;;  %v1031_v42 = vsel %vm1030_vm3, %v1029_v49, %v24704_v62  ;;  %v1826_v59 = vsel %vm1038_vm7, %v1825_v20, %v24715_v38  ;;  %v1435_v49 = vsel %vm1036_vm6, %v1434_v6, %v24718_v18 }
 0x3f0   : > { %v2631_v56 = vsel %vm1038_vm7, %v2630_v34, %v2595_v28  ;;  %v2247_v33 = vsel %vm1036_vm6, %v2246_v2, %v2229_v45  ;;  %v2239_v25 = vsel %vm1034_vm5, %v2238_v26, %v2197_v46  ;;  %v1033_v22 = vsel %vm1032_vm4, %v1031_v42, %v24707_v9  ;;  %v24709_v34 = vld [vmem:[#allocation98_spill] sm:$0xff]  ;;  %v24721_v2 = vld [vmem:[#allocation115_spill] sm:$0xff] }
 0x3f1   : > { %4265 = vmatpush1.msra.mxu0 %v2631_v56  ;;  %v1818_v4 = vsel %vm1036_vm6, %v1817_v21, %v24709_v34  ;;  %v24714_v56 = vld [vmem:[#allocation26_spill] sm:$0xff]  ;;  %v1035_v8 = vsel %vm1034_vm5, %v1033_v22, %v24716_v50  ;;  %v1436_v39 = vsel %vm1038_vm7, %v1435_v49, %v24720_v0 }
 0x3f2   : > { %v1428_v15 = vsel %vm1036_vm6, %v1427_v37, %v24714_v56  ;;  %v1819_v48 = vsel %vm1038_vm7, %v1818_v4, %v24717_v14  ;;  %v1037_v24 = vsel %vm1036_vm6, %v1035_v8, %v24719_v3 }
 0x3f3   : > { %v2201_v27 = vpop.permute.xlu1 %2200  ;;  %v2233_v5 = vpop.permute.xlu0 %2232  ;;  %v1429_v40 = vsel %vm1038_vm7, %v1428_v15, %v24721_v2 }
 0x3f4   : > { %v2248_v58 = vsel %vm1038_vm7, %v2247_v33, %v2233_v5  ;;  %v2240_v45 = vsel %vm1036_vm6, %v2239_v25, %v2201_v27  ;;  %v24724_v33 = vld [vmem:[#allocation104_spill] sm:$0xff]  ;;  %v24725_v5 = vmov 0.0  }
 0x3f5   : > { %4266 = vmatprep.subr.mxu0 %v2248_v58  ;;  %v1039_v27 = vsel %vm1038_vm7, %v1037_v24, %v24724_v33 }
 0x3f7   : > { %v2205_v28 = vpop.permute.xlu1 %2204 }
 0x3f8   : > { %v2241_v46 = vsel %vm1038_vm7, %v2240_v45, %v2205_v28 }
 0x3f9   : > { %4267 = vmatpush1.msra.mxu0 %v2241_v46 }
 0x3fa   : > { %4268 = vmatprep.subr.mxu0 %v1826_v59 }
 0x3fb   : > { %4269 = vmatpush1.msra.mxu0 %v1819_v48 }
 0x3fc   : > { %4270 = vmatprep.subr.mxu0 %v1436_v39 }
 0x3fd   : > { %4271 = vmatpush1.msra.mxu0 %v1429_v40 }
 0x3fe   : > { %4272 = vmatprep.subr.mxu0 %v1046_v54 }
 0x3ff   : > { %4273 = vmatpush1.msra.mxu0 %v1039_v27 }
 0x400   : > { %14781 = vmatmul.mubr.msk.f32.vlgmr.msra.gmra.mxu0 %vm4238_vm8, %v4231_v30  ;;  %v4236_v10 = vpop.permute.xlu0 %4235 }
 0x401   : > { %11883 = vmatprep.mubr.f32.mxu0 %v24725_v5 }
 0x4c0   : > { %v4308_v13 = vpop.f32.mrf.mxu0 }
 0x4c1   : > { %v4309_v12 = vadd.f32 %v4308_v13, %v4236_v10 }
 0x4c2   : > { %v4310_v35 = vpop.f32.mrf.mxu0 }
 0x4c3   : > { %v17755_v16 = vmax.f32 %v4309_v12, 0.0  ;;  %v4311_v41 = vadd.f32 %v4310_v35, %v4236_v10 }
 0x4c5   : > { %24726 = vst [vmem:[#allocation51_spill] sm:$0xff] %v17755_v16  ;;  %4324 = vrot.lane.b32.xlu0 %v17755_v16, %s14982_s4  ;;  %4318 = vrot.lane.b32.xlu1 %v17755_v16, %s14983_s6  ;;  %v17769_v58 = vmax.f32 %v4311_v41, 0.0 }
 0x4c7   : > { %24727 = vst [vmem:[#allocation79_spill] sm:$0xff] %v17769_v58 }
 0x4c9   : > { %4330 = vrot.lane.b32.xlu0 %v17755_v16, %s14987_s10  ;;  %4321 = vrot.lane.b32.xlu1 %v17755_v16, %s14985_s9 }
 0x4cd   : > { %4336 = vrot.lane.b32.xlu0 %v17755_v16, %s14988_s11  ;;  %4327 = vrot.lane.b32.xlu1 %v17755_v16, %s14984_s8 }
 0x4d1   : > { %4343 = vrot.lane.b32.xlu0 %v17769_v58, %s14985_s9  ;;  %4333 = vrot.lane.b32.xlu1 %v17755_v16, %s14986_s23 }
 0x4d5   : > { %4349 = vrot.lane.b32.xlu0 %v17769_v58, %s14984_s8  ;;  %4340 = vrot.lane.b32.xlu1 %v17769_v58, %s14983_s6 }
 0x4d9   : > { %4355 = vrot.lane.b32.xlu0 %v17769_v58, %s14986_s23  ;;  %4346 = vrot.lane.b32.xlu1 %v17769_v58, %s14982_s4 }
 0x4dd   : > { %4352 = vrot.lane.b32.xlu1 %v17769_v58, %s14987_s10 }
 0x4e1   : > { %4358 = vrot.lane.b32.xlu1 %v17769_v58, %s14988_s11 }
 0x537   : > { %v4325_v44 = vpop.permute.xlu0 %4324  ;;  %v4319_v61 = vpop.permute.xlu1 %4318 }
 0x538   : > { %v4377_v62 = vcombine.low %v4319_v61, %v4325_v44  ;;  %v4378_v38 = vcombine.high %v4319_v61, %v4325_v44 }
 0x53a   : > { %v4385_v25 = vrot.slane %v4377_v62, %v15232_v17  ;;  %v4392_v2 = vrot.slane %v4378_v38, %v15232_v17 }
 0x53b   : > { %v4331_v11 = vpop.permute.xlu0 %4330  ;;  %v4322_v53 = vpop.permute.xlu1 %4321 }
 0x53c   : > { %v4361_v43 = vcombine.low %v17755_v16, %v4322_v53  ;;  %v4362_v52 = vcombine.high %v17755_v16, %v4322_v53 }
 0x53e   : > { %v4369_v57 = vrot.slane %v4361_v43, %v15232_v17  ;;  %v4376_v18 = vrot.slane %v4362_v52, %v15232_v17 }
 0x53f   : > { %v4337_v7 = vpop.permute.xlu0 %4336  ;;  %v4328_v26 = vpop.permute.xlu1 %4327 }
 0x540   : > { %v4409_v42 = vcombine.low %v4331_v11, %v4337_v7  ;;  %v4425_v19 = vcombine.low %v4369_v57, %v4385_v25  ;;  %v4426_v20 = vcombine.high %v4369_v57, %v4385_v25  ;;  %v4410_v31 = vcombine.high %v4331_v11, %v4337_v7 }
 0x541   : > { %v4441_v30 = vcombine.low %v4376_v18, %v4392_v2  ;;  %v4442_v62 = vcombine.high %v4376_v18, %v4392_v2 }
 0x542   : > { %v4417_v9 = vrot.slane %v4409_v42, %v15232_v17  ;;  %v4433_v23 = vrot.slane %v4425_v19, %v15240_v29  ;;  %v4424_v49 = vrot.slane %v4410_v31, %v15232_v17  ;;  %v4440_v24 = vrot.slane %v4426_v20, %v15240_v29 }
 0x543   : > { %v17789_v51 = vpop.permute.xlu0 %4343  ;;  %v4334_v36 = vpop.permute.xlu1 %4333  ;;  %v4449_v35 = vrot.slane %v4441_v30, %v15240_v29 }
 0x544   : > { %v4393_v21 = vcombine.low %v4328_v26, %v4334_v36  ;;  %v4394_v47 = vcombine.high %v4328_v26, %v4334_v36  ;;  %v4497_v15 = vcombine.low %v17769_v58, %v17789_v51  ;;  %v4498_v42 = vcombine.high %v17769_v58, %v17789_v51 }
 0x545   : > { %v4456_v51 = vrot.slane %v4442_v62, %v15240_v29 }
 0x546   : > { %v4401_v22 = vrot.slane %v4393_v21, %v15232_v17  ;;  %v4408_v59 = vrot.slane %v4394_v47, %v15232_v17  ;;  %v4505_v0 = vrot.slane %v4497_v15, %v15232_v17 }
 0x547   : > { %v17794_v6 = vpop.permute.xlu1 %4340  ;;  %v4350_v4 = vpop.permute.xlu0 %4349 }
 0x548   : > { %v4457_v34 = vcombine.low %v4401_v22, %v4417_v9  ;;  %v4458_v63 = vcombine.high %v4401_v22, %v4417_v9  ;;  %v4473_v40 = vcombine.low %v4408_v59, %v4424_v49  ;;  %v4474_v11 = vcombine.high %v4408_v59, %v4424_v49 }
 0x54a   : > { %v4465_v45 = vrot.slane %v4457_v34, %v15240_v29  ;;  %v4472_v8 = vrot.slane %v4458_v63, %v15240_v29  ;;  %v4481_v10 = vrot.slane %v4473_v40, %v15240_v29  ;;  %v4488_v9 = vrot.slane %v4474_v11, %v15240_v29 }
 0x54b   : > { %v4347_v28 = vpop.permute.xlu1 %4346  ;;  %v4356_v55 = vpop.permute.xlu0 %4355  ;;  %v4512_v34 = vrot.slane %v4498_v42, %v15232_v17 }
 0x54c   : > { %v4489_v37 = vcombine.low %v4433_v23, %v4465_v45  ;;  %v4513_v46 = vcombine.low %v17794_v6, %v4347_v28  ;;  %v4490_v50 = vcombine.high %v4433_v23, %v4465_v45  ;;  %v4529_v14 = vcombine.low %v4350_v4, %v4356_v55 }
 0x54d   : > { %v4491_v1 = vcombine.low %v4440_v24, %v4472_v8  ;;  %v4492_v27 = vcombine.high %v4440_v24, %v4472_v8  ;;  %v4493_v53 = vcombine.low %v4449_v35, %v4481_v10  ;;  %v4530_v43 = vcombine.high %v4350_v4, %v4356_v55 }
 0x54e   : > { %4649 = vrot.lane.b32.xlu0 %v4489_v37, %s14992_s17  ;;  %v4521_v48 = vrot.slane %v4513_v46, %v15232_v17  ;;  %v4537_v60 = vrot.slane %v4529_v14, %v15232_v17  ;;  %v4514_v7 = vcombine.high %v17794_v6, %v4347_v28  ;;  %v4494_v25 = vcombine.high %v4449_v35, %v4481_v10 }
 0x54f   : > { %v4353_v56 = vpop.permute.xlu1 %4352  ;;  %v4544_v22 = vrot.slane %v4530_v43, %v15232_v17  ;;  %v4495_v28 = vcombine.low %v4456_v51, %v4488_v9  ;;  %v4496_v37 = vcombine.high %v4456_v51, %v4488_v9 }
 0x550   : > { %v4561_v32 = vcombine.low %v4505_v0, %v4521_v48  ;;  %v4562_v26 = vcombine.high %v4505_v0, %v4521_v48  ;;  %v4528_v19 = vrot.slane %v4514_v7, %v15232_v17 }
 0x552   : > { %4653 = vrot.lane.b32.xlu0 %v4490_v50, %s14992_s17  ;;  %v4569_v13 = vrot.slane %v4561_v32, %v15240_v29  ;;  %v4576_v6 = vrot.slane %v4562_v26, %v15240_v29  ;;  %v4577_v23 = vcombine.low %v4512_v34, %v4528_v19  ;;  %v4578_v31 = vcombine.high %v4512_v34, %v4528_v19 }
 0x553   : > { %v4359_v3 = vpop.permute.xlu1 %4358 }
 0x554   : > { %v4545_v39 = vcombine.low %v4353_v56, %v4359_v3  ;;  %v4546_v41 = vcombine.high %v4353_v56, %v4359_v3  ;;  %v4585_v46 = vrot.slane %v4577_v23, %v15240_v29  ;;  %v4592_v15 = vrot.slane %v4578_v31, %v15240_v29 }
 0x556   : > { %v4553_v54 = vrot.slane %v4545_v39, %v15232_v17  ;;  %4657 = vrot.lane.b32.xlu0 %v4491_v1, %s14992_s17  ;;  %v4560_v57 = vrot.slane %v4546_v41, %v15232_v17 }
 0x558   : > { %v4593_v33 = vcombine.low %v4537_v60, %v4553_v54  ;;  %v4594_v44 = vcombine.high %v4537_v60, %v4553_v54  ;;  %v4609_v4 = vcombine.low %v4544_v22, %v4560_v57  ;;  %v4610_v52 = vcombine.high %v4544_v22, %v4560_v57 }
 0x55a   : > { %v4601_v12 = vrot.slane %v4593_v33, %v15240_v29  ;;  %4661 = vrot.lane.b32.xlu0 %v4492_v27, %s14992_s17  ;;  %v4608_v21 = vrot.slane %v4594_v44, %v15240_v29  ;;  %v4617_v63 = vrot.slane %v4609_v4, %v15240_v29  ;;  %v4624_v56 = vrot.slane %v4610_v52, %v15240_v29 }
 0x55c   : > { %v4625_v61 = vcombine.low %v4569_v13, %v4601_v12  ;;  %v4626_v36 = vcombine.high %v4569_v13, %v4601_v12  ;;  %v4627_v45 = vcombine.low %v4576_v6, %v4608_v21  ;;  %v4628_v47 = vcombine.high %v4576_v6, %v4608_v21 }
 0x55d   : > { %v4629_v20 = vcombine.low %v4585_v46, %v4617_v63  ;;  %v4630_v55 = vcombine.high %v4585_v46, %v4617_v63  ;;  %v4631_v38 = vcombine.low %v4592_v15, %v4624_v56  ;;  %v4632_v59 = vcombine.high %v4592_v15, %v4624_v56 }
 0x55e   : > { %4651 = vrot.lane.b32.xlu1 %v4625_v61, %s14992_s17  ;;  %4665 = vrot.lane.b32.xlu0 %v4493_v53, %s14992_s17 }
 0x562   : > { %4655 = vrot.lane.b32.xlu1 %v4626_v36, %s14992_s17  ;;  %4669 = vrot.lane.b32.xlu0 %v4494_v25, %s14992_s17 }
 0x566   : > { %4659 = vrot.lane.b32.xlu1 %v4627_v45, %s14992_s17  ;;  %4673 = vrot.lane.b32.xlu0 %v4495_v28, %s14992_s17 }
 0x56a   : > { %4663 = vrot.lane.b32.xlu1 %v4628_v47, %s14992_s17  ;;  %4677 = vrot.lane.b32.xlu0 %v4496_v37, %s14992_s17 }
 0x56e   : > { %4667 = vrot.lane.b32.xlu1 %v4629_v20, %s14992_s17 }
 0x572   : > { %4671 = vrot.lane.b32.xlu1 %v4630_v55, %s14992_s17 }
 0x576   : > { %4675 = vrot.lane.b32.xlu1 %v4631_v38, %s14992_s17 }
 0x57a   : > { %4679 = vrot.lane.b32.xlu1 %v4632_v59, %s14992_s17 }
 0x5c0   : > { %v4650_v50 = vpop.permute.xlu0 %4649 }
 0x5c1   : > { %4697 = vst.msk [vmem:[#allocation2 + $0x8] sm:$0xff] %vm602_vm1, %v4650_v50 }
 0x5c4   : > { %v4654_v8 = vpop.permute.xlu0 %4653 }
 0x5c5   : > { %4699 = vst.msk [vmem:[#allocation2 + $0x28] sm:$0xff] %vm602_vm1, %v4654_v8 }
 0x5c8   : > { %v4658_v14 = vpop.permute.xlu0 %4657  ;;  %v17849_v48 = vld [vmem:[#allocation2 + $0x6] sm:$0xff] }
 0x5c9   : > { %v5915_v18 = vld [vmem:[#allocation2 + $0x8] sm:$0xff]  ;;  %4701 = vst.msk [vmem:[#allocation2 + $0x48] sm:$0xff] %vm602_vm1, %v4658_v14  ;;  %4745 = vrot.lane.b32.xlu0 %v17849_v48, %s14997_s19 }
 0x5ca   : > { %6727 = vrot.lane.b32.xlu1 %v5915_v18, %s14998_s22 }
 0x5cc   : > { %v4662_v49 = vpop.permute.xlu0 %4661  ;;  %v17855_v3 = vld [vmem:[#allocation2 + $0x26] sm:$0xff] }
 0x5cd   : > { %4703 = vst.msk [vmem:[#allocation2 + $0x68] sm:$0xff] %vm602_vm1, %v4662_v49  ;;  %4749 = vrot.lane.b32.xlu0 %v17855_v3, %s14997_s19  ;;  %v5917_v43 = vld [vmem:[#allocation2 + $0x28] sm:$0xff] }
 0x5d0   : > { %v4652_v24 = vpop.permute.xlu1 %4651  ;;  %v4666_v0 = vpop.permute.xlu0 %4665  ;;  %v4717_v39 = vld [vmem:[#allocation2 + $0x46] sm:$0xff] }
 0x5d1   : > { %4698 = vst.msk [vmem:[#allocation2 + $0x10] sm:$0xff] %vm602_vm1, %v4652_v24  ;;  %v5919_v2 = vld [vmem:[#allocation2 + $0x48] sm:$0xff]  ;;  %4705 = vst.msk [vmem:[#allocation2 + $0x88] sm:$0xff] %vm602_vm1, %v4666_v0  ;;  %4753 = vrot.lane.b32.xlu0 %v4717_v39, %s14997_s19 }
 0x5d2   : > { %6735 = vrot.lane.b32.xlu1 %v5919_v2, %s14998_s22 }
 0x5d4   : > { %v4656_v40 = vpop.permute.xlu1 %4655  ;;  %v4670_v1 = vpop.permute.xlu0 %4669  ;;  %v17865_v60 = vld [vmem:[#allocation2 + $0x66] sm:$0xff] }
 0x5d5   : > { %4700 = vst.msk [vmem:[#allocation2 + $0x30] sm:$0xff] %vm602_vm1, %v4656_v40  ;;  %4707 = vst.msk [vmem:[#allocation2 + $0xa8] sm:$0xff] %vm602_vm1, %v4670_v1  ;;  %4757 = vrot.lane.b32.xlu0 %v17865_v60, %s14997_s19  ;;  %v5921_v7 = vld [vmem:[#allocation2 + $0x68] sm:$0xff] }
 0x5d8   : > { %v4660_v32 = vpop.permute.xlu1 %4659  ;;  %v4674_v54 = vpop.permute.xlu0 %4673  ;;  %v4721_v30 = vld [vmem:[#allocation2 + $0x86] sm:$0xff]  ;;  %v17919_v42 = vld [vmem:[#allocation2 + $0xe] sm:$0xff] }
 0x5d9   : > { %4702 = vst.msk [vmem:[#allocation2 + $0x50] sm:$0xff] %vm602_vm1, %v4660_v32  ;;  %v5923_v33 = vld [vmem:[#allocation2 + $0x88] sm:$0xff]  ;;  %4709 = vst.msk [vmem:[#allocation2 + $0xc8] sm:$0xff] %vm602_vm1, %v4674_v54  ;;  %4761 = vrot.lane.b32.xlu0 %v4721_v30, %s14997_s19  ;;  %v18022_v15 = vld [vmem:[#allocation2 + $0x12] sm:$0xff] }
 0x5da   : > { %6743 = vrot.lane.b32.xlu1 %v5923_v33, %s14998_s22  ;;  %24728 = vst [vmem:[#allocation59_spill] sm:$0xff] %v17919_v42 }
 0x5dc   : > { %v4664_v27 = vpop.permute.xlu1 %4663  ;;  %v4678_v10 = vpop.permute.xlu0 %4677  ;;  %v17875_v13 = vld [vmem:[#allocation2 + $0xa6] sm:$0xff]  ;;  %v17924_v57 = vld [vmem:[#allocation2 + $0x2e] sm:$0xff] }
 0x5dd   : > { %4704 = vst.msk [vmem:[#allocation2 + $0x70] sm:$0xff] %vm602_vm1, %v4664_v27  ;;  %4711 = vst.msk [vmem:[#allocation2 + $0xe8] sm:$0xff] %vm602_vm1, %v4678_v10  ;;  %4765 = vrot.lane.b32.xlu0 %v17875_v13, %s14997_s19  ;;  %v5925_v26 = vld [vmem:[#allocation2 + $0xa8] sm:$0xff]  ;;  %v17988_v28 = vld [vmem:[#allocation2 + $0x32] sm:$0xff] }
 0x5e0   : > { %v4668_v12 = vpop.permute.xlu1 %4667  ;;  %v4725_v35 = vld [vmem:[#allocation2 + $0xc6] sm:$0xff]  ;;  %v17929_v36 = vld [vmem:[#allocation2 + $0x4e] sm:$0xff] }
 0x5e1   : > { %4706 = vst.msk [vmem:[#allocation2 + $0x90] sm:$0xff] %vm602_vm1, %v4668_v12  ;;  %v5927_v41 = vld [vmem:[#allocation2 + $0xc8] sm:$0xff]  ;;  %4769 = vrot.lane.b32.xlu0 %v4725_v35, %s14997_s19  ;;  %24729 = vst [vmem:[#allocation47_spill] sm:$0xff] %v17929_v36  ;;  %v18043_v49 = vld [vmem:[#allocation2 + $0x52] sm:$0xff] }
 0x5e2   : > { %6751 = vrot.lane.b32.xlu1 %v5927_v41, %s14998_s22 }
 0x5e4   : > { %v4672_v44 = vpop.permute.xlu1 %4671  ;;  %v17884_v61 = vld [vmem:[#allocation2 + $0xe6] sm:$0xff]  ;;  %v17934_v21 = vld [vmem:[#allocation2 + $0x6e] sm:$0xff] }
 0x5e5   : > { %4708 = vst.msk [vmem:[#allocation2 + $0xb0] sm:$0xff] %vm602_vm1, %v4672_v44  ;;  %4773 = vrot.lane.b32.xlu0 %v17884_v61, %s14997_s19  ;;  %v5929_v62 = vld [vmem:[#allocation2 + $0xe8] sm:$0xff]  ;;  %v17998_v63 = vld [vmem:[#allocation2 + $0x72] sm:$0xff] }
 0x5e6   : > { %6337 = vrot.lane.b32.xlu1 %v5915_v18, %s14994_s20 }
 0x5e8   : > { %v4676_v11 = vpop.permute.xlu1 %4675  ;;  %v17939_v25 = vld [vmem:[#allocation2 + $0x8e] sm:$0xff] }
 0x5e9   : > { %4710 = vst.msk [vmem:[#allocation2 + $0xd0] sm:$0xff] %vm602_vm1, %v4676_v11  ;;  %5135 = vrot.lane.b32.xlu0 %v17849_v48, %s14994_s20  ;;  %24730 = vst [vmem:[#allocation41_spill] sm:$0xff] %v17939_v25  ;;  %v18068_v32 = vld [vmem:[#allocation2 + $0x92] sm:$0xff] }
 0x5ea   : > { %6345 = vrot.lane.b32.xlu1 %v5919_v2, %s14994_s20 }
 0x5ec   : > { %v4680_v53 = vpop.permute.xlu1 %4679  ;;  %v17944_v9 = vld [vmem:[#allocation2 + $0xae] sm:$0xff] }
 0x5ed   : > { %4712 = vst.msk [vmem:[#allocation2 + $0xf0] sm:$0xff] %vm602_vm1, %v4680_v53  ;;  %5139 = vrot.lane.b32.xlu0 %v17855_v3, %s14994_s20  ;;  %v18008_v52 = vld [vmem:[#allocation2 + $0xb2] sm:$0xff]  ;;  %v18081_v27 = vld [vmem:[#allocation2 + $0xaa] sm:$0xff] }
 0x5ee   : > { %6353 = vrot.lane.b32.xlu1 %v5923_v33, %s14994_s20 }
 0x5f0   : > { %v17949_v22 = vld [vmem:[#allocation2 + $0xce] sm:$0xff] }
 0x5f1   : > { %5143 = vrot.lane.b32.xlu0 %v4717_v39, %s14994_s20  ;;  %24731 = vst [vmem:[#allocation96_spill] sm:$0xff] %v17949_v22  ;;  %v18083_v10 = vld [vmem:[#allocation2 + $0xd2] sm:$0xff] }
 0x5f2   : > { %6361 = vrot.lane.b32.xlu1 %v5927_v41, %s14994_s20 }
 0x5f4   : > { %v17954_v19 = vld [vmem:[#allocation2 + $0xee] sm:$0xff] }
 0x5f5   : > { %5147 = vrot.lane.b32.xlu0 %v17865_v60, %s14994_s20  ;;  %24732 = vst [vmem:[#allocation93_spill] sm:$0xff] %v17954_v19  ;;  %v18020_v56 = vld [vmem:[#allocation2 + $0xf2] sm:$0xff]  ;;  %v18098_v44 = vld [vmem:[#allocation2 + $0xea] sm:$0xff] }
 0x5f6   : > { %5947 = vrot.lane.b32.xlu1 %v5915_v18, %s14997_s19  ;;  %v18041_v18 = vld [vmem:[#allocation2 + $0x2a] sm:$0xff] }
 0x5f9   : > { %5151 = vrot.lane.b32.xlu0 %v4721_v30, %s14994_s20 }
 0x5fa   : > { %5955 = vrot.lane.b32.xlu1 %v5919_v2, %s14997_s19 }
 0x5fd   : > { %5155 = vrot.lane.b32.xlu0 %v17875_v13, %s14994_s20 }
 0x5fe   : > { %5963 = vrot.lane.b32.xlu1 %v5923_v33, %s14997_s19 }
 0x601   : > { %5159 = vrot.lane.b32.xlu0 %v4725_v35, %s14994_s20 }
 0x602   : > { %5971 = vrot.lane.b32.xlu1 %v5927_v41, %s14997_s19 }
 0x605   : > { %5163 = vrot.lane.b32.xlu0 %v17884_v61, %s14994_s20 }
 0x606   : > { %5525 = vrot.lane.b32.xlu1 %v17849_v48, %s14998_s22 }
 0x609   : > { %6731 = vrot.lane.b32.xlu0 %v5917_v43, %s14998_s22 }
 0x60a   : > { %5533 = vrot.lane.b32.xlu1 %v4717_v39, %s14998_s22 }
 0x60d   : > { %6739 = vrot.lane.b32.xlu0 %v5921_v7, %s14998_s22 }
 0x60e   : > { %5541 = vrot.lane.b32.xlu1 %v4721_v30, %s14998_s22 }
 0x611   : > { %6747 = vrot.lane.b32.xlu0 %v5925_v26, %s14998_s22 }
 0x612   : > { %5549 = vrot.lane.b32.xlu1 %v4725_v35, %s14998_s22 }
 0x615   : > { %6755 = vrot.lane.b32.xlu0 %v5929_v62, %s14998_s22 }
 0x616   : > { %4747 = vrot.lane.b32.xlu1 %v17919_v42, %s14997_s19 }
 0x619   : > { %6341 = vrot.lane.b32.xlu0 %v5917_v43, %s14994_s20 }
 0x61a   : > { %4751 = vrot.lane.b32.xlu1 %v17924_v57, %s14997_s19 }
 0x61d   : > { %6349 = vrot.lane.b32.xlu0 %v5921_v7, %s14994_s20 }
 0x61e   : > { %4755 = vrot.lane.b32.xlu1 %v17929_v36, %s14997_s19 }
 0x621   : > { %6357 = vrot.lane.b32.xlu0 %v5925_v26, %s14994_s20 }
 0x622   : > { %4759 = vrot.lane.b32.xlu1 %v17934_v21, %s14997_s19 }
 0x625   : > { %6365 = vrot.lane.b32.xlu0 %v5929_v62, %s14994_s20 }
 0x626   : > { %4763 = vrot.lane.b32.xlu1 %v17939_v25, %s14997_s19 }
 0x629   : > { %5951 = vrot.lane.b32.xlu0 %v5917_v43, %s14997_s19  ;;  %v18110_v43 = vld [vmem:[#allocation2 + $0x4a] sm:$0xff] }
 0x62a   : > { %4767 = vrot.lane.b32.xlu1 %v17944_v9, %s14997_s19 }
 0x62d   : > { %5959 = vrot.lane.b32.xlu0 %v5921_v7, %s14997_s19 }
 0x62e   : > { %4771 = vrot.lane.b32.xlu1 %v17949_v22, %s14997_s19 }
 0x631   : > { %5967 = vrot.lane.b32.xlu0 %v5925_v26, %s14997_s19 }
 0x632   : > { %4775 = vrot.lane.b32.xlu1 %v17954_v19, %s14997_s19 }
 0x635   : > { %5975 = vrot.lane.b32.xlu0 %v5929_v62, %s14997_s19  ;;  %v18120_v62 = vld [vmem:[#allocation2 + $0x8a] sm:$0xff] }
 0x636   : > { %5137 = vrot.lane.b32.xlu1 %v17919_v42, %s14994_s20 }
 0x639   : > { %5529 = vrot.lane.b32.xlu0 %v17855_v3, %s14998_s22 }
 0x63a   : > { %5141 = vrot.lane.b32.xlu1 %v17924_v57, %s14994_s20 }
 0x63b   : > { %v17966_v6 = vpop.permute.xlu0 %4745 }
 0x63c   : > { %v17984_v4 = vpop.permute.xlu1 %6727 }
 0x63d   : > { %5537 = vrot.lane.b32.xlu0 %v17865_v60, %s14998_s22  ;;  %v18066_v60 = vld [vmem:[#allocation2 + $0x6a] sm:$0xff] }
 0x63e   : > { %5145 = vrot.lane.b32.xlu1 %v17929_v36, %s14994_s20 }
 0x63f   : > { %v17972_v51 = vpop.permute.xlu0 %4749 }
 0x641   : > { %5545 = vrot.lane.b32.xlu0 %v17875_v13, %s14998_s22 }
 0x642   : > { %5149 = vrot.lane.b32.xlu1 %v17934_v21, %s14994_s20 }
 0x643   : > { %v17978_v34 = vpop.permute.xlu0 %4753 }
 0x644   : > { %v17994_v23 = vpop.permute.xlu1 %6735  ;;  %v4793_v38 = vcombine.low %v17966_v6, %v17978_v34 }
 0x645   : > { %5553 = vrot.lane.b32.xlu0 %v17884_v61, %s14998_s22  ;;  %v18100_v61 = vld [vmem:[#allocation2 + $0xa] sm:$0xff] }
 0x646   : > { %5153 = vrot.lane.b32.xlu1 %v17939_v25, %s14994_s20  ;;  %v18050_v3 = vrot.slane %v4793_v38, %v15232_v17 }
 0x647   : > { %v17986_v45 = vpop.permute.xlu0 %4757 }
 0x648   : > { %v4809_v55 = vcombine.low %v17972_v51, %v17986_v45 }
 0x649   : > { %7935 = vrot.lane.b32.xlu0 %v17988_v28, %s14998_s22 }
 0x64a   : > { %5157 = vrot.lane.b32.xlu1 %v17944_v9, %s14994_s20  ;;  %v18037_v14 = vrot.slane %v4809_v55, %v15232_v17 }
 0x64b   : > { %v17996_v47 = vpop.permute.xlu0 %4761 }
 0x64c   : > { %v18004_v37 = vpop.permute.xlu1 %6743  ;;  %v4857_v40 = vcombine.low %v18050_v3, %v18037_v14 }
 0x64d   : > { %7943 = vrot.lane.b32.xlu0 %v17998_v63, %s14998_s22 }
 0x64e   : > { %5161 = vrot.lane.b32.xlu1 %v17949_v22, %s14994_s20  ;;  %v18086_v13 = vrot.slane %v4857_v40, %v15240_v29 }
 0x64f   : > { %v18006_v46 = vpop.permute.xlu0 %4765 }
 0x650   : > { %24739 = vst [vmem:[#allocation80_spill] sm:$0xff] %v18086_v13 }
 0x651   : > { %7951 = vrot.lane.b32.xlu0 %v18008_v52, %s14998_s22 }
 0x652   : > { %5165 = vrot.lane.b32.xlu1 %v17954_v19, %s14994_s20 }
 0x653   : > { %v18014_v20 = vpop.permute.xlu0 %4769 }
 0x654   : > { %v18016_v31 = vpop.permute.xlu1 %6751  ;;  %v4825_v59 = vcombine.low %v17996_v47, %v18014_v20 }
 0x655   : > { %7959 = vrot.lane.b32.xlu0 %v18020_v56, %s14998_s22 }
 0x656   : > { %7931 = vrot.lane.b32.xlu1 %v18022_v15, %s14998_s22  ;;  %v18053_v24 = vrot.slane %v4825_v59, %v15232_v17  ;;  %v18130_v59 = vld [vmem:[#allocation2 + $0xca] sm:$0xff] }
 0x657   : > { %v18032_v50 = vpop.permute.xlu0 %4773 }
 0x658   : > { %v18034_v8 = vpop.permute.xlu1 %6337  ;;  %v4841_v48 = vcombine.low %v18006_v46, %v18032_v50 }
 0x659   : > { %24733 = vst [vmem:[#allocation88_spill] sm:$0xff] %v18034_v8  ;;  %7933 = vrot.lane.b32.xlu0 %v18041_v18, %s14998_s22 }
 0x65a   : > { %7939 = vrot.lane.b32.xlu1 %v18043_v49, %s14998_s22  ;;  %v18056_v0 = vrot.slane %v4841_v48, %v15232_v17 }
 0x65b   : > { %v18058_v39 = vpop.permute.xlu0 %5135 }
 0x65c   : > { %24734 = vst [vmem:[#allocation86_spill] sm:$0xff] %v18058_v39  ;;  %v18060_v2 = vpop.permute.xlu1 %6345  ;;  %v4889_v1 = vcombine.low %v18053_v24, %v18056_v0 }
 0x65d   : > { %24735 = vst [vmem:[#allocation90_spill] sm:$0xff] %v18060_v2  ;;  %7941 = vrot.lane.b32.xlu0 %v18066_v60, %s14998_s22 }
 0x65e   : > { %7947 = vrot.lane.b32.xlu1 %v18068_v32, %s14998_s22  ;;  %v18075_v54 = vrot.slane %v4889_v1, %v15240_v29 }
 0x65f   : > { %v18077_v30 = vpop.permute.xlu0 %5139 }
 0x660   : > { %24736 = vst [vmem:[#allocation87_spill] sm:$0xff] %v18075_v54  ;;  %24737 = vst [vmem:[#allocation84_spill] sm:$0xff] %v18077_v30  ;;  %v18079_v33 = vpop.permute.xlu1 %6353  ;;  %v6807_v54 = vcombine.low %v18004_v37, %v18016_v31 }
 0x661   : > { %24738 = vst [vmem:[#allocation81_spill] sm:$0xff] %v18079_v33  ;;  %7949 = vrot.lane.b32.xlu0 %v18081_v27, %s14998_s22 }
 0x662   : > { %7955 = vrot.lane.b32.xlu1 %v18083_v10, %s14998_s22  ;;  %v18222_v42 = vrot.slane %v6807_v54, %v15232_v17 }
 0x663   : > { %v18094_v35 = vpop.permute.xlu0 %5143 }
 0x664   : > { %24740 = vst [vmem:[#allocation78_spill] sm:$0xff] %v18094_v35  ;;  %v18096_v41 = vpop.permute.xlu1 %6361  ;;  %v5183_v12 = vcombine.low %v18058_v39, %v18094_v35  ;;  %24761 = vst [vmem:[#allocation64_spill] sm:$0xff] %v18222_v42 }
 0x665   : > { %24741 = vst [vmem:[#allocation22_spill] sm:$0xff] %v18096_v41  ;;  %7957 = vrot.lane.b32.xlu0 %v18098_v44, %s14998_s22 }
 0x666   : > { %7929 = vrot.lane.b32.xlu1 %v18100_v61, %s14998_s22  ;;  %v18160_v39 = vrot.slane %v5183_v12, %v15232_v17 }
 0x667   : > { %v18106_v11 = vpop.permute.xlu0 %5147 }
 0x668   : > { %24742 = vst [vmem:[#allocation12_spill] sm:$0xff] %v18106_v11  ;;  %v18108_v53 = vpop.permute.xlu1 %5947  ;;  %v5199_v48 = vcombine.low %v18077_v30, %v18106_v11  ;;  %24753 = vst [vmem:[#allocation70_spill] sm:$0xff] %v18160_v39 }
 0x669   : > { %24743 = vst [vmem:[#allocation27_spill] sm:$0xff] %v18108_v53  ;;  %7545 = vrot.lane.b32.xlu0 %v17988_v28, %s14994_s20 }
 0x66a   : > { %7937 = vrot.lane.b32.xlu1 %v18110_v43, %s14998_s22  ;;  %v18151_v16 = vrot.slane %v5199_v48, %v15232_v17 }
 0x66b   : > { %v18116_v7 = vpop.permute.xlu0 %5151 }
 0x66c   : > { %24744 = vst [vmem:[#allocation13_spill] sm:$0xff] %v18116_v7  ;;  %v18118_v26 = vpop.permute.xlu1 %5955  ;;  %24750 = vst [vmem:[#allocation68_spill] sm:$0xff] %v18151_v16 }
 0x66d   : > { %24745 = vst [vmem:[#allocation25_spill] sm:$0xff] %v18118_v26  ;;  %7553 = vrot.lane.b32.xlu0 %v17998_v63, %s14994_s20 }
 0x66e   : > { %7945 = vrot.lane.b32.xlu1 %v18120_v62, %s14998_s22 }
 0x66f   : > { %v18126_v55 = vpop.permute.xlu0 %5155 }
 0x670   : > { %24746 = vst [vmem:[#allocation19_spill] sm:$0xff] %v18126_v55  ;;  %v18128_v38 = vpop.permute.xlu1 %5963 }
 0x671   : > { %24747 = vst [vmem:[#allocation76_spill] sm:$0xff] %v18128_v38  ;;  %7561 = vrot.lane.b32.xlu0 %v18008_v52, %s14994_s20 }
 0x672   : > { %7953 = vrot.lane.b32.xlu1 %v18130_v59, %s14998_s22 }
 0x673   : > { %v18138_v40 = vpop.permute.xlu0 %5159 }
 0x674   : > { %24748 = vst [vmem:[#allocation29_spill] sm:$0xff] %v18138_v40  ;;  %v18140_v1 = vpop.permute.xlu1 %5971  ;;  %v5215_v58 = vcombine.low %v18116_v7, %v18138_v40  ;;  %v5247_v7 = vcombine.low %v18160_v39, %v18151_v16 }
 0x675   : > { %24749 = vst [vmem:[#allocation17_spill] sm:$0xff] %v18140_v1  ;;  %7569 = vrot.lane.b32.xlu0 %v18020_v56, %s14994_s20 }
 0x676   : > { %7541 = vrot.lane.b32.xlu1 %v18022_v15, %s14994_s20  ;;  %v18167_v35 = vrot.slane %v5215_v58, %v15232_v17  ;;  %v6776_v58 = vcombine.high %v17984_v4, %v17994_v23  ;;  %v18190_v16 = vrot.slane %v5247_v7, %v15240_v29 }
 0x677   : > { %v18153_v5 = vpop.permute.xlu0 %5163 }
 0x678   : > { %24751 = vst [vmem:[#allocation63_spill] sm:$0xff] %v18153_v5  ;;  %v18155_v30 = vpop.permute.xlu1 %5525  ;;  %v5231_v11 = vcombine.low %v18126_v55, %v18153_v5  ;;  %24754 = vst [vmem:[#allocation66_spill] sm:$0xff] %v18167_v35 }
 0x679   : > { %24752 = vst [vmem:[#allocation11_spill] sm:$0xff] %v18155_v30  ;;  %7543 = vrot.lane.b32.xlu0 %v18041_v18, %s14994_s20  ;;  %24759 = vst [vmem:[#allocation55_spill] sm:$0xff] %v18190_v16 }
 0x67a   : > { %7549 = vrot.lane.b32.xlu1 %v18043_v49, %s14994_s20  ;;  %v18170_v48 = vrot.slane %v5231_v11, %v15232_v17 }
 0x67b   : > { %v6732_v40 = vpop.permute.xlu0 %6731 }
 0x67c   : > { %24755 = vst [vmem:[#allocation60_spill] sm:$0xff] %v18170_v48  ;;  %v18174_v55 = vpop.permute.xlu1 %5533  ;;  %v5279_v12 = vcombine.low %v18167_v35, %v18170_v48  ;;  %v6790_v48 = vrot.slane %v6776_v58, %v15232_v17  ;;  %v6808_v35 = vcombine.high %v18004_v37, %v18016_v31 }
 0x67d   : > { %24756 = vst [vmem:[#allocation71_spill] sm:$0xff] %v18174_v55  ;;  %7551 = vrot.lane.b32.xlu0 %v18066_v60, %s14994_s20 }
 0x67e   : > { %7557 = vrot.lane.b32.xlu1 %v18068_v32, %s14994_s20  ;;  %v18185_v11 = vrot.slane %v5279_v12, %v15240_v29  ;;  %v6822_v37 = vrot.slane %v6808_v35, %v15232_v17 }
 0x67f   : > { %v6740_v5 = vpop.permute.xlu0 %6739 }
 0x680   : > { %24757 = vst [vmem:[#allocation67_spill] sm:$0xff] %v18185_v11  ;;  %v18187_v39 = vpop.permute.xlu1 %5541  ;;  %v6792_v22 = vcombine.high %v6732_v40, %v6740_v5  ;;  %v6791_v7 = vcombine.low %v6732_v40, %v6740_v5 }
 0x681   : > { %24758 = vst [vmem:[#allocation61_spill] sm:$0xff] %v18187_v39  ;;  %7559 = vrot.lane.b32.xlu0 %v18081_v27, %s14994_s20 }
 0x682   : > { %7565 = vrot.lane.b32.xlu1 %v18083_v10, %s14994_s20  ;;  %v6806_v12 = vrot.slane %v6792_v22, %v15232_v17  ;;  %v6775_v22 = vcombine.low %v17984_v4, %v17994_v23  ;;  %v18215_v40 = vrot.slane %v6791_v7, %v15232_v17 }
 0x683   : > { %v6748_v25 = vpop.permute.xlu0 %6747 }
 0x684   : > { %v18200_v36 = vpop.permute.xlu1 %5549  ;;  %v6856_v13 = vcombine.high %v6790_v48, %v6806_v12  ;;  %v6855_v19 = vcombine.low %v6790_v48, %v6806_v12 }
 0x685   : > { %24760 = vst [vmem:[#allocation69_spill] sm:$0xff] %v18200_v36  ;;  %7567 = vrot.lane.b32.xlu0 %v18098_v44, %s14994_s20 }
 0x686   : > { %7539 = vrot.lane.b32.xlu1 %v18100_v61, %s14994_s20  ;;  %v18265_v48 = vrot.slane %v6855_v19, %v15240_v29  ;;  %v18268_v12 = vrot.slane %v6856_v13, %v15240_v29  ;;  %v6385_v13 = vcombine.low %v18034_v8, %v18060_v2 }
 0x687   : > { %v6756_v58 = vpop.permute.xlu0 %6755 }
 0x688   : > { %v18212_v16 = vpop.permute.xlu1 %4747  ;;  %v6823_v11 = vcombine.low %v6748_v25, %v6756_v58  ;;  %v6824_v5 = vcombine.high %v6748_v25, %v6756_v58  ;;  %v18230_v25 = vrot.slane %v6775_v22, %v15232_v17  ;;  %24768 = vst [vmem:[#allocation35_spill] sm:$0xff] %v18265_v48  ;;  %24769 = vst [vmem:[#allocation48_spill] sm:$0xff] %v18268_v12 }
 0x689   : > { %7155 = vrot.lane.b32.xlu0 %v17988_v28, %s14997_s19 }
 0x68a   : > { %7547 = vrot.lane.b32.xlu1 %v18110_v43, %s14994_s20  ;;  %v18226_v4 = vrot.slane %v6823_v11, %v15232_v17  ;;  %v6838_v23 = vrot.slane %v6824_v5, %v15232_v17  ;;  %v6839_v35 = vcombine.low %v18230_v25, %v18215_v40 }
 0x68b   : > { %v18232_v31 = vpop.permute.xlu0 %6341 }
 0x68c   : > { %24762 = vst [vmem:[#allocation58_spill] sm:$0xff] %v18232_v31  ;;  %v18234_v7 = vpop.permute.xlu1 %4751  ;;  %v6871_v28 = vcombine.low %v18222_v42, %v18226_v4  ;;  %v6887_v58 = vcombine.low %v6822_v37, %v6838_v23  ;;  %v6888_v54 = vcombine.high %v6822_v37, %v6838_v23 }
 0x68d   : > { %7163 = vrot.lane.b32.xlu0 %v17998_v63, %s14997_s19  ;;  %v18262_v63 = vrot.slane %v6839_v35, %v15240_v29 }
 0x68e   : > { %7555 = vrot.lane.b32.xlu1 %v18120_v62, %s14994_s20  ;;  %v18249_v5 = vrot.slane %v6871_v28, %v15240_v29  ;;  %v18252_v42 = vrot.slane %v6887_v58, %v15240_v29  ;;  %v18255_v37 = vrot.slane %v6888_v54, %v15240_v29 }
 0x68f   : > { %v18244_v11 = vpop.permute.xlu0 %6349  ;;  %24767 = vst [vmem:[#allocation42_spill] sm:$0xff] %v18262_v63 }
 0x690   : > { %24763 = vst [vmem:[#allocation54_spill] sm:$0xff] %v18244_v11  ;;  %v18246_v22 = vpop.permute.xlu1 %4755  ;;  %24764 = vst [vmem:[#allocation36_spill] sm:$0xff] %v18249_v5  ;;  %v6401_v23 = vcombine.low %v18232_v31, %v18244_v11 }
 0x691   : > { %24765 = vst [vmem:[#allocation34_spill] sm:$0xff] %v18252_v42  ;;  %24766 = vst [vmem:[#allocation37_spill] sm:$0xff] %v18255_v37  ;;  %7171 = vrot.lane.b32.xlu0 %v18008_v52, %s14997_s19  ;;  %v6417_v52 = vcombine.low %v18079_v33, %v18096_v41  ;;  %v18409_v41 = vld [vmem:[#allocation2 + $0x70] sm:$0xff] }
 0x692   : > { %7563 = vrot.lane.b32.xlu1 %v18130_v59, %s14994_s20  ;;  %v6409_v54 = vrot.slane %v6401_v23, %v15232_v17 }
 0x693   : > { %v18272_v28 = vpop.permute.xlu0 %6357 }
 0x694   : > { %24770 = vst [vmem:[#allocation82_spill] sm:$0xff] %v18272_v28  ;;  %v18274_v58 = vpop.permute.xlu1 %4759 }
 0x695   : > { %7179 = vrot.lane.b32.xlu0 %v18020_v56, %s14997_s19  ;;  %v6393_v56 = vrot.slane %v6385_v13, %v15232_v17 }
 0x696   : > { %7151 = vrot.lane.b32.xlu1 %v18022_v15, %s14997_s19  ;;  %v6425_v15 = vrot.slane %v6417_v52, %v15232_v17 }
 0x697   : > { %v18293_v31 = vpop.permute.xlu0 %6365  ;;  %v6449_v23 = vcombine.low %v6393_v56, %v6409_v54  ;;  %v6450_v37 = vcombine.high %v6393_v56, %v6409_v54 }
 0x698   : > { %24771 = vst [vmem:[#allocation77_spill] sm:$0xff] %v18293_v31  ;;  %v18295_v19 = vpop.permute.xlu1 %4763  ;;  %v6433_v8 = vcombine.low %v18272_v28, %v18293_v31  ;;  %v18444_v28 = vld [vmem:[#allocation2 + $0xf0] sm:$0xff]  ;;  %v5573_v31 = vcombine.low %v18155_v30, %v18174_v55 }
 0x699   : > { %7153 = vrot.lane.b32.xlu0 %v18041_v18, %s14997_s19  ;;  %v18325_v54 = vrot.slane %v6449_v23, %v15240_v29  ;;  %v18328_v13 = vrot.slane %v6450_v37, %v15240_v29 }
 0x69a   : > { %v6441_v35 = vrot.slane %v6433_v8, %v15232_v17  ;;  %7159 = vrot.lane.b32.xlu1 %v18043_v49, %s14997_s19  ;;  %v18480_v55 = vrot.slane %v5573_v31, %v15232_v17 }
 0x69b   : > { %v18306_v12 = vpop.permute.xlu0 %5951  ;;  %24776 = vst [vmem:[#allocation94_spill] sm:$0xff] %v18325_v54  ;;  %24777 = vst [vmem:[#allocation91_spill] sm:$0xff] %v18328_v13 }
 0x69c   : > { %24772 = vst [vmem:[#allocation92_spill] sm:$0xff] %v18306_v12  ;;  %v18308_v2 = vpop.permute.xlu1 %4767  ;;  %v6481_v11 = vcombine.low %v6425_v15, %v6441_v35  ;;  %v6482_v33 = vcombine.high %v6425_v15, %v6441_v35  ;;  %24800 = vst [vmem:[#allocation74_spill] sm:$0xff] %v18480_v55 }
 0x69d   : > { %7161 = vrot.lane.b32.xlu0 %v18066_v60, %s14997_s19  ;;  %v4945_v60 = vcombine.low %v18234_v7, %v18274_v58 }
 0x69e   : > { %7167 = vrot.lane.b32.xlu1 %v18068_v32, %s14997_s19  ;;  %v18315_v18 = vrot.slane %v6481_v11, %v15240_v29  ;;  %v18318_v8 = vrot.slane %v6482_v33, %v15240_v29  ;;  %v4929_v11 = vcombine.low %v18212_v16, %v18246_v22  ;;  %v5995_v32 = vcombine.low %v18108_v53, %v18118_v26 }
 0x69f   : > { %v18320_v49 = vpop.permute.xlu0 %5959 }
 0x6a0   : > { %24773 = vst [vmem:[#allocation89_spill] sm:$0xff] %v18315_v18  ;;  %24774 = vst [vmem:[#allocation102_spill] sm:$0xff] %v18318_v8  ;;  %v18322_v52 = vpop.permute.xlu1 %4771  ;;  %v6011_v15 = vcombine.low %v18306_v12, %v18320_v49 }
 0x6a1   : > { %24775 = vst [vmem:[#allocation101_spill] sm:$0xff] %v18320_v49  ;;  %7169 = vrot.lane.b32.xlu0 %v18081_v27, %s14997_s19  ;;  %v4961_v37 = vcombine.low %v18295_v19, %v18322_v52  ;;  %v18349_v27 = vrot.slane %v4945_v60, %v15232_v17  ;;  %v18364_v60 = vrot.slane %v4929_v11, %v15232_v17 }
 0x6a2   : > { %7175 = vrot.lane.b32.xlu1 %v18083_v10, %s14997_s19  ;;  %v6027_v10 = vcombine.low %v18128_v38, %v18140_v1  ;;  %v18383_v11 = vrot.slane %v6011_v15, %v15232_v17  ;;  %v18398_v1 = vrot.slane %v5995_v32, %v15232_v17 }
 0x6a3   : > { %v18344_v35 = vpop.permute.xlu0 %5967  ;;  %v18367_v33 = vrot.slane %v4961_v37, %v15232_v17  ;;  %v4993_v53 = vcombine.low %v18364_v60, %v18349_v27 }
 0x6a4   : > { %24778 = vst [vmem:[#allocation85_spill] sm:$0xff] %v18344_v35  ;;  %v18346_v56 = vpop.permute.xlu1 %4775  ;;  %24781 = vst [vmem:[#allocation15_spill] sm:$0xff] %v18383_v11 }
 0x6a5   : > { %v4977_v23 = vcombine.low %v18308_v2, %v18346_v56  ;;  %7177 = vrot.lane.b32.xlu0 %v18098_v44, %s14997_s19  ;;  %24784 = vst [vmem:[#allocation23_spill] sm:$0xff] %v18398_v1 }
 0x6a6   : > { %7149 = vrot.lane.b32.xlu1 %v18100_v61, %s14997_s19  ;;  %v18378_v61 = vld [vmem:[#allocation2 + $0x30] sm:$0xff] }
 0x6a7   : > { %v18370_v12 = vrot.slane %v4977_v23, %v15232_v17  ;;  %v18372_v49 = vpop.permute.xlu0 %5975  ;;  %v18390_v23 = vrot.slane %v6027_v10, %v15232_v17 }
 0x6a8   : > { %24779 = vst [vmem:[#allocation83_spill] sm:$0xff] %v18372_v49  ;;  %v18374_v44 = vpop.permute.xlu1 %5137  ;;  %v6043_v38 = vcombine.low %v18344_v35, %v18372_v49 }
 0x6a9   : > { %24780 = vst [vmem:[#allocation97_spill] sm:$0xff] %v18374_v44  ;;  %v5025_v37 = vcombine.low %v18367_v33, %v18370_v12  ;;  %6733 = vrot.lane.b32.xlu0 %v18378_v61, %s14998_s22  ;;  %24782 = vst [vmem:[#allocation14_spill] sm:$0xff] %v18390_v23 }
 0x6aa   : > { %v18393_v26 = vrot.slane %v6043_v38, %v15232_v17  ;;  %7157 = vrot.lane.b32.xlu1 %v18110_v43, %s14997_s19  ;;  %v6059_v38 = vcombine.low %v18398_v1, %v18383_v11  ;;  %v18416_v43 = vrot.slane %v4993_v53, %v15240_v29  ;;  %v18429_v1 = vld [vmem:[#allocation2 + $0xb0] sm:$0xff] }
 0x6ab   : > { %v18400_v15 = vpop.permute.xlu0 %5529  ;;  %v18405_v49 = vrot.slane %v5025_v37, %v15240_v29 }
 0x6ac   : > { %24783 = vst [vmem:[#allocation111_spill] sm:$0xff] %v18393_v26  ;;  %24785 = vst [vmem:[#allocation20_spill] sm:$0xff] %v18400_v15  ;;  %v18402_v35 = vpop.permute.xlu1 %5141  ;;  %v6091_v10 = vcombine.low %v18390_v23, %v18393_v26  ;;  %v18434_v53 = vrot.slane %v6059_v38, %v15240_v29  ;;  %v18450_v38 = vld [vmem:[#allocation2 + $0x10] sm:$0xff] }
 0x6ad   : > { %24786 = vst [vmem:[#allocation50_spill] sm:$0xff] %v18402_v35  ;;  %24787 = vst [vmem:[#allocation65_spill] sm:$0xff] %v18405_v49  ;;  %6741 = vrot.lane.b32.xlu0 %v18409_v41, %s14998_s22 }
 0x6ae   : > { %24788 = vst [vmem:[#allocation62_spill] sm:$0xff] %v18416_v43  ;;  %7165 = vrot.lane.b32.xlu1 %v18120_v62, %s14997_s19  ;;  %v18425_v23 = vrot.slane %v6091_v10, %v15240_v29  ;;  %24792 = vst [vmem:[#allocation16_spill] sm:$0xff] %v18434_v53 }
 0x6af   : > { %v18420_v32 = vpop.permute.xlu0 %5537 }
 0x6b0   : > { %24789 = vst [vmem:[#allocation112_spill] sm:$0xff] %v18420_v32  ;;  %v18422_v37 = vpop.permute.xlu1 %5145  ;;  %24791 = vst [vmem:[#allocation38_spill] sm:$0xff] %v18425_v23  ;;  %v5589_v26 = vcombine.low %v18400_v15, %v18420_v32 }
 0x6b1   : > { %24790 = vst [vmem:[#allocation39_spill] sm:$0xff] %v18422_v37  ;;  %6749 = vrot.lane.b32.xlu0 %v18429_v1, %s14998_s22 }
 0x6b2   : > { %7173 = vrot.lane.b32.xlu1 %v18130_v59, %s14997_s19  ;;  %v5605_v59 = vcombine.low %v18187_v39, %v18200_v36  ;;  %v18465_v32 = vrot.slane %v5589_v26, %v15232_v17  ;;  %v18469_v39 = vld [vmem:[#allocation2 + $0x50] sm:$0xff] }
 0x6b3   : > { %v18438_v62 = vpop.permute.xlu0 %5545 }
 0x6b4   : > { %24793 = vst [vmem:[#allocation57_spill] sm:$0xff] %v18438_v62  ;;  %v18440_v11 = vpop.permute.xlu1 %5149  ;;  %24797 = vst [vmem:[#allocation46_spill] sm:$0xff] %v18465_v32  ;;  %v18472_v36 = vrot.slane %v5605_v59, %v15232_v17  ;;  %v5637_v59 = vcombine.low %v18480_v55, %v18465_v32  ;;  %v18504_v55 = vld [vmem:[#allocation2 + $0xd0] sm:$0xff] }
 0x6b5   : > { %24794 = vst [vmem:[#allocation56_spill] sm:$0xff] %v18440_v11  ;;  %6757 = vrot.lane.b32.xlu0 %v18444_v28, %s14998_s22  ;;  %v5335_v49 = vcombine.low %v18402_v35, %v18440_v11 }
 0x6b6   : > { %6729 = vrot.lane.b32.xlu1 %v18450_v38, %s14998_s22  ;;  %24798 = vst [vmem:[#allocation118_spill] sm:$0xff] %v18472_v36  ;;  %v18507_v32 = vrot.slane %v5637_v59, %v15240_v29 }
 0x6b7   : > { %v18458_v10 = vpop.permute.xlu0 %5553  ;;  %v18522_v48 = vrot.slane %v5335_v49, %v15232_v17 }
 0x6b8   : > { %24795 = vst [vmem:[#allocation33_spill] sm:$0xff] %v18458_v10  ;;  %v18460_v53 = vpop.permute.xlu1 %5153  ;;  %v5621_v15 = vcombine.low %v18438_v62, %v18458_v10  ;;  %24804 = vst [vmem:[#allocation52_spill] sm:$0xff] %v18507_v32 }
 0x6b9   : > { %24796 = vst [vmem:[#allocation49_spill] sm:$0xff] %v18460_v53  ;;  %6343 = vrot.lane.b32.xlu0 %v18378_v61, %s14994_s20  ;;  %24806 = vst [vmem:[#allocation105_spill] sm:$0xff] %v18522_v48 }
 0x6ba   : > { %v18475_v30 = vrot.slane %v5621_v15, %v15232_v17  ;;  %6737 = vrot.lane.b32.xlu1 %v18469_v39, %s14998_s22  ;;  %v5924_v15 = vld [vmem:[#allocation2 + $0x90] sm:$0xff] }
 0x6bb   : > { %v18482_v62 = vpop.permute.xlu0 %7935 }
 0x6bc   : > { %24799 = vst [vmem:[#allocation45_spill] sm:$0xff] %v18475_v30  ;;  %v18484_v26 = vpop.permute.xlu1 %5157  ;;  %v5669_v10 = vcombine.low %v18472_v36, %v18475_v30  ;;  %v5319_v36 = vcombine.low %v18374_v44, %v18422_v37 }
 0x6bd   : > { %24801 = vst [vmem:[#allocation75_spill] sm:$0xff] %v18484_v26  ;;  %6351 = vrot.lane.b32.xlu0 %v18409_v41, %s14994_s20 }
 0x6be   : > { %6745 = vrot.lane.b32.xlu1 %v5924_v15, %s14998_s22  ;;  %v18498_v43 = vrot.slane %v5669_v10, %v15240_v29  ;;  %v18529_v44 = vrot.slane %v5319_v36, %v15232_v17 }
 0x6bf   : > { %v18493_v23 = vpop.permute.xlu0 %7943 }
 0x6c0   : > { %v18495_v31 = vpop.permute.xlu1 %5161  ;;  %24803 = vst [vmem:[#allocation18_spill] sm:$0xff] %v18498_v43  ;;  %24807 = vst [vmem:[#allocation24_spill] sm:$0xff] %v18529_v44 }
 0x6c1   : > { %24802 = vst [vmem:[#allocation119_spill] sm:$0xff] %v18495_v31  ;;  %6359 = vrot.lane.b32.xlu0 %v18429_v1, %s14994_s20  ;;  %v5351_v30 = vcombine.low %v18460_v53, %v18495_v31  ;;  %v5383_v31 = vcombine.low %v18529_v44, %v18522_v48 }
 0x6c2   : > { %6753 = vrot.lane.b32.xlu1 %v18504_v55, %s14998_s22 }
 0x6c3   : > { %v18515_v10 = vpop.permute.xlu0 %7951  ;;  %v18532_v37 = vrot.slane %v5351_v30, %v15232_v17 }
 0x6c4   : > { %v18517_v35 = vpop.permute.xlu1 %5165 }
 0x6c5   : > { %24805 = vst [vmem:[#allocation99_spill] sm:$0xff] %v18517_v35  ;;  %v5367_v59 = vcombine.low %v18484_v26, %v18517_v35  ;;  %6367 = vrot.lane.b32.xlu0 %v18444_v28, %s14994_s20  ;;  %24808 = vst [vmem:[#allocation117_spill] sm:$0xff] %v18532_v37  ;;  %v18559_v35 = vrot.slane %v5383_v31, %v15240_v29  ;;  %v8129_v31 = vcombine.low %v18482_v62, %v18493_v23 }
 0x6c6   : > { %6339 = vrot.lane.b32.xlu1 %v18450_v38, %s14994_s20 }
 0x6c7   : > { %v18535_v53 = vrot.slane %v5367_v59, %v15232_v17  ;;  %v18539_v49 = vpop.permute.xlu0 %7959  ;;  %24812 = vst [vmem:[#allocation114_spill] sm:$0xff] %v18559_v35 }
 0x6c8   : > { %v18541_v11 = vpop.permute.xlu1 %7931 }
 0x6c9   : > { %24809 = vst [vmem:[#allocation106_spill] sm:$0xff] %v18535_v53  ;;  %v5415_v36 = vcombine.low %v18532_v37, %v18535_v53  ;;  %5953 = vrot.lane.b32.xlu0 %v18378_v61, %s14997_s19 }
 0x6ca   : > { %6347 = vrot.lane.b32.xlu1 %v18469_v39, %s14994_s20 }
 0x6cb   : > { %v18552_v30 = vrot.slane %v5415_v36, %v15240_v29  ;;  %v18554_v59 = vpop.permute.xlu0 %7933 }
 0x6cc   : > { %24811 = vst [vmem:[#allocation120_spill] sm:$0xff] %v18554_v59  ;;  %v18556_v26 = vpop.permute.xlu1 %7939 }
 0x6cd   : > { %24810 = vst [vmem:[#allocation116_spill] sm:$0xff] %v18552_v30  ;;  %5961 = vrot.lane.b32.xlu0 %v18409_v41, %s14997_s19  ;;  %v8113_v36 = vcombine.low %v18541_v11, %v18556_v26  ;;  %v8161_v41 = vcombine.low %v18515_v10, %v18539_v49 }
 0x6ce   : > { %6355 = vrot.lane.b32.xlu1 %v5924_v15, %s14994_s20 }
 0x6cf   : > { %v18566_v44 = vpop.permute.xlu0 %7941  ;;  %v18585_v53 = vrot.slane %v8113_v36, %v15232_v17  ;;  %v18595_v30 = vrot.slane %v8161_v41, %v15232_v17 }
 0x6d0   : > { %24813 = vst [vmem:[#allocation121_spill] sm:$0xff] %v18566_v44  ;;  %v18568_v48 = vpop.permute.xlu1 %7947 }
 0x6d1   : > { %5969 = vrot.lane.b32.xlu0 %v18429_v1, %s14997_s19  ;;  %v18592_v1 = vrot.slane %v8129_v31, %v15232_v17 }
 0x6d2   : > { %6363 = vrot.lane.b32.xlu1 %v18504_v55, %s14994_s20 }
 0x6d3   : > { %v18580_v61 = vpop.permute.xlu0 %7949  ;;  %v8177_v42 = vcombine.low %v18585_v53, %v18592_v1 }
 0x6d4   : > { %v18582_v37 = vpop.permute.xlu1 %7955 }
 0x6d5   : > { %v8145_v35 = vcombine.low %v18568_v48, %v18582_v37  ;;  %5977 = vrot.lane.b32.xlu0 %v18444_v28, %s14997_s19  ;;  %v18622_v41 = vrot.slane %v8177_v42, %v15240_v29  ;;  %v4810_v42 = vcombine.high %v17972_v51, %v17986_v45  ;;  %v4890_v45 = vcombine.high %v18053_v24, %v18056_v0 }
 0x6d6   : > { %5949 = vrot.lane.b32.xlu1 %v18450_v38, %s14997_s19 }
 0x6d7   : > { %v18598_v32 = vrot.slane %v8145_v35, %v15232_v17  ;;  %v18602_v36 = vpop.permute.xlu0 %7957  ;;  %24818 = vst [vmem:[#allocation100_spill] sm:$0xff] %v18622_v41  ;;  %v24826_v41 = vld [vmem:[#allocation59_spill] sm:$0xff] }
 0x6d8   : > { %v18604_v43 = vpop.permute.xlu1 %7929 }
 0x6d9   : > { %24814 = vst [vmem:[#allocation53_spill] sm:$0xff] %v18604_v43  ;;  %v8209_v28 = vcombine.low %v18598_v32, %v18595_v30  ;;  %5531 = vrot.lane.b32.xlu0 %v17924_v57, %s14998_s22 }
 0x6da   : > { %5957 = vrot.lane.b32.xlu1 %v18469_v39, %s14997_s19  ;;  %v4842_v39 = vcombine.high %v18006_v46, %v18032_v50  ;;  %v8025_v46 = vcombine.low %v18580_v61, %v18602_v36  ;;  %v4794_v50 = vcombine.high %v17966_v6, %v17978_v34  ;;  %v4858_v6 = vcombine.high %v18050_v3, %v18037_v14 }
 0x6db   : > { %v18615_v35 = vrot.slane %v8209_v28, %v15240_v29  ;;  %v18617_v38 = vpop.permute.xlu0 %7545 }
 0x6dc   : > { %24816 = vst [vmem:[#allocation40_spill] sm:$0xff] %v18617_v38  ;;  %v18619_v31 = vpop.permute.xlu1 %7937  ;;  %v4856_v51 = vrot.slane %v4842_v39, %v15232_v17  ;;  %v24822_v39 = vld [vmem:[#allocation93_spill] sm:$0xff]  ;;  %v18673_v0 = vrot.slane %v8025_v46, %v15232_v17 }
 0x6dd   : > { %24815 = vst [vmem:[#allocation113_spill] sm:$0xff] %v18615_v35  ;;  %24817 = vst [vmem:[#allocation122_spill] sm:$0xff] %v18619_v31  ;;  %5539 = vrot.lane.b32.xlu0 %v17934_v21, %s14998_s22  ;;  %v7977_v8 = vcombine.low %v18604_v43, %v18619_v31  ;;  %v4826_v21 = vcombine.high %v17996_v47, %v18014_v20  ;;  %v24830_v35 = vld [vmem:[#allocation80_spill] sm:$0xff] }
 0x6de   : > { %5965 = vrot.lane.b32.xlu1 %v5924_v15, %s14997_s19  ;;  %v7993_v15 = vcombine.low %v18554_v59, %v18566_v44  ;;  %24824 = vst [vmem:[#allocation98_spill] sm:$0xff] %v18673_v0  ;;  %v4904_v59 = vrot.slane %v4890_v45, %v15240_v29  ;;  %v24840_v31 = vld [vmem:[#allocation96_spill] sm:$0xff] }
 0x6df   : > { %v18631_v28 = vpop.permute.xlu0 %7553  ;;  %v18659_v20 = vrot.slane %v7977_v8, %v15232_v17  ;;  %v4840_v34 = vrot.slane %v4826_v21, %v15232_v17 }
 0x6e0   : > { %24819 = vst [vmem:[#allocation30_spill] sm:$0xff] %v18631_v28  ;;  %v18633_v13 = vpop.permute.xlu1 %7945  ;;  %v18670_v24 = vrot.slane %v7993_v15, %v15232_v17 }
 0x6e1   : > { %5547 = vrot.lane.b32.xlu0 %v17944_v9, %s14998_s22  ;;  %24821 = vst [vmem:[#allocation107_spill] sm:$0xff] %v18659_v20  ;;  %v4905_v14 = vcombine.low %v4840_v34, %v4856_v51 }
 0x6e2   : > { %5973 = vrot.lane.b32.xlu1 %v18504_v55, %s14997_s19  ;;  %v4824_v55 = vrot.slane %v4810_v42, %v15232_v17  ;;  %24823 = vst [vmem:[#allocation43_spill] sm:$0xff] %v18670_v24  ;;  %v4808_v42 = vrot.slane %v4794_v50, %v15232_v17  ;;  %v8041_v46 = vcombine.low %v18659_v20, %v18670_v24  ;;  %v24831_v50 = vld [vmem:[#allocation47_spill] sm:$0xff]  ;;  %s14999_s19 = smov 116  }
 0x6e3   : > { %v18654_v47 = vpop.permute.xlu0 %7561  ;;  %v4913_v24 = vrot.slane %v4905_v14, %v15240_v29 }
 0x6e4   : > { %24820 = vst [vmem:[#allocation44_spill] sm:$0xff] %v18654_v47  ;;  %v18656_v9 = vpop.permute.xlu1 %7953  ;;  %v4873_v44 = vcombine.low %v4808_v42, %v4824_v55 }
 0x6e5   : > { %v8009_v57 = vcombine.low %v18633_v13, %v18656_v9  ;;  %5555 = vrot.lane.b32.xlu0 %v24822_v39, %s14998_s22  ;;  %v24829_v39 = vld [vmem:[#allocation87_spill] sm:$0xff] }
 0x6e6   : > { %5527 = vrot.lane.b32.xlu1 %v24826_v41, %s14998_s22  ;;  %v4922_v15 = vcombine.high %v24830_v35, %v24829_v39  ;;  %v4872_v41 = vrot.slane %v4858_v6, %v15240_v29  ;;  %v4906_v39 = vcombine.high %v4840_v34, %v4856_v51  ;;  %v4881_v6 = vrot.slane %v4873_v44, %v15240_v29 }
 0x6e7   : > { %v18676_v8 = vrot.slane %v8009_v57, %v15232_v17  ;;  %v18681_v3 = vpop.permute.xlu0 %7569 }
 0x6e8   : > { %24827 = vst [vmem:[#allocation73_spill] sm:$0xff] %v18681_v3  ;;  %v18683_v21 = vpop.permute.xlu1 %7541  ;;  %v4924_v20 = vcombine.high %v4872_v41, %v4904_v59  ;;  %v4920_v14 = vrot.slane %v4906_v39, %v15240_v29  ;;  %v7771_v51 = vcombine.low %v18654_v47, %v18681_v3  ;;  %v4978_v39 = vcombine.high %v18308_v2, %v18346_v56 }
 0x6e9   : > { %24825 = vst [vmem:[#allocation108_spill] sm:$0xff] %v18676_v8  ;;  %24828 = vst [vmem:[#allocation95_spill] sm:$0xff] %v18683_v21  ;;  %v8073_v57 = vcombine.low %v18676_v8, %v18673_v0  ;;  %5066 = vrot.lane.b32.xlu0 %v4922_v15, %s14988_s11  ;;  %v18705_v8 = vrot.slane %v8041_v46, %v15240_v29  ;;  %v4874_v15 = vcombine.high %v4808_v42, %v4824_v55  ;;  %v24839_v42 = vld [vmem:[#allocation66_spill] sm:$0xff] }
 0x6ea   : > { %5535 = vrot.lane.b32.xlu1 %v24831_v50, %s14998_s22  ;;  %v24836_v50 = vld [vmem:[#allocation41_spill] sm:$0xff]  ;;  %v4926_v0 = vcombine.high %v4881_v6, %v4913_v24  ;;  %v4962_v2 = vcombine.high %v18295_v19, %v18322_v52  ;;  %v5026_v19 = vcombine.high %v18367_v33, %v18370_v12 }
 0x6eb   : > { %v18697_v43 = vrot.slane %v8073_v57, %v15240_v29  ;;  %v18699_v35 = vpop.permute.xlu0 %7543  ;;  %24835 = vst [vmem:[#allocation103_spill] sm:$0xff] %v18705_v8  ;;  %v4888_v44 = vrot.slane %v4874_v15, %v15240_v29 }
 0x6ec   : > { %24833 = vst [vmem:[#allocation26_spill] sm:$0xff] %v18699_v35  ;;  %v18701_v45 = vpop.permute.xlu1 %7549  ;;  %v4976_v12 = vrot.slane %v4962_v2, %v15232_v17 }
 0x6ed   : > { %24832 = vst [vmem:[#allocation32_spill] sm:$0xff] %v18697_v43  ;;  %24834 = vst [vmem:[#allocation123_spill] sm:$0xff] %v18701_v45  ;;  %5074 = vrot.lane.b32.xlu0 %v4924_v20, %s14987_s10  ;;  %v7723_v55 = vcombine.low %v18683_v21, %v18701_v45  ;;  %v24838_v20 = vld [vmem:[#allocation60_spill] sm:$0xff]  ;;  %v4928_v15 = vcombine.high %v4888_v44, %v4920_v14 }
 0x6ee   : > { %5543 = vrot.lane.b32.xlu1 %v24836_v50, %s14998_s22  ;;  %v5280_v46 = vcombine.high %v24839_v42, %v24838_v20  ;;  %v7739_v50 = vcombine.low %v18617_v38, %v18631_v28  ;;  %v4923_v42 = vcombine.low %v4872_v41, %v4904_v59  ;;  %v24841_v38 = vld [vmem:[#allocation68_spill] sm:$0xff]  ;;  %v24842_v28 = vld [vmem:[#allocation70_spill] sm:$0xff]  ;;  %v24844_v41 = vld [vmem:[#allocation55_spill] sm:$0xff] }
 0x6ef   : > { %v18713_v34 = vpop.permute.xlu0 %7551  ;;  %v18737_v45 = vrot.slane %v7723_v55, %v15232_v17  ;;  %v5248_v47 = vcombine.high %v24842_v28, %v24841_v38  ;;  %v18752_v55 = vrot.slane %v7771_v51, %v15232_v17  ;;  %v24843_v28 = vld [vmem:[#allocation67_spill] sm:$0xff] }
 0x6f0   : > { %24837 = vst [vmem:[#allocation21_spill] sm:$0xff] %v18713_v34  ;;  %v18715_v57 = vpop.permute.xlu1 %7557  ;;  %v18749_v56 = vrot.slane %v7739_v50, %v15232_v17  ;;  %v5294_v59 = vrot.slane %v5280_v46, %v15240_v29  ;;  %v5312_v51 = vcombine.high %v24844_v41, %v24843_v28 }
 0x6f1   : > { %5082 = vrot.lane.b32.xlu0 %v4926_v0, %s14982_s4  ;;  %v5262_v33 = vrot.slane %v5248_v47, %v15240_v29 }
 0x6f2   : > { %5551 = vrot.lane.b32.xlu1 %v24840_v31, %s14998_s22  ;;  %v4946_v31 = vcombine.high %v18234_v7, %v18274_v58  ;;  %v4930_v7 = vcombine.high %v18212_v16, %v18246_v22  ;;  %v4992_v58 = vrot.slane %v4978_v39, %v15232_v17  ;;  %v7787_v50 = vcombine.low %v18737_v45, %v18749_v56  ;;  %s15000_s22 = smov 124  }
 0x6f3   : > { %v18732_v21 = vpop.permute.xlu0 %7559  ;;  %v4994_v22 = vcombine.high %v18364_v60, %v18349_v27  ;;  %v18790_v27 = vrot.slane %v5026_v19, %v15240_v29  ;;  %v4927_v60 = vcombine.low %v4888_v44, %v4920_v14 }
 0x6f4   : > { %v18734_v0 = vpop.permute.xlu1 %7565  ;;  %v4960_v16 = vrot.slane %v4946_v31, %v15232_v17  ;;  %v5314_v31 = vcombine.high %v5262_v33, %v5294_v59  ;;  %v18793_v2 = vrot.slane %v7787_v50, %v15240_v29  ;;  %v24847_v50 = vld [vmem:[#allocation64_spill] sm:$0xff] }
 0x6f5   : > { %v7755_v20 = vcombine.low %v18715_v57, %v18734_v0  ;;  %5090 = vrot.lane.b32.xlu0 %v4928_v15, %s14983_s6  ;;  %v4925_v15 = vcombine.low %v4881_v6, %v4913_v24 }
 0x6f6   : > { %5070 = vrot.lane.b32.xlu1 %v4923_v42, %s14986_s23  ;;  %v5041_v42 = vcombine.low %v4976_v12, %v4992_v58  ;;  %24846 = vst [vmem:[#allocation109_spill] sm:$0xff] %v18793_v2 }
 0x6f7   : > { %v18755_v3 = vrot.slane %v7755_v20, %v15232_v17  ;;  %v18764_v52 = vpop.permute.xlu0 %7567  ;;  %v4944_v20 = vrot.slane %v4930_v7, %v15232_v17 }
 0x6f8   : > { %v18766_v38 = vpop.permute.xlu1 %7539  ;;  %v18809_v44 = vrot.slane %v5041_v42, %v15240_v29  ;;  %v7603_v42 = vcombine.low %v18699_v35, %v18713_v34  ;;  %v7635_v7 = vcombine.low %v18732_v21, %v18764_v52  ;;  %v8162_v35 = vcombine.high %v18515_v10, %v18539_v49 }
 0x6f9   : > { %v7819_v46 = vcombine.low %v18755_v3, %v18752_v55  ;;  %5456 = vrot.lane.b32.xlu0 %v5312_v51, %s14988_s11  ;;  %v5009_v47 = vcombine.low %v4944_v20, %v4960_v16  ;;  %v18797_v51 = vrot.slane %v4994_v22, %v15240_v29  ;;  %v6872_v22 = vcombine.high %v24847_v50, %v18226_v4 }
 0x6fa   : > { %5078 = vrot.lane.b32.xlu1 %v4925_v15, %s14984_s8  ;;  %v5010_v28 = vcombine.high %v4944_v20, %v4960_v16  ;;  %v6904_v20 = vcombine.high %v18262_v63, %v18249_v5  ;;  %v18848_v50 = vrot.slane %v7603_v42, %v15232_v17  ;;  %v8106_v63 = vcombine.high %v18705_v8, %v18697_v43  ;;  %v24864_v8 = vld [vmem:[#allocation35_spill] sm:$0xff] }
 0x6fb   : > { %v18782_v39 = vrot.slane %v7819_v46, %v15240_v29  ;;  %v18785_v24 = vpop.permute.xlu0 %7155  ;;  %v5042_v46 = vcombine.high %v4976_v12, %v4992_v58  ;;  %v5059_v14 = vcombine.low %v18797_v51, %v18790_v27  ;;  %v18817_v58 = vrot.slane %v5009_v47, %v15240_v29 }
 0x6fc   : > { %v18787_v6 = vpop.permute.xlu1 %7547  ;;  %v6840_v12 = vcombine.high %v18230_v25, %v18215_v40  ;;  %v6886_v47 = vrot.slane %v6872_v22, %v15240_v29 }
 0x6fd   : > { %24845 = vst [vmem:[#allocation31_spill] sm:$0xff] %v18782_v39  ;;  %5464 = vrot.lane.b32.xlu0 %v5314_v31, %s14987_s10  ;;  %v7587_v31 = vcombine.low %v18766_v38, %v18787_v6  ;;  %v5061_v16 = vcombine.low %v18817_v58, %v18809_v44 }
 0x6fe   : > { %5086 = vrot.lane.b32.xlu1 %v4927_v60, %s14985_s9  ;;  %v5313_v60 = vcombine.low %v5262_v33, %v5294_v59  ;;  %v18833_v33 = vrot.slane %v5042_v46, %v15240_v29  ;;  %v18851_v46 = vrot.slane %v7635_v7, %v15232_v17 }
 0x6ff   : > { %v18802_v15 = vpop.permute.xlu0 %7163  ;;  %v18836_v40 = vrot.slane %v7587_v31, %v15232_v17 }
 0x700   : > { %v18804_v19 = vpop.permute.xlu1 %7555 }
 0x701   : > { %5098 = vrot.lane.b32.xlu0 %v5059_v14, %s14986_s23  ;;  %v18845_v14 = vrot.slane %v5010_v28, %v15240_v29  ;;  %v7651_v42 = vcombine.low %v18836_v40, %v18848_v50 }
 0x702   : > { %5460 = vrot.lane.b32.xlu1 %v5313_v60, %s14986_s23  ;;  %v6854_v60 = vrot.slane %v6840_v12, %v15240_v29 }
 0x703   : > { %v18826_v4 = vpop.permute.xlu0 %7171  ;;  %v5063_v28 = vcombine.low %v18845_v14, %v18833_v33 }
 0x704   : > { %v18828_v59 = vpop.permute.xlu1 %7563 }
 0x705   : > { %v7619_v25 = vcombine.low %v18804_v19, %v18828_v59  ;;  %5106 = vrot.lane.b32.xlu0 %v5061_v16, %s14984_s8  ;;  %v6905_v16 = vcombine.low %v6854_v60, %v6886_v47 }
 0x706   : > { %7048 = vrot.lane.b32.xlu1 %v6904_v20, %s14988_s11  ;;  %v8210_v20 = vcombine.high %v18598_v32, %v18595_v30  ;;  %v8178_v32 = vcombine.high %v18585_v53, %v18592_v1  ;;  %v8130_v30 = vcombine.high %v18482_v62, %v18493_v23  ;;  %v7852_v53 = vcombine.high %v18793_v2, %v18782_v39 }
 0x707   : > { %v18854_v31 = vrot.slane %v7619_v25, %v15232_v17  ;;  %v18858_v41 = vpop.permute.xlu0 %7179  ;;  %v8146_v25 = vcombine.high %v18568_v48, %v18582_v37  ;;  %v6514_v37 = vcombine.high %v18325_v54, %v18315_v18  ;;  %v18913_v23 = vrot.slane %v8162_v35, %v15232_v17 }
 0x708   : > { %v18860_v22 = vpop.permute.xlu1 %7151  ;;  %v7788_v1 = vcombine.high %v18737_v45, %v18749_v56  ;;  %v18929_v35 = vrot.slane %v8130_v30, %v15232_v17  ;;  %v8010_v45 = vcombine.high %v18633_v13, %v18656_v9  ;;  %v8026_v13 = vcombine.high %v18580_v61, %v18602_v36  ;;  %v24854_v30 = vld [vmem:[#allocation91_spill] sm:$0xff]  ;;  %v24857_v61 = vld [vmem:[#allocation121_spill] sm:$0xff]  ;;  %v24858_v36 = vld [vmem:[#allocation120_spill] sm:$0xff] }
 0x709   : > { %v7683_v7 = vcombine.low %v18854_v31, %v18851_v46  ;;  %5114 = vrot.lane.b32.xlu0 %v5063_v28, %s14985_s9  ;;  %v8114_v28 = vcombine.high %v18541_v11, %v18556_v26  ;;  %v18898_v10 = vrot.slane %v8146_v25, %v15232_v17  ;;  %v7820_v11 = vcombine.high %v18755_v3, %v18752_v55  ;;  %v24856_v26 = vld [vmem:[#allocation53_spill] sm:$0xff] }
 0x70a   : > { %7052 = vrot.lane.b32.xlu1 %v6905_v16, %s14986_s23  ;;  %v6906_v55 = vcombine.high %v6854_v60, %v6886_v47  ;;  %v18926_v16 = vrot.slane %v8178_v32, %v15240_v29  ;;  %v7349_v47 = vcombine.low %v18785_v24, %v18802_v15  ;;  %v7381_v60 = vcombine.low %v18826_v4, %v18858_v41  ;;  %v24853_v32 = vld [vmem:[#allocation102_spill] sm:$0xff] }
 0x70b   : > { %v18873_v12 = vrot.slane %v7683_v7, %v15240_v29  ;;  %v18877_v5 = vpop.permute.xlu0 %7153  ;;  %v18890_v7 = vrot.slane %v7651_v42, %v15240_v29  ;;  %v18916_v62 = vrot.slane %v8114_v28, %v15232_v17  ;;  %v8225_v25 = vcombine.low %v18898_v10, %v18913_v23 }
 0x70c   : > { %24849 = vst [vmem:[#allocation115_spill] sm:$0xff] %v18877_v5  ;;  %v18885_v48 = vpop.permute.xlu1 %7159  ;;  %v18937_v56 = vrot.slane %v7820_v11, %v15240_v29  ;;  %v6515_v11 = vcombine.low %v24854_v30, %v24853_v32  ;;  %v7994_v2 = vcombine.high %v24858_v36, %v24857_v61  ;;  %v18969_v43 = vrot.slane %v8010_v45, %v15232_v17 }
 0x70d   : > { %24848 = vst [vmem:[#allocation28_spill] sm:$0xff] %v18873_v12  ;;  %24850 = vst [vmem:[#allocation110_spill] sm:$0xff] %v18890_v7  ;;  %8250 = vrot.lane.b32.xlu0 %v8106_v63, %s14988_s11  ;;  %v18910_v63 = vrot.slane %v8210_v20, %v15240_v29  ;;  %v7333_v42 = vcombine.low %v18860_v22, %v18885_v48 }
 0x70e   : > { %6658 = vrot.lane.b32.xlu1 %v6514_v37, %s14988_s11  ;;  %v8193_v37 = vcombine.low %v18916_v62, %v18929_v35  ;;  %24859 = vst [vmem:[#allocation93_spill] sm:$0xff] %v18969_v43 }
 0x70f   : > { %v18905_v49 = vpop.permute.xlu0 %7161  ;;  %v8244_v28 = vcombine.high %v18926_v16, %v18910_v63  ;;  %v18961_v54 = vrot.slane %v7333_v42, %v15232_v17  ;;  %v18978_v42 = vrot.slane %v7349_v47, %v15232_v17 }
 0x710   : > { %24851 = vst [vmem:[#allocation72_spill] sm:$0xff] %v18905_v49  ;;  %v18920_v3 = vpop.permute.xlu1 %7167  ;;  %v18998_v32 = vrot.slane %v8193_v37, %v15240_v29 }
 0x711   : > { %7888 = vrot.lane.b32.xlu0 %v7852_v53, %s14988_s11  ;;  %v18956_v53 = vrot.slane %v7788_v1, %v15240_v29 }
 0x712   : > { %7056 = vrot.lane.b32.xlu1 %v6906_v55, %s14987_s10  ;;  %v24855_v55 = vld [vmem:[#allocation122_spill] sm:$0xff] }
 0x713   : > { %v18943_v20 = vpop.permute.xlu0 %7169  ;;  %v7978_v18 = vcombine.high %v24856_v26, %v24855_v55  ;;  %v7853_v1 = vcombine.low %v18956_v53, %v18937_v56  ;;  %v18975_v26 = vrot.slane %v8225_v25, %v15240_v29  ;;  %v18983_v55 = vrot.slane %v7381_v60, %v15232_v17  ;;  %v24863_v25 = vld [vmem:[#allocation34_spill] sm:$0xff] }
 0x714   : > { %24852 = vst [vmem:[#allocation104_spill] sm:$0xff] %v18943_v20  ;;  %v18951_v9 = vpop.permute.xlu1 %7175  ;;  %v6907_v47 = vcombine.low %v24864_v8, %v24863_v25 }
 0x715   : > { %v7365_v39 = vcombine.low %v18920_v3, %v18951_v9  ;;  %8286 = vrot.lane.b32.xlu0 %v8244_v28, %s14987_s10  ;;  %v7684_v28 = vcombine.high %v18854_v31, %v18851_v46  ;;  %v19001_v46 = vrot.slane %v7978_v18, %v15232_v17  ;;  %v7397_v31 = vcombine.low %v18961_v54, %v18978_v42 }
 0x716   : > { %6662 = vrot.lane.b32.xlu1 %v6515_v11, %s14986_s23  ;;  %v18991_v11 = vrot.slane %v8026_v13, %v15232_v17  ;;  %v19011_v13 = vrot.slane %v7994_v2, %v15232_v17  ;;  %v24871_v2 = vld [vmem:[#allocation62_spill] sm:$0xff] }
 0x717   : > { %v18986_v45 = vrot.slane %v7365_v39, %v15232_v17  ;;  %v18988_v61 = vpop.permute.xlu0 %7177  ;;  %24865 = vst [vmem:[#allocation60_spill] sm:$0xff] %v19001_v46  ;;  %v7652_v39 = vcombine.high %v18836_v40, %v18848_v50  ;;  %v8245_v40 = vcombine.low %v18998_v32, %v18975_v26  ;;  %v7698_v50 = vrot.slane %v7684_v28, %v15240_v29 }
 0x718   : > { %24860 = vst [vmem:[#allocation59_spill] sm:$0xff] %v18988_v61  ;;  %24861 = vst [vmem:[#allocation47_spill] sm:$0xff] %v18991_v11  ;;  %v18993_v36 = vpop.permute.xlu1 %7149  ;;  %v8089_v18 = vcombine.low %v18969_v43, %v18991_v11  ;;  %v19033_v11 = vrot.slane %v7397_v31, %v15240_v29  ;;  %v7213_v31 = vcombine.low %v18877_v5, %v18905_v49  ;;  %v24880_v5 = vld [vmem:[#allocation98_spill] sm:$0xff]  ;;  %v24881_v49 = vld [vmem:[#allocation108_spill] sm:$0xff] }
 0x719   : > { %24862 = vst [vmem:[#allocation41_spill] sm:$0xff] %v18993_v36  ;;  %v7429_v60 = vcombine.low %v18986_v45, %v18983_v55  ;;  %7892 = vrot.lane.b32.xlu0 %v7853_v1, %s14986_s23  ;;  %24866 = vst [vmem:[#allocation66_spill] sm:$0xff] %v19011_v13  ;;  %v24870_v1 = vld [vmem:[#allocation65_spill] sm:$0xff]  ;;  %v7666_v43 = vrot.slane %v7652_v39, %v15240_v29  ;;  %v5060_v39 = vcombine.high %v18797_v51, %v18790_v27 }
 0x71a   : > { %7060 = vrot.lane.b32.xlu1 %v6907_v47, %s14984_s8  ;;  %v5058_v30 = vcombine.high %v24871_v2, %v24870_v1  ;;  %v8057_v47 = vcombine.low %v19001_v46, %v19011_v13  ;;  %24872 = vst [vmem:[#allocation64_spill] sm:$0xff] %v19033_v11  ;;  %v8097_v1 = vrot.slane %v8089_v18, %v15240_v29  ;;  %v24885_v13 = vld [vmem:[#allocation107_spill] sm:$0xff] }
 0x71b   : > { %v19016_v37 = vpop.permute.xlu0 %6733  ;;  %v19022_v25 = vrot.slane %v7429_v60, %v15240_v29  ;;  %v7717_v34 = vcombine.low %v7666_v43, %v7698_v50  ;;  %v7245_v18 = vcombine.low %v18943_v20, %v18988_v61  ;;  %v5062_v27 = vcombine.high %v18817_v58, %v18809_v44 }
 0x71c   : > { %24867 = vst [vmem:[#allocation96_spill] sm:$0xff] %v19016_v37  ;;  %v19024_v8 = vpop.permute.xlu1 %7157  ;;  %v8074_v20 = vcombine.high %v24881_v49, %v24880_v5 }
 0x71d   : > { %24868 = vst [vmem:[#allocation68_spill] sm:$0xff] %v19022_v25  ;;  %24869 = vst [vmem:[#allocation70_spill] sm:$0xff] %v19024_v8  ;;  %8290 = vrot.lane.b32.xlu0 %v8245_v40, %s14984_s8  ;;  %v7197_v28 = vcombine.low %v18993_v36, %v19024_v8 }
 0x71e   : > { %5094 = vrot.lane.b32.xlu1 %v5058_v30, %s14988_s11  ;;  %v8065_v30 = vrot.slane %v8057_v47, %v15240_v29  ;;  %v19071_v47 = vrot.slane %v7245_v18, %v15232_v17 }
 0x71f   : > { %v19038_v60 = vpop.permute.xlu0 %6741  ;;  %v19055_v40 = vrot.slane %v7197_v28, %v15232_v17 }
 0x720   : > { %24873 = vst [vmem:[#allocation122_spill] sm:$0xff] %v19038_v60  ;;  %v19043_v46 = vpop.permute.xlu1 %7165  ;;  %v8109_v36 = vcombine.low %v8065_v30, %v8097_v1 }
 0x721   : > { %24874 = vst [vmem:[#allocation53_spill] sm:$0xff] %v19043_v46  ;;  %7864 = vrot.lane.b32.xlu0 %v7717_v34, %s14986_s23  ;;  %24875 = vst [vmem:[#allocation121_spill] sm:$0xff] %v19055_v40  ;;  %v19064_v34 = vrot.slane %v7213_v31, %v15232_v17  ;;  %v5064_v31 = vcombine.high %v18845_v14, %v18833_v33  ;;  %v24883_v33 = vld [vmem:[#allocation100_spill] sm:$0xff] }
 0x722   : > { %5102 = vrot.lane.b32.xlu1 %v5060_v39, %s14987_s10 }
 0x723   : > { %v19057_v2 = vpop.permute.xlu0 %6749  ;;  %v7261_v28 = vcombine.low %v19055_v40, %v19064_v34 }
 0x724   : > { %24876 = vst [vmem:[#allocation120_spill] sm:$0xff] %v19057_v2  ;;  %v19059_v8 = vpop.permute.xlu1 %7173 }
 0x725   : > { %24877 = vst [vmem:[#allocation124_spill] sm:$0xff] %v19059_v8  ;;  %v7229_v51 = vcombine.low %v19043_v46, %v19059_v8  ;;  %8262 = vrot.lane.b32.xlu0 %v8109_v36, %s14984_s8  ;;  %v24882_v46 = vld [vmem:[#allocation113_spill] sm:$0xff] }
 0x726   : > { %5110 = vrot.lane.b32.xlu1 %v5062_v27, %s14982_s4  ;;  %v19090_v27 = vrot.slane %v7261_v28, %v15240_v29  ;;  %v8242_v14 = vcombine.high %v24883_v33, %v24882_v46  ;;  %v8243_v46 = vcombine.low %v18926_v16, %v18910_v63  ;;  %v8088_v33 = vrot.slane %v8074_v20, %v15240_v29 }
 0x727   : > { %v19076_v39 = vrot.slane %v7229_v51, %v15232_v17  ;;  %v19078_v44 = vpop.permute.xlu0 %6757  ;;  %v7756_v63 = vcombine.high %v18715_v57, %v18734_v0 }
 0x728   : > { %v19080_v58 = vpop.permute.xlu1 %6729  ;;  %24878 = vst [vmem:[#allocation125_spill] sm:$0xff] %v19090_v27 }
 0x729   : > { %v7293_v36 = vcombine.low %v19076_v39, %v19071_v47 }
 0x72a   : > { %5118 = vrot.lane.b32.xlu1 %v5064_v31, %s14983_s6  ;;  %v24884_v31 = vld [vmem:[#allocation43_spill] sm:$0xff] }
 0x72b   : > { %v19087_v18 = vpop.permute.xlu0 %6343  ;;  %v19093_v51 = vrot.slane %v7293_v36, %v15240_v29  ;;  %v8042_v40 = vcombine.high %v24885_v13, %v24884_v31  ;;  %v6927_v13 = vcombine.low %v19016_v37, %v19038_v60  ;;  %v6959_v31 = vcombine.low %v19057_v2, %v19078_v44  ;;  %v24888_v37 = vld [vmem:[#allocation123_spill] sm:$0xff] }
 0x72c   : > { %v19097_v61 = vpop.permute.xlu1 %6737 }
 0x72d   : > { %24879 = vst [vmem:[#allocation126_spill] sm:$0xff] %v19093_v51  ;;  %v7326_v8 = vcombine.high %v19090_v27, %v19093_v51  ;;  %v6911_v28 = vcombine.low %v19080_v58, %v19097_v61  ;;  %v19135_v20 = vrot.slane %v6927_v13, %v15232_v17  ;;  %v19145_v57 = vrot.slane %v6959_v31, %v15232_v17 }
 0x72e   : > { %8278 = vrot.lane.b32.xlu1 %v8242_v14, %s14988_s11  ;;  %v7718_v14 = vcombine.high %v7666_v43, %v7698_v50  ;;  %v8110_v50 = vcombine.high %v8065_v30, %v8097_v1  ;;  %v24890_v30 = vld [vmem:[#allocation30_spill] sm:$0xff]  ;;  %v7716_v31 = vcombine.high %v18890_v7, %v18873_v12 }
 0x72f   : > { %7470 = vrot.lane.b32.xlu0 %v7326_v8, %s14988_s11  ;;  %v19109_v36 = vpop.permute.xlu0 %6351  ;;  %v8056_v8 = vrot.slane %v8042_v40, %v15240_v29  ;;  %v19125_v5 = vrot.slane %v6911_v28, %v15232_v17  ;;  %v24886_v40 = vld [vmem:[#allocation73_spill] sm:$0xff]  ;;  %v24887_v28 = vld [vmem:[#allocation44_spill] sm:$0xff] }
 0x730   : > { %v19113_v49 = vpop.permute.xlu1 %6745  ;;  %v7772_v27 = vcombine.high %v24887_v28, %v24886_v40  ;;  %v24891_v40 = vld [vmem:[#allocation40_spill] sm:$0xff] }
 0x731   : > { %v8107_v43 = vcombine.low %v8056_v8, %v8088_v33  ;;  %v6975_v0 = vcombine.low %v19125_v5, %v19135_v20  ;;  %v7740_v28 = vcombine.high %v24891_v40, %v24890_v30 }
 0x732   : > { %8282 = vrot.lane.b32.xlu1 %v8243_v46, %s14986_s23 }
 0x733   : > { %7868 = vrot.lane.b32.xlu0 %v7718_v14, %s14987_s10  ;;  %v19128_v51 = vpop.permute.xlu0 %6359  ;;  %v24889_v14 = vld [vmem:[#allocation95_spill] sm:$0xff]  ;;  %v19180_v40 = vrot.slane %v6975_v0, %v15240_v29 }
 0x734   : > { %v19132_v16 = vpop.permute.xlu1 %6753  ;;  %v7724_v60 = vcombine.high %v24889_v14, %v24888_v37  ;;  %v19158_v37 = vrot.slane %v7756_v63, %v15232_v17  ;;  %v7430_v14 = vcombine.high %v18986_v45, %v18983_v55  ;;  %v7398_v63 = vcombine.high %v18961_v54, %v18978_v42 }
 0x735   : > { %v6943_v46 = vcombine.low %v19113_v49, %v19132_v16  ;;  %24893 = vst [vmem:[#allocation108_spill] sm:$0xff] %v19180_v40  ;;  %v19186_v45 = vrot.slane %v7740_v28, %v15232_v17 }
 0x736   : > { %8254 = vrot.lane.b32.xlu1 %v8107_v43, %s14986_s23  ;;  %v19172_v2 = vrot.slane %v7724_v60, %v15232_v17  ;;  %v19195_v42 = vrot.slane %v7430_v14, %v15240_v29  ;;  %v7462_v14 = vcombine.high %v19033_v11, %v19022_v25  ;;  %v24906_v25 = vld [vmem:[#allocation93_spill] sm:$0xff] }
 0x737   : > { %v19150_v13 = vrot.slane %v6943_v46, %v15232_v17  ;;  %8266 = vrot.lane.b32.xlu0 %v8110_v50, %s14982_s4  ;;  %v19153_v1 = vpop.permute.xlu0 %6367  ;;  %v19169_v50 = vrot.slane %v7772_v27, %v15232_v17 }
 0x738   : > { %v19160_v43 = vpop.permute.xlu1 %6339  ;;  %v7803_v0 = vcombine.low %v19172_v2, %v19186_v45 }
 0x739   : > { %v7007_v46 = vcombine.low %v19150_v13, %v19145_v57  ;;  %v7835_v60 = vcombine.low %v19158_v37, %v19169_v50 }
 0x73a   : > { %7860 = vrot.lane.b32.xlu1 %v7716_v31, %s14988_s11  ;;  %v8108_v31 = vcombine.high %v8056_v8, %v8088_v33  ;;  %v8226_v8 = vcombine.high %v18898_v10, %v18913_v23  ;;  %v8194_v33 = vcombine.high %v18916_v62, %v18929_v35  ;;  %v7382_v10 = vcombine.high %v18826_v4, %v18858_v41 }
 0x73b   : > { %v19177_v30 = vpop.permute.xlu0 %5953  ;;  %v19183_v55 = vrot.slane %v7007_v46, %v15240_v29  ;;  %v7412_v46 = vrot.slane %v7398_v63, %v15240_v29  ;;  %v19213_v7 = vrot.slane %v7835_v60, %v15240_v29  ;;  %v7334_v23 = vcombine.high %v18860_v22, %v18885_v48 }
 0x73c   : > { %24892 = vst [vmem:[#allocation98_spill] sm:$0xff] %v19177_v30  ;;  %v19190_v27 = vpop.permute.xlu1 %6347  ;;  %v19228_v60 = vrot.slane %v7803_v0, %v15240_v29  ;;  %v7350_v41 = vcombine.high %v18785_v24, %v18802_v15  ;;  %v7854_v22 = vcombine.high %v18956_v53, %v18937_v56  ;;  %v19246_v35 = vrot.slane %v8226_v8, %v15240_v29 }
 0x73d   : > { %24894 = vst [vmem:[#allocation43_spill] sm:$0xff] %v19183_v55  ;;  %v7040_v54 = vcombine.high %v19180_v40, %v19183_v55  ;;  %v6521_v63 = vcombine.low %v19160_v43, %v19190_v27  ;;  %v19259_v15 = vrot.slane %v7382_v10, %v15232_v17  ;;  %v19262_v56 = vrot.slane %v7334_v23, %v15232_v17 }
 0x73e   : > { %8258 = vrot.lane.b32.xlu1 %v8108_v31, %s14987_s10  ;;  %v7366_v31 = vcombine.high %v18920_v3, %v18951_v9  ;;  %v6537_v3 = vcombine.low %v19087_v18, %v19109_v36  ;;  %v6569_v9 = vcombine.low %v19128_v51, %v19153_v1  ;;  %v7856_v48 = vcombine.high %v19228_v60, %v19213_v7 }
 0x73f   : > { %7076 = vrot.lane.b32.xlu0 %v7040_v54, %s14988_s11  ;;  %v19201_v28 = vpop.permute.xlu0 %5961  ;;  %v7464_v54 = vcombine.high %v7412_v46, %v19195_v42  ;;  %v8208_v53 = vrot.slane %v8194_v33, %v15240_v29  ;;  %v6976_v8 = vcombine.high %v19125_v5, %v19135_v20  ;;  %v19281_v10 = vrot.slane %v7350_v41, %v15232_v17 }
 0x740   : > { %24895 = vst [vmem:[#allocation107_spill] sm:$0xff] %v19201_v28  ;;  %v19208_v12 = vpop.permute.xlu1 %6355  ;;  %v19249_v0 = vrot.slane %v7366_v31, %v15232_v17  ;;  %v8246_v5 = vcombine.high %v18998_v32, %v18975_v26  ;;  %v7836_v55 = vcombine.high %v19158_v37, %v19169_v50 }
 0x741   : > { %v8248_v20 = vcombine.high %v8208_v53, %v19246_v35  ;;  %v7413_v41 = vcombine.low %v19262_v56, %v19281_v10  ;;  %v19304_v26 = vrot.slane %v6976_v8, %v15240_v29 }
 0x742   : > { %7498 = vrot.lane.b32.xlu1 %v7462_v14, %s14988_s11  ;;  %v7008_v14 = vcombine.high %v19150_v13, %v19145_v57  ;;  %v19269_v57 = vrot.slane %v6537_v3, %v15232_v17  ;;  %v19272_v13 = vrot.slane %v6569_v9, %v15232_v17  ;;  %v7445_v23 = vcombine.low %v19249_v0, %v19259_v15 }
 0x743   : > { %7506 = vrot.lane.b32.xlu0 %v7464_v54, %s14987_s10  ;;  %v19235_v62 = vpop.permute.xlu0 %5969  ;;  %v19254_v54 = vrot.slane %v6521_v63, %v15232_v17  ;;  %v19335_v50 = vrot.slane %v7413_v41, %v15240_v29  ;;  %v19355_v41 = vrot.slane %v7836_v55, %v15240_v29 }
 0x744   : > { %24896 = vst [vmem:[#allocation73_spill] sm:$0xff] %v19235_v62  ;;  %v19239_v4 = vpop.permute.xlu1 %6363  ;;  %v19319_v40 = vrot.slane %v7445_v23, %v15240_v29 }
 0x745   : > { %v6553_v24 = vcombine.low %v19208_v12, %v19239_v4  ;;  %v6585_v3 = vcombine.low %v19254_v54, %v19269_v57 }
 0x746   : > { %7896 = vrot.lane.b32.xlu1 %v7854_v22, %s14987_s10  ;;  %v19295_v22 = vrot.slane %v7008_v14, %v15240_v29 }
 0x747   : > { %v19275_v31 = vrot.slane %v6553_v24, %v15232_v17  ;;  %7904 = vrot.lane.b32.xlu0 %v7856_v48, %s14982_s4  ;;  %v19278_v63 = vpop.permute.xlu0 %5977  ;;  %v7620_v24 = vcombine.high %v18804_v19, %v18828_v59  ;;  %v19322_v8 = vrot.slane %v6585_v3, %v15240_v29  ;;  %v7588_v19 = vcombine.high %v18766_v38, %v18787_v6 }
 0x748   : > { %24897 = vst [vmem:[#allocation44_spill] sm:$0xff] %v19278_v63  ;;  %v19283_v33 = vpop.permute.xlu1 %5949  ;;  %v7804_v59 = vcombine.high %v19172_v2, %v19186_v45  ;;  %v7294_v6 = vcombine.high %v19076_v39, %v19071_v47  ;;  %v7855_v45 = vcombine.low %v19228_v60, %v19213_v7  ;;  %v7465_v3 = vcombine.low %v19335_v50, %v19319_v40  ;;  %v24904_v47 = vld [vmem:[#allocation121_spill] sm:$0xff] }
 0x749   : > { %24898 = vst [vmem:[#allocation123_spill] sm:$0xff] %v19283_v33  ;;  %v6617_v9 = vcombine.low %v19275_v31, %v19272_v13  ;;  %24901 = vst [vmem:[#allocation40_spill] sm:$0xff] %v19322_v8  ;;  %v19342_v38 = vrot.slane %v7620_v24, %v15232_v17  ;;  %v7262_v39 = vcombine.high %v24904_v47, %v19064_v34 }
 0x74a   : > { %8294 = vrot.lane.b32.xlu1 %v8246_v5, %s14982_s4  ;;  %v7463_v5 = vcombine.low %v7412_v46, %v19195_v42  ;;  %v24902_v46 = vld [vmem:[#allocation21_spill] sm:$0xff]  ;;  %v6147_v7 = vcombine.low %v19177_v30, %v19201_v28  ;;  %v6179_v60 = vcombine.low %v19235_v62, %v19278_v63  ;;  %v24905_v42 = vld [vmem:[#allocation47_spill] sm:$0xff]  ;;  %v24907_v30 = vld [vmem:[#allocation66_spill] sm:$0xff] }
 0x74b   : > { %8302 = vrot.lane.b32.xlu0 %v8248_v20, %s14983_s6  ;;  %v19301_v32 = vpop.permute.xlu0 %5531  ;;  %v19307_v48 = vrot.slane %v6617_v9, %v15240_v29  ;;  %v7041_v20 = vcombine.low %v19304_v26, %v19295_v22  ;;  %v7636_v9 = vcombine.high %v18732_v21, %v18764_v52  ;;  %v24903_v21 = vld [vmem:[#allocation26_spill] sm:$0xff]  ;;  %v19398_v47 = vrot.slane %v7262_v39, %v15240_v29  ;;  %v24908_v28 = vld [vmem:[#allocation60_spill] sm:$0xff] }
 0x74c   : > { %v19311_v14 = vpop.permute.xlu1 %5957  ;;  %v7604_v52 = vcombine.high %v24903_v21, %v24902_v46  ;;  %v8247_v46 = vcombine.low %v8208_v53, %v19246_v35  ;;  %v19385_v21 = vrot.slane %v7294_v6, %v15240_v29  ;;  %v19401_v35 = vrot.slane %v6147_v7, %v15232_v17 }
 0x74d   : > { %24899 = vst [vmem:[#allocation95_spill] sm:$0xff] %v19307_v48  ;;  %24900 = vst [vmem:[#allocation30_spill] sm:$0xff] %v19311_v14  ;;  %v6131_v23 = vcombine.low %v19283_v33, %v19311_v14  ;;  %v19358_v24 = vrot.slane %v7636_v9, %v15232_v17  ;;  %v19404_v53 = vrot.slane %v6179_v60, %v15232_v17 }
 0x74e   : > { %7502 = vrot.lane.b32.xlu1 %v7463_v5, %s14986_s23  ;;  %v19361_v5 = vrot.slane %v7588_v19, %v15232_v17  ;;  %v19377_v9 = vrot.slane %v7604_v52, %v15232_v17  ;;  %v8090_v11 = vcombine.high %v24906_v25, %v24905_v42  ;;  %v7327_v39 = vcombine.low %v19398_v47, %v19385_v21 }
 0x74f   : > { %7080 = vrot.lane.b32.xlu0 %v7041_v20, %s14986_s23  ;;  %v19332_v37 = vpop.permute.xlu0 %5539  ;;  %v19374_v20 = vrot.slane %v7804_v59, %v15240_v29  ;;  %v7699_v34 = vcombine.low %v19342_v38, %v19358_v24  ;;  %v8058_v25 = vcombine.high %v24908_v28, %v24907_v30  ;;  %v6944_v30 = vcombine.high %v19113_v49, %v19132_v16  ;;  %v24919_v16 = vld [vmem:[#allocation104_spill] sm:$0xff] }
 0x750   : > { %v19346_v2 = vpop.permute.xlu1 %5965  ;;  %v7042_v28 = vcombine.high %v19304_v26, %v19295_v22  ;;  %v24914_v22 = vld [vmem:[#allocation122_spill] sm:$0xff]  ;;  %v24915_v26 = vld [vmem:[#allocation96_spill] sm:$0xff] }
 0x751   : > { %v7857_v52 = vcombine.low %v19374_v20, %v19355_v41  ;;  %v19419_v7 = vrot.slane %v7699_v34, %v15240_v29 }
 0x752   : > { %7900 = vrot.lane.b32.xlu1 %v7855_v45, %s14984_s8  ;;  %v19388_v45 = vrot.slane %v6131_v23, %v15232_v17 }
 0x753   : > { %7510 = vrot.lane.b32.xlu0 %v7465_v3, %s14984_s8  ;;  %v19371_v55 = vpop.permute.xlu0 %5547  ;;  %v7667_v3 = vcombine.low %v19361_v5, %v19377_v9 }
 0x754   : > { %v19381_v19 = vpop.permute.xlu1 %5973  ;;  %v6195_v60 = vcombine.low %v19388_v45, %v19401_v35 }
 0x755   : > { %v6163_v59 = vcombine.low %v19346_v2, %v19381_v19  ;;  %v19431_v42 = vrot.slane %v7667_v3, %v15240_v29 }
 0x756   : > { %8298 = vrot.lane.b32.xlu1 %v8247_v46, %s14985_s9  ;;  %v19451_v3 = vrot.slane %v6195_v60, %v15240_v29  ;;  %v6928_v60 = vcombine.high %v24915_v26, %v24914_v22  ;;  %v7466_v22 = vcombine.high %v19335_v50, %v19319_v40  ;;  %v24918_v26 = vld [vmem:[#allocation59_spill] sm:$0xff]  ;;  %v6586_v40 = vcombine.high %v19254_v54, %v19269_v57 }
 0x757   : > { %v19407_v6 = vrot.slane %v6163_v59, %v15232_v17  ;;  %7908 = vrot.lane.b32.xlu0 %v7857_v52, %s14985_s9  ;;  %v19410_v23 = vpop.permute.xlu0 %5555  ;;  %v6650_v52 = vcombine.high %v19322_v8, %v19307_v48  ;;  %v7719_v48 = vcombine.low %v19431_v42, %v19419_v7  ;;  %v19444_v8 = vrot.slane %v8090_v11, %v15240_v29  ;;  %v24912_v11 = vld [vmem:[#allocation120_spill] sm:$0xff] }
 0x758   : > { %v19414_v46 = vpop.permute.xlu1 %5527  ;;  %24911 = vst [vmem:[#allocation121_spill] sm:$0xff] %v19451_v3  ;;  %v5725_v50 = vcombine.low %v19301_v32, %v19332_v37  ;;  %v7328_v57 = vcombine.high %v19398_v47, %v19385_v21 }
 0x759   : > { %v6227_v59 = vcombine.low %v19407_v6, %v19404_v53 }
 0x75a   : > { %7474 = vrot.lane.b32.xlu1 %v7327_v39, %s14986_s23  ;;  %v6912_v39 = vcombine.high %v19080_v58, %v19097_v61  ;;  %v24917_v61 = vld [vmem:[#allocation53_spill] sm:$0xff]  ;;  %v19537_v47 = vrot.slane %v5725_v50, %v15232_v17 }
 0x75b   : > { %6686 = vrot.lane.b32.xlu0 %v6650_v52, %s14988_s11  ;;  %v19434_v34 = vpop.permute.xlu0 %5066  ;;  %v19437_v33 = vrot.slane %v6227_v59, %v15240_v29  ;;  %v19457_v59 = vrot.slane %v8058_v25, %v15240_v29  ;;  %v6960_v52 = vcombine.high %v24912_v11, %v19078_v44  ;;  %v19475_v44 = vrot.slane %v6944_v30, %v15232_v17 }
 0x75c   : > { %24909 = vst [vmem:[#allocation21_spill] sm:$0xff] %v19434_v34  ;;  %v19439_v14 = vpop.permute.xlu1 %5535  ;;  %v24916_v34 = vld [vmem:[#allocation124_spill] sm:$0xff]  ;;  %v19488_v63 = vrot.slane %v6912_v39, %v15232_v17  ;;  %v5757_v30 = vcombine.low %v19371_v55, %v19410_v23 }
 0x75d   : > { %24910 = vst [vmem:[#allocation26_spill] sm:$0xff] %v19437_v33  ;;  %v7230_v58 = vcombine.high %v24917_v61, %v24916_v34  ;;  %v8111_v25 = vcombine.low %v19457_v59, %v19444_v8  ;;  %v5709_v11 = vcombine.low %v19414_v46, %v19439_v14  ;;  %v7246_v34 = vcombine.high %v24919_v16, %v24918_v26  ;;  %v24920_v61 = vld [vmem:[#allocation70_spill] sm:$0xff]  ;;  %v24924_v16 = vld [vmem:[#allocation115_spill] sm:$0xff] }
 0x75e   : > { %7872 = vrot.lane.b32.xlu1 %v7719_v48, %s14984_s8 }
 0x75f   : > { %7084 = vrot.lane.b32.xlu0 %v7042_v28, %s14987_s10  ;;  %v19462_v49 = vpop.permute.xlu0 %5074  ;;  %v6618_v28 = vcombine.high %v19275_v31, %v19272_v13  ;;  %v7858_v13 = vcombine.high %v19374_v20, %v19355_v41  ;;  %v19494_v31 = vrot.slane %v6960_v52, %v15232_v17  ;;  %v19508_v41 = vrot.slane %v6928_v60, %v15232_v17 }
 0x760   : > { %24913 = vst [vmem:[#allocation47_spill] sm:$0xff] %v19462_v49  ;;  %v19470_v48 = vpop.permute.xlu1 %5543  ;;  %v24921_v49 = vld [vmem:[#allocation41_spill] sm:$0xff]  ;;  %v19511_v20 = vrot.slane %v7230_v58, %v15232_v17  ;;  %v19528_v58 = vrot.slane %v7246_v34, %v15232_v17 }
 0x761   : > { %v7198_v62 = vcombine.high %v24921_v49, %v24920_v61  ;;  %v24923_v49 = vld [vmem:[#allocation72_spill] sm:$0xff]  ;;  %v7023_v52 = vcombine.low %v19475_v44, %v19494_v31  ;;  %v19525_v60 = vrot.slane %v6618_v28, %v15240_v29  ;;  %v6991_v21 = vcombine.low %v19488_v63, %v19508_v41 }
 0x762   : > { %8270 = vrot.lane.b32.xlu1 %v8111_v25, %s14985_s9  ;;  %v7214_v25 = vcombine.high %v24924_v16, %v24923_v49  ;;  %v7446_v16 = vcombine.high %v19249_v0, %v19259_v15  ;;  %v7309_v50 = vcombine.low %v19511_v20, %v19528_v58  ;;  %v7414_v15 = vcombine.high %v19262_v56, %v19281_v10 }
 0x763   : > { %7514 = vrot.lane.b32.xlu0 %v7466_v22, %s14982_s4  ;;  %v19503_v39 = vpop.permute.xlu0 %5082  ;;  %v19520_v22 = vrot.slane %v5709_v11, %v15232_v17  ;;  %v19531_v61 = vrot.slane %v7198_v62, %v15232_v17  ;;  %v19540_v11 = vrot.slane %v5757_v30, %v15232_v17  ;;  %v6600_v62 = vrot.slane %v6586_v40, %v15240_v29 }
 0x764   : > { %24922 = vst [vmem:[#allocation93_spill] sm:$0xff] %v19503_v39  ;;  %v19513_v54 = vpop.permute.xlu1 %5551  ;;  %v19550_v49 = vrot.slane %v7214_v25, %v15232_v17  ;;  %v7460_v10 = vrot.slane %v7446_v16, %v15240_v29 }
 0x765   : > { %v5741_v26 = vcombine.low %v19470_v48, %v19513_v54  ;;  %v6651_v25 = vcombine.low %v6600_v62, %v19525_v60 }
 0x766   : > { %7478 = vrot.lane.b32.xlu1 %v7328_v57, %s14987_s10  ;;  %v7720_v57 = vcombine.high %v19431_v42, %v19419_v7  ;;  %v7277_v0 = vcombine.low %v19531_v61, %v19550_v49  ;;  %v6999_v42 = vrot.slane %v6991_v21, %v15240_v29  ;;  %v7668_v21 = vcombine.high %v19361_v5, %v19377_v9 }
 0x767   : > { %v19543_v28 = vrot.slane %v5741_v26, %v15232_v17  ;;  %7912 = vrot.lane.b32.xlu0 %v7858_v13, %s14983_s6  ;;  %v19546_v34 = vpop.permute.xlu0 %5090  ;;  %v5773_v13 = vcombine.low %v19520_v22, %v19537_v47  ;;  %v7031_v26 = vrot.slane %v7023_v52, %v15240_v29  ;;  %v7700_v52 = vcombine.high %v19342_v38, %v19358_v24 }
 0x768   : > { %24925 = vst [vmem:[#allocation66_spill] sm:$0xff] %v19546_v34  ;;  %v19556_v30 = vpop.permute.xlu1 %5070  ;;  %v7285_v38 = vrot.slane %v7277_v0, %v15240_v29  ;;  %v7682_v5 = vrot.slane %v7668_v21, %v15240_v29 }
 0x769   : > { %24926 = vst [vmem:[#allocation60_spill] sm:$0xff] %v19556_v30  ;;  %v5805_v40 = vcombine.low %v19543_v28, %v19540_v11  ;;  %v7317_v30 = vrot.slane %v7309_v50, %v15240_v29  ;;  %v7043_v56 = vcombine.low %v6999_v42, %v7031_v26 }
 0x76a   : > { %7876 = vrot.lane.b32.xlu1 %v7720_v57, %s14982_s4  ;;  %v8112_v57 = vcombine.high %v19457_v59, %v19444_v8  ;;  %v7428_v8 = vrot.slane %v7414_v15, %v15240_v29  ;;  %v6652_v59 = vcombine.high %v6600_v62, %v19525_v60  ;;  %v6538_v60 = vcombine.high %v19087_v18, %v19109_v36 }
 0x76b   : > { %6690 = vrot.lane.b32.xlu0 %v6651_v25, %s14986_s23  ;;  %v19572_v7 = vpop.permute.xlu0 %5456  ;;  %v19576_v34 = vrot.slane %v5805_v40, %v15240_v29  ;;  %v19587_v25 = vrot.slane %v5773_v13, %v15240_v29  ;;  %v7329_v50 = vcombine.low %v7285_v38, %v7317_v30  ;;  %v7714_v13 = vrot.slane %v7700_v52, %v15240_v29 }
 0x76c   : > { %24927 = vst [vmem:[#allocation120_spill] sm:$0xff] %v19572_v7  ;;  %v19580_v39 = vpop.permute.xlu1 %5078  ;;  %v7467_v40 = vcombine.low %v7428_v8, %v7460_v10  ;;  %v6196_v18 = vcombine.high %v19388_v45, %v19401_v35  ;;  %v24965_v7 = vld [vmem:[#allocation30_spill] sm:$0xff] }
 0x76d   : > { %24928 = vst [vmem:[#allocation122_spill] sm:$0xff] %v19576_v34  ;;  %24929 = vst [vmem:[#allocation96_spill] sm:$0xff] %v19580_v39  ;;  %v7721_v15 = vcombine.low %v7682_v5, %v7714_v13 }
 0x76e   : > { %24930 = vst [vmem:[#allocation124_spill] sm:$0xff] %v19587_v25  ;;  %8274 = vrot.lane.b32.xlu1 %v8112_v57, %s14983_s6  ;;  %v6260_v57 = vcombine.high %v19451_v3, %v19437_v33 }
 0x76f   : > { %7088 = vrot.lane.b32.xlu0 %v7043_v56, %s14984_s8  ;;  %v19594_v24 = vpop.permute.xlu0 %5464  ;;  %v7310_v56 = vcombine.high %v19511_v20, %v19528_v58 }
 0x770   : > { %24931 = vst [vmem:[#allocation53_spill] sm:$0xff] %v19594_v24  ;;  %v19599_v16 = vpop.permute.xlu1 %5086 }
 0x771   : > { %24932 = vst [vmem:[#allocation59_spill] sm:$0xff] %v19599_v16  ;;  %v7278_v16 = vcombine.high %v19531_v61, %v19550_v49 }
 0x772   : > { %7482 = vrot.lane.b32.xlu1 %v7329_v50, %s14984_s8  ;;  %v7330_v50 = vcombine.high %v7285_v38, %v7317_v30  ;;  %v6210_v38 = vrot.slane %v6196_v18, %v15240_v29  ;;  %v24945_v18 = vld [vmem:[#allocation81_spill] sm:$0xff] }
 0x773   : > { %7518 = vrot.lane.b32.xlu0 %v7467_v40, %s14985_s9  ;;  %v19605_v9 = vpop.permute.xlu0 %5098  ;;  %v6554_v40 = vcombine.high %v19208_v12, %v19239_v4  ;;  %v7722_v12 = vcombine.high %v7682_v5, %v7714_v13  ;;  %v7324_v4 = vrot.slane %v7310_v56, %v15240_v29  ;;  %v24940_v13 = vld [vmem:[#allocation16_spill] sm:$0xff] }
 0x774   : > { %24933 = vst [vmem:[#allocation104_spill] sm:$0xff] %v19605_v9  ;;  %v19607_v0 = vpop.permute.xlu1 %5460  ;;  %v24964_v9 = vld [vmem:[#allocation73_spill] sm:$0xff] }
 0x775   : > { %24934 = vst [vmem:[#allocation70_spill] sm:$0xff] %v19607_v0  ;;  %v19638_v61 = vrot.slane %v6554_v40, %v15232_v17 }
 0x776   : > { %7880 = vrot.lane.b32.xlu1 %v7721_v15, %s14985_s9  ;;  %v6570_v15 = vcombine.high %v19128_v51, %v19153_v1  ;;  %v6228_v51 = vcombine.high %v19407_v6, %v19404_v53  ;;  %v7044_v1 = vcombine.high %v6999_v42, %v7031_v26  ;;  %v19658_v6 = vrot.slane %v6538_v60, %v15232_v17 }
 0x777   : > { %6296 = vrot.lane.b32.xlu0 %v6260_v57, %s14988_s11  ;;  %v19613_v52 = vpop.permute.xlu0 %5106  ;;  %v6522_v57 = vcombine.high %v19160_v43, %v19190_v27  ;;  %v7292_v43 = vrot.slane %v7278_v16, %v15240_v29  ;;  %v7468_v26 = vcombine.high %v7428_v8, %v7460_v10  ;;  %v24939_v16 = vld [vmem:[#allocation38_spill] sm:$0xff]  ;;  %v7024_v10 = vcombine.high %v19475_v44, %v19494_v31 }
 0x778   : > { %24935 = vst [vmem:[#allocation41_spill] sm:$0xff] %v19613_v52  ;;  %v19617_v21 = vpop.permute.xlu1 %7048  ;;  %v19645_v27 = vrot.slane %v6570_v15, %v15232_v17  ;;  %v6242_v42 = vrot.slane %v6228_v51, %v15240_v29  ;;  %v6124_v5 = vcombine.high %v24940_v13, %v24939_v16  ;;  %v24985_v16 = vld [vmem:[#allocation118_spill] sm:$0xff] }
 0x779   : > { %v19648_v62 = vrot.slane %v6522_v57, %v15232_v17  ;;  %v7331_v53 = vcombine.low %v7292_v43, %v7324_v4  ;;  %v24941_v57 = vld [vmem:[#allocation77_spill] sm:$0xff]  ;;  %v7038_v31 = vrot.slane %v7024_v10, %v15240_v29  ;;  %v24987_v13 = vld [vmem:[#allocation74_spill] sm:$0xff] }
 0x77a   : > { %7486 = vrot.lane.b32.xlu1 %v7330_v50, %s14982_s4  ;;  %v6633_v30 = vcombine.low %v19638_v61, %v19645_v27  ;;  %v6261_v8 = vcombine.low %v6210_v38, %v6242_v42  ;;  %v6992_v50 = vcombine.high %v19488_v63, %v19508_v41  ;;  %v24948_v41 = vld [vmem:[#allocation91_spill] sm:$0xff] }
 0x77b   : > { %6694 = vrot.lane.b32.xlu0 %v6652_v59, %s14987_s10  ;;  %v19630_v20 = vpop.permute.xlu0 %5114  ;;  %v6601_v45 = vcombine.low %v19648_v62, %v19658_v6 }
 0x77c   : > { %24936 = vst [vmem:[#allocation72_spill] sm:$0xff] %v19630_v20  ;;  %v19632_v58 = vpop.permute.xlu1 %7052  ;;  %v6641_v56 = vrot.slane %v6633_v30, %v15240_v29  ;;  %v24946_v30 = vld [vmem:[#allocation54_spill] sm:$0xff]  ;;  %v24952_v20 = vld [vmem:[#allocation88_spill] sm:$0xff] }
 0x77d   : > { %v6609_v15 = vrot.slane %v6601_v45, %v15240_v29 }
 0x77e   : > { %7884 = vrot.lane.b32.xlu1 %v7722_v12, %s14983_s6  ;;  %v24942_v12 = vld [vmem:[#allocation82_spill] sm:$0xff] }
 0x77f   : > { %7092 = vrot.lane.b32.xlu0 %v7044_v1, %s14982_s4  ;;  %v19653_v36 = vpop.permute.xlu0 %8250  ;;  %v6434_v60 = vcombine.high %v24942_v12, %v24941_v57  ;;  %v6653_v44 = vcombine.low %v6609_v15, %v6641_v56  ;;  %v24944_v1 = vld [vmem:[#allocation22_spill] sm:$0xff]  ;;  %v7006_v57 = vrot.slane %v6992_v50, %v15240_v29  ;;  %v24957_v50 = vld [vmem:[#allocation23_spill] sm:$0xff] }
 0x780   : > { %v19655_v49 = vpop.permute.xlu1 %6658  ;;  %v24951_v12 = vld [vmem:[#allocation90_spill] sm:$0xff] }
 0x781   : > { %24937 = vst [vmem:[#allocation115_spill] sm:$0xff] %v19655_v49  ;;  %v6386_v10 = vcombine.high %v24952_v20, %v24951_v12  ;;  %v19704_v24 = vrot.slane %v6434_v60, %v15232_v17  ;;  %v7045_v52 = vcombine.low %v7006_v57, %v7038_v31  ;;  %v24958_v20 = vld [vmem:[#allocation35_spill] sm:$0xff]  ;;  %v24959_v12 = vld [vmem:[#allocation34_spill] sm:$0xff] }
 0x782   : > { %7490 = vrot.lane.b32.xlu1 %v7331_v53, %s14985_s9  ;;  %v6418_v53 = vcombine.high %v24945_v18, %v24944_v1  ;;  %v24953_v1 = vld [vmem:[#allocation111_spill] sm:$0xff]  ;;  %v24954_v18 = vld [vmem:[#allocation14_spill] sm:$0xff]  ;;  %v24960_v60 = vcombine.high %v24958_v20, %v24959_v12 }
 0x783   : > { %7522 = vrot.lane.b32.xlu0 %v7468_v26, %s14983_s6  ;;  %v19667_v35 = vpop.permute.xlu0 %7888  ;;  %v24947_v26 = vld [vmem:[#allocation58_spill] sm:$0xff] }
 0x784   : > { %v19670_v59 = vpop.permute.xlu1 %7056  ;;  %v6402_v63 = vcombine.high %v24947_v26, %v24946_v30  ;;  %v6092_v30 = vcombine.high %v24954_v18, %v24953_v1  ;;  %v19724_v1 = vrot.slane %v6386_v10, %v15232_v17 }
 0x785   : > { %24938 = vst [vmem:[#allocation127_spill] sm:$0xff] %v19670_v59  ;;  %v25011_v59 = vld [vmem:[#allocation49_spill] sm:$0xff] }
 0x786   : > { %6268 = vrot.lane.b32.xlu1 %v6124_v5, %s14988_s11  ;;  %v24949_v5 = vld [vmem:[#allocation102_spill] sm:$0xff]  ;;  %v6106_v39 = vrot.slane %v6092_v30, %v15240_v29  ;;  %v6262_v30 = vcombine.high %v6210_v38, %v6242_v42  ;;  %v5806_v38 = vcombine.high %v19543_v28, %v19540_v11 }
 0x787   : > { %6300 = vrot.lane.b32.xlu0 %v6261_v8, %s14986_s23  ;;  %v19681_v40 = vpop.permute.xlu0 %8286  ;;  %v24950_v8 = vcombine.high %v24948_v41, %v24949_v5  ;;  %v19711_v41 = vrot.slane %v6418_v53, %v15232_v17  ;;  %v24956_v5 = vld [vmem:[#allocation15_spill] sm:$0xff] }
 0x788   : > { %v19686_v51 = vpop.permute.xlu1 %6662 }
 0x789   : > { %24943 = vst [vmem:[#allocation77_spill] sm:$0xff] %v19686_v51  ;;  %v6497_v53 = vcombine.low %v19711_v41, %v19704_v24 }
 0x78a   : > { %6666 = vrot.lane.b32.xlu1 %v24950_v8, %s14987_s10  ;;  %v6060_v8 = vcombine.high %v24957_v50, %v24956_v5  ;;  %v5838_v5 = vcombine.high %v19587_v25, %v19576_v34  ;;  %v24968_v34 = vld [vmem:[#allocation107_spill] sm:$0xff]  ;;  %v24980_v25 = vld [vmem:[#allocation101_spill] sm:$0xff] }
 0x78b   : > { %6698 = vrot.lane.b32.xlu0 %v6653_v44, %s14984_s8  ;;  %v19698_v45 = vpop.permute.xlu0 %7892  ;;  %v19714_v44 = vrot.slane %v6402_v63, %v15232_v17  ;;  %v7332_v63 = vcombine.high %v7292_v43, %v7324_v4  ;;  %v6505_v4 = vrot.slane %v6497_v53, %v15240_v29  ;;  %v6164_v43 = vcombine.high %v19346_v2, %v19381_v19  ;;  %v24969_v2 = vld [vmem:[#allocation98_spill] sm:$0xff] }
 0x78c   : > { %v19708_v26 = vpop.permute.xlu1 %7060  ;;  %v6148_v19 = vcombine.high %v24969_v2, %v24968_v34 }
 0x78d   : > { %24955 = vst [vmem:[#allocation82_spill] sm:$0xff] %v19708_v26  ;;  %v6465_v50 = vcombine.low %v19724_v1, %v19714_v44  ;;  %v19759_v42 = vrot.slane %v6164_v43, %v15232_v17  ;;  %v25010_v26 = vld [vmem:[#allocation119_spill] sm:$0xff] }
 0x78e   : > { %7064 = vrot.lane.b32.xlu1 %v24960_v60, %s14982_s4  ;;  %v24963_v60 = vld [vmem:[#allocation44_spill] sm:$0xff]  ;;  %v19776_v43 = vrot.slane %v6148_v19, %v15232_v17 }
 0x78f   : > { %7096 = vrot.lane.b32.xlu0 %v7045_v52, %s14985_s9  ;;  %v19731_v0 = vpop.permute.xlu0 %8290  ;;  %v6074_v52 = vrot.slane %v6060_v8, %v15240_v29  ;;  %v6473_v12 = vrot.slane %v6465_v50, %v15240_v29  ;;  %v24966_v8 = vld [vmem:[#allocation123_spill] sm:$0xff] }
 0x790   : > { %v19728_v18 = vpop.permute.xlu1 %5094 }
 0x791   : > { %24961 = vst [vmem:[#allocation22_spill] sm:$0xff] %v19728_v18  ;;  %v6125_v20 = vcombine.low %v6074_v52, %v6106_v39  ;;  %v6132_v18 = vcombine.high %v24966_v8, %v24965_v7  ;;  %v6517_v53 = vcombine.low %v6473_v12, %v6505_v4  ;;  %v24974_v8 = vld [vmem:[#allocation18_spill] sm:$0xff] }
 0x792   : > { %7494 = vrot.lane.b32.xlu1 %v7332_v63, %s14983_s6  ;;  %v6180_v63 = vcombine.high %v24964_v9, %v24963_v60  ;;  %v6654_v9 = vcombine.high %v6609_v15, %v6641_v56  ;;  %v7046_v56 = vcombine.high %v7006_v57, %v7038_v31  ;;  %v5820_v15 = vrot.slane %v5806_v38, %v15240_v29 }
 0x793   : > { %5874 = vrot.lane.b32.xlu0 %v5838_v5, %s14988_s11  ;;  %v19751_v5 = vpop.permute.xlu0 %7864  ;;  %v19768_v50 = vrot.slane %v6132_v18, %v15232_v17  ;;  %v24971_v18 = vld [vmem:[#allocation48_spill] sm:$0xff]  ;;  %v6634_v31 = vcombine.high %v19638_v61, %v19645_v27  ;;  %v6126_v61 = vcombine.high %v6074_v52, %v6106_v39  ;;  %v24982_v39 = vld [vmem:[#allocation25_spill] sm:$0xff]  ;;  %v24983_v52 = vld [vmem:[#allocation27_spill] sm:$0xff] }
 0x794   : > { %v19740_v10 = vpop.permute.xlu1 %5102  ;;  %v19765_v7 = vrot.slane %v6180_v63, %v15232_v17 }
 0x795   : > { %24962 = vst [vmem:[#allocation81_spill] sm:$0xff] %v19740_v10 }
 0x796   : > { %6272 = vrot.lane.b32.xlu1 %v6125_v20, %s14986_s23  ;;  %v5774_v20 = vcombine.high %v19520_v22, %v19537_v47  ;;  %v6243_v11 = vcombine.low %v19759_v42, %v19765_v7  ;;  %v6211_v22 = vcombine.low %v19768_v50, %v19776_v43 }
 0x797   : > { %6304 = vrot.lane.b32.xlu0 %v6262_v30, %s14987_s10  ;;  %v19780_v28 = vpop.permute.xlu0 %8262  ;;  %v24972_v30 = vld [vmem:[#allocation37_spill] sm:$0xff] }
 0x798   : > { %v19754_v10 = vpop.permute.xlu1 %5110  ;;  %v24973_v60 = vcombine.low %v24971_v18, %v24972_v30  ;;  %v5788_v47 = vrot.slane %v5774_v20, %v15240_v29  ;;  %v19800_v38 = vrot.slane %v6243_v11, %v15240_v29  ;;  %v6219_v20 = vrot.slane %v6211_v22, %v15240_v29 }
 0x799   : > { %24967 = vst [vmem:[#allocation54_spill] sm:$0xff] %v19754_v10  ;;  %v19813_v11 = vrot.slane %v6634_v31, %v15240_v29 }
 0x79a   : > { %6670 = vrot.lane.b32.xlu1 %v6517_v53, %s14984_s8  ;;  %v24975_v53 = vld [vmem:[#allocation52_spill] sm:$0xff]  ;;  %v5839_v19 = vcombine.low %v5788_v47, %v5820_v15  ;;  %v6263_v27 = vcombine.low %v6219_v20, %v19800_v38 }
 0x79b   : > { %6702 = vrot.lane.b32.xlu0 %v6654_v9, %s14982_s4  ;;  %v5702_v2 = vcombine.high %v24975_v53, %v24974_v8  ;;  %v6602_v9 = vcombine.high %v19648_v62, %v19658_v6  ;;  %v24978_v8 = vld [vmem:[#allocation17_spill] sm:$0xff]  ;;  %v24981_v62 = vld [vmem:[#allocation92_spill] sm:$0xff] }
 0x79c   : > { %v19773_v34 = vpop.permute.xlu1 %5118  ;;  %v6012_v6 = vcombine.high %v24981_v62, %v24980_v25  ;;  %v6518_v25 = vcombine.high %v6473_v12, %v6505_v4 }
 0x79d   : > { %24970 = vst [vmem:[#allocation58_spill] sm:$0xff] %v19773_v34 }
 0x79e   : > { %7068 = vrot.lane.b32.xlu1 %v24973_v60, %s14985_s9  ;;  %v24977_v60 = vld [vmem:[#allocation85_spill] sm:$0xff] }
 0x79f   : > { %7100 = vrot.lane.b32.xlu0 %v7046_v56, %s14983_s6  ;;  %v24976_v56 = vld [vmem:[#allocation83_spill] sm:$0xff] }
 0x7a0   : > { %v19791_v63 = vpop.permute.xlu1 %8278  ;;  %v6044_v34 = vcombine.high %v24977_v60, %v24976_v56  ;;  %v5996_v56 = vcombine.high %v24983_v52, %v24982_v39  ;;  %v24984_v60 = vld [vmem:[#allocation45_spill] sm:$0xff]  ;;  %v24989_v52 = vld [vmem:[#allocation114_spill] sm:$0xff] }
 0x7a1   : > { %v19797_v57 = vpop.permute.xlu0 %7470 }
 0x7a2   : > { %5846 = vrot.lane.b32.xlu1 %v5702_v2, %s14988_s11  ;;  %v24979_v2 = vld [vmem:[#allocation76_spill] sm:$0xff]  ;;  %v19827_v31 = vrot.slane %v6044_v34, %v15232_v17 }
 0x7a3   : > { %5878 = vrot.lane.b32.xlu0 %v5839_v19, %s14986_s23  ;;  %v6028_v53 = vcombine.high %v24979_v2, %v24978_v8  ;;  %v6616_v19 = vrot.slane %v6602_v9, %v15240_v29  ;;  %v5670_v8 = vcombine.high %v24985_v16, %v24984_v60  ;;  %v24986_v9 = vld [vmem:[#allocation46_spill] sm:$0xff]  ;;  %v19845_v16 = vrot.slane %v5996_v56, %v15232_v17 }
 0x7a4   : > { %v19809_v10 = vpop.permute.xlu1 %8282  ;;  %v5638_v39 = vcombine.high %v24987_v13, %v24986_v9  ;;  %v24990_v56 = vcombine.high %v24971_v18, %v24972_v30  ;;  %v5840_v18 = vcombine.high %v5788_v47, %v5820_v15  ;;  %v6466_v30 = vcombine.high %v19724_v1, %v19714_v44  ;;  %v24992_v15 = vld [vmem:[#allocation117_spill] sm:$0xff] }
 0x7a5   : > { %v19820_v22 = vpop.permute.xlu0 %7868  ;;  %v19835_v62 = vrot.slane %v6028_v53, %v15232_v17  ;;  %v5684_v34 = vrot.slane %v5670_v8, %v15240_v29  ;;  %v5742_v8 = vcombine.high %v19470_v48, %v19513_v54  ;;  %v5726_v44 = vcombine.high %v19301_v32, %v19332_v37 }
 0x7a6   : > { %6276 = vrot.lane.b32.xlu1 %v6126_v61, %s14987_s10  ;;  %v6655_v61 = vcombine.low %v6616_v19, %v19813_v11  ;;  %v6264_v1 = vcombine.high %v6219_v20, %v19800_v38  ;;  %v6480_v32 = vrot.slane %v6466_v30, %v15240_v29  ;;  %v6656_v30 = vcombine.high %v6616_v19, %v19813_v11 }
 0x7a7   : > { %6308 = vrot.lane.b32.xlu0 %v6263_v27, %s14984_s8  ;;  %v19838_v27 = vrot.slane %v6012_v6, %v15232_v17  ;;  %v6107_v4 = vcombine.low %v19835_v62, %v19827_v31  ;;  %v24988_v6 = vld [vmem:[#allocation116_spill] sm:$0xff]  ;;  %v19912_v37 = vrot.slane %v5726_v44, %v15232_v17  ;;  %v6244_v11 = vcombine.high %v19759_v42, %v19765_v7 }
 0x7a8   : > { %v19831_v2 = vpop.permute.xlu1 %8254  ;;  %v5448_v60 = vcombine.high %v24989_v52, %v24988_v6 }
 0x7a9   : > { %v19852_v53 = vpop.permute.xlu0 %8266  ;;  %v6075_v13 = vcombine.low %v19845_v16, %v19838_v27  ;;  %v19871_v52 = vrot.slane %v6107_v4, %v15240_v29  ;;  %v24993_v4 = vld [vmem:[#allocation105_spill] sm:$0xff] }
 0x7aa   : > { %6674 = vrot.lane.b32.xlu1 %v6518_v25, %s14982_s4  ;;  %v5652_v25 = vrot.slane %v5638_v39, %v15240_v29  ;;  %v24991_v39 = vld [vmem:[#allocation106_spill] sm:$0xff] }
 0x7ab   : > { %6706 = vrot.lane.b32.xlu0 %v6655_v61, %s14985_s9  ;;  %v6498_v61 = vcombine.high %v19711_v41, %v19704_v24  ;;  %v5758_v24 = vcombine.high %v19371_v55, %v19410_v23  ;;  %v5710_v41 = vcombine.high %v19414_v46, %v19439_v14  ;;  %v6083_v48 = vrot.slane %v6075_v13, %v15240_v29 }
 0x7ac   : > { %v19849_v12 = vpop.permute.xlu1 %7860  ;;  %v5703_v6 = vcombine.low %v5652_v25, %v5684_v34  ;;  %v5416_v47 = vcombine.high %v24992_v15, %v24991_v39  ;;  %v19892_v55 = vrot.slane %v5742_v8, %v15232_v17 }
 0x7ad   : > { %v19885_v54 = vrot.slane %v6498_v61, %v15240_v29  ;;  %v6127_v14 = vcombine.low %v6083_v48, %v19871_v52  ;;  %v19903_v13 = vrot.slane %v5758_v24, %v15232_v17  ;;  %v24996_v24 = vld [vmem:[#allocation57_spill] sm:$0xff] }
 0x7ae   : > { %7072 = vrot.lane.b32.xlu1 %v24990_v56, %s14983_s6  ;;  %v19906_v56 = vrot.slane %v5710_v41, %v15232_v17  ;;  %v19920_v8 = vrot.slane %v5416_v47, %v15240_v29  ;;  %v25000_v47 = vld [vmem:[#allocation20_spill] sm:$0xff] }
 0x7af   : > { %5484 = vrot.lane.b32.xlu0 %v5448_v60, %s14988_s11  ;;  %v5821_v38 = vcombine.low %v19892_v55, %v19903_v13  ;;  %v6519_v61 = vcombine.low %v6480_v32, %v19885_v54 }
 0x7b0   : > { %v19868_v9 = vpop.permute.xlu1 %8258  ;;  %v5789_v15 = vcombine.low %v19906_v56, %v19912_v37 }
 0x7b1   : > { %v19873_v33 = vpop.permute.xlu0 %7076 }
 0x7b2   : > { %5850 = vrot.lane.b32.xlu1 %v5703_v6, %s14986_s23  ;;  %v24994_v6 = vld [vmem:[#allocation24_spill] sm:$0xff] }
 0x7b3   : > { %5882 = vrot.lane.b32.xlu0 %v5840_v18, %s14987_s10  ;;  %v5384_v60 = vcombine.high %v24994_v6, %v24993_v4  ;;  %v24995_v18 = vld [vmem:[#allocation33_spill] sm:$0xff]  ;;  %v24999_v6 = vld [vmem:[#allocation112_spill] sm:$0xff] }
 0x7b4   : > { %v19894_v23 = vpop.permute.xlu1 %7498  ;;  %v5622_v41 = vcombine.high %v24996_v24, %v24995_v18  ;;  %v5590_v3 = vcombine.high %v25000_v47, %v24999_v6  ;;  %v25001_v18 = vld [vmem:[#allocation71_spill] sm:$0xff]  ;;  %v5797_v6 = vrot.slane %v5789_v15, %v15240_v29  ;;  %v19970_v15 = vrot.slane %v6244_v11, %v15240_v29 }
 0x7b5   : > { %v19897_v46 = vpop.permute.xlu0 %7506  ;;  %v5398_v44 = vrot.slane %v5384_v60, %v15240_v29  ;;  %v25002_v24 = vld [vmem:[#allocation11_spill] sm:$0xff] }
 0x7b6   : > { %6280 = vrot.lane.b32.xlu1 %v6127_v14, %s14984_s8  ;;  %v24997_v14 = vld [vmem:[#allocation69_spill] sm:$0xff]  ;;  %v5574_v51 = vcombine.high %v25002_v24, %v25001_v18  ;;  %v19945_v60 = vrot.slane %v5622_v41, %v15232_v17  ;;  %v19955_v7 = vrot.slane %v5590_v3, %v15232_v17  ;;  %v25007_v47 = vld [vmem:[#allocation75_spill] sm:$0xff] }
 0x7b7   : > { %6312 = vrot.lane.b32.xlu0 %v6264_v1, %s14982_s4  ;;  %v24998_v1 = vld [vmem:[#allocation61_spill] sm:$0xff]  ;;  %v5449_v49 = vcombine.low %v5398_v44, %v19920_v8 }
 0x7b8   : > { %v19916_v20 = vpop.permute.xlu1 %7896  ;;  %v5606_v4 = vcombine.high %v24998_v1, %v24997_v14  ;;  %v5704_v1 = vcombine.high %v5652_v25, %v5684_v34  ;;  %v25003_v34 = vld [vmem:[#allocation100_spill] sm:$0xff]  ;;  %v25004_v25 = vld [vmem:[#allocation113_spill] sm:$0xff] }
 0x7b9   : > { %v19924_v39 = vpop.permute.xlu0 %7904  ;;  %v25005_v41 = vcombine.low %v25003_v34, %v25004_v25  ;;  %v25008_v34 = vld [vmem:[#allocation56_spill] sm:$0xff]  ;;  %v25009_v25 = vld [vmem:[#allocation50_spill] sm:$0xff] }
 0x7ba   : > { %6678 = vrot.lane.b32.xlu1 %v6519_v61, %s14985_s9  ;;  %v19942_v61 = vrot.slane %v5821_v38, %v15240_v29  ;;  %v19952_v42 = vrot.slane %v5606_v4, %v15232_v17  ;;  %v19959_v38 = vrot.slane %v5574_v51, %v15232_v17  ;;  %v25006_v4 = vld [vmem:[#allocation99_spill] sm:$0xff] }
 0x7bb   : > { %6710 = vrot.lane.b32.xlu0 %v6656_v30, %s14983_s6  ;;  %v6212_v30 = vcombine.high %v19768_v50, %v19776_v43  ;;  %v8312_v50 = vsel %vm1027_vm2, %v25005_v41, %v19791_v63  ;;  %v5368_v51 = vcombine.high %v25007_v47, %v25006_v4  ;;  %v6128_v63 = vcombine.high %v6083_v48, %v19871_v52 }
 0x7bc   : > { %v8295_v19 = vpop.permute.xlu1 %8294  ;;  %v5841_v43 = vcombine.low %v5797_v6, %v19942_v61  ;;  %v5685_v3 = vcombine.low %v19952_v42, %v19945_v60  ;;  %v8313_v18 = vsel %vm187_vm0, %v8312_v50, %v19809_v10  ;;  %v5653_v11 = vcombine.low %v19959_v38, %v19955_v7  ;;  %v25012_v50 = vld [vmem:[#allocation39_spill] sm:$0xff] }
 0x7bd   : > { %v8303_v14 = vpop.permute.xlu0 %8302  ;;  %v5336_v41 = vcombine.high %v25009_v25, %v25008_v34  ;;  %v5352_v4 = vcombine.high %v25011_v59, %v25010_v26  ;;  %v6108_v10 = vcombine.high %v19835_v62, %v19827_v31  ;;  %v8314_v52 = vsel %vm1030_vm3, %v8313_v18, %v19681_v40 }
 0x7be   : > { %5488 = vrot.lane.b32.xlu1 %v5449_v49, %s14986_s23  ;;  %v20000_v34 = vrot.slane %v5368_v51, %v15232_v17  ;;  %v6520_v59 = vcombine.high %v6480_v32, %v19885_v54  ;;  %v5693_v26 = vrot.slane %v5685_v3, %v15240_v29  ;;  %v6076_v31 = vcombine.high %v19845_v16, %v19838_v27  ;;  %v25014_v32 = vld [vmem:[#allocation63_spill] sm:$0xff] }
 0x7bf   : > { %5854 = vrot.lane.b32.xlu0 %v5704_v1, %s14987_s10  ;;  %v6226_v1 = vrot.slane %v6212_v30, %v15240_v29  ;;  %v20010_v40 = vrot.slane %v5336_v41, %v15232_v17  ;;  %v20013_v62 = vrot.slane %v5352_v4, %v15232_v17  ;;  %v8315_v51 = vsel %vm1032_vm4, %v8314_v52, %v19731_v0  ;;  %v25015_v3 = vld [vmem:[#allocation19_spill] sm:$0xff] }
 0x7c0   : > { %v19966_v49 = vpop.permute.xlu1 %7502  ;;  %v5661_v54 = vrot.slane %v5653_v11, %v15240_v29  ;;  %v5232_v18 = vcombine.high %v25015_v3, %v25014_v32  ;;  %v8316_v27 = vsel %vm1034_vm5, %v8315_v51, %v8295_v19  ;;  %v6122_v41 = vrot.slane %v6108_v10, %v15240_v29  ;;  %v25019_v19 = vld [vmem:[#allocation13_spill] sm:$0xff]  ;;  %v25020_v32 = vld [vmem:[#allocation78_spill] sm:$0xff] }
 0x7c1   : > { %v19978_v24 = vpop.permute.xlu0 %7080  ;;  %v6265_v30 = vcombine.low %v6226_v1, %v19970_v15  ;;  %v5431_v0 = vcombine.low %v20013_v62, %v20000_v34  ;;  %v6090_v51 = vrot.slane %v6076_v31, %v15240_v29  ;;  %v25021_v3 = vld [vmem:[#allocation86_spill] sm:$0xff] }
 0x7c2   : > { %5886 = vrot.lane.b32.xlu1 %v5841_v43, %s14984_s8  ;;  %v25013_v43 = vld [vmem:[#allocation97_spill] sm:$0xff]  ;;  %v5705_v11 = vcombine.low %v5661_v54, %v5693_v26 }
 0x7c3   : > { %6284 = vrot.lane.b32.xlu0 %v6128_v63, %s14982_s4  ;;  %v5320_v47 = vcombine.high %v25013_v43, %v25012_v50  ;;  %v5450_v63 = vcombine.high %v5398_v44, %v19920_v8  ;;  %v25016_v50 = vld [vmem:[#allocation12_spill] sm:$0xff]  ;;  %v25018_v44 = vld [vmem:[#allocation29_spill] sm:$0xff] }
 0x7c4   : > { %v19994_v48 = vpop.permute.xlu1 %7900  ;;  %v25017_v43 = vld [vmem:[#allocation84_spill] sm:$0xff]  ;;  %v5216_v10 = vcombine.high %v25019_v19, %v25018_v44 }
 0x7c5   : > { %v20002_v25 = vpop.permute.xlu0 %7510  ;;  %v20025_v4 = vrot.slane %v5320_v47, %v15232_v17 }
 0x7c6   : > { %6316 = vrot.lane.b32.xlu1 %v6265_v30, %s14985_s9 }
 0x7c7   : > { %6682 = vrot.lane.b32.xlu0 %v6520_v59, %s14983_s6  ;;  %v5200_v59 = vcombine.high %v25017_v43, %v25016_v50  ;;  %v5399_v47 = vcombine.low %v20025_v4, %v20010_v40  ;;  %v6129_v43 = vcombine.low %v6090_v51, %v6122_v41 }
 0x7c8   : > { %v8299_v16 = vpop.permute.xlu1 %8298 }
 0x7c9   : > { %v8317_v52 = vsel %vm1036_vm6, %v8316_v27, %v8299_v16  ;;  %v20030_v30 = vpop.permute.xlu0 %7908  ;;  %v5184_v27 = vcombine.high %v25021_v3, %v25020_v32  ;;  %v20057_v31 = vrot.slane %v5200_v59, %v15232_v17 }
 0x7ca   : > { %5492 = vrot.lane.b32.xlu1 %v5450_v63, %s14987_s10  ;;  %v8318_v8 = vsel %vm1038_vm7, %v8317_v52, %v8303_v14  ;;  %v5842_v63 = vcombine.high %v5797_v6, %v19942_v61  ;;  %v20048_v14 = vrot.slane %v5232_v18, %v15232_v17  ;;  %v5822_v52 = vcombine.high %v19892_v55, %v19903_v13 }
 0x7cb   : > { %5858 = vrot.lane.b32.xlu0 %v5705_v11, %s14984_s8  ;;  %8345 = vmatprep.subr.mxu1 %v8318_v8  ;;  %v5439_v11 = vrot.slane %v5431_v0, %v15240_v29  ;;  %v20060_v8 = vrot.slane %v5216_v10, %v15232_v17  ;;  %v5790_v61 = vcombine.high %v19906_v56, %v19912_v37 }
 0x7cc   : > { %v20044_v16 = vpop.permute.xlu1 %7474  ;;  %v5407_v55 = vrot.slane %v5399_v47, %v15240_v29  ;;  %v6266_v6 = vcombine.high %v6226_v1, %v19970_v15  ;;  %v20070_v18 = vrot.slane %v5184_v27, %v15232_v17  ;;  %v5836_v19 = vrot.slane %v5822_v52, %v15240_v29  ;;  %v25023_v52 = vld [vmem:[#allocation32_spill] sm:$0xff] }
 0x7cd   : > { %v20052_v50 = vpop.permute.xlu0 %6686  ;;  %v5295_v0 = vcombine.low %v20060_v8, %v20048_v14  ;;  %v5804_v37 = vrot.slane %v5790_v61, %v15240_v29  ;;  %v5706_v1 = vcombine.high %v5661_v54, %v5693_v26  ;;  %v5686_v10 = vcombine.high %v19952_v42, %v19945_v60 }
 0x7ce   : > { %5890 = vrot.lane.b32.xlu1 %v5842_v63, %s14982_s4  ;;  %v5451_v44 = vcombine.low %v5407_v55, %v5439_v11  ;;  %v5263_v56 = vcombine.low %v20070_v18, %v20057_v31  ;;  %v5654_v27 = vcombine.high %v19959_v38, %v19955_v7  ;;  %v25022_v63 = vld [vmem:[#allocation103_spill] sm:$0xff]  ;;  %v6130_v54 = vcombine.high %v6090_v51, %v6122_v41 }
 0x7cf   : > { %6288 = vrot.lane.b32.xlu0 %v6129_v43, %s14985_s9  ;;  %v5843_v32 = vcombine.low %v5804_v37, %v5836_v19  ;;  %v5303_v3 = vrot.slane %v5295_v0, %v15240_v29  ;;  %v25024_v43 = vcombine.low %v25022_v63, %v25023_v52  ;;  %v5700_v0 = vrot.slane %v5686_v10, %v15240_v29 }
 0x7d0   : > { %v20066_v13 = vpop.permute.xlu1 %7872  ;;  %v5271_v60 = vrot.slane %v5263_v56, %v15240_v29  ;;  %v5668_v41 = vrot.slane %v5654_v27, %v15240_v29  ;;  %v5400_v27 = vcombine.high %v20025_v4, %v20010_v40 }
 0x7d1   : > { %v20074_v59 = vpop.permute.xlu0 %7084  ;;  %v8305_v61 = vsel %vm1027_vm2, %v25024_v43, %v19653_v36  ;;  %v25026_v36 = vld [vmem:[#allocation31_spill] sm:$0xff] }
 0x7d2   : > { %6320 = vrot.lane.b32.xlu1 %v6266_v6, %s14983_s6  ;;  %v8306_v42 = vsel %vm187_vm0, %v8305_v61, %v19831_v2  ;;  %v5315_v38 = vcombine.low %v5271_v60, %v5303_v3  ;;  %v5708_v61 = vcombine.high %v5668_v41, %v5700_v0 }
 0x7d3   : > { %5496 = vrot.lane.b32.xlu0 %v5451_v44, %s14984_s8  ;;  %v8307_v6 = vsel %vm1030_vm3, %v8306_v42, %v19868_v9  ;;  %v25025_v44 = vld [vmem:[#allocation109_spill] sm:$0xff]  ;;  %v5432_v9 = vcombine.high %v20013_v62, %v20000_v34  ;;  %v5296_v34 = vcombine.high %v20060_v8, %v20048_v14  ;;  %v5316_v8 = vcombine.high %v5271_v60, %v5303_v3  ;;  %v25029_v3 = vld [vmem:[#allocation28_spill] sm:$0xff] }
 0x7d4   : > { %v8271_v15 = vpop.permute.xlu1 %8270  ;;  %v8308_v51 = vsel %vm1032_vm4, %v8307_v6, %v19780_v28 }
 0x7d5   : > { %v20084_v47 = vpop.permute.xlu0 %7514  ;;  %v8309_v28 = vsel %vm1034_vm5, %v8308_v51, %v19852_v53  ;;  %v5264_v53 = vcombine.high %v20070_v18, %v20057_v31  ;;  %v25028_v18 = vld [vmem:[#allocation110_spill] sm:$0xff] }
 0x7d6   : > { %5862 = vrot.lane.b32.xlu1 %v5706_v1, %s14982_s4  ;;  %v25027_v1 = vcombine.low %v25025_v44, %v25026_v36  ;;  %v25030_v60 = vcombine.low %v25028_v18, %v25029_v3  ;;  %v25037_v18 = vld [vmem:[#allocation108_spill] sm:$0xff] }
 0x7d7   : > { %5894 = vrot.lane.b32.xlu0 %v5843_v32, %s14985_s9  ;;  %v5278_v31 = vrot.slane %v5264_v53, %v15240_v29 }
 0x7d8   : > { %v20099_v26 = vpop.permute.xlu1 %7478  ;;  %v7922_v32 = vsel %vm1027_vm2, %v25027_v1, %v19667_v35  ;;  %v5452_v35 = vcombine.high %v5407_v55, %v5439_v11  ;;  %v5844_v11 = vcombine.high %v5804_v37, %v5836_v19  ;;  %v5446_v55 = vrot.slane %v5432_v9, %v15240_v29 }
 0x7d9   : > { %v7913_v7 = vpop.permute.xlu0 %7912  ;;  %v7923_v2 = vsel %vm187_vm0, %v7922_v32, %v19698_v45  ;;  %v5707_v45 = vcombine.low %v5668_v41, %v5700_v0  ;;  %v5414_v19 = vrot.slane %v5400_v27, %v15240_v29  ;;  %v7915_v42 = vsel %vm1027_vm2, %v25030_v60, %v19849_v12  ;;  %v14783_v12 = vld [vmem:[%s23874_s2 + $0x8] sm:$0xff]  ;;  %v25032_v41 = vld [vmem:[#allocation68_spill] sm:$0xff] }
 0x7da   : > { %6292 = vrot.lane.b32.xlu1 %v6130_v54, %s14983_s6  ;;  %v7924_v56 = vsel %vm1030_vm3, %v7923_v2, %v19916_v20  ;;  %v7916_v0 = vsel %vm187_vm0, %v7915_v42, %v19751_v5  ;;  %v25031_v2 = vld [vmem:[#allocation64_spill] sm:$0xff] }
 0x7db   : > { %5468 = vrot.lane.b32.xlu0 %v5315_v38, %s14984_s8  ;;  %v7925_v63 = vsel %vm1032_vm4, %v7924_v56, %v19994_v48  ;;  %v8310_v48 = vsel %vm1036_vm6, %v8309_v28, %v8271_v15  ;;  %v5310_v15 = vrot.slane %v5296_v34, %v15240_v29  ;;  %v5454_v38 = vcombine.high %v5414_v19, %v5446_v55 }
 0x7dc   : > { %v7877_v10 = vpop.permute.xlu1 %7876  ;;  %v7926_v20 = vsel %vm1034_vm5, %v7925_v63, %v19924_v39  ;;  %v7917_v1 = vsel %vm1030_vm3, %v7916_v0, %v19820_v22  ;;  %v25033_v9 = vcombine.low %v25031_v2, %v25032_v41 }
 0x7dd   : > { %v20122_v52 = vpop.permute.xlu0 %6690  ;;  %v7927_v40 = vsel %vm1036_vm6, %v7926_v20, %v20030_v30  ;;  %v5453_v30 = vcombine.low %v5414_v19, %v5446_v55  ;;  %v5317_v6 = vcombine.low %v5278_v31, %v5310_v15  ;;  %v5318_v36 = vcombine.high %v5278_v31, %v5310_v15  ;;  %v25034_v55 = vld [vmem:[#allocation125_spill] sm:$0xff] }
 0x7de   : > { %5500 = vrot.lane.b32.xlu1 %v5452_v35, %s14982_s4  ;;  %v7928_v39 = vsel %vm1038_vm7, %v7927_v40, %v7913_v7  ;;  %v7532_v5 = vsel %vm1027_vm2, %v25033_v9, %v19894_v23  ;;  %v7918_v51 = vsel %vm1032_vm4, %v7917_v1, %v20066_v13  ;;  %v25041_v9 = vld [vmem:[#allocation36_spill] sm:$0xff] }
 0x7df   : > { %5866 = vrot.lane.b32.xlu0 %v5707_v45, %s14985_s9  ;;  %v7533_v56 = vsel %vm187_vm0, %v7532_v5, %v19966_v49  ;;  %v7919_v35 = vsel %vm1034_vm5, %v7918_v51, %v7877_v10 }
 0x7e0   : > { %v8275_v62 = vpop.permute.xlu1 %8274  ;;  %v7534_v23 = vsel %vm1030_vm3, %v7533_v56, %v19897_v46 }
 0x7e1   : > { %v20138_v4 = vpop.permute.xlu0 %7088  ;;  %v8311_v14 = vsel %vm1038_vm7, %v8310_v48, %v8275_v62  ;;  %v7535_v13 = vsel %vm1032_vm4, %v7534_v23, %v20002_v25  ;;  %v25035_v25 = vld [vmem:[#allocation126_spill] sm:$0xff] }
 0x7e2   : > { %5898 = vrot.lane.b32.xlu1 %v5844_v11, %s14983_s6  ;;  %8346 = vmatpush1.msra.mxu1 %v8311_v14  ;;  %v7536_v34 = vsel %vm1034_vm5, %v7535_v13, %v20084_v47  ;;  %v25036_v40 = vcombine.low %v25034_v55, %v25035_v25 }
 0x7e3   : > { %5472 = vrot.lane.b32.xlu0 %v5316_v8, %s14982_s4  ;;  %8347 = vmatprep.subr.mxu1 %v7928_v39 }
 0x7e4   : > { %v7483_v37 = vpop.permute.xlu1 %7482  ;;  %v7525_v47 = vsel %vm1027_vm2, %v25036_v40, %v19797_v57 }
 0x7e5   : > { %v7519_v43 = vpop.permute.xlu0 %7518  ;;  %v7526_v14 = vsel %vm187_vm0, %v7525_v47, %v20044_v16 }
 0x7e6   : > { %5504 = vrot.lane.b32.xlu1 %v5453_v30, %s14985_s9  ;;  %v7537_v10 = vsel %vm1036_vm6, %v7536_v34, %v7519_v43  ;;  %v7527_v53 = vsel %vm1030_vm3, %v7526_v14, %v20099_v26  ;;  %v25038_v26 = vld [vmem:[#allocation43_spill] sm:$0xff] }
 0x7e7   : > { %5870 = vrot.lane.b32.xlu0 %v5708_v61, %s14983_s6  ;;  %v7528_v19 = vsel %vm1032_vm4, %v7527_v53, %v7483_v37  ;;  %v25039_v3 = vcombine.low %v25037_v18, %v25038_v26  ;;  %v25048_v18 = vld [vmem:[#allocation115_spill] sm:$0xff]  ;;  %v25050_v26 = vld [vmem:[#allocation89_spill] sm:$0xff] }
 0x7e8   : > { %v7881_v54 = vpop.permute.xlu1 %7880 }
 0x7e9   : > { %v20156_v7 = vpop.permute.xlu0 %6296  ;;  %v7920_v22 = vsel %vm1036_vm6, %v7919_v35, %v7881_v54  ;;  %v7110_v37 = vsel %vm1027_vm2, %v25039_v3, %v19873_v33  ;;  %v25043_v35 = vld [vmem:[#allocation127_spill] sm:$0xff] }
 0x7ea   : > { %5476 = vrot.lane.b32.xlu1 %v5317_v6, %s14985_s9  ;;  %v7111_v42 = vsel %vm187_vm0, %v7110_v37, %v19978_v24 }
 0x7eb   : > { %5508 = vrot.lane.b32.xlu0 %v5454_v38, %s14983_s6  ;;  %v7112_v6 = vsel %vm1030_vm3, %v7111_v42, %v20074_v59  ;;  %v25040_v59 = vld [vmem:[#allocation42_spill] sm:$0xff] }
 0x7ec   : > { %v7487_v44 = vpop.permute.xlu1 %7486  ;;  %v7113_v38 = vsel %vm1032_vm4, %v7112_v6, %v20138_v4  ;;  %v25042_v5 = vcombine.low %v25040_v59, %v25041_v9 }
 0x7ed   : > { %v20167_v32 = vpop.permute.xlu0 %6694  ;;  %v7529_v30 = vsel %vm1034_vm5, %v7528_v19, %v7487_v44 }
 0x7ee   : > { %5480 = vrot.lane.b32.xlu1 %v5318_v36, %s14983_s6  ;;  %v7103_v4 = vsel %vm1027_vm2, %v25042_v5, %v19617_v21  ;;  %v25053_v5 = vld [vmem:[#allocation121_spill] sm:$0xff] }
 0x7ef   : > { %8325 = vperm.xlu0 %14863, %v14783_v12   ;;  %v7104_v51 = vsel %vm187_vm0, %v7103_v4, %v19632_v58  ;;  %v25054_v4 = vld [vmem:[#allocation26_spill] sm:$0xff] }
 0x7f0   : > { %v7885_v63 = vpop.permute.xlu1 %7884 }
 0x7f1   : > { %v7093_v45 = vpop.permute.xlu0 %7092  ;;  %v7921_v27 = vsel %vm1038_vm7, %v7920_v22, %v7885_v63  ;;  %v7105_v22 = vsel %vm1030_vm3, %v7104_v51, %v25043_v35  ;;  %v25055_v51 = vcombine.low %v25053_v5, %v25054_v4 }
 0x7f2   : > { %8348 = vmatpush1.msra.mxu1 %v7921_v27  ;;  %v7114_v0 = vsel %vm1034_vm5, %v7113_v38, %v7093_v45  ;;  %v25044_v45 = vld [vmem:[#allocation82_spill] sm:$0xff] }
 0x7f3   : > { %v7106_v27 = vsel %vm1032_vm4, %v7105_v22, %v25044_v45  ;;  %v6330_v35 = vsel %vm1027_vm2, %v25055_v51, %v20156_v7  ;;  %v25056_v7 = vld [vmem:[#allocation16_spill] sm:$0xff] }
 0x7f4   : > { %v7491_v49 = vpop.permute.xlu1 %7490  ;;  %v25073_v51 = vld [vmem:[#allocation60_spill] sm:$0xff] }
 0x7f5   : > { %v7523_v28 = vpop.permute.xlu0 %7522  ;;  %v7530_v15 = vsel %vm1036_vm6, %v7529_v30, %v7491_v49 }
 0x7f6   : > { %v7538_v20 = vsel %vm1038_vm7, %v7537_v10, %v7523_v28  ;;  %v25045_v28 = vld [vmem:[#allocation40_spill] sm:$0xff] }
 0x7f7   : > { %8349 = vmatprep.subr.mxu1 %v7538_v20  ;;  %v25046_v20 = vld [vmem:[#allocation95_spill] sm:$0xff] }
 0x7f8   : > { %v20190_v48 = vpop.permute.xlu1 %6268  ;;  %v25047_v55 = vcombine.low %v25045_v28, %v25046_v20 }
 0x7f9   : > { %v20192_v62 = vpop.permute.xlu0 %6300 }
 0x7fa   : > { %v6720_v25 = vsel %vm1027_vm2, %v25047_v55, %v20052_v50 }
 0x7fb   : > { %v6721_v47 = vsel %vm187_vm0, %v6720_v25, %v20122_v52  ;;  %v25049_v52 = vld [vmem:[#allocation94_spill] sm:$0xff] }
 0x7fc   : > { %v20194_v11 = vpop.permute.xlu1 %6666  ;;  %v25051_v3 = vcombine.low %v25049_v52, %v25050_v26  ;;  %v25062_v26 = vld [vmem:[#allocation52_spill] sm:$0xff] }
 0x7fd   : > { %v6699_v46 = vpop.permute.xlu0 %6698 }
 0x800   : > { %v7065_v8 = vpop.permute.xlu1 %7064 }
 0x801   : > { %v7097_v39 = vpop.permute.xlu0 %7096  ;;  %v7107_v23 = vsel %vm1034_vm5, %v7106_v27, %v7065_v8  ;;  %v6722_v8 = vsel %vm1030_vm3, %v6721_v47, %v20167_v32  ;;  %v6713_v32 = vsel %vm1027_vm2, %v25051_v3, %v25048_v18  ;;  %v25063_v3 = vld [vmem:[#allocation18_spill] sm:$0xff] }
 0x802   : > { %v7115_v36 = vsel %vm1036_vm6, %v7114_v0, %v7097_v39  ;;  %v6723_v53 = vsel %vm1032_vm4, %v6722_v8, %v6699_v46  ;;  %v25052_v46 = vld [vmem:[#allocation77_spill] sm:$0xff] }
 0x803   : > { %v6714_v42 = vsel %vm187_vm0, %v6713_v32, %v25052_v46  ;;  %v25064_v32 = vcombine.low %v25062_v26, %v25063_v3 }
 0x804   : > { %v7495_v43 = vpop.permute.xlu1 %7494  ;;  %v6715_v6 = vsel %vm1030_vm3, %v6714_v42, %v20194_v11  ;;  %v6331_v11 = vsel %vm187_vm0, %v6330_v35, %v20192_v62 }
 0x805   : > { %v20208_v61 = vpop.permute.xlu0 %5874  ;;  %v7531_v31 = vsel %vm1038_vm7, %v7530_v15, %v7495_v43 }
 0x806   : > { %8350 = vmatpush1.msra.mxu1 %v7531_v31 }
 0x808   : > { %v20211_v57 = vpop.permute.xlu1 %6272 }
 0x809   : > { %v20213_v16 = vpop.permute.xlu0 %6304 }
 0x80c   : > { %v6671_v60 = vpop.permute.xlu1 %6670 }
 0x80d   : > { %v6703_v54 = vpop.permute.xlu0 %6702  ;;  %v6716_v38 = vsel %vm1032_vm4, %v6715_v6, %v6671_v60  ;;  %v25065_v6 = vld [vmem:[#allocation22_spill] sm:$0xff] }
 0x80e   : > { %v6724_v39 = vsel %vm1034_vm5, %v6723_v53, %v6703_v54 }
 0x810   : > { %v7069_v44 = vpop.permute.xlu1 %7068 }
 0x811   : > { %v7101_v12 = vpop.permute.xlu0 %7100  ;;  %v7108_v13 = vsel %vm1036_vm6, %v7107_v23, %v7069_v44 }
 0x812   : > { %v7116_v1 = vsel %vm1038_vm7, %v7115_v36, %v7101_v12 }
 0x813   : > { %8351 = vmatprep.subr.mxu1 %v7116_v1 }
 0x814   : > { %v20229_v33 = vpop.permute.xlu1 %5846 }
 0x815   : > { %v20231_v2 = vpop.permute.xlu0 %5878  ;;  %v5901_v46 = vsel %vm1027_vm2, %v25064_v32, %v20229_v33  ;;  %v25070_v33 = vld [vmem:[#allocation80_spill] sm:$0xff]  ;;  %v25089_v32 = vld [vmem:[#allocation93_spill] sm:$0xff] }
 0x818   : > { %v6277_v24 = vpop.permute.xlu1 %6276 }
 0x819   : > { %v6309_v41 = vpop.permute.xlu0 %6308 }
 0x81c   : > { %v6675_v56 = vpop.permute.xlu1 %6674 }
 0x81d   : > { %v6707_v63 = vpop.permute.xlu0 %6706  ;;  %v6717_v0 = vsel %vm1034_vm5, %v6716_v38, %v6675_v56  ;;  %v6332_v56 = vsel %vm1030_vm3, %v6331_v11, %v20213_v16  ;;  %v25066_v38 = vld [vmem:[#allocation62_spill] sm:$0xff] }
 0x81e   : > { %v6725_v30 = vsel %vm1036_vm6, %v6724_v39, %v6707_v63  ;;  %v6333_v63 = vsel %vm1032_vm4, %v6332_v56, %v6309_v41  ;;  %v25074_v11 = vld [vmem:[#allocation114_spill] sm:$0xff] }
 0x820   : > { %v7073_v34 = vpop.permute.xlu1 %7072 }
 0x821   : > { %v20246_v49 = vpop.permute.xlu0 %5484  ;;  %v7109_v21 = vsel %vm1038_vm7, %v7108_v13, %v7073_v34 }
 0x822   : > { %8352 = vmatpush1.msra.mxu1 %v7109_v21  ;;  %v25057_v21 = vld [vmem:[#allocation38_spill] sm:$0xff] }
 0x823   : > { %v25058_v62 = vcombine.low %v25056_v7, %v25057_v21  ;;  %v25081_v21 = vld [vmem:[#allocation104_spill] sm:$0xff] }
 0x824   : > { %v20249_v10 = vpop.permute.xlu1 %5850 }
 0x825   : > { %v5883_v58 = vpop.permute.xlu0 %5882  ;;  %v6323_v28 = vsel %vm1027_vm2, %v25058_v62, %v20190_v48  ;;  %v25059_v48 = vld [vmem:[#allocation124_spill] sm:$0xff] }
 0x826   : > { %v6324_v16 = vsel %vm187_vm0, %v6323_v28, %v20211_v57 }
 0x827   : > { %v6325_v41 = vsel %vm1030_vm3, %v6324_v16, %v6277_v24 }
 0x828   : > { %v6281_v40 = vpop.permute.xlu1 %6280 }
 0x829   : > { %v6313_v14 = vpop.permute.xlu0 %6312  ;;  %v6326_v25 = vsel %vm1032_vm4, %v6325_v41, %v6281_v40  ;;  %v25082_v41 = vld [vmem:[#allocation70_spill] sm:$0xff] }
 0x82a   : > { %v6334_v45 = vsel %vm1034_vm5, %v6333_v63, %v6313_v14 }
 0x82c   : > { %v6679_v19 = vpop.permute.xlu1 %6678 }
 0x82d   : > { %v6711_v15 = vpop.permute.xlu0 %6710  ;;  %v6718_v36 = vsel %vm1036_vm6, %v6717_v0, %v6679_v19  ;;  %v25060_v19 = vld [vmem:[#allocation122_spill] sm:$0xff] }
 0x82e   : > { %v6726_v43 = vsel %vm1038_vm7, %v6725_v30, %v6711_v15  ;;  %v25061_v30 = vcombine.low %v25059_v48, %v25060_v19 }
 0x82f   : > { %8353 = vmatprep.subr.mxu1 %v6726_v43 }
 0x830   : > { %v20264_v50 = vpop.permute.xlu1 %5488  ;;  %v5908_v57 = vsel %vm1027_vm2, %v25061_v30, %v20208_v61 }
 0x831   : > { %v5855_v31 = vpop.permute.xlu0 %5854  ;;  %v5909_v24 = vsel %vm187_vm0, %v5908_v57, %v20231_v2  ;;  %v5902_v2 = vsel %vm187_vm0, %v5901_v46, %v20249_v10  ;;  %v25086_v57 = vld [vmem:[#allocation41_spill] sm:$0xff] }
 0x832   : > { %v5910_v40 = vsel %vm1030_vm3, %v5909_v24, %v5883_v58 }
 0x834   : > { %v5887_v37 = vpop.permute.xlu1 %5886 }
 0x835   : > { %v6285_v54 = vpop.permute.xlu0 %6284  ;;  %v5911_v18 = vsel %vm1032_vm4, %v5910_v40, %v5887_v37  ;;  %v25067_v37 = vld [vmem:[#allocation65_spill] sm:$0xff] }
 0x836   : > { %v6327_v47 = vsel %vm1034_vm5, %v6326_v25, %v6285_v54  ;;  %v25068_v0 = vcombine.low %v25066_v38, %v25067_v37  ;;  %v25087_v40 = vld [vmem:[#allocation53_spill] sm:$0xff]  ;;  %v25091_v38 = vld [vmem:[#allocation72_spill] sm:$0xff] }
 0x838   : > { %v6317_v44 = vpop.permute.xlu1 %6316 }
 0x839   : > { %v6683_v12 = vpop.permute.xlu0 %6682  ;;  %v6335_v27 = vsel %vm1036_vm6, %v6334_v45, %v6317_v44  ;;  %v5128_v44 = vsel %vm1027_vm2, %v25068_v0, %v25065_v6  ;;  %v25077_v45 = vld [vmem:[#allocation120_spill] sm:$0xff] }
 0x83a   : > { %v6719_v1 = vsel %vm1038_vm7, %v6718_v36, %v6683_v12  ;;  %v5903_v36 = vsel %vm1030_vm3, %v5902_v2, %v5855_v31  ;;  %v25069_v12 = vld [vmem:[#allocation21_spill] sm:$0xff] }
 0x83b   : > { %8354 = vmatpush1.msra.mxu1 %v6719_v1  ;;  %v25071_v1 = vld [vmem:[#allocation87_spill] sm:$0xff] }
 0x83c   : > { %v5493_v59 = vpop.permute.xlu1 %5492  ;;  %v25072_v5 = vcombine.low %v25070_v33, %v25071_v1 }
 0x83d   : > { %v5859_v9 = vpop.permute.xlu0 %5858 }
 0x83e   : > { %v5121_v4 = vsel %vm1027_vm2, %v25072_v5, %v25069_v12  ;;  %v5904_v10 = vsel %vm1032_vm4, %v5903_v36, %v5859_v9  ;;  %v5129_v9 = vsel %vm187_vm0, %v5128_v44, %v25081_v21  ;;  %v25093_v44 = vld [vmem:[#allocation66_spill] sm:$0xff]  ;;  %v25094_v12 = vmov 0.0  }
 0x83f   : > { %v5122_v35 = vsel %vm187_vm0, %v5121_v4, %v25073_v51 }
 0x840   : > { %v5891_v60 = vpop.permute.xlu1 %5890 }
 0x841   : > { %v6289_v22 = vpop.permute.xlu0 %6288  ;;  %v5912_v52 = vsel %vm1034_vm5, %v5911_v18, %v5891_v60  ;;  %v25075_v60 = vld [vmem:[#allocation116_spill] sm:$0xff] }
 0x842   : > { %v6328_v14 = vsel %vm1036_vm6, %v6327_v47, %v6289_v22  ;;  %v25076_v56 = vcombine.low %v25074_v11, %v25075_v60 }
 0x844   : > { %v6321_v23 = vpop.permute.xlu1 %6320  ;;  %v5518_v22 = vsel %vm1027_vm2, %v25076_v56, %v20246_v49 }
 0x845   : > { %v5497_v13 = vpop.permute.xlu0 %5496  ;;  %v6336_v34 = vsel %vm1038_vm7, %v6335_v27, %v6321_v23  ;;  %v25078_v27 = vld [vmem:[#allocation55_spill] sm:$0xff]  ;;  %v5519_v62 = vsel %vm187_vm0, %v5518_v22, %v20264_v50  ;;  %v25085_v50 = vld [vmem:[#allocation96_spill] sm:$0xff] }
 0x846   : > { %8355 = vmatprep.subr.mxu1 %v6336_v34  ;;  %v25079_v23 = vld [vmem:[#allocation67_spill] sm:$0xff]  ;;  %v5520_v25 = vsel %vm1030_vm3, %v5519_v62, %v5493_v59 }
 0x847   : > { %v25080_v34 = vcombine.low %v25078_v27, %v25079_v23 }
 0x848   : > { %v5863_v20 = vpop.permute.xlu1 %5862 }
 0x849   : > { %v5895_v55 = vpop.permute.xlu0 %5894  ;;  %v5905_v31 = vsel %vm1034_vm5, %v5904_v10, %v5863_v20  ;;  %v5511_v7 = vsel %vm1027_vm2, %v25080_v34, %v25077_v45  ;;  %v25083_v20 = vld [vmem:[#allocation81_spill] sm:$0xff] }
 0x84a   : > { %v5913_v42 = vsel %vm1036_vm6, %v5912_v52, %v5895_v55  ;;  %v5512_v49 = vsel %vm187_vm0, %v5511_v7, %v25082_v41  ;;  %v5130_v55 = vsel %vm1030_vm3, %v5129_v9, %v25083_v20  ;;  %v25088_v52 = vld [vmem:[#allocation54_spill] sm:$0xff] }
 0x84b   : > { %v5131_v24 = vsel %vm1032_vm4, %v5130_v55, %v25086_v57  ;;  %v5513_v59 = vsel %vm1030_vm3, %v5512_v49, %v25087_v40 }
 0x84c   : > { %v6293_v8 = vpop.permute.xlu1 %6292  ;;  %v5132_v26 = vsel %vm1034_vm5, %v5131_v24, %v25088_v52 }
 0x84d   : > { %v5469_v53 = vpop.permute.xlu0 %5468  ;;  %v6329_v39 = vsel %vm1038_vm7, %v6328_v14, %v6293_v8  ;;  %v25084_v14 = vld [vmem:[#allocation47_spill] sm:$0xff]  ;;  %v5133_v37 = vsel %vm1036_vm6, %v5132_v26, %v25091_v38 }
 0x84e   : > { %8356 = vmatpush1.msra.mxu1 %v6329_v39  ;;  %v5123_v8 = vsel %vm1030_vm3, %v5122_v35, %v25084_v14  ;;  %v5521_v39 = vsel %vm1032_vm4, %v5520_v25, %v5497_v13  ;;  %v5514_v13 = vsel %vm1032_vm4, %v5513_v59, %v5469_v53  ;;  %v25092_v53 = vld [vmem:[#allocation58_spill] sm:$0xff] }
 0x84f   : > { %v5124_v48 = vsel %vm1032_vm4, %v5123_v8, %v25085_v50  ;;  %v5134_v0 = vsel %vm1038_vm7, %v5133_v37, %v25092_v53 }
 0x850   : > { %v5501_v15 = vpop.permute.xlu1 %5500 }
 0x851   : > { %v5867_v43 = vpop.permute.xlu0 %5866  ;;  %v5522_v19 = vsel %vm1034_vm5, %v5521_v39, %v5501_v15  ;;  %v5125_v15 = vsel %vm1034_vm5, %v5124_v48, %v25089_v32 }
 0x852   : > { %v5906_v28 = vsel %vm1036_vm6, %v5905_v31, %v5867_v43 }
 0x854   : > { %v5899_v61 = vpop.permute.xlu1 %5898 }
 0x855   : > { %v5473_v54 = vpop.permute.xlu0 %5472  ;;  %v5914_v58 = vsel %vm1038_vm7, %v5913_v42, %v5899_v61  ;;  %v25090_v42 = vld [vmem:[#allocation59_spill] sm:$0xff] }
 0x856   : > { %8357 = vmatprep.subr.mxu1 %v5914_v58  ;;  %v5515_v46 = vsel %vm1034_vm5, %v5514_v13, %v5473_v54  ;;  %v5126_v61 = vsel %vm1036_vm6, %v5125_v15, %v25090_v42  ;;  %v14782_v54 = vld [vmem:[%s23873_s1 + $0x8] sm:$0xff] }
 0x857   : > { %v5127_v36 = vsel %vm1038_vm7, %v5126_v61, %v25093_v44 }
 0x858   : > { %v5505_v63 = vpop.permute.xlu1 %5504 }
 0x859   : > { %v5871_v16 = vpop.permute.xlu0 %5870  ;;  %v5523_v43 = vsel %vm1036_vm6, %v5522_v19, %v5505_v63 }
 0x85a   : > { %v5907_v47 = vsel %vm1038_vm7, %v5906_v28, %v5871_v16 }
 0x85b   : > { %8358 = vmatpush1.msra.mxu1 %v5907_v47 }
 0x85c   : > { %v5477_v30 = vpop.permute.xlu1 %5476 }
 0x85d   : > { %v5509_v18 = vpop.permute.xlu0 %5508  ;;  %v5516_v2 = vsel %vm1036_vm6, %v5515_v46, %v5477_v30 }
 0x85e   : > { %v5524_v3 = vsel %vm1038_vm7, %v5523_v43, %v5509_v18 }
 0x85f   : > { %8359 = vmatprep.subr.mxu1 %v5524_v3 }
 0x860   : > { %v5481_v58 = vpop.permute.xlu1 %5480 }
 0x861   : > { %v5517_v6 = vsel %vm1038_vm7, %v5516_v2, %v5481_v58 }
 0x862   : > { %8360 = vmatpush1.msra.mxu1 %v5517_v6 }
 0x863   : > { %8361 = vmatprep.subr.mxu1 %v5134_v0 }
 0x864   : > { %8362 = vmatpush1.msra.mxu1 %v5127_v36 }
 0x865   : > { %14784 = vmatmul.mubr.msk.f32.vlgmr.msra.gmra.mxu1 %vm4238_vm8, %v14782_v54 }
 0x866   : > { %14674 = vmatprep.mubr.f32.mxu1 %v25094_v12 }
 0x86a   : > { %v8326_v33 = vpop.permute.xlu0 %8325 }
 0x925   : > { %v8397_v1 = vpop.f32.mrf.mxu1 }
 0x926   : > { %v8398_v5 = vadd.f32 %v8397_v1, %v8326_v33 }
 0x927   : > { %v8399_v10 = vpop.f32.mrf.mxu1 }
 0x928   : > { %v20392_v4 = vmax.f32 %v8398_v5, 0.0  ;;  %v8400_v51 = vadd.f32 %v8399_v10, %v8326_v33 }
 0x92a   : > { %25095 = vst [vmem:[#allocation91_spill] sm:$0xff] %v20392_v4  ;;  %8410 = vrot.lane.b32.xlu1 %v20392_v4, %s14985_s9  ;;  %8407 = vrot.lane.b32.xlu0 %v20392_v4, %s14983_s6  ;;  %v20406_v35 = vmax.f32 %v8400_v51, 0.0 }
 0x92c   : > { %25096 = vst [vmem:[#allocation102_spill] sm:$0xff] %v20406_v35 }
 0x92e   : > { %8416 = vrot.lane.b32.xlu1 %v20392_v4, %s14984_s8  ;;  %8413 = vrot.lane.b32.xlu0 %v20392_v4, %s14982_s4 }
 0x932   : > { %8422 = vrot.lane.b32.xlu1 %v20392_v4, %s14986_s23  ;;  %8419 = vrot.lane.b32.xlu0 %v20392_v4, %s14987_s10 }
 0x936   : > { %8429 = vrot.lane.b32.xlu1 %v20406_v35, %s14983_s6  ;;  %8425 = vrot.lane.b32.xlu0 %v20392_v4, %s14988_s11 }
 0x93a   : > { %8435 = vrot.lane.b32.xlu1 %v20406_v35, %s14982_s4  ;;  %8432 = vrot.lane.b32.xlu0 %v20406_v35, %s14985_s9 }
 0x93e   : > { %8441 = vrot.lane.b32.xlu1 %v20406_v35, %s14987_s10  ;;  %8438 = vrot.lane.b32.xlu0 %v20406_v35, %s14984_s8 }
 0x942   : > { %8447 = vrot.lane.b32.xlu1 %v20406_v35, %s14988_s11  ;;  %8444 = vrot.lane.b32.xlu0 %v20406_v35, %s14986_s23 }
 0x99c   : > { %v8411_v11 = vpop.permute.xlu1 %8410  ;;  %v8408_v60 = vpop.permute.xlu0 %8407 }
 0x99d   : > { %v8450_v27 = vcombine.low %v20392_v4, %v8411_v11  ;;  %v8451_v25 = vcombine.high %v20392_v4, %v8411_v11 }
 0x99f   : > { %v8458_v9 = vrot.slane %v8450_v27, %v15232_v17  ;;  %v8465_v40 = vrot.slane %v8451_v25, %v15232_v17 }
 0x9a0   : > { %v8417_v56 = vpop.permute.xlu1 %8416  ;;  %v8414_v22 = vpop.permute.xlu0 %8413 }
 0x9a1   : > { %v8466_v31 = vcombine.low %v8408_v60, %v8414_v22  ;;  %v8467_v16 = vcombine.high %v8408_v60, %v8414_v22 }
 0x9a3   : > { %v8474_v23 = vrot.slane %v8466_v31, %v15232_v17  ;;  %v8481_v48 = vrot.slane %v8467_v16, %v15232_v17 }
 0x9a4   : > { %v8423_v63 = vpop.permute.xlu1 %8422  ;;  %v8420_v45 = vpop.permute.xlu0 %8419 }
 0x9a5   : > { %v8482_v34 = vcombine.low %v8417_v56, %v8423_v63  ;;  %v8514_v41 = vcombine.low %v8458_v9, %v8474_v23  ;;  %v8483_v49 = vcombine.high %v8417_v56, %v8423_v63  ;;  %v8515_v19 = vcombine.high %v8458_v9, %v8474_v23 }
 0x9a6   : > { %v8530_v3 = vcombine.low %v8465_v40, %v8481_v48  ;;  %v8531_v53 = vcombine.high %v8465_v40, %v8481_v48 }
 0x9a7   : > { %v8490_v20 = vrot.slane %v8482_v34, %v15232_v17  ;;  %v8497_v30 = vrot.slane %v8483_v49, %v15232_v17  ;;  %v8522_v57 = vrot.slane %v8514_v41, %v15240_v29  ;;  %v8529_v46 = vrot.slane %v8515_v19, %v15240_v29 }
 0x9a8   : > { %v20426_v7 = vpop.permute.xlu1 %8429  ;;  %v8426_v21 = vpop.permute.xlu0 %8425  ;;  %v8538_v54 = vrot.slane %v8530_v3, %v15240_v29  ;;  %v8545_v56 = vrot.slane %v8531_v53, %v15240_v29 }
 0x9a9   : > { %v8498_v62 = vcombine.low %v8420_v45, %v8426_v21  ;;  %v8499_v28 = vcombine.high %v8420_v45, %v8426_v21 }
 0x9ab   : > { %v8506_v55 = vrot.slane %v8498_v62, %v15232_v17  ;;  %v8513_v8 = vrot.slane %v8499_v28, %v15232_v17 }
 0x9ac   : > { %v8436_v47 = vpop.permute.xlu1 %8435  ;;  %v8433_v14 = vpop.permute.xlu0 %8432 }
 0x9ad   : > { %v8546_v39 = vcombine.low %v8490_v20, %v8506_v55  ;;  %v8547_v50 = vcombine.high %v8490_v20, %v8506_v55  ;;  %v8562_v18 = vcombine.low %v8497_v30, %v8513_v8  ;;  %v8602_v32 = vcombine.low %v20426_v7, %v8436_v47 }
 0x9ae   : > { %v8586_v15 = vcombine.low %v20406_v35, %v8433_v14  ;;  %v8563_v42 = vcombine.high %v8497_v30, %v8513_v8  ;;  %v8603_v22 = vcombine.high %v20426_v7, %v8436_v47  ;;  %v8587_v31 = vcombine.high %v20406_v35, %v8433_v14 }
 0x9af   : > { %v8554_v24 = vrot.slane %v8546_v39, %v15240_v29  ;;  %v8561_v13 = vrot.slane %v8547_v50, %v15240_v29  ;;  %v8570_v37 = vrot.slane %v8562_v18, %v15240_v29  ;;  %v8610_v44 = vrot.slane %v8602_v32, %v15232_v17 }
 0x9b0   : > { %v8442_v59 = vpop.permute.xlu1 %8441  ;;  %v8439_v43 = vpop.permute.xlu0 %8438  ;;  %v8594_v36 = vrot.slane %v8586_v15, %v15232_v17  ;;  %v8577_v1 = vrot.slane %v8563_v42, %v15240_v29  ;;  %v8617_v62 = vrot.slane %v8603_v22, %v15232_v17  ;;  %v8601_v7 = vrot.slane %v8587_v31, %v15232_v17 }
 0x9b1   : > { %v8579_v52 = vcombine.high %v8522_v57, %v8554_v24  ;;  %v8578_v26 = vcombine.low %v8522_v57, %v8554_v24  ;;  %v8581_v38 = vcombine.high %v8529_v46, %v8561_v13  ;;  %v8580_v0 = vcombine.low %v8529_v46, %v8561_v13 }
 0x9b2   : > { %v8583_v11 = vcombine.high %v8538_v54, %v8570_v37  ;;  %v8582_v60 = vcombine.low %v8538_v54, %v8570_v37  ;;  %v8650_v63 = vcombine.low %v8594_v36, %v8610_v44  ;;  %v8585_v45 = vcombine.high %v8545_v56, %v8577_v1 }
 0x9b3   : > { %8742 = vrot.lane.b32.xlu0 %v8579_v52, %s14992_s17  ;;  %8738 = vrot.lane.b32.xlu1 %v8578_v26, %s14992_s17  ;;  %v8584_v9 = vcombine.low %v8545_v56, %v8577_v1  ;;  %v8651_v28 = vcombine.high %v8594_v36, %v8610_v44  ;;  %v8666_v25 = vcombine.low %v8601_v7, %v8617_v62 }
 0x9b4   : > { %v8448_v61 = vpop.permute.xlu1 %8447  ;;  %v8445_v2 = vpop.permute.xlu0 %8444  ;;  %v8658_v16 = vrot.slane %v8650_v63, %v15240_v29  ;;  %v8667_v48 = vcombine.high %v8601_v7, %v8617_v62 }
 0x9b5   : > { %v8634_v58 = vcombine.low %v8442_v59, %v8448_v61  ;;  %v8618_v6 = vcombine.low %v8439_v43, %v8445_v2  ;;  %v8635_v5 = vcombine.high %v8442_v59, %v8448_v61  ;;  %v8619_v10 = vcombine.high %v8439_v43, %v8445_v2 }
 0x9b6   : > { %v8665_v47 = vrot.slane %v8651_v28, %v15240_v29  ;;  %v8674_v19 = vrot.slane %v8666_v25, %v15240_v29  ;;  %v8681_v40 = vrot.slane %v8667_v48, %v15240_v29 }
 0x9b7   : > { %v8642_v12 = vrot.slane %v8634_v58, %v15232_v17  ;;  %v8626_v33 = vrot.slane %v8618_v6, %v15232_v17  ;;  %8750 = vrot.lane.b32.xlu0 %v8581_v38, %s14992_s17  ;;  %8746 = vrot.lane.b32.xlu1 %v8580_v0, %s14992_s17  ;;  %v8649_v27 = vrot.slane %v8635_v5, %v15232_v17 }
 0x9b8   : > { %v8633_v23 = vrot.slane %v8619_v10, %v15232_v17 }
 0x9b9   : > { %v8682_v51 = vcombine.low %v8626_v33, %v8642_v12  ;;  %v8683_v34 = vcombine.high %v8626_v33, %v8642_v12 }
 0x9ba   : > { %v8698_v41 = vcombine.low %v8633_v23, %v8649_v27  ;;  %v8699_v14 = vcombine.high %v8633_v23, %v8649_v27 }
 0x9bb   : > { %8758 = vrot.lane.b32.xlu0 %v8583_v11, %s14992_s17  ;;  %8754 = vrot.lane.b32.xlu1 %v8582_v60, %s14992_s17  ;;  %v8690_v21 = vrot.slane %v8682_v51, %v15240_v29  ;;  %v8697_v20 = vrot.slane %v8683_v34, %v15240_v29 }
 0x9bc   : > { %v8706_v39 = vrot.slane %v8698_v41, %v15240_v29  ;;  %v8713_v57 = vrot.slane %v8699_v14, %v15240_v29 }
 0x9bd   : > { %v8715_v49 = vcombine.high %v8658_v16, %v8690_v21  ;;  %v8714_v55 = vcombine.low %v8658_v16, %v8690_v21  ;;  %v8717_v8 = vcombine.high %v8665_v47, %v8697_v20  ;;  %v8716_v50 = vcombine.low %v8665_v47, %v8697_v20 }
 0x9be   : > { %v8719_v30 = vcombine.high %v8674_v19, %v8706_v39  ;;  %v8718_v24 = vcombine.low %v8674_v19, %v8706_v39  ;;  %v8721_v59 = vcombine.high %v8681_v40, %v8713_v57  ;;  %v8720_v43 = vcombine.low %v8681_v40, %v8713_v57 }
 0x9bf   : > { %8766 = vrot.lane.b32.xlu0 %v8585_v45, %s14992_s17  ;;  %8762 = vrot.lane.b32.xlu1 %v8584_v9, %s14992_s17 }
 0x9c3   : > { %8744 = vrot.lane.b32.xlu0 %v8715_v49, %s14992_s17  ;;  %8740 = vrot.lane.b32.xlu1 %v8714_v55, %s14992_s17 }
 0x9c7   : > { %8752 = vrot.lane.b32.xlu0 %v8717_v8, %s14992_s17  ;;  %8748 = vrot.lane.b32.xlu1 %v8716_v50, %s14992_s17 }
 0x9cb   : > { %8760 = vrot.lane.b32.xlu0 %v8719_v30, %s14992_s17  ;;  %8756 = vrot.lane.b32.xlu1 %v8718_v24, %s14992_s17 }
 0x9cf   : > { %8768 = vrot.lane.b32.xlu0 %v8721_v59, %s14992_s17  ;;  %8764 = vrot.lane.b32.xlu1 %v8720_v43, %s14992_s17 }
 0xa25   : > { %v8739_v18 = vpop.permute.xlu1 %8738  ;;  %v8743_v52 = vpop.permute.xlu0 %8742 }
 0xa26   : > { %8786 = vst.msk [vmem:[#allocation2 + $0x8] sm:$0xff] %vm602_vm1, %v8739_v18  ;;  %8788 = vst.msk [vmem:[#allocation2 + $0x28] sm:$0xff] %vm602_vm1, %v8743_v52 }
 0xa29   : > { %v8751_v26 = vpop.permute.xlu0 %8750  ;;  %v8747_v13 = vpop.permute.xlu1 %8746 }
 0xa2a   : > { %8792 = vst.msk [vmem:[#allocation2 + $0x68] sm:$0xff] %vm602_vm1, %v8751_v26  ;;  %8790 = vst.msk [vmem:[#allocation2 + $0x48] sm:$0xff] %vm602_vm1, %v8747_v13 }
 0xa2d   : > { %v8759_v3 = vpop.permute.xlu0 %8758  ;;  %v10004_v32 = vld [vmem:[#allocation2 + $0x8] sm:$0xff]  ;;  %v8755_v46 = vpop.permute.xlu1 %8754 }
 0xa2e   : > { %v10006_v15 = vld [vmem:[#allocation2 + $0x28] sm:$0xff]  ;;  %8796 = vst.msk [vmem:[#allocation2 + $0xa8] sm:$0xff] %vm602_vm1, %v8759_v3  ;;  %10816 = vrot.lane.b32.xlu1 %v10004_v32, %s14999_s19  ;;  %8794 = vst.msk [vmem:[#allocation2 + $0x88] sm:$0xff] %vm602_vm1, %v8755_v46 }
 0xa2f   : > { %10820 = vrot.lane.b32.xlu0 %v10006_v15, %s14999_s19  ;;  %v8804_v10 = vld [vmem:[#allocation2 + $0x24] sm:$0xff] }
 0xa30   : > { %v8802_v51 = vld [vmem:[#allocation2 + $0x4] sm:$0xff] }
 0xa31   : > { %v8767_v42 = vpop.permute.xlu0 %8766  ;;  %v10010_v61 = vld [vmem:[#allocation2 + $0x68] sm:$0xff]  ;;  %v8763_v2 = vpop.permute.xlu1 %8762 }
 0xa32   : > { %8800 = vst.msk [vmem:[#allocation2 + $0xe8] sm:$0xff] %vm602_vm1, %v8767_v42  ;;  %v10008_v58 = vld [vmem:[#allocation2 + $0x48] sm:$0xff]  ;;  %8798 = vst.msk [vmem:[#allocation2 + $0xc8] sm:$0xff] %vm602_vm1, %v8763_v2 }
 0xa33   : > { %10828 = vrot.lane.b32.xlu0 %v10010_v61, %s14999_s19  ;;  %10824 = vrot.lane.b32.xlu1 %v10008_v58, %s14999_s19  ;;  %v8808_v11 = vld [vmem:[#allocation2 + $0x64] sm:$0xff] }
 0xa34   : > { %v8806_v60 = vld [vmem:[#allocation2 + $0x44] sm:$0xff] }
 0xa35   : > { %v8745_v6 = vpop.permute.xlu0 %8744  ;;  %v10014_v38 = vld [vmem:[#allocation2 + $0xa8] sm:$0xff]  ;;  %v8741_v37 = vpop.permute.xlu1 %8740 }
 0xa36   : > { %8789 = vst.msk [vmem:[#allocation2 + $0x30] sm:$0xff] %vm602_vm1, %v8745_v6  ;;  %v10012_v53 = vld [vmem:[#allocation2 + $0x88] sm:$0xff]  ;;  %8787 = vst.msk [vmem:[#allocation2 + $0x10] sm:$0xff] %vm602_vm1, %v8741_v37 }
 0xa37   : > { %10836 = vrot.lane.b32.xlu0 %v10014_v38, %s14999_s19  ;;  %10832 = vrot.lane.b32.xlu1 %v10012_v53, %s14999_s19  ;;  %v8812_v56 = vld [vmem:[#allocation2 + $0xa4] sm:$0xff] }
 0xa38   : > { %v8810_v22 = vld [vmem:[#allocation2 + $0x84] sm:$0xff] }
 0xa39   : > { %v8753_v0 = vpop.permute.xlu0 %8752  ;;  %v10018_v54 = vld [vmem:[#allocation2 + $0xe8] sm:$0xff]  ;;  %v8749_v44 = vpop.permute.xlu1 %8748 }
 0xa3a   : > { %8793 = vst.msk [vmem:[#allocation2 + $0x70] sm:$0xff] %vm602_vm1, %v8753_v0  ;;  %v10016_v36 = vld [vmem:[#allocation2 + $0xc8] sm:$0xff]  ;;  %8791 = vst.msk [vmem:[#allocation2 + $0x50] sm:$0xff] %vm602_vm1, %v8749_v44 }
 0xa3b   : > { %10844 = vrot.lane.b32.xlu0 %v10018_v54, %s14999_s19  ;;  %10840 = vrot.lane.b32.xlu1 %v10016_v36, %s14999_s19  ;;  %v8816_v31 = vld [vmem:[#allocation2 + $0xe4] sm:$0xff] }
 0xa3c   : > { %v8814_v63 = vld [vmem:[#allocation2 + $0xc4] sm:$0xff] }
 0xa3d   : > { %v8761_v12 = vpop.permute.xlu0 %8760  ;;  %v8757_v33 = vpop.permute.xlu1 %8756  ;;  %v20544_v45 = vld [vmem:[#allocation2 + $0x34] sm:$0xff]  ;;  %v20576_v28 = vld [vmem:[#allocation2 + $0x2c] sm:$0xff] }
 0xa3e   : > { %8797 = vst.msk [vmem:[#allocation2 + $0xb0] sm:$0xff] %vm602_vm1, %v8761_v12  ;;  %8795 = vst.msk [vmem:[#allocation2 + $0x90] sm:$0xff] %vm602_vm1, %v8757_v33  ;;  %v20546_v27 = vld [vmem:[#allocation2 + $0x14] sm:$0xff]  ;;  %v20578_v16 = vld [vmem:[#allocation2 + $0xc] sm:$0xff] }
 0xa3f   : > { %10430 = vrot.lane.b32.xlu0 %v10006_v15, %s14994_s20  ;;  %10426 = vrot.lane.b32.xlu1 %v10004_v32, %s14994_s20 }
 0xa41   : > { %v8769_v1 = vpop.permute.xlu0 %8768  ;;  %v8765_v5 = vpop.permute.xlu1 %8764  ;;  %v20552_v23 = vld [vmem:[#allocation2 + $0x74] sm:$0xff]  ;;  %v20588_v20 = vld [vmem:[#allocation2 + $0x6c] sm:$0xff] }
 0xa42   : > { %8801 = vst.msk [vmem:[#allocation2 + $0xf0] sm:$0xff] %vm602_vm1, %v8769_v1  ;;  %8799 = vst.msk [vmem:[#allocation2 + $0xd0] sm:$0xff] %vm602_vm1, %v8765_v5  ;;  %v20554_v34 = vld [vmem:[#allocation2 + $0x54] sm:$0xff]  ;;  %v20590_v55 = vld [vmem:[#allocation2 + $0x4c] sm:$0xff] }
 0xa43   : > { %10438 = vrot.lane.b32.xlu0 %v10010_v61, %s14994_s20  ;;  %10434 = vrot.lane.b32.xlu1 %v10008_v58, %s14994_s20 }
 0xa45   : > { %v20560_v21 = vld [vmem:[#allocation2 + $0xb4] sm:$0xff]  ;;  %v20600_v14 = vld [vmem:[#allocation2 + $0xac] sm:$0xff] }
 0xa46   : > { %v20562_v9 = vld [vmem:[#allocation2 + $0x94] sm:$0xff]  ;;  %v20602_v8 = vld [vmem:[#allocation2 + $0x8c] sm:$0xff] }
 0xa47   : > { %10446 = vrot.lane.b32.xlu0 %v10014_v38, %s14994_s20  ;;  %10442 = vrot.lane.b32.xlu1 %v10012_v53, %s14994_s20 }
 0xa49   : > { %v20568_v62 = vld [vmem:[#allocation2 + $0xf4] sm:$0xff]  ;;  %v20612_v48 = vld [vmem:[#allocation2 + $0xec] sm:$0xff] }
 0xa4a   : > { %v20570_v7 = vld [vmem:[#allocation2 + $0xd4] sm:$0xff]  ;;  %v20614_v19 = vld [vmem:[#allocation2 + $0xcc] sm:$0xff] }
 0xa4b   : > { %10454 = vrot.lane.b32.xlu0 %v10018_v54, %s14994_s20  ;;  %10450 = vrot.lane.b32.xlu1 %v10016_v36, %s14994_s20 }
 0xa4f   : > { %10040 = vrot.lane.b32.xlu0 %v10006_v15, %s15000_s22  ;;  %10036 = vrot.lane.b32.xlu1 %v10004_v32, %s15000_s22 }
 0xa53   : > { %10048 = vrot.lane.b32.xlu0 %v10010_v61, %s15000_s22  ;;  %10044 = vrot.lane.b32.xlu1 %v10008_v58, %s15000_s22 }
 0xa57   : > { %10056 = vrot.lane.b32.xlu0 %v10014_v38, %s15000_s22  ;;  %10052 = vrot.lane.b32.xlu1 %v10012_v53, %s15000_s22 }
 0xa5b   : > { %10064 = vrot.lane.b32.xlu0 %v10018_v54, %s15000_s22  ;;  %10060 = vrot.lane.b32.xlu1 %v10016_v36, %s15000_s22 }
 0xa5f   : > { %9618 = vrot.lane.b32.xlu0 %v8804_v10, %s14999_s19  ;;  %9614 = vrot.lane.b32.xlu1 %v8802_v51, %s14999_s19 }
 0xa63   : > { %9626 = vrot.lane.b32.xlu0 %v8808_v11, %s14999_s19  ;;  %9622 = vrot.lane.b32.xlu1 %v8806_v60, %s14999_s19 }
 0xa67   : > { %9634 = vrot.lane.b32.xlu0 %v8812_v56, %s14999_s19  ;;  %9630 = vrot.lane.b32.xlu1 %v8810_v22, %s14999_s19 }
 0xa6b   : > { %9642 = vrot.lane.b32.xlu0 %v8816_v31, %s14999_s19  ;;  %9638 = vrot.lane.b32.xlu1 %v8814_v63, %s14999_s19 }
 0xa6f   : > { %9228 = vrot.lane.b32.xlu0 %v8804_v10, %s14994_s20  ;;  %9224 = vrot.lane.b32.xlu1 %v8802_v51, %s14994_s20 }
 0xa73   : > { %9236 = vrot.lane.b32.xlu0 %v8808_v11, %s14994_s20  ;;  %9232 = vrot.lane.b32.xlu1 %v8806_v60, %s14994_s20 }
 0xa77   : > { %9244 = vrot.lane.b32.xlu0 %v8812_v56, %s14994_s20  ;;  %9240 = vrot.lane.b32.xlu1 %v8810_v22, %s14994_s20 }
 0xa7b   : > { %9252 = vrot.lane.b32.xlu0 %v8816_v31, %s14994_s20  ;;  %9248 = vrot.lane.b32.xlu1 %v8814_v63, %s14994_s20 }
 0xa7f   : > { %8838 = vrot.lane.b32.xlu0 %v8804_v10, %s15000_s22  ;;  %8834 = vrot.lane.b32.xlu1 %v8802_v51, %s15000_s22 }
 0xa83   : > { %8846 = vrot.lane.b32.xlu0 %v8808_v11, %s15000_s22  ;;  %8842 = vrot.lane.b32.xlu1 %v8806_v60, %s15000_s22 }
 0xa87   : > { %8854 = vrot.lane.b32.xlu0 %v8812_v56, %s15000_s22  ;;  %8850 = vrot.lane.b32.xlu1 %v8810_v22, %s15000_s22 }
 0xa8b   : > { %8862 = vrot.lane.b32.xlu0 %v8816_v31, %s15000_s22  ;;  %8858 = vrot.lane.b32.xlu1 %v8814_v63, %s15000_s22 }
 0xa8f   : > { %11614 = vrot.lane.b32.xlu0 %v20544_v45, %s14999_s19  ;;  %11612 = vrot.lane.b32.xlu1 %v20546_v27, %s14999_s19 }
 0xa93   : > { %11618 = vrot.lane.b32.xlu0 %v20552_v23, %s14999_s19  ;;  %11616 = vrot.lane.b32.xlu1 %v20554_v34, %s14999_s19 }
 0xa97   : > { %11622 = vrot.lane.b32.xlu0 %v20560_v21, %s14999_s19  ;;  %11620 = vrot.lane.b32.xlu1 %v20562_v9, %s14999_s19 }
 0xa9b   : > { %11626 = vrot.lane.b32.xlu0 %v20568_v62, %s14999_s19  ;;  %11624 = vrot.lane.b32.xlu1 %v20570_v7, %s14999_s19 }
 0xa9f   : > { %9620 = vrot.lane.b32.xlu0 %v20576_v28, %s14999_s19  ;;  %9616 = vrot.lane.b32.xlu1 %v20578_v16, %s14999_s19 }
 0xaa0   : > { %v20584_v41 = vpop.permute.xlu1 %10816 }
 0xaa1   : > { %v20586_v49 = vpop.permute.xlu0 %10820 }
 0xaa3   : > { %9628 = vrot.lane.b32.xlu0 %v20588_v20, %s14999_s19  ;;  %9624 = vrot.lane.b32.xlu1 %v20590_v55, %s14999_s19 }
 0xaa5   : > { %v20596_v25 = vpop.permute.xlu0 %10828  ;;  %v20598_v47 = vpop.permute.xlu1 %10824 }
 0xaa6   : > { %v10864_v30 = vcombine.low %v20584_v41, %v20598_v47  ;;  %v10880_v57 = vcombine.low %v20586_v49, %v20596_v25 }
 0xaa7   : > { %9636 = vrot.lane.b32.xlu0 %v20600_v14, %s14999_s19  ;;  %9632 = vrot.lane.b32.xlu1 %v20602_v8, %s14999_s19 }
 0xaa8   : > { %v20635_v18 = vrot.slane %v10864_v30, %v15232_v17  ;;  %v20638_v52 = vrot.slane %v10880_v57, %v15232_v17 }
 0xaa9   : > { %v20608_v39 = vpop.permute.xlu0 %10836  ;;  %v20610_v50 = vpop.permute.xlu1 %10832 }
 0xaaa   : > { %v10928_v46 = vcombine.low %v20635_v18, %v20638_v52 }
 0xaab   : > { %9644 = vrot.lane.b32.xlu0 %v20612_v48, %s14999_s19  ;;  %9640 = vrot.lane.b32.xlu1 %v20614_v19, %s14999_s19 }
 0xaac   : > { %v20672_v58 = vrot.slane %v10928_v46, %v15240_v29 }
 0xaad   : > { %v20624_v24 = vpop.permute.xlu0 %10844  ;;  %v20626_v40 = vpop.permute.xlu1 %10840 }
 0xaae   : > { %v10912_v59 = vcombine.low %v20608_v39, %v20624_v24  ;;  %v10896_v43 = vcombine.low %v20610_v50, %v20626_v40  ;;  %25098 = vst [vmem:[#allocation88_spill] sm:$0xff] %v20672_v58 }
 0xaaf   : > { %11419 = vrot.lane.b32.xlu0 %v20544_v45, %s14994_s20  ;;  %11417 = vrot.lane.b32.xlu1 %v20546_v27, %s14994_s20 }
 0xab0   : > { %v20641_v26 = vrot.slane %v10912_v59, %v15232_v17  ;;  %v20646_v13 = vrot.slane %v10896_v43, %v15232_v17 }
 0xab1   : > { %v20648_v3 = vpop.permute.xlu0 %10430  ;;  %v20650_v32 = vpop.permute.xlu1 %10426 }
 0xab2   : > { %v10960_v15 = vcombine.low %v20646_v13, %v20641_v26 }
 0xab3   : > { %11423 = vrot.lane.b32.xlu0 %v20552_v23, %s14994_s20  ;;  %11421 = vrot.lane.b32.xlu1 %v20554_v34, %s14994_s20 }
 0xab4   : > { %v20665_v2 = vrot.slane %v10960_v15, %v15240_v29 }
 0xab5   : > { %v20660_v42 = vpop.permute.xlu0 %10438  ;;  %v20662_v61 = vpop.permute.xlu1 %10434 }
 0xab6   : > { %25097 = vst [vmem:[#allocation90_spill] sm:$0xff] %v20665_v2  ;;  %v10474_v53 = vcombine.low %v20650_v32, %v20662_v61  ;;  %v10490_v0 = vcombine.low %v20648_v3, %v20660_v42 }
 0xab7   : > { %11427 = vrot.lane.b32.xlu0 %v20560_v21, %s14994_s20  ;;  %11425 = vrot.lane.b32.xlu1 %v20562_v9, %s14994_s20 }
 0xab8   : > { %v20699_v33 = vrot.slane %v10474_v53, %v15232_v17  ;;  %v20702_v1 = vrot.slane %v10490_v0, %v15232_v17 }
 0xab9   : > { %v20674_v6 = vpop.permute.xlu0 %10446  ;;  %v20676_v38 = vpop.permute.xlu1 %10442 }
 0xaba   : > { %v10538_v56 = vcombine.low %v20699_v33, %v20702_v1 }
 0xabb   : > { %11431 = vrot.lane.b32.xlu0 %v20568_v62, %s14994_s20  ;;  %11429 = vrot.lane.b32.xlu1 %v20570_v7, %s14994_s20 }
 0xabc   : > { %v20736_v30 = vrot.slane %v10538_v56, %v15240_v29 }
 0xabd   : > { %v20688_v54 = vpop.permute.xlu0 %10454  ;;  %v20690_v44 = vpop.permute.xlu1 %10450 }
 0xabe   : > { %v10522_v36 = vcombine.low %v20674_v6, %v20688_v54  ;;  %v10506_v12 = vcombine.low %v20676_v38, %v20690_v44  ;;  %25104 = vst [vmem:[#allocation34_spill] sm:$0xff] %v20736_v30 }
 0xabf   : > { %9230 = vrot.lane.b32.xlu0 %v20576_v28, %s14994_s20  ;;  %9226 = vrot.lane.b32.xlu1 %v20578_v16, %s14994_s20 }
 0xac0   : > { %v20705_v5 = vrot.slane %v10522_v36, %v15232_v17  ;;  %v20710_v10 = vrot.slane %v10506_v12, %v15232_v17 }
 0xac1   : > { %v20712_v51 = vpop.permute.xlu0 %10040  ;;  %v20714_v11 = vpop.permute.xlu1 %10036 }
 0xac2   : > { %25099 = vst [vmem:[#allocation111_spill] sm:$0xff] %v20712_v51  ;;  %25100 = vst [vmem:[#allocation14_spill] sm:$0xff] %v20714_v11  ;;  %v10570_v60 = vcombine.low %v20710_v10, %v20705_v5 }
 0xac3   : > { %9238 = vrot.lane.b32.xlu0 %v20588_v20, %s14994_s20  ;;  %9234 = vrot.lane.b32.xlu1 %v20590_v55, %s14994_s20 }
 0xac4   : > { %v20729_v63 = vrot.slane %v10570_v60, %v15240_v29 }
 0xac5   : > { %v20724_v22 = vpop.permute.xlu0 %10048  ;;  %v20726_v31 = vpop.permute.xlu1 %10044 }
 0xac6   : > { %25101 = vst [vmem:[#allocation15_spill] sm:$0xff] %v20724_v22  ;;  %25102 = vst [vmem:[#allocation23_spill] sm:$0xff] %v20726_v31  ;;  %v10084_v15 = vcombine.low %v20714_v11, %v20726_v31  ;;  %v10100_v46 = vcombine.low %v20712_v51, %v20724_v22  ;;  %v20934_v11 = vld [vmem:[#allocation2 + $0xf0] sm:$0xff] }
 0xac7   : > { %25103 = vst [vmem:[#allocation35_spill] sm:$0xff] %v20729_v63  ;;  %9246 = vrot.lane.b32.xlu0 %v20600_v14, %s14994_s20  ;;  %9242 = vrot.lane.b32.xlu1 %v20602_v8, %s14994_s20 }
 0xac8   : > { %v20763_v60 = vrot.slane %v10084_v15, %v15232_v17  ;;  %v20766_v56 = vrot.slane %v10100_v46, %v15232_v17 }
 0xac9   : > { %v20738_v57 = vpop.permute.xlu0 %10056  ;;  %v20740_v59 = vpop.permute.xlu1 %10052 }
 0xaca   : > { %25105 = vst [vmem:[#allocation44_spill] sm:$0xff] %v20738_v57  ;;  %v10148_v15 = vcombine.low %v20763_v60, %v20766_v56 }
 0xacb   : > { %9254 = vrot.lane.b32.xlu0 %v20612_v48, %s14994_s20  ;;  %9250 = vrot.lane.b32.xlu1 %v20614_v19, %s14994_s20 }
 0xacd   : > { %v20752_v53 = vpop.permute.xlu0 %10064  ;;  %v20754_v0 = vpop.permute.xlu1 %10060 }
 0xace   : > { %v10132_v36 = vcombine.low %v20738_v57, %v20752_v53  ;;  %v10116_v12 = vcombine.low %v20740_v59, %v20754_v0 }
 0xacf   : > { %11224 = vrot.lane.b32.xlu0 %v20544_v45, %s15000_s22  ;;  %11222 = vrot.lane.b32.xlu1 %v20546_v27, %s15000_s22 }
 0xad0   : > { %v20769_v43 = vrot.slane %v10132_v36, %v15232_v17  ;;  %v20774_v37 = vrot.slane %v10116_v12, %v15232_v17 }
 0xad1   : > { %v20776_v35 = vpop.permute.xlu0 %9618  ;;  %v20778_v4 = vpop.permute.xlu1 %9614 }
 0xad2   : > { %25106 = vst [vmem:[#allocation73_spill] sm:$0xff] %v20776_v35  ;;  %25107 = vst [vmem:[#allocation30_spill] sm:$0xff] %v20778_v4  ;;  %v10180_v45 = vcombine.low %v20774_v37, %v20769_v43 }
 0xad3   : > { %11228 = vrot.lane.b32.xlu0 %v20552_v23, %s15000_s22  ;;  %11226 = vrot.lane.b32.xlu1 %v20554_v34, %s15000_s22  ;;  %v20800_v23 = vrot.slane %v10148_v15, %v15240_v29 }
 0xad4   : > { %v20793_v36 = vrot.slane %v10180_v45, %v15240_v29 }
 0xad5   : > { %v20788_v27 = vpop.permute.xlu0 %9626  ;;  %v20790_v46 = vpop.permute.xlu1 %9622  ;;  %25111 = vst [vmem:[#allocation48_spill] sm:$0xff] %v20800_v23 }
 0xad6   : > { %25108 = vst [vmem:[#allocation123_spill] sm:$0xff] %v20788_v27  ;;  %25109 = vst [vmem:[#allocation107_spill] sm:$0xff] %v20790_v46  ;;  %v9662_v45 = vcombine.low %v20778_v4, %v20790_v46 }
 0xad7   : > { %25110 = vst [vmem:[#allocation98_spill] sm:$0xff] %v20793_v36  ;;  %11232 = vrot.lane.b32.xlu0 %v20560_v21, %s15000_s22  ;;  %11230 = vrot.lane.b32.xlu1 %v20562_v9, %s15000_s22  ;;  %v9678_v21 = vcombine.low %v20776_v35, %v20788_v27 }
 0xad9   : > { %v20802_v12 = vpop.permute.xlu0 %9634  ;;  %v20804_v51 = vpop.permute.xlu1 %9630  ;;  %v20830_v4 = vrot.slane %v9678_v21, %v15232_v17 }
 0xada   : > { %25112 = vst [vmem:[#allocation37_spill] sm:$0xff] %v20802_v12  ;;  %25113 = vst [vmem:[#allocation83_spill] sm:$0xff] %v20804_v51 }
 0xadb   : > { %11236 = vrot.lane.b32.xlu0 %v20568_v62, %s15000_s22  ;;  %11234 = vrot.lane.b32.xlu1 %v20570_v7, %s15000_s22  ;;  %v20827_v62 = vrot.slane %v9662_v45, %v15232_v17  ;;  %25117 = vst [vmem:[#allocation101_spill] sm:$0xff] %v20830_v4 }
 0xadd   : > { %v20816_v9 = vpop.permute.xlu0 %9642  ;;  %v20818_v15 = vpop.permute.xlu1 %9638  ;;  %25116 = vst [vmem:[#allocation76_spill] sm:$0xff] %v20827_v62  ;;  %v9726_v45 = vcombine.low %v20827_v62, %v20830_v4 }
 0xade   : > { %25114 = vst [vmem:[#allocation85_spill] sm:$0xff] %v20816_v9  ;;  %25115 = vst [vmem:[#allocation17_spill] sm:$0xff] %v20818_v15  ;;  %v9710_v22 = vcombine.low %v20802_v12, %v20816_v9  ;;  %v9694_v34 = vcombine.low %v20804_v51, %v20818_v15  ;;  %v20864_v9 = vld [vmem:[#allocation2 + $0x30] sm:$0xff] }
 0xadf   : > { %8840 = vrot.lane.b32.xlu0 %v20576_v28, %s15000_s22  ;;  %8836 = vrot.lane.b32.xlu1 %v20578_v16, %s15000_s22  ;;  %v20920_v15 = vld [vmem:[#allocation2 + $0x90] sm:$0xff] }
 0xae0   : > { %v20833_v7 = vrot.slane %v9710_v22, %v15232_v17  ;;  %v20838_v46 = vrot.slane %v9694_v34, %v15232_v17  ;;  %v20856_v34 = vrot.slane %v9726_v45, %v15240_v29 }
 0xae1   : > { %v9229_v35 = vpop.permute.xlu0 %9228  ;;  %v9225_v27 = vpop.permute.xlu1 %9224 }
 0xae2   : > { %25118 = vst [vmem:[#allocation92_spill] sm:$0xff] %v20833_v7  ;;  %25119 = vst [vmem:[#allocation25_spill] sm:$0xff] %v20838_v46  ;;  %v9758_v28 = vcombine.low %v20838_v46, %v20833_v7 }
 0xae3   : > { %8848 = vrot.lane.b32.xlu0 %v20588_v20, %s15000_s22  ;;  %8844 = vrot.lane.b32.xlu1 %v20590_v55, %s15000_s22  ;;  %25121 = vst [vmem:[#allocation45_spill] sm:$0xff] %v20856_v34 }
 0xae4   : > { %v20849_v16 = vrot.slane %v9758_v28, %v15240_v29 }
 0xae5   : > { %v9237_v22 = vpop.permute.xlu0 %9236  ;;  %v9233_v21 = vpop.permute.xlu1 %9232 }
 0xae6   : > { %25120 = vst [vmem:[#allocation27_spill] sm:$0xff] %v20849_v16  ;;  %v9288_v55 = vcombine.low %v9229_v35, %v9237_v22  ;;  %v9289_v4 = vcombine.high %v9229_v35, %v9237_v22  ;;  %v9272_v28 = vcombine.low %v9225_v27, %v9233_v21  ;;  %v9273_v7 = vcombine.high %v9225_v27, %v9233_v21 }
 0xae7   : > { %8856 = vrot.lane.b32.xlu0 %v20600_v14, %s15000_s22  ;;  %8852 = vrot.lane.b32.xlu1 %v20602_v8, %s15000_s22 }
 0xae8   : > { %v20867_v51 = vrot.slane %v9288_v55, %v15232_v17  ;;  %v20870_v62 = vrot.slane %v9289_v4, %v15232_v17  ;;  %v20880_v27 = vrot.slane %v9273_v7, %v15232_v17 }
 0xae9   : > { %v9245_v20 = vpop.permute.xlu0 %9244  ;;  %v9241_v46 = vpop.permute.xlu1 %9240 }
 0xaea   : > { %25122 = vst [vmem:[#allocation118_spill] sm:$0xff] %v20867_v51  ;;  %25123 = vst [vmem:[#allocation46_spill] sm:$0xff] %v20870_v62 }
 0xaeb   : > { %8864 = vrot.lane.b32.xlu0 %v20612_v48, %s15000_s22  ;;  %8860 = vrot.lane.b32.xlu1 %v20614_v19, %s15000_s22  ;;  %v20872_v48 = vld [vmem:[#allocation2 + $0x10] sm:$0xff]  ;;  %v20877_v19 = vrot.slane %v9272_v28, %v15232_v17  ;;  %25125 = vst [vmem:[#allocation106_spill] sm:$0xff] %v20880_v27 }
 0xaed   : > { %v9253_v14 = vpop.permute.xlu0 %9252  ;;  %v9249_v8 = vpop.permute.xlu1 %9248  ;;  %25124 = vst [vmem:[#allocation74_spill] sm:$0xff] %v20877_v19 }
 0xaee   : > { %v9320_v12 = vcombine.low %v9245_v20, %v9253_v14  ;;  %v9321_v45 = vcombine.high %v9245_v20, %v9253_v14  ;;  %v9304_v35 = vcombine.low %v9241_v46, %v9249_v8  ;;  %v9305_v22 = vcombine.high %v9241_v46, %v9249_v8  ;;  %v20896_v14 = vld [vmem:[#allocation2 + $0x70] sm:$0xff] }
 0xaef   : > { %10822 = vrot.lane.b32.xlu0 %v20864_v9, %s14999_s19  ;;  %10818 = vrot.lane.b32.xlu1 %v20872_v48, %s14999_s19  ;;  %v20902_v8 = vld [vmem:[#allocation2 + $0x50] sm:$0xff] }
 0xaf0   : > { %v20883_v21 = vrot.slane %v9320_v12, %v15232_v17  ;;  %v20886_v20 = vrot.slane %v9321_v45, %v15232_v17  ;;  %v20891_v4 = vrot.slane %v9304_v35, %v15232_v17  ;;  %v20894_v46 = vrot.slane %v9305_v22, %v15232_v17 }
 0xaf1   : > { %v8839_v55 = vpop.permute.xlu0 %8838  ;;  %v8835_v28 = vpop.permute.xlu1 %8834  ;;  %v9336_v45 = vcombine.low %v20877_v19, %v20867_v51  ;;  %v9353_v35 = vcombine.high %v20880_v27, %v20870_v62 }
 0xaf2   : > { %25126 = vst [vmem:[#allocation117_spill] sm:$0xff] %v20883_v21  ;;  %25127 = vst [vmem:[#allocation105_spill] sm:$0xff] %v20886_v20  ;;  %v9368_v12 = vcombine.low %v20891_v4, %v20883_v21  ;;  %v9385_v7 = vcombine.high %v20894_v46, %v20886_v20  ;;  %v20912_v21 = vld [vmem:[#allocation2 + $0xb0] sm:$0xff] }
 0xaf3   : > { %25128 = vst [vmem:[#allocation24_spill] sm:$0xff] %v20891_v4  ;;  %25129 = vst [vmem:[#allocation33_spill] sm:$0xff] %v20894_v46  ;;  %10830 = vrot.lane.b32.xlu0 %v20896_v14, %s14999_s19  ;;  %10826 = vrot.lane.b32.xlu1 %v20902_v8, %s14999_s19  ;;  %v20928_v62 = vrot.slane %v9336_v45, %v15240_v29  ;;  %v20940_v45 = vld [vmem:[#allocation2 + $0xd0] sm:$0xff] }
 0xaf4   : > { %v20915_v46 = vrot.slane %v9368_v12, %v15240_v29  ;;  %v20918_v20 = vrot.slane %v9385_v7, %v15240_v29  ;;  %v20931_v12 = vrot.slane %v9353_v35, %v15240_v29 }
 0xaf5   : > { %v8847_v22 = vpop.permute.xlu0 %8846  ;;  %v8843_v34 = vpop.permute.xlu1 %8842  ;;  %25132 = vst [vmem:[#allocation61_spill] sm:$0xff] %v20928_v62 }
 0xaf6   : > { %v8899_v4 = vcombine.high %v8839_v55, %v8847_v22  ;;  %25130 = vst [vmem:[#allocation57_spill] sm:$0xff] %v20915_v46  ;;  %25131 = vst [vmem:[#allocation69_spill] sm:$0xff] %v20918_v20  ;;  %v8883_v16 = vcombine.high %v8835_v28, %v8843_v34  ;;  %v8882_v51 = vcombine.low %v8835_v28, %v8843_v34 }
 0xaf7   : > { %10838 = vrot.lane.b32.xlu0 %v20912_v21, %s14999_s19  ;;  %10834 = vrot.lane.b32.xlu1 %v20920_v15, %s14999_s19  ;;  %25133 = vst [vmem:[#allocation112_spill] sm:$0xff] %v20931_v12  ;;  %v8898_v23 = vcombine.low %v8839_v55, %v8847_v22 }
 0xaf8   : > { %v8913_v27 = vrot.slane %v8899_v4, %v15232_v17  ;;  %v8897_v7 = vrot.slane %v8883_v16, %v15232_v17  ;;  %v20947_v34 = vrot.slane %v8882_v51, %v15232_v17 }
 0xaf9   : > { %v8855_v19 = vpop.permute.xlu0 %8854  ;;  %v8851_v36 = vpop.permute.xlu1 %8850  ;;  %v20950_v55 = vrot.slane %v8898_v23, %v15232_v17 }
 0xafa   : > { %v8963_v57 = vcombine.high %v8897_v7, %v8913_v27  ;;  %25134 = vst [vmem:[#allocation20_spill] sm:$0xff] %v20947_v34 }
 0xafb   : > { %10846 = vrot.lane.b32.xlu0 %v20934_v11, %s14999_s19  ;;  %10842 = vrot.lane.b32.xlu1 %v20940_v45, %s14999_s19  ;;  %25135 = vst [vmem:[#allocation71_spill] sm:$0xff] %v20950_v55  ;;  %s14688_s19 = scalar_lea.sflag [#allocation5], %s15119_s29 }
 0xafd   : > { %v8863_v16 = vpop.permute.xlu0 %8862  ;;  %v8859_v28 = vpop.permute.xlu1 %8858 }
 0xafe   : > { %v8930_v35 = vcombine.low %v8855_v19, %v8863_v16  ;;  %v8931_v22 = vcombine.high %v8855_v19, %v8863_v16  ;;  %v8914_v4 = vcombine.low %v8851_v36, %v8859_v28  ;;  %v8915_v31 = vcombine.high %v8851_v36, %v8859_v28 }
 0xaff   : > { %10432 = vrot.lane.b32.xlu0 %v20864_v9, %s14994_s20  ;;  %10428 = vrot.lane.b32.xlu1 %v20872_v48, %s14994_s20  ;;  %v8946_v36 = vcombine.low %v20947_v34, %v20950_v55  ;;  %v8962_v16 = vcombine.low %v8897_v7, %v8913_v27 }
 0xb00   : > { %v20955_v12 = vrot.slane %v8930_v35, %v15232_v17  ;;  %v8945_v20 = vrot.slane %v8931_v22, %v15232_v17  ;;  %v20961_v51 = vrot.slane %v8914_v4, %v15232_v17  ;;  %v8929_v23 = vrot.slane %v8915_v31, %v15232_v17 }
 0xb01   : > { %v20964_v62 = vpop.permute.xlu0 %11614  ;;  %v20968_v19 = vpop.permute.xlu1 %11612 }
 0xb02   : > { %25136 = vst [vmem:[#allocation11_spill] sm:$0xff] %v20961_v51  ;;  %25137 = vst [vmem:[#allocation100_spill] sm:$0xff] %v20964_v62  ;;  %v8978_v28 = vcombine.low %v20961_v51, %v20955_v12  ;;  %v8994_v35 = vcombine.low %v8929_v23, %v8945_v20  ;;  %v8995_v22 = vcombine.high %v8929_v23, %v8945_v20 }
 0xb03   : > { %25138 = vst [vmem:[#allocation113_spill] sm:$0xff] %v20968_v19  ;;  %10440 = vrot.lane.b32.xlu0 %v20896_v14, %s14994_s20  ;;  %10436 = vrot.lane.b32.xlu1 %v20902_v8, %s14994_s20  ;;  %v20992_v20 = vrot.slane %v8946_v36, %v15240_v29  ;;  %v20995_v23 = vrot.slane %v8962_v16, %v15240_v29 }
 0xb04   : > { %v20979_v4 = vrot.slane %v8978_v28, %v15240_v29  ;;  %v20982_v34 = vrot.slane %v8994_v35, %v15240_v29  ;;  %v20987_v7 = vrot.slane %v8995_v22, %v15240_v29  ;;  %v21000_v28 = vrot.slane %v8963_v57, %v15240_v29 }
 0xb05   : > { %v20976_v31 = vpop.permute.xlu0 %11618  ;;  %v20984_v27 = vpop.permute.xlu1 %11616  ;;  %25144 = vst [vmem:[#allocation49_spill] sm:$0xff] %v20992_v20  ;;  %25145 = vst [vmem:[#allocation39_spill] sm:$0xff] %v20995_v23 }
 0xb06   : > { %25139 = vst [vmem:[#allocation99_spill] sm:$0xff] %v20976_v31  ;;  %25140 = vst [vmem:[#allocation75_spill] sm:$0xff] %v20979_v4  ;;  %v11636_v57 = vcombine.low %v20968_v19, %v20984_v27  ;;  %v11652_v22 = vcombine.low %v20964_v62, %v20976_v31 }
 0xb07   : > { %25141 = vst [vmem:[#allocation56_spill] sm:$0xff] %v20982_v34  ;;  %25142 = vst [vmem:[#allocation50_spill] sm:$0xff] %v20984_v27  ;;  %10448 = vrot.lane.b32.xlu0 %v20912_v21, %s14994_s20  ;;  %10444 = vrot.lane.b32.xlu1 %v20920_v15, %s14994_s20 }
 0xb08   : > { %25143 = vst [vmem:[#allocation119_spill] sm:$0xff] %v20987_v7  ;;  %25146 = vst [vmem:[#allocation97_spill] sm:$0xff] %v21000_v28  ;;  %v21033_v7 = vrot.slane %v11636_v57, %v15232_v17  ;;  %v21036_v28 = vrot.slane %v11652_v22, %v15232_v17  ;;  %v10897_v22 = vcombine.high %v20610_v50, %v20626_v40 }
 0xb09   : > { %v21002_v35 = vpop.permute.xlu0 %11622  ;;  %v21008_v51 = vpop.permute.xlu1 %11620  ;;  %v10865_v57 = vcombine.high %v20584_v41, %v20598_v47  ;;  %v10961_v50 = vcombine.high %v20646_v13, %v20641_v26 }
 0xb0b   : > { %10456 = vrot.lane.b32.xlu0 %v20934_v11, %s14994_s20  ;;  %10452 = vrot.lane.b32.xlu1 %v20940_v45, %s14994_s20  ;;  %v21095_v26 = vrot.slane %v10865_v57, %v15232_v17  ;;  %v10975_v13 = vrot.slane %v10961_v50, %v15240_v29 }
 0xb0d   : > { %v21022_v55 = vpop.permute.xlu0 %11626  ;;  %v21024_v23 = vpop.permute.xlu1 %11624 }
 0xb0e   : > { %v11684_v36 = vcombine.low %v21002_v35, %v21022_v55  ;;  %v11668_v16 = vcombine.low %v21008_v51, %v21024_v23 }
 0xb0f   : > { %10042 = vrot.lane.b32.xlu0 %v20864_v9, %s15000_s22  ;;  %10038 = vrot.lane.b32.xlu1 %v20872_v48, %s15000_s22  ;;  %v11700_v48 = vcombine.low %v21033_v7, %v21036_v28 }
 0xb10   : > { %v21039_v19 = vrot.slane %v11684_v36, %v15232_v17  ;;  %v21044_v27 = vrot.slane %v11668_v16, %v15232_v17  ;;  %v10913_v36 = vcombine.high %v20608_v39, %v20624_v24  ;;  %v10929_v24 = vcombine.high %v20635_v18, %v20638_v52 }
 0xb11   : > { %v21046_v62 = vpop.permute.xlu0 %9620  ;;  %v21048_v31 = vpop.permute.xlu1 %9616 }
 0xb12   : > { %25147 = vst [vmem:[#allocation63_spill] sm:$0xff] %v21046_v62  ;;  %25148 = vst [vmem:[#allocation19_spill] sm:$0xff] %v21048_v31  ;;  %v11732_v9 = vcombine.low %v21044_v27, %v21039_v19  ;;  %v21083_v41 = vrot.slane %v10913_v36, %v15232_v17  ;;  %v10993_v36 = vcombine.high %v20672_v58, %v20665_v2 }
 0xb13   : > { %10050 = vrot.lane.b32.xlu0 %v20896_v14, %s15000_s22  ;;  %10046 = vrot.lane.b32.xlu1 %v20902_v8, %s15000_s22  ;;  %v10881_v14 = vcombine.high %v20586_v49, %v20596_v25  ;;  %v21080_v8 = vrot.slane %v10897_v22, %v15232_v17  ;;  %v21088_v49 = vrot.slane %v11700_v48, %v15240_v29 }
 0xb14   : > { %v21073_v39 = vrot.slane %v11732_v9, %v15240_v29  ;;  %v10571_v25 = vcombine.high %v20710_v10, %v20705_v5  ;;  %v10943_v22 = vrot.slane %v10929_v24, %v15240_v29 }
 0xb15   : > { %v21062_v16 = vpop.permute.xlu0 %9628  ;;  %v21070_v40 = vpop.permute.xlu1 %9624  ;;  %25152 = vst [vmem:[#allocation13_spill] sm:$0xff] %v21088_v49  ;;  %v21098_v18 = vrot.slane %v10881_v14, %v15232_v17  ;;  %v10976_v5 = vcombine.low %v21080_v8, %v21083_v41 }
 0xb16   : > { %25149 = vst [vmem:[#allocation12_spill] sm:$0xff] %v21062_v16  ;;  %25150 = vst [vmem:[#allocation84_spill] sm:$0xff] %v21070_v40  ;;  %v9798_v10 = vcombine.low %v21048_v31, %v21070_v40  ;;  %v9814_v9 = vcombine.low %v21046_v62, %v21062_v16  ;;  %v21127_v48 = vrot.slane %v10571_v25, %v15240_v29  ;;  %v25163_v62 = vld [vmem:[#allocation15_spill] sm:$0xff]  ;;  %v25167_v16 = vld [vmem:[#allocation98_spill] sm:$0xff] }
 0xb17   : > { %25151 = vst [vmem:[#allocation29_spill] sm:$0xff] %v21073_v39  ;;  %10058 = vrot.lane.b32.xlu0 %v20912_v21, %s15000_s22  ;;  %10054 = vrot.lane.b32.xlu1 %v20920_v15, %s15000_s22  ;;  %v10539_v21 = vcombine.high %v20699_v33, %v20702_v1  ;;  %v10507_v33 = vcombine.high %v20676_v38, %v20690_v44 }
 0xb18   : > { %v10523_v1 = vcombine.high %v20674_v6, %v20688_v54  ;;  %v10944_v57 = vcombine.low %v21095_v26, %v21098_v18  ;;  %v10994_v38 = vcombine.low %v10943_v22, %v10975_v13  ;;  %v10475_v6 = vcombine.high %v20650_v32, %v20662_v61 }
 0xb19   : > { %v21092_v47 = vpop.permute.xlu0 %9636  ;;  %v21100_v52 = vpop.permute.xlu1 %9632  ;;  %v10491_v54 = vcombine.high %v20648_v3, %v20660_v42  ;;  %v21143_v50 = vrot.slane %v10539_v21, %v15240_v29  ;;  %v21146_v24 = vrot.slane %v9798_v10, %v15232_v17  ;;  %v21149_v25 = vrot.slane %v9814_v9, %v15232_v17 }
 0xb1a   : > { %25153 = vst [vmem:[#allocation78_spill] sm:$0xff] %v21092_v47  ;;  %v21156_v3 = vrot.slane %v10976_v5, %v15240_v29  ;;  %v21159_v32 = vrot.slane %v10507_v33, %v15232_v17  ;;  %v21162_v42 = vrot.slane %v10523_v1, %v15232_v17  ;;  %v10181_v9 = vcombine.high %v20774_v37, %v20769_v43 }
 0xb1b   : > { %10066 = vrot.lane.b32.xlu0 %v20934_v11, %s15000_s22  ;;  %10062 = vrot.lane.b32.xlu1 %v20940_v45, %s15000_s22  ;;  %v10604_v10 = vcombine.low %v21143_v50, %v21127_v48  ;;  %v10603_v5 = vcombine.high %v20736_v30, %v20729_v63  ;;  %v21178_v33 = vrot.slane %v10475_v6, %v15232_v17 }
 0xb1c   : > { %v21181_v1 = vrot.slane %v10491_v54, %v15232_v17  ;;  %v10149_v37 = vcombine.high %v20763_v60, %v20766_v56  ;;  %v9862_v43 = vcombine.low %v21146_v24, %v21149_v25  ;;  %v10586_v6 = vcombine.low %v21159_v32, %v21162_v42 }
 0xb1d   : > { %v21122_v11 = vpop.permute.xlu0 %9644  ;;  %v21131_v45 = vpop.permute.xlu1 %9640  ;;  %v10195_v56 = vrot.slane %v10181_v9, %v15240_v29 }
 0xb1e   : > { %25154 = vst [vmem:[#allocation86_spill] sm:$0xff] %v21122_v11  ;;  %v9846_v14 = vcombine.low %v21092_v47, %v21122_v11  ;;  %v9830_v44 = vcombine.low %v21100_v52, %v21131_v45  ;;  %v10554_v2 = vcombine.low %v21178_v33, %v21181_v1  ;;  %v21217_v9 = vrot.slane %v9862_v43, %v15240_v29  ;;  %v25187_v47 = vld [vmem:[#allocation30_spill] sm:$0xff] }
 0xb1f   : > { %11137 = vrot.lane.b32.xlu0 %v10993_v36, %s14988_s11  ;;  %11141 = vrot.lane.b32.xlu1 %v10994_v38, %s14986_s23  ;;  %v10952_v38 = vrot.slane %v10944_v57, %v15240_v29  ;;  %v25158_v57 = vld [vmem:[#allocation44_spill] sm:$0xff] }
 0xb20   : > { %v21152_v15 = vrot.slane %v9846_v14, %v15232_v17  ;;  %v21165_v61 = vrot.slane %v9830_v44, %v15232_v17  ;;  %v10995_v44 = vcombine.high %v10943_v22, %v10975_v13  ;;  %v10133_v30 = vcombine.high %v25158_v57, %v20752_v53  ;;  %v25161_v13 = vld [vmem:[#allocation23_spill] sm:$0xff]  ;;  %v25162_v22 = vld [vmem:[#allocation14_spill] sm:$0xff]  ;;  %25165 = vst [vmem:[#allocation28_spill] sm:$0xff] %v21217_v9 }
 0xb21   : > { %v21167_v21 = vpop.permute.xlu0 %11419  ;;  %v21173_v36 = vpop.permute.xlu1 %11417  ;;  %v10996_v63 = vcombine.low %v10952_v38, %v21156_v3  ;;  %v10085_v58 = vcombine.high %v25162_v22, %v25161_v13  ;;  %v10163_v53 = vrot.slane %v10149_v37, %v15240_v29  ;;  %v10594_v13 = vrot.slane %v10586_v6, %v15240_v29 }
 0xb22   : > { %25155 = vst [vmem:[#allocation103_spill] sm:$0xff] %v21167_v21  ;;  %25156 = vst [vmem:[#allocation32_spill] sm:$0xff] %v21173_v36  ;;  %v9894_v14 = vcombine.low %v21165_v61, %v21152_v15 }
 0xb23   : > { %10751 = vrot.lane.b32.xlu0 %v10604_v10, %s14986_s23  ;;  %10747 = vrot.lane.b32.xlu1 %v10603_v5, %s14988_s11  ;;  %v10117_v10 = vcombine.high %v20740_v59, %v20754_v0  ;;  %v25164_v59 = vld [vmem:[#allocation111_spill] sm:$0xff]  ;;  %v10215_v43 = vcombine.high %v10163_v53, %v10195_v56  ;;  %v21241_v6 = vrot.slane %v10085_v58, %v15232_v17 }
 0xb24   : > { %v21205_v5 = vrot.slane %v9894_v14, %v15240_v29  ;;  %v10101_v0 = vcombine.high %v25164_v59, %v25163_v62  ;;  %v10977_v14 = vcombine.high %v21080_v8, %v21083_v41  ;;  %v21230_v62 = vrot.slane %v10133_v30, %v15232_v17 }
 0xb25   : > { %v21194_v54 = vpop.permute.xlu0 %11423  ;;  %v21201_v60 = vpop.permute.xlu1 %11421  ;;  %v21227_v22 = vrot.slane %v10117_v10, %v15232_v17  ;;  %v10945_v8 = vcombine.high %v21095_v26, %v21098_v18  ;;  %v10562_v41 = vrot.slane %v10554_v2, %v15240_v29 }
 0xb26   : > { %25157 = vst [vmem:[#allocation109_spill] sm:$0xff] %v21194_v54  ;;  %25159 = vst [vmem:[#allocation31_spill] sm:$0xff] %v21201_v60  ;;  %v21244_v10 = vrot.slane %v10101_v0, %v15232_v17  ;;  %v11441_v30 = vcombine.low %v21173_v36, %v21201_v60  ;;  %v11457_v59 = vcombine.low %v21167_v21, %v21194_v54  ;;  %v25181_v54 = vld [vmem:[#allocation85_spill] sm:$0xff] }
 0xb27   : > { %25160 = vst [vmem:[#allocation110_spill] sm:$0xff] %v21205_v5  ;;  %11149 = vrot.lane.b32.xlu0 %v10996_v63, %s14984_s8  ;;  %11145 = vrot.lane.b32.xlu1 %v10995_v44, %s14987_s10  ;;  %v25168_v63 = vld [vmem:[#allocation48_spill] sm:$0xff]  ;;  %v10196_v2 = vcombine.low %v21227_v22, %v21230_v62  ;;  %v10607_v18 = vcombine.high %v10562_v41, %v10594_v13 }
 0xb28   : > { %v10213_v31 = vcombine.high %v25168_v63, %v25167_v16  ;;  %v10991_v0 = vrot.slane %v10977_v14, %v15240_v29  ;;  %v21272_v63 = vrot.slane %v11457_v59, %v15232_v17 }
 0xb29   : > { %v21221_v57 = vpop.permute.xlu0 %11427  ;;  %v21232_v37 = vpop.permute.xlu1 %11425  ;;  %v10204_v59 = vrot.slane %v10196_v2, %v15240_v29 }
 0xb2a   : > { %25166 = vst [vmem:[#allocation64_spill] sm:$0xff] %v21221_v57  ;;  %25169 = vst [vmem:[#allocation68_spill] sm:$0xff] %v21232_v37 }
 0xb2b   : > { %10357 = vrot.lane.b32.xlu0 %v10213_v31, %s14988_s11  ;;  %10365 = vrot.lane.b32.xlu1 %v10215_v43, %s14987_s10  ;;  %v10605_v31 = vcombine.high %v21143_v50, %v21127_v48  ;;  %v10959_v43 = vrot.slane %v10945_v8, %v15240_v29  ;;  %v10164_v48 = vcombine.low %v21241_v6, %v21244_v10 }
 0xb2c   : > { %v21269_v50 = vrot.slane %v11441_v30, %v15232_v17  ;;  %v10997_v8 = vcombine.high %v10952_v38, %v21156_v3 }
 0xb2d   : > { %v21251_v44 = vpop.permute.xlu0 %11431  ;;  %v21257_v58 = vpop.permute.xlu1 %11429  ;;  %v10172_v3 = vrot.slane %v10164_v48, %v15240_v29  ;;  %v25180_v48 = vld [vmem:[#allocation83_spill] sm:$0xff]  ;;  %v10998_v11 = vcombine.low %v10959_v43, %v10991_v0 }
 0xb2e   : > { %25170 = vst [vmem:[#allocation125_spill] sm:$0xff] %v21251_v44  ;;  %25171 = vst [vmem:[#allocation126_spill] sm:$0xff] %v21257_v58  ;;  %v11489_v26 = vcombine.low %v21221_v57, %v21251_v44  ;;  %v11473_v16 = vcombine.low %v21232_v37, %v21257_v58  ;;  %v10587_v44 = vcombine.high %v21159_v32, %v21162_v42 }
 0xb2f   : > { %10755 = vrot.lane.b32.xlu0 %v10605_v31, %s14987_s10  ;;  %10763 = vrot.lane.b32.xlu1 %v10607_v18, %s14982_s4  ;;  %v10999_v37 = vcombine.high %v10959_v43, %v10991_v0  ;;  %v11505_v18 = vcombine.low %v21269_v50, %v21272_v63  ;;  %v10214_v42 = vcombine.low %v10163_v53, %v10195_v56  ;;  %v25179_v53 = vld [vmem:[#allocation17_spill] sm:$0xff] }
 0xb30   : > { %v21275_v57 = vrot.slane %v11489_v26, %v15232_v17  ;;  %v21279_v14 = vrot.slane %v11473_v16, %v15232_v17  ;;  %v10555_v16 = vcombine.high %v21178_v33, %v21181_v1  ;;  %v10216_v2 = vcombine.low %v10172_v3, %v10204_v59 }
 0xb31   : > { %v21281_v31 = vpop.permute.xlu0 %9230  ;;  %v21286_v30 = vpop.permute.xlu1 %9226  ;;  %v10601_v58 = vrot.slane %v10587_v44, %v15240_v29  ;;  %v21310_v1 = vrot.slane %v11505_v18, %v15240_v29  ;;  %v10606_v56 = vcombine.low %v10562_v41, %v10594_v13  ;;  %v9695_v21 = vcombine.high %v25180_v48, %v25179_v53  ;;  %v25182_v44 = vld [vmem:[#allocation37_spill] sm:$0xff]  ;;  %v25186_v18 = vld [vmem:[#allocation107_spill] sm:$0xff]  ;;  %v25188_v53 = vld [vmem:[#allocation92_spill] sm:$0xff] }
 0xb32   : > { %25172 = vst [vmem:[#allocation108_spill] sm:$0xff] %v21281_v31  ;;  %25173 = vst [vmem:[#allocation43_spill] sm:$0xff] %v21286_v30  ;;  %v11537_v26 = vcombine.low %v21279_v14, %v21275_v57  ;;  %v10569_v33 = vrot.slane %v10555_v16, %v15240_v29  ;;  %v9711_v36 = vcombine.high %v25182_v44, %v25181_v54  ;;  %v25185_v16 = vld [vmem:[#allocation73_spill] sm:$0xff] }
 0xb33   : > { %11153 = vrot.lane.b32.xlu0 %v10997_v8, %s14982_s4  ;;  %11161 = vrot.lane.b32.xlu1 %v10999_v37, %s14983_s6  ;;  %25177 = vst [vmem:[#allocation82_spill] sm:$0xff] %v21310_v1  ;;  %v9663_v13 = vcombine.high %v25187_v47, %v25186_v18  ;;  %v25189_v48 = vld [vmem:[#allocation25_spill] sm:$0xff] }
 0xb34   : > { %v21304_v8 = vrot.slane %v11537_v26, %v15240_v29  ;;  %v10608_v60 = vcombine.low %v10569_v33, %v10601_v58  ;;  %v9759_v44 = vcombine.high %v25189_v48, %v25188_v53  ;;  %v25192_v18 = vld [vmem:[#allocation61_spill] sm:$0xff]  ;;  %v25194_v48 = vld [vmem:[#allocation76_spill] sm:$0xff] }
 0xb35   : > { %v21298_v32 = vpop.permute.xlu0 %9238  ;;  %v21300_v38 = vpop.permute.xlu1 %9234  ;;  %v25193_v53 = vld [vmem:[#allocation101_spill] sm:$0xff] }
 0xb36   : > { %25174 = vst [vmem:[#allocation42_spill] sm:$0xff] %v21298_v32  ;;  %25175 = vst [vmem:[#allocation36_spill] sm:$0xff] %v21300_v38  ;;  %v9408_v41 = vcombine.low %v21286_v30, %v21300_v38  ;;  %v9424_v54 = vcombine.low %v21281_v31, %v21298_v32  ;;  %v9727_v0 = vcombine.high %v25194_v48, %v25193_v53 }
 0xb37   : > { %25176 = vst [vmem:[#allocation127_spill] sm:$0xff] %v21304_v8  ;;  %10361 = vrot.lane.b32.xlu0 %v10214_v42, %s14986_s23  ;;  %10369 = vrot.lane.b32.xlu1 %v10216_v2, %s14984_s8  ;;  %v25184_v2 = vld [vmem:[#allocation123_spill] sm:$0xff]  ;;  %v10217_v31 = vcombine.high %v10172_v3, %v10204_v59 }
 0xb38   : > { %v9679_v40 = vcombine.high %v25185_v16, %v25184_v2  ;;  %v21337_v2 = vrot.slane %v9695_v21, %v15232_v17  ;;  %v21360_v43 = vrot.slane %v9408_v41, %v15232_v17  ;;  %v21363_v38 = vrot.slane %v9424_v54, %v15232_v17 }
 0xb39   : > { %v21312_v37 = vpop.permute.xlu0 %9246  ;;  %v21318_v26 = vpop.permute.xlu1 %9242 }
 0xb3a   : > { %25178 = vst [vmem:[#allocation40_spill] sm:$0xff] %v21312_v37  ;;  %25183 = vst [vmem:[#allocation95_spill] sm:$0xff] %v21318_v26  ;;  %v21349_v30 = vrot.slane %v9679_v40, %v15232_v17 }
 0xb3b   : > { %10759 = vrot.lane.b32.xlu0 %v10606_v56, %s14984_s8  ;;  %10767 = vrot.lane.b32.xlu1 %v10608_v60, %s14985_s9  ;;  %v21340_v56 = vrot.slane %v9711_v36, %v15232_v17  ;;  %v9401_v60 = vcombine.high %v25192_v18, %v20915_v46  ;;  %v21357_v36 = vrot.slane %v9663_v13, %v15232_v17  ;;  %v25198_v46 = vld [vmem:[#allocation45_spill] sm:$0xff] }
 0xb3c   : > { %25195 = vst [vmem:[#allocation89_spill] sm:$0xff] %v21360_v43  ;;  %v9773_v18 = vrot.slane %v9759_v44, %v15240_v29  ;;  %v25200_v44 = vld [vmem:[#allocation117_spill] sm:$0xff] }
 0xb3d   : > { %v21334_v42 = vpop.permute.xlu0 %9254  ;;  %v21342_v47 = vpop.permute.xlu1 %9250  ;;  %v9774_v41 = vcombine.low %v21337_v2, %v21340_v56 }
 0xb3e   : > { %25190 = vst [vmem:[#allocation115_spill] sm:$0xff] %v21334_v42  ;;  %25191 = vst [vmem:[#allocation94_spill] sm:$0xff] %v21342_v47  ;;  %v9456_v16 = vcombine.low %v21312_v37, %v21334_v42  ;;  %v9440_v21 = vcombine.low %v21318_v26, %v21342_v47  ;;  %v10609_v47 = vcombine.high %v10569_v33, %v10601_v58  ;;  %v25205_v37 = vld [vmem:[#allocation118_spill] sm:$0xff] }
 0xb3f   : > { %11157 = vrot.lane.b32.xlu0 %v10998_v11, %s14985_s9  ;;  %9545 = vrot.lane.b32.xlu1 %v9401_v60, %s14988_s11  ;;  %v25197_v11 = vld [vmem:[#allocation27_spill] sm:$0xff]  ;;  %v9741_v60 = vrot.slane %v9727_v0, %v15240_v29  ;;  %v25206_v42 = vld [vmem:[#allocation74_spill] sm:$0xff]  ;;  %v10197_v58 = vcombine.high %v21227_v22, %v21230_v62 }
 0xb40   : > { %v21366_v40 = vrot.slane %v9456_v16, %v15232_v17  ;;  %v21370_v53 = vrot.slane %v9440_v21, %v15232_v17  ;;  %v9791_v13 = vcombine.high %v25198_v46, %v25197_v11  ;;  %v9742_v21 = vcombine.low %v21357_v36, %v21349_v30  ;;  %v25201_v46 = vld [vmem:[#allocation24_spill] sm:$0xff] }
 0xb41   : > { %v21372_v48 = vpop.permute.xlu0 %11224  ;;  %v21379_v54 = vpop.permute.xlu1 %11222  ;;  %v9472_v11 = vcombine.low %v21360_v43, %v21363_v38  ;;  %v9369_v32 = vcombine.high %v25201_v46, %v25200_v44  ;;  %v9792_v59 = vcombine.low %v9741_v60, %v9773_v18  ;;  %v9337_v43 = vcombine.high %v25206_v42, %v25205_v37 }
 0xb42   : > { %25196 = vst [vmem:[#allocation77_spill] sm:$0xff] %v21372_v48  ;;  %25199 = vst [vmem:[#allocation121_spill] sm:$0xff] %v21379_v54  ;;  %v9504_v16 = vcombine.low %v21370_v53, %v21366_v40  ;;  %v9750_v46 = vrot.slane %v9742_v21, %v15240_v29  ;;  %v25209_v21 = vld [vmem:[#allocation105_spill] sm:$0xff] }
 0xb43   : > { %9935 = vrot.lane.b32.xlu0 %v9791_v13, %s14988_s11  ;;  %10373 = vrot.lane.b32.xlu1 %v10217_v31, %s14982_s4  ;;  %v21397_v13 = vrot.slane %v9774_v41, %v15240_v29  ;;  %v21408_v31 = vrot.slane %v9472_v11, %v15240_v29  ;;  %v9793_v41 = vcombine.high %v9741_v60, %v9773_v18 }
 0xb44   : > { %v21400_v0 = vrot.slane %v9504_v16, %v15240_v29  ;;  %v9383_v16 = vrot.slane %v9369_v32, %v15240_v29  ;;  %v9351_v11 = vrot.slane %v9337_v43, %v15240_v29  ;;  %v10211_v60 = vrot.slane %v10197_v58, %v15240_v29 }
 0xb45   : > { %v21392_v26 = vpop.permute.xlu0 %11228  ;;  %v21394_v3 = vpop.permute.xlu1 %11226  ;;  %25207 = vst [vmem:[#allocation124_spill] sm:$0xff] %v21408_v31  ;;  %v9794_v37 = vcombine.low %v9750_v46, %v21397_v13 }
 0xb46   : > { %25202 = vst [vmem:[#allocation26_spill] sm:$0xff] %v21392_v26  ;;  %25203 = vst [vmem:[#allocation16_spill] sm:$0xff] %v21394_v3  ;;  %v11246_v22 = vcombine.low %v21379_v54, %v21394_v3  ;;  %v11262_v62 = vcombine.low %v21372_v48, %v21392_v26  ;;  %v9402_v18 = vcombine.low %v9351_v11, %v9383_v16  ;;  %v25211_v48 = vld [vmem:[#allocation46_spill] sm:$0xff]  ;;  %v25217_v3 = vld [vmem:[#allocation20_spill] sm:$0xff] }
 0xb47   : > { %25204 = vst [vmem:[#allocation38_spill] sm:$0xff] %v21400_v0  ;;  %9939 = vrot.lane.b32.xlu0 %v9792_v59, %s14986_s23  ;;  %10771 = vrot.lane.b32.xlu1 %v10609_v47, %s14983_s6  ;;  %v10165_v47 = vcombine.high %v21241_v6, %v21244_v10  ;;  %v25210_v59 = vld [vmem:[#allocation33_spill] sm:$0xff]  ;;  %v25212_v26 = vld [vmem:[#allocation106_spill] sm:$0xff] }
 0xb48   : > { %v9384_v6 = vcombine.low %v25210_v59, %v25209_v21  ;;  %v9352_v54 = vcombine.low %v25212_v26, %v25211_v48  ;;  %v21445_v58 = vrot.slane %v11246_v22, %v15232_v17  ;;  %v21448_v21 = vrot.slane %v11262_v62, %v15232_v17 }
 0xb49   : > { %v21412_v33 = vpop.permute.xlu0 %11232  ;;  %v21415_v44 = vpop.permute.xlu1 %11230 }
 0xb4a   : > { %25208 = vst [vmem:[#allocation122_spill] sm:$0xff] %v21415_v44  ;;  %v9392_v62 = vrot.slane %v9384_v6, %v15240_v29  ;;  %v9775_v6 = vcombine.high %v21337_v2, %v21340_v56  ;;  %v9795_v56 = vcombine.high %v9750_v46, %v21397_v13 }
 0xb4b   : > { %9943 = vrot.lane.b32.xlu0 %v9793_v41, %s14987_s10  ;;  %9947 = vrot.lane.b32.xlu1 %v9794_v37, %s14984_s8  ;;  %v9403_v41 = vcombine.high %v9351_v11, %v9383_v16  ;;  %v10179_v37 = vrot.slane %v10165_v47, %v15240_v29 }
 0xb4d   : > { %v21429_v32 = vpop.permute.xlu0 %11236  ;;  %v21434_v10 = vpop.permute.xlu1 %11234  ;;  %v10218_v47 = vcombine.low %v10179_v37, %v10211_v60  ;;  %v10219_v22 = vcombine.high %v10179_v37, %v10211_v60  ;;  %v9011_v60 = vcombine.high %v20992_v20, %v20979_v4  ;;  %v9789_v20 = vrot.slane %v9775_v6, %v15240_v29 }
 0xb4e   : > { %v11294_v43 = vcombine.low %v21412_v33, %v21429_v32  ;;  %v11278_v42 = vcombine.low %v21415_v44, %v21434_v10  ;;  %v11310_v44 = vcombine.low %v21445_v58, %v21448_v21 }
 0xb4f   : > { %9549 = vrot.lane.b32.xlu0 %v9402_v18, %s14986_s23  ;;  %9553 = vrot.lane.b32.xlu1 %v9403_v41, %s14987_s10  ;;  %v25214_v18 = vld [vmem:[#allocation11_spill] sm:$0xff] }
 0xb50   : > { %v21451_v59 = vrot.slane %v11294_v43, %v15232_v17  ;;  %v21455_v16 = vrot.slane %v11278_v42, %v15232_v17  ;;  %v8979_v26 = vcombine.high %v25214_v18, %v20955_v12  ;;  %v25216_v41 = vld [vmem:[#allocation71_spill] sm:$0xff]  ;;  %v9360_v12 = vrot.slane %v9352_v54, %v15240_v29 }
 0xb51   : > { %v21457_v11 = vpop.permute.xlu0 %8840  ;;  %v21461_v48 = vpop.permute.xlu1 %8836  ;;  %v8947_v42 = vcombine.high %v25217_v3, %v25216_v41  ;;  %v9743_v54 = vcombine.high %v21357_v36, %v21349_v30  ;;  %v21491_v4 = vrot.slane %v11310_v44, %v15240_v29 }
 0xb52   : > { %25213 = vst [vmem:[#allocation52_spill] sm:$0xff] %v21457_v11  ;;  %25215 = vst [vmem:[#allocation18_spill] sm:$0xff] %v21461_v48  ;;  %v11342_v43 = vcombine.low %v21455_v16, %v21451_v59  ;;  %v8993_v3 = vrot.slane %v8979_v26, %v15240_v29 }
 0xb53   : > { %10377 = vrot.lane.b32.xlu0 %v10218_v47, %s14985_s9  ;;  %10381 = vrot.lane.b32.xlu1 %v10219_v22, %s14983_s6  ;;  %v9404_v47 = vcombine.low %v9360_v12, %v9392_v62  ;;  %v8961_v22 = vrot.slane %v8947_v42, %v15240_v29  ;;  %25220 = vst [vmem:[#allocation65_spill] sm:$0xff] %v21491_v4 }
 0xb54   : > { %v21483_v41 = vrot.slane %v11342_v43, %v15240_v29  ;;  %v9757_v13 = vrot.slane %v9743_v54, %v15240_v29 }
 0xb55   : > { %v21473_v18 = vpop.permute.xlu0 %8848  ;;  %v21479_v37 = vpop.permute.xlu1 %8844  ;;  %v9013_v43 = vcombine.high %v8961_v22, %v8993_v3  ;;  %v9012_v44 = vcombine.low %v8961_v22, %v8993_v3 }
 0xb56   : > { %25218 = vst [vmem:[#allocation22_spill] sm:$0xff] %v21473_v18  ;;  %25219 = vst [vmem:[#allocation62_spill] sm:$0xff] %v21483_v41  ;;  %v9018_v30 = vcombine.low %v21461_v48, %v21479_v37  ;;  %v9034_v36 = vcombine.low %v21457_v11, %v21473_v18  ;;  %v9796_v11 = vcombine.low %v9757_v13, %v9789_v20  ;;  %v25224_v48 = vld [vmem:[#allocation112_spill] sm:$0xff] }
 0xb57   : > { %9155 = vrot.lane.b32.xlu0 %v9011_v60, %s14988_s11  ;;  %9557 = vrot.lane.b32.xlu1 %v9404_v47, %s14984_s8  ;;  %v9797_v47 = vcombine.high %v9757_v13, %v9789_v20  ;;  %v11765_v13 = vcombine.high %v21088_v49, %v21073_v39  ;;  %v25233_v49 = vld [vmem:[#allocation100_spill] sm:$0xff] }
 0xb58   : > { %v21518_v60 = vrot.slane %v9018_v30, %v15232_v17  ;;  %v25223_v30 = vld [vmem:[#allocation69_spill] sm:$0xff] }
 0xb59   : > { %v21493_v2 = vpop.permute.xlu0 %8856  ;;  %v21496_v26 = vpop.permute.xlu1 %8852 }
 0xb5b   : > { %9951 = vrot.lane.b32.xlu0 %v9795_v56, %s14982_s4  ;;  %9163 = vrot.lane.b32.xlu1 %v9013_v43, %s14987_s10  ;;  %v21521_v43 = vrot.slane %v9034_v36, %v15232_v17  ;;  %v9406_v36 = vcombine.low %v25224_v48, %v25223_v30 }
 0xb5d   : > { %v21508_v46 = vpop.permute.xlu0 %8864  ;;  %v21510_v42 = vpop.permute.xlu1 %8860 }
 0xb5e   : > { %v9066_v6 = vcombine.low %v21493_v2, %v21508_v46  ;;  %v9050_v56 = vcombine.low %v21496_v26, %v21510_v42 }
 0xb5f   : > { %9159 = vrot.lane.b32.xlu0 %v9012_v44, %s14986_s23  ;;  %9959 = vrot.lane.b32.xlu1 %v9797_v47, %s14983_s6  ;;  %v11733_v44 = vcombine.high %v21044_v27, %v21039_v19  ;;  %v11701_v47 = vcombine.high %v21033_v7, %v21036_v28  ;;  %v9405_v19 = vcombine.high %v9360_v12, %v9392_v62 }
 0xb60   : > { %v21524_v54 = vrot.slane %v9066_v6, %v15232_v17  ;;  %v21528_v3 = vrot.slane %v9050_v56, %v15232_v17  ;;  %v9082_v56 = vcombine.low %v21518_v60, %v21521_v43  ;;  %v9895_v62 = vcombine.high %v21165_v61, %v21152_v15 }
 0xb61   : > { %v21530_v22 = vpop.permute.xlu0 %10822  ;;  %v21534_v18 = vpop.permute.xlu1 %10818  ;;  %v21553_v30 = vrot.slane %v11733_v44, %v15240_v29  ;;  %v21561_v7 = vrot.slane %v11701_v47, %v15240_v29  ;;  %v25230_v44 = vld [vmem:[#allocation39_spill] sm:$0xff]  ;;  %v9863_v15 = vcombine.high %v21146_v24, %v21149_v25  ;;  %v25236_v24 = vld [vmem:[#allocation113_spill] sm:$0xff] }
 0xb62   : > { %25221 = vst [vmem:[#allocation21_spill] sm:$0xff] %v21530_v22  ;;  %25222 = vst [vmem:[#allocation80_spill] sm:$0xff] %v21534_v18  ;;  %v9114_v6 = vcombine.low %v21528_v3, %v21524_v54  ;;  %v21564_v28 = vrot.slane %v9082_v56, %v15240_v29  ;;  %v11669_v56 = vcombine.high %v21008_v51, %v21024_v23  ;;  %v25232_v47 = vld [vmem:[#allocation99_spill] sm:$0xff] }
 0xb63   : > { %9955 = vrot.lane.b32.xlu0 %v9796_v11, %s14985_s9  ;;  %9565 = vrot.lane.b32.xlu1 %v9406_v36, %s14985_s9  ;;  %v9014_v36 = vcombine.low %v25230_v44, %v20982_v34  ;;  %v11653_v48 = vcombine.high %v25233_v49, %v25232_v47  ;;  %v9909_v23 = vrot.slane %v9895_v62, %v15240_v29 }
 0xb64   : > { %v21556_v11 = vrot.slane %v9114_v6, %v15240_v29  ;;  %25228 = vst [vmem:[#allocation116_spill] sm:$0xff] %v21564_v28  ;;  %v11570_v49 = vcombine.high %v21310_v1, %v21304_v8  ;;  %v21608_v47 = vrot.slane %v11669_v56, %v15232_v17  ;;  %v25240_v8 = vld [vmem:[#allocation78_spill] sm:$0xff] }
 0xb65   : > { %v21546_v20 = vpop.permute.xlu0 %10830  ;;  %v21548_v27 = vpop.permute.xlu1 %10826 }
 0xb66   : > { %25225 = vst [vmem:[#allocation87_spill] sm:$0xff] %v21546_v20  ;;  %25226 = vst [vmem:[#allocation60_spill] sm:$0xff] %v21548_v27  ;;  %v11000_v61 = vcombine.low %v21534_v18, %v21548_v27  ;;  %v11016_v39 = vcombine.low %v21530_v22, %v21546_v20  ;;  %v11375_v18 = vcombine.high %v21491_v4, %v21483_v41  ;;  %v25256_v27 = vld [vmem:[#allocation31_spill] sm:$0xff]  ;;  %v25261_v4 = vld [vmem:[#allocation68_spill] sm:$0xff] }
 0xb67   : > { %25227 = vst [vmem:[#allocation114_spill] sm:$0xff] %v21556_v11  ;;  %9561 = vrot.lane.b32.xlu0 %v9405_v19, %s14982_s4  ;;  %11773 = vrot.lane.b32.xlu1 %v11765_v13, %s14988_s11  ;;  %v11766_v19 = vcombine.low %v21561_v7, %v21553_v30  ;;  %v11685_v13 = vcombine.high %v21002_v35, %v21022_v55  ;;  %v25235_v35 = vld [vmem:[#allocation50_spill] sm:$0xff] }
 0xb68   : > { %v9927_v55 = vcombine.high %v21217_v9, %v21205_v5  ;;  %v11637_v25 = vcombine.high %v25236_v24, %v25235_v35  ;;  %v21620_v35 = vrot.slane %v11000_v61, %v15232_v17  ;;  %v21623_v24 = vrot.slane %v11016_v39, %v15232_v17  ;;  %v25245_v9 = vld [vmem:[#allocation12_spill] sm:$0xff] }
 0xb69   : > { %v21568_v12 = vpop.permute.xlu0 %10838  ;;  %v21572_v6 = vpop.permute.xlu1 %10834  ;;  %v21611_v5 = vrot.slane %v11685_v13, %v15232_v17  ;;  %v9831_v13 = vcombine.high %v21100_v52, %v21131_v45  ;;  %v21639_v39 = vrot.slane %v11653_v48, %v15232_v17  ;;  %v9505_v61 = vcombine.high %v21370_v53, %v21366_v40  ;;  %v25246_v48 = vld [vmem:[#allocation63_spill] sm:$0xff]  ;;  %v25247_v53 = vld [vmem:[#allocation89_spill] sm:$0xff] }
 0xb6a   : > { %25229 = vst [vmem:[#allocation120_spill] sm:$0xff] %v21568_v12  ;;  %25231 = vst [vmem:[#allocation55_spill] sm:$0xff] %v21572_v6  ;;  %v9537_v52 = vcombine.high %v21408_v31, %v21400_v0  ;;  %v9815_v44 = vcombine.high %v25246_v48, %v25245_v9  ;;  %v9473_v0 = vcombine.high %v25247_v53, %v21363_v38 }
 0xb6b   : > { %9167 = vrot.lane.b32.xlu0 %v9014_v36, %s14984_s8  ;;  %11777 = vrot.lane.b32.xlu1 %v11766_v19, %s14986_s23  ;;  %v11538_v36 = vcombine.high %v21279_v14, %v21275_v57  ;;  %v9877_v57 = vrot.slane %v9863_v15, %v15240_v29  ;;  %v11506_v14 = vcombine.high %v21269_v50, %v21272_v63 }
 0xb6c   : > { %25238 = vst [vmem:[#allocation70_spill] sm:$0xff] %v21620_v35  ;;  %v21671_v9 = vrot.slane %v9831_v13, %v15232_v17  ;;  %v11767_v38 = vcombine.high %v21561_v7, %v21553_v30  ;;  %v21696_v31 = vrot.slane %v9815_v44, %v15232_v17  ;;  %v21701_v30 = vrot.slane %v9473_v0, %v15240_v29 }
 0xb6d   : > { %v21592_v51 = vpop.permute.xlu0 %10846  ;;  %v21601_v34 = vpop.permute.xlu1 %10842  ;;  %v9928_v50 = vcombine.low %v9877_v57, %v9909_v23  ;;  %v21648_v45 = vrot.slane %v11538_v36, %v15240_v29  ;;  %v11064_v36 = vcombine.low %v21620_v35, %v21623_v24  ;;  %v25267_v35 = vld [vmem:[#allocation95_spill] sm:$0xff] }
 0xb6e   : > { %25234 = vst [vmem:[#allocation67_spill] sm:$0xff] %v21592_v51  ;;  %25237 = vst [vmem:[#allocation104_spill] sm:$0xff] %v21601_v34  ;;  %v11048_v19 = vcombine.low %v21568_v12, %v21592_v51  ;;  %v11032_v62 = vcombine.low %v21572_v6, %v21601_v34  ;;  %v25259_v51 = vld [vmem:[#allocation103_spill] sm:$0xff] }
 0xb6f   : > { %9963 = vrot.lane.b32.xlu0 %v9927_v55, %s14988_s11  ;;  %11578 = vrot.lane.b32.xlu1 %v11570_v49, %s14988_s11  ;;  %v25239_v55 = vld [vmem:[#allocation86_spill] sm:$0xff]  ;;  %v25243_v49 = vld [vmem:[#allocation84_spill] sm:$0xff]  ;;  %v21704_v7 = vrot.slane %v11064_v36, %v15240_v29 }
 0xb70   : > { %v21626_v56 = vrot.slane %v11048_v19, %v15232_v17  ;;  %v9847_v15 = vcombine.high %v25240_v8, %v25239_v55  ;;  %v21634_v1 = vrot.slane %v11032_v62, %v15232_v17  ;;  %v21651_v8 = vrot.slane %v11637_v25, %v15232_v17  ;;  %v25244_v62 = vld [vmem:[#allocation19_spill] sm:$0xff] }
 0xb71   : > { %v21636_v63 = vpop.permute.xlu0 %10432  ;;  %v21643_v19 = vpop.permute.xlu1 %10428  ;;  %v9799_v55 = vcombine.high %v25244_v62, %v25243_v49  ;;  %v21666_v25 = vrot.slane %v11506_v14, %v15240_v29  ;;  %v11748_v49 = vcombine.low %v21608_v47, %v21611_v5  ;;  %25251 = vst [vmem:[#allocation54_spill] sm:$0xff] %v21704_v7 }
 0xb72   : > { %25241 = vst [vmem:[#allocation81_spill] sm:$0xff] %v21636_v63  ;;  %25242 = vst [vmem:[#allocation47_spill] sm:$0xff] %v21643_v19  ;;  %v11096_v40 = vcombine.low %v21634_v1, %v21626_v56  ;;  %v21674_v62 = vrot.slane %v9847_v15, %v15232_v17  ;;  %v11716_v13 = vcombine.low %v21651_v8, %v21639_v39 }
 0xb73   : > { %9967 = vrot.lane.b32.xlu0 %v9928_v50, %s14986_s23  ;;  %9573 = vrot.lane.b32.xlu1 %v9537_v52, %s14988_s11  ;;  %v11571_v14 = vcombine.low %v21666_v25, %v21648_v45  ;;  %v21685_v52 = vrot.slane %v9505_v61, %v15240_v29  ;;  %v21693_v15 = vrot.slane %v9799_v55, %v15232_v17 }
 0xb74   : > { %v21688_v53 = vrot.slane %v11096_v40, %v15240_v29  ;;  %v9910_v61 = vcombine.low %v21671_v9, %v21674_v62  ;;  %v9929_v55 = vcombine.high %v9877_v57, %v9909_v23  ;;  %v11756_v22 = vrot.slane %v11748_v49, %v15240_v29 }
 0xb75   : > { %v21676_v50 = vpop.permute.xlu0 %10440  ;;  %v21680_v48 = vpop.permute.xlu1 %10436  ;;  %v9878_v36 = vcombine.low %v21693_v15, %v21696_v31 }
 0xb76   : > { %25248 = vst [vmem:[#allocation96_spill] sm:$0xff] %v21676_v50  ;;  %25249 = vst [vmem:[#allocation41_spill] sm:$0xff] %v21680_v48  ;;  %v21725_v49 = vrot.slane %v9910_v61, %v15240_v29  ;;  %v10626_v41 = vcombine.low %v21636_v63, %v21676_v50  ;;  %v9083_v50 = vcombine.high %v21518_v60, %v21521_v43 }
 0xb77   : > { %25250 = vst [vmem:[#allocation53_spill] sm:$0xff] %v21688_v53  ;;  %11781 = vrot.lane.b32.xlu0 %v11767_v38, %s14987_s10  ;;  %11582 = vrot.lane.b32.xlu1 %v11571_v14, %s14986_s23  ;;  %v9538_v38 = vcombine.low %v21701_v30, %v21685_v52  ;;  %v11724_v14 = vrot.slane %v11716_v13, %v15240_v29  ;;  %v25258_v13 = vld [vmem:[#allocation109_spill] sm:$0xff] }
 0xb78   : > { %v21741_v61 = vrot.slane %v9878_v36, %v15240_v29  ;;  %v9911_v60 = vcombine.high %v21671_v9, %v21674_v62  ;;  %v9097_v62 = vrot.slane %v9083_v50, %v15240_v29 }
 0xb79   : > { %v21708_v40 = vpop.permute.xlu0 %10448  ;;  %v21711_v44 = vpop.permute.xlu1 %10444  ;;  %v11768_v57 = vcombine.low %v11724_v14, %v11756_v22 }
 0xb7a   : > { %25252 = vst [vmem:[#allocation93_spill] sm:$0xff] %v21708_v40  ;;  %25253 = vst [vmem:[#allocation59_spill] sm:$0xff] %v21711_v44 }
 0xb7b   : > { %9971 = vrot.lane.b32.xlu0 %v9929_v55, %s14987_s10  ;;  %9577 = vrot.lane.b32.xlu1 %v9538_v38, %s14986_s23  ;;  %v25257_v55 = vld [vmem:[#allocation32_spill] sm:$0xff]  ;;  %v11458_v38 = vcombine.high %v25259_v51, %v25258_v13  ;;  %v25262_v13 = vld [vmem:[#allocation125_spill] sm:$0xff] }
 0xb7c   : > { %v11442_v12 = vcombine.high %v25257_v55, %v25256_v27  ;;  %v11769_v27 = vcombine.high %v11724_v14, %v11756_v22  ;;  %v25260_v55 = vld [vmem:[#allocation126_spill] sm:$0xff] }
 0xb7d   : > { %v21722_v23 = vpop.permute.xlu0 %10456  ;;  %v21727_v20 = vpop.permute.xlu1 %10452  ;;  %v11474_v51 = vcombine.high %v25261_v4, %v25260_v55  ;;  %v21776_v55 = vrot.slane %v11458_v38, %v15232_v17 }
 0xb7e   : > { %25254 = vst [vmem:[#allocation72_spill] sm:$0xff] %v21722_v23  ;;  %25255 = vst [vmem:[#allocation58_spill] sm:$0xff] %v21727_v20  ;;  %v10658_v0 = vcombine.low %v21708_v40, %v21722_v23  ;;  %v10642_v6 = vcombine.low %v21711_v44, %v21727_v20  ;;  %v10610_v40 = vcombine.low %v21643_v19, %v21680_v48  ;;  %v25263_v23 = vld [vmem:[#allocation64_spill] sm:$0xff]  ;;  %v25264_v20 = vld [vmem:[#allocation115_spill] sm:$0xff] }
 0xb7f   : > { %11785 = vrot.lane.b32.xlu0 %v11768_v57, %s14984_s8  ;;  %11383 = vrot.lane.b32.xlu1 %v11375_v18, %s14988_s11  ;;  %v11490_v44 = vcombine.high %v25263_v23, %v25262_v13  ;;  %v25265_v57 = vld [vmem:[#allocation40_spill] sm:$0xff]  ;;  %v9930_v19 = vcombine.low %v21741_v61, %v21725_v49  ;;  %v25266_v48 = vld [vmem:[#allocation94_spill] sm:$0xff]  ;;  %v11343_v18 = vcombine.high %v21455_v16, %v21451_v59 }
 0xb80   : > { %v9457_v34 = vcombine.high %v25265_v57, %v25264_v20  ;;  %v9441_v63 = vcombine.high %v25267_v35, %v25266_v48  ;;  %v21763_v22 = vrot.slane %v10642_v6, %v15232_v17  ;;  %v21766_v4 = vrot.slane %v10658_v0, %v15232_v17  ;;  %v25268_v35 = vld [vmem:[#allocation42_spill] sm:$0xff]  ;;  %v25269_v48 = vld [vmem:[#allocation108_spill] sm:$0xff]  ;;  %v25271_v6 = vld [vmem:[#allocation43_spill] sm:$0xff] }
 0xb81   : > { %v21754_v36 = vpop.permute.xlu0 %10042  ;;  %v21768_v14 = vpop.permute.xlu1 %10038  ;;  %v11749_v20 = vcombine.high %v21608_v47, %v21611_v5  ;;  %v21773_v23 = vrot.slane %v11442_v12, %v15232_v17  ;;  %v9425_v59 = vcombine.high %v25269_v48, %v25268_v35  ;;  %v25270_v16 = vld [vmem:[#allocation36_spill] sm:$0xff]  ;;  %v11311_v13 = vcombine.high %v21445_v58, %v21448_v21 }
 0xb82   : > { %v9409_v0 = vcombine.high %v25271_v6, %v25270_v16  ;;  %v21786_v57 = vrot.slane %v10610_v40, %v15232_v17  ;;  %v21789_v5 = vrot.slane %v10626_v41, %v15232_v17  ;;  %v21793_v12 = vrot.slane %v11474_v51, %v15232_v17 }
 0xb83   : > { %9975 = vrot.lane.b32.xlu0 %v9930_v19, %s14984_s8  ;;  %11789 = vrot.lane.b32.xlu1 %v11769_v27, %s14982_s4  ;;  %v21796_v47 = vrot.slane %v11490_v44, %v15232_v17  ;;  %v21799_v19 = vrot.slane %v9457_v34, %v15232_v17  ;;  %v11572_v58 = vcombine.high %v21666_v25, %v21648_v45 }
 0xb84   : > { %v21806_v21 = vrot.slane %v9441_v63, %v15232_v17  ;;  %v10706_v41 = vcombine.low %v21763_v22, %v21766_v4  ;;  %v9539_v44 = vcombine.high %v21701_v30, %v21685_v52  ;;  %v21815_v27 = vrot.slane %v11343_v18, %v15240_v29 }
 0xb85   : > { %v21801_v38 = vpop.permute.xlu0 %10050  ;;  %v21810_v40 = vpop.permute.xlu1 %10046  ;;  %v11717_v34 = vcombine.high %v21651_v8, %v21639_v39  ;;  %v21821_v45 = vrot.slane %v9409_v0, %v15232_v17  ;;  %v21824_v63 = vrot.slane %v9425_v59, %v15232_v17  ;;  %v10674_v25 = vcombine.low %v21786_v57, %v21789_v5 }
 0xb86   : > { %v21830_v52 = vrot.slane %v11311_v13, %v15240_v29  ;;  %v11553_v30 = vcombine.low %v21793_v12, %v21796_v47  ;;  %v9147_v8 = vcombine.high %v21564_v28, %v21556_v11  ;;  %v21839_v51 = vrot.slane %v11749_v20, %v15240_v29 }
 0xb87   : > { %11586 = vrot.lane.b32.xlu0 %v11572_v58, %s14987_s10  ;;  %9581 = vrot.lane.b32.xlu1 %v9539_v44, %s14987_s10  ;;  %v11521_v18 = vcombine.low %v21773_v23, %v21776_v55  ;;  %v9520_v35 = vcombine.low %v21806_v21, %v21799_v19  ;;  %v21850_v16 = vrot.slane %v10706_v41, %v15240_v29 }
 0xb88   : > { %v11376_v59 = vcombine.low %v21830_v52, %v21815_v27  ;;  %v10220_v6 = vcombine.low %v21768_v14, %v21810_v40  ;;  %v10236_v20 = vcombine.low %v21754_v36, %v21801_v38  ;;  %v21858_v0 = vrot.slane %v11717_v34, %v15240_v29 }
 0xb89   : > { %v21834_v39 = vpop.permute.xlu0 %10058  ;;  %v21845_v48 = vpop.permute.xlu1 %10054  ;;  %v9488_v13 = vcombine.low %v21821_v45, %v21824_v63  ;;  %v21864_v58 = vrot.slane %v10674_v25, %v15240_v29  ;;  %v9115_v41 = vcombine.high %v21528_v3, %v21524_v54  ;;  %v9931_v34 = vcombine.high %v21741_v61, %v21725_v49 }
 0xb8a   : > { %v11770_v11 = vcombine.low %v21858_v0, %v21839_v51  ;;  %v21880_v25 = vrot.slane %v9520_v35, %v15240_v29  ;;  %v11529_v54 = vrot.slane %v11521_v18, %v15240_v29  ;;  %v21888_v49 = vrot.slane %v10220_v6, %v15232_v17 }
 0xb8b   : > { %9183 = vrot.lane.b32.xlu0 %v9147_v8, %s14988_s11  ;;  %11387 = vrot.lane.b32.xlu1 %v11376_v59, %s14986_s23  ;;  %v11561_v8 = vrot.slane %v11553_v30, %v15240_v29  ;;  %v21891_v61 = vrot.slane %v10236_v20, %v15232_v17  ;;  %v21901_v18 = vrot.slane %v9488_v13, %v15240_v29 }
 0xb8c   : > { %25272 = vst [vmem:[#allocation66_spill] sm:$0xff] %v21888_v49  ;;  %v9129_v3 = vrot.slane %v9115_v41, %v15240_v29 }
 0xb8d   : > { %v21868_v44 = vpop.permute.xlu0 %10066  ;;  %v21875_v28 = vpop.permute.xlu1 %10062  ;;  %25273 = vst [vmem:[#allocation44_spill] sm:$0xff] %v21891_v61  ;;  %v11573_v20 = vcombine.low %v11529_v54, %v11561_v8  ;;  %v10284_v13 = vcombine.low %v21888_v49, %v21891_v61  ;;  %v25282_v61 = vld [vmem:[#allocation26_spill] sm:$0xff] }
 0xb8e   : > { %v10268_v59 = vcombine.low %v21834_v39, %v21868_v44  ;;  %v10252_v30 = vcombine.low %v21845_v48, %v21875_v28 }
 0xb8f   : > { %9979 = vrot.lane.b32.xlu0 %v9931_v34, %s14982_s4  ;;  %11793 = vrot.lane.b32.xlu1 %v11770_v11, %s14985_s9  ;;  %v9879_v11 = vcombine.high %v21693_v15, %v21696_v31  ;;  %v11129_v15 = vcombine.high %v21704_v7, %v21688_v53  ;;  %v21937_v50 = vrot.slane %v10284_v13, %v15240_v29  ;;  %v25280_v7 = vld [vmem:[#allocation16_spill] sm:$0xff]  ;;  %v25281_v13 = vld [vmem:[#allocation121_spill] sm:$0xff] }
 0xb90   : > { %v21897_v35 = vrot.slane %v10268_v59, %v15232_v17  ;;  %v21906_v43 = vrot.slane %v10252_v30, %v15232_v17  ;;  %v9540_v59 = vcombine.low %v21901_v18, %v21880_v25  ;;  %v9148_v30 = vcombine.low %v9097_v62, %v9129_v3 }
 0xb91   : > { %v21908_v6 = vpop.permute.xlu0 %11137  ;;  %v21911_v34 = vpop.permute.xlu1 %11141  ;;  %v11247_v49 = vcombine.high %v25281_v13, %v25280_v7 }
 0xb92   : > { %25274 = vst [vmem:[#allocation23_spill] sm:$0xff] %v21906_v43  ;;  %25275 = vst [vmem:[#allocation14_spill] sm:$0xff] %v21908_v6  ;;  %v10316_v9 = vcombine.low %v21906_v43, %v21897_v35  ;;  %v25283_v43 = vld [vmem:[#allocation77_spill] sm:$0xff] }
 0xb93   : > { %25276 = vst [vmem:[#allocation15_spill] sm:$0xff] %v21911_v34  ;;  %11590 = vrot.lane.b32.xlu0 %v11573_v20, %s14984_s8  ;;  %9585 = vrot.lane.b32.xlu1 %v9540_v59, %s14984_s8  ;;  %v9925_v34 = vrot.slane %v9911_v60, %v15240_v29  ;;  %v9893_v20 = vrot.slane %v9879_v11, %v15240_v29  ;;  %v25279_v60 = vld [vmem:[#allocation122_spill] sm:$0xff] }
 0xb94   : > { %v21928_v6 = vrot.slane %v10316_v9, %v15240_v29  ;;  %v11295_v59 = vcombine.high %v21412_v33, %v21429_v32  ;;  %v11279_v9 = vcombine.high %v25279_v60, %v21434_v10  ;;  %v11574_v11 = vcombine.high %v11529_v54, %v11561_v8 }
 0xb95   : > { %v21924_v41 = vpop.permute.xlu0 %10751  ;;  %v21930_v31 = vpop.permute.xlu1 %10747  ;;  %v11263_v33 = vcombine.high %v25283_v43, %v25282_v61  ;;  %v9067_v8 = vcombine.high %v21493_v2, %v21508_v46  ;;  %v11377_v54 = vcombine.high %v21830_v52, %v21815_v27  ;;  %v11097_v61 = vcombine.high %v21634_v1, %v21626_v56  ;;  %v25285_v46 = vld [vmem:[#allocation22_spill] sm:$0xff] }
 0xb96   : > { %25277 = vst [vmem:[#allocation111_spill] sm:$0xff] %v21924_v41  ;;  %25278 = vst [vmem:[#allocation17_spill] sm:$0xff] %v21930_v31  ;;  %v9932_v31 = vcombine.low %v9893_v20, %v9925_v34  ;;  %v21956_v32 = vrot.slane %v11295_v59, %v15232_v17  ;;  %v21960_v10 = vrot.slane %v11279_v9, %v15232_v17  ;;  %v25287_v27 = vld [vmem:[#allocation70_spill] sm:$0xff] }
 0xb97   : > { %9187 = vrot.lane.b32.xlu0 %v9148_v30, %s14986_s23  ;;  %11165 = vrot.lane.b32.xlu1 %v11129_v15, %s14988_s11  ;;  %v9051_v15 = vcombine.high %v21496_v26, %v21510_v42  ;;  %v21975_v59 = vrot.slane %v11247_v49, %v15232_v17  ;;  %v21978_v60 = vrot.slane %v11263_v33, %v15232_v17  ;;  %v25284_v26 = vld [vmem:[#allocation18_spill] sm:$0xff]  ;;  %v25286_v42 = vld [vmem:[#allocation52_spill] sm:$0xff] }
 0xb98   : > { %v9019_v2 = vcombine.high %v25284_v26, %v21479_v37  ;;  %v9035_v9 = vcombine.high %v25286_v42, %v25285_v46  ;;  %v11065_v1 = vcombine.high %v25287_v27, %v21623_v24  ;;  %v11358_v56 = vcombine.low %v21960_v10, %v21956_v32 }
 0xb99   : > { %v21944_v41 = vpop.permute.xlu0 %11149  ;;  %v21948_v30 = vpop.permute.xlu1 %11145  ;;  %v21991_v52 = vrot.slane %v9051_v15, %v15232_v17  ;;  %v11771_v49 = vcombine.high %v21858_v0, %v21839_v51  ;;  %v11111_v13 = vrot.slane %v11097_v61, %v15240_v29  ;;  %v11326_v33 = vcombine.low %v21975_v59, %v21978_v60 }
 0xb9a   : > { %v22008_v15 = vrot.slane %v9019_v2, %v15232_v17  ;;  %v11522_v51 = vcombine.high %v21773_v23, %v21776_v55 }
 0xb9b   : > { %9983 = vrot.lane.b32.xlu0 %v9932_v31, %s14985_s9  ;;  %11594 = vrot.lane.b32.xlu1 %v11574_v11, %s14982_s4  ;;  %v9149_v31 = vcombine.high %v9097_v62, %v9129_v3  ;;  %v21994_v3 = vrot.slane %v9067_v8, %v15232_v17  ;;  %v11554_v62 = vcombine.high %v21793_v12, %v21796_v47 }
 0xb9c   : > { %v9933_v11 = vcombine.high %v9893_v20, %v9925_v34  ;;  %v22011_v8 = vrot.slane %v9035_v9, %v15232_v17  ;;  %v11079_v12 = vrot.slane %v11065_v1, %v15240_v29  ;;  %v9541_v34 = vcombine.high %v21901_v18, %v21880_v25 }
 0xb9d   : > { %v21966_v7 = vpop.permute.xlu0 %10357  ;;  %v21972_v43 = vpop.permute.xlu1 %10365  ;;  %v9130_v47 = vcombine.low %v21991_v52, %v21994_v3  ;;  %v11366_v20 = vrot.slane %v11358_v56, %v15240_v29  ;;  %v11568_v55 = vrot.slane %v11554_v62, %v15240_v29  ;;  %v11334_v26 = vrot.slane %v11326_v33, %v15240_v29 }
 0xb9e   : > { %v11130_v23 = vcombine.low %v11079_v12, %v11111_v13  ;;  %v9489_v25 = vcombine.high %v21821_v45, %v21824_v63  ;;  %v11536_v18 = vrot.slane %v11522_v51, %v15240_v29  ;;  %v11359_v33 = vcombine.high %v21960_v10, %v21956_v32 }
 0xb9f   : > { %11391 = vrot.lane.b32.xlu0 %v11377_v54, %s14987_s10  ;;  %9191 = vrot.lane.b32.xlu1 %v9149_v31, %s14987_s10  ;;  %v9521_v54 = vcombine.high %v21806_v21, %v21799_v19  ;;  %v9098_v31 = vcombine.low %v22008_v15, %v22011_v8  ;;  %v11378_v21 = vcombine.low %v11334_v26, %v11366_v20 }
 0xba0   : > { %v9138_v2 = vrot.slane %v9130_v47, %v15240_v29  ;;  %v11575_v42 = vcombine.low %v11536_v18, %v11568_v55  ;;  %v9503_v45 = vrot.slane %v9489_v25, %v15240_v29  ;;  %v11379_v47 = vcombine.high %v11334_v26, %v11366_v20  ;;  %v25291_v25 = vld [vmem:[#allocation67_spill] sm:$0xff]  ;;  %v25293_v26 = vld [vmem:[#allocation60_spill] sm:$0xff] }
 0xba1   : > { %v21996_v37 = vpop.permute.xlu0 %10755  ;;  %v22002_v24 = vpop.permute.xlu1 %10763  ;;  %v9535_v9 = vrot.slane %v9521_v54, %v15240_v29  ;;  %v9106_v27 = vrot.slane %v9098_v31, %v15240_v29  ;;  %v25289_v54 = vld [vmem:[#allocation104_spill] sm:$0xff]  ;;  %v22075_v20 = vrot.slane %v11359_v33, %v15240_v29  ;;  %v11576_v33 = vcombine.high %v11536_v18, %v11568_v55 }
 0xba3   : > { %11797 = vrot.lane.b32.xlu0 %v11771_v49, %s14983_s6  ;;  %9987 = vrot.lane.b32.xlu1 %v9933_v11, %s14983_s6  ;;  %v9150_v1 = vcombine.low %v9106_v27, %v9138_v2  ;;  %v9542_v49 = vcombine.low %v9503_v45, %v9535_v9  ;;  %v10739_v11 = vcombine.high %v21864_v58, %v21850_v16 }
 0xba4   : > { %v9151_v10 = vcombine.high %v9106_v27, %v9138_v2  ;;  %v10707_v2 = vcombine.high %v21763_v22, %v21766_v4  ;;  %v9543_v55 = vcombine.high %v9503_v45, %v9535_v9  ;;  %v10253_v9 = vcombine.high %v21845_v48, %v21875_v28 }
 0xba5   : > { %v22020_v0 = vpop.permute.xlu0 %11153  ;;  %v22027_v61 = vpop.permute.xlu1 %11161  ;;  %v10269_v45 = vcombine.high %v21834_v39, %v21868_v44  ;;  %v9099_v28 = vcombine.high %v22008_v15, %v22011_v8  ;;  %v10221_v39 = vcombine.high %v21768_v14, %v21810_v40  ;;  %v10237_v48 = vcombine.high %v21754_v36, %v21801_v38 }
 0xba6   : > { %25288 = vst [vmem:[#allocation83_spill] sm:$0xff] %v22027_v61  ;;  %v10721_v18 = vrot.slane %v10707_v2, %v15240_v29  ;;  %v25301_v2 = vld [vmem:[#allocation72_spill] sm:$0xff]  ;;  %v22153_v15 = vrot.slane %v10253_v9, %v15232_v17 }
 0xba7   : > { %9589 = vrot.lane.b32.xlu0 %v9541_v34, %s14982_s4  ;;  %11169 = vrot.lane.b32.xlu1 %v11130_v23, %s14986_s23  ;;  %v11327_v34 = vcombine.high %v21975_v59, %v21978_v60  ;;  %v25290_v23 = vld [vmem:[#allocation55_spill] sm:$0xff]  ;;  %v22156_v14 = vrot.slane %v10269_v45, %v15232_v17  ;;  %v22168_v9 = vrot.slane %v10221_v39, %v15232_v17 }
 0xba8   : > { %v11033_v31 = vcombine.high %v25290_v23, %v25289_v54  ;;  %v25295_v60 = vld [vmem:[#allocation87_spill] sm:$0xff]  ;;  %v22171_v45 = vrot.slane %v10237_v48, %v15232_v17 }
 0xba9   : > { %v22038_v19 = vpop.permute.xlu0 %10361  ;;  %v22041_v46 = vpop.permute.xlu1 %10369  ;;  %v22084_v54 = vrot.slane %v11327_v34, %v15240_v29 }
 0xbab   : > { %11395 = vrot.lane.b32.xlu0 %v11378_v21, %s14984_s8  ;;  %11598 = vrot.lane.b32.xlu1 %v11575_v42, %s14985_s9  ;;  %v25292_v21 = vld [vmem:[#allocation120_spill] sm:$0xff] }
 0xbac   : > { %v11049_v42 = vcombine.high %v25292_v21, %v25291_v25  ;;  %v11380_v25 = vcombine.low %v22084_v54, %v22075_v20  ;;  %v10675_v21 = vcombine.high %v21786_v57, %v21789_v5 }
 0xbad   : > { %v22048_v63 = vpop.permute.xlu0 %10759  ;;  %v22050_v56 = vpop.permute.xlu1 %10767 }
 0xbae   : > { %v10689_v5 = vrot.slane %v10675_v21, %v15240_v29  ;;  %v25304_v21 = vld [vmem:[#allocation41_spill] sm:$0xff] }
 0xbaf   : > { %9195 = vrot.lane.b32.xlu0 %v9150_v1, %s14984_s8  ;;  %9593 = vrot.lane.b32.xlu1 %v9542_v49, %s14985_s9  ;;  %v11131_v49 = vcombine.high %v11079_v12, %v11111_v13  ;;  %v22087_v13 = vrot.slane %v11033_v31, %v15232_v17  ;;  %v22090_v12 = vrot.slane %v11049_v42, %v15232_v17 }
 0xbb1   : > { %v22054_v62 = vpop.permute.xlu0 %11157  ;;  %v22060_v51 = vpop.permute.xlu1 %9545  ;;  %v11112_v22 = vcombine.low %v22087_v13, %v22090_v12 }
 0xbb3   : > { %10775 = vrot.lane.b32.xlu0 %v10739_v11, %s14988_s11  ;;  %11399 = vrot.lane.b32.xlu1 %v11379_v47, %s14982_s4  ;;  %v25294_v11 = vld [vmem:[#allocation80_spill] sm:$0xff]  ;;  %v25296_v47 = vld [vmem:[#allocation21_spill] sm:$0xff] }
 0xbb4   : > { %v11001_v59 = vcombine.high %v25294_v11, %v25293_v26  ;;  %v11017_v53 = vcombine.high %v25296_v47, %v25295_v60  ;;  %v10740_v26 = vcombine.low %v10689_v5, %v10721_v18  ;;  %v11120_v11 = vrot.slane %v11112_v22, %v15240_v29  ;;  %v25300_v60 = vld [vmem:[#allocation59_spill] sm:$0xff] }
 0xbb5   : > { %v22070_v1 = vpop.permute.xlu0 %9935  ;;  %v22072_v32 = vpop.permute.xlu1 %10373  ;;  %v25305_v22 = vld [vmem:[#allocation47_spill] sm:$0xff] }
 0xbb6   : > { %v22101_v34 = vrot.slane %v11001_v59, %v15232_v17  ;;  %v22104_v31 = vrot.slane %v11017_v53, %v15232_v17  ;;  %v10349_v53 = vcombine.high %v21937_v50, %v21928_v6  ;;  %v25299_v59 = vld [vmem:[#allocation58_spill] sm:$0xff] }
 0xbb7   : > { %11173 = vrot.lane.b32.xlu0 %v11131_v49, %s14987_s10  ;;  %9199 = vrot.lane.b32.xlu1 %v9151_v10, %s14982_s4  ;;  %v9131_v49 = vcombine.high %v21991_v52, %v21994_v3  ;;  %v10643_v47 = vcombine.high %v25300_v60, %v25299_v59  ;;  %v10741_v3 = vcombine.high %v10689_v5, %v10721_v18  ;;  %v25307_v59 = vld [vmem:[#allocation81_spill] sm:$0xff] }
 0xbb8   : > { %v11080_v57 = vcombine.low %v22101_v34, %v22104_v31 }
 0xbb9   : > { %v22094_v27 = vpop.permute.xlu0 %9939  ;;  %v22096_v23 = vpop.permute.xlu1 %10771  ;;  %v9145_v38 = vrot.slane %v9131_v49, %v15240_v29  ;;  %v10657_v8 = vrot.slane %v10643_v47, %v15232_v17  ;;  %v9113_v49 = vrot.slane %v9099_v28, %v15240_v29 }
 0xbba   : > { %25297 = vst [vmem:[#allocation85_spill] sm:$0xff] %v22096_v23  ;;  %v11088_v44 = vrot.slane %v11080_v57, %v15240_v29  ;;  %v25309_v57 = vld [vmem:[#allocation23_spill] sm:$0xff] }
 0xbbb   : > { %11602 = vrot.lane.b32.xlu0 %v11576_v33, %s14983_s6  ;;  %11403 = vrot.lane.b32.xlu1 %v11380_v25, %s14985_s9  ;;  %v25302_v33 = vld [vmem:[#allocation93_spill] sm:$0xff]  ;;  %v10317_v5 = vcombine.high %v25309_v57, %v21897_v35  ;;  %v9152_v48 = vcombine.low %v9113_v49, %v9145_v38  ;;  %v11381_v57 = vcombine.high %v22084_v54, %v22075_v20 }
 0xbbc   : > { %v10659_v25 = vcombine.high %v25302_v33, %v25301_v2  ;;  %v11132_v36 = vcombine.low %v11088_v44, %v11120_v11  ;;  %v11133_v2 = vcombine.high %v11088_v44, %v11120_v11  ;;  %v10332_v11 = vcombine.low %v22153_v15, %v22156_v14 }
 0xbbd   : > { %v22112_v4 = vpop.permute.xlu0 %9943  ;;  %v22115_v42 = vpop.permute.xlu1 %9947  ;;  %v10331_v28 = vrot.slane %v10317_v5, %v15240_v29  ;;  %v11113_v5 = vcombine.high %v22087_v13, %v22090_v12 }
 0xbbe   : > { %25298 = vst [vmem:[#allocation37_spill] sm:$0xff] %v22115_v42  ;;  %v10673_v18 = vrot.slane %v10659_v25, %v15232_v17  ;;  %v25311_v25 = vld [vmem:[#allocation44_spill] sm:$0xff] }
 0xbbf   : > { %9597 = vrot.lane.b32.xlu0 %v9543_v55, %s14983_s6  ;;  %10385 = vrot.lane.b32.xlu1 %v10349_v53, %s14988_s11  ;;  %v10611_v55 = vcombine.high %v25305_v22, %v25304_v21  ;;  %v25306_v53 = vld [vmem:[#allocation96_spill] sm:$0xff]  ;;  %v9153_v22 = vcombine.high %v9113_v49, %v9145_v38  ;;  %v10340_v38 = vrot.slane %v10332_v11, %v15240_v29 }
 0xbc0   : > { %v10627_v60 = vcombine.high %v25307_v59, %v25306_v53  ;;  %v10722_v44 = vcombine.low %v10657_v8, %v10673_v18 }
 0xbc1   : > { %v22130_v10 = vpop.permute.xlu0 %9549  ;;  %v22137_v52 = vpop.permute.xlu1 %9553  ;;  %v10625_v47 = vrot.slane %v10611_v55, %v15232_v17  ;;  %v10300_v55 = vcombine.low %v22168_v9, %v22171_v45 }
 0xbc2   : > { %25303 = vst [vmem:[#allocation123_spill] sm:$0xff] %v22137_v52  ;;  %v10641_v33 = vrot.slane %v10627_v60, %v15232_v17  ;;  %v10723_v60 = vcombine.high %v10657_v8, %v10673_v18  ;;  %v11081_v18 = vcombine.high %v22101_v34, %v22104_v31  ;;  %v25343_v52 = vld [vmem:[#allocation28_spill] sm:$0xff] }
 0xbc3   : > { %10779 = vrot.lane.b32.xlu0 %v10740_v26, %s14986_s23  ;;  %10783 = vrot.lane.b32.xlu1 %v10741_v3, %s14987_s10  ;;  %v25312_v3 = vld [vmem:[#allocation66_spill] sm:$0xff]  ;;  %v10308_v8 = vrot.slane %v10300_v55, %v15240_v29  ;;  %v10333_v55 = vcombine.high %v22153_v15, %v22156_v14 }
 0xbc4   : > { %v10285_v35 = vcombine.high %v25312_v3, %v25311_v25  ;;  %v10690_v53 = vcombine.low %v10625_v47, %v10641_v33  ;;  %v10730_v25 = vrot.slane %v10722_v44, %v15240_v29  ;;  %v10691_v3 = vcombine.high %v10625_v47, %v10641_v33 }
 0xbc5   : > { %v22158_v40 = vpop.permute.xlu0 %10377  ;;  %v22165_v26 = vpop.permute.xlu1 %10381  ;;  %v10352_v13 = vcombine.low %v10308_v8, %v10340_v38  ;;  %v10737_v12 = vrot.slane %v10723_v60, %v15240_v29  ;;  %v11127_v47 = vrot.slane %v11113_v5, %v15240_v29  ;;  %v11095_v34 = vrot.slane %v11081_v18, %v15240_v29 }
 0xbc6   : > { %25308 = vst [vmem:[#allocation73_spill] sm:$0xff] %v22158_v40  ;;  %25310 = vst [vmem:[#allocation107_spill] sm:$0xff] %v22165_v26  ;;  %v10299_v59 = vrot.slane %v10285_v35, %v15240_v29  ;;  %v10698_v20 = vrot.slane %v10690_v53, %v15240_v29  ;;  %v10705_v33 = vrot.slane %v10691_v3, %v15240_v29 }
 0xbc7   : > { %11177 = vrot.lane.b32.xlu0 %v11132_v36, %s14984_s8  ;;  %11181 = vrot.lane.b32.xlu1 %v11133_v2, %s14982_s4  ;;  %v10353_v60 = vcombine.high %v10308_v8, %v10340_v38 }
 0xbc8   : > { %v10350_v49 = vcombine.low %v10299_v59, %v10331_v28  ;;  %v10742_v11 = vcombine.low %v10698_v20, %v10730_v25  ;;  %v10351_v5 = vcombine.high %v10299_v59, %v10331_v28  ;;  %v10745_v18 = vcombine.high %v10705_v33, %v10737_v12 }
 0xbc9   : > { %v22182_v39 = vpop.permute.xlu0 %9155  ;;  %v22184_v21 = vpop.permute.xlu1 %9557  ;;  %v10743_v15 = vcombine.high %v10698_v20, %v10730_v25  ;;  %v11135_v59 = vcombine.high %v11095_v34, %v11127_v47  ;;  %v25323_v20 = vld [vmem:[#allocation39_spill] sm:$0xff] }
 0xbca   : > { %25313 = vst [vmem:[#allocation30_spill] sm:$0xff] %v22182_v39  ;;  %25314 = vst [vmem:[#allocation92_spill] sm:$0xff] %v22184_v21  ;;  %v25341_v21 = vld [vmem:[#allocation29_spill] sm:$0xff] }
 0xbcb   : > { %9203 = vrot.lane.b32.xlu0 %v9152_v48, %s14985_s9  ;;  %9207 = vrot.lane.b32.xlu1 %v9153_v22, %s14983_s6  ;;  %v10744_v48 = vcombine.low %v10705_v33, %v10737_v12  ;;  %v11134_v22 = vcombine.low %v11095_v34, %v11127_v47  ;;  %v25324_v12 = vld [vmem:[#allocation56_spill] sm:$0xff]  ;;  %v22261_v47 = vld [vmem:[#allocation2 + $0x20] sm:$0xff] }
 0xbcc   : > { %v25325_v33 = vcombine.high %v25323_v20, %v25324_v12  ;;  %v22263_v34 = vld [vmem:[#allocation2 + $0x60] sm:$0xff]  ;;  %v22286_v12 = vld [vmem:[#allocation2 + $0x38] sm:$0xff] }
 0xbcd   : > { %v22192_v36 = vpop.permute.xlu0 %9951  ;;  %v22199_v2 = vpop.permute.xlu1 %9163  ;;  %25333 = vst [vmem:[#allocation33_spill] sm:$0xff] %v22286_v12 }
 0xbce   : > { %25315 = vst [vmem:[#allocation25_spill] sm:$0xff] %v22192_v36  ;;  %25316 = vst [vmem:[#allocation101_spill] sm:$0xff] %v22199_v2 }
 0xbcf   : > { %11407 = vrot.lane.b32.xlu0 %v11381_v57, %s14983_s6  ;;  %10389 = vrot.lane.b32.xlu1 %v10350_v49, %s14986_s23  ;;  %v10301_v49 = vcombine.high %v22168_v9, %v22171_v45 }
 0xbd1   : > { %v22208_v54 = vpop.permute.xlu0 %9159  ;;  %v22211_v35 = vpop.permute.xlu1 %9959  ;;  %v10315_v14 = vrot.slane %v10301_v49, %v15240_v29  ;;  %v22328_v49 = vld [vmem:[#allocation2 + $0xd8] sm:$0xff] }
 0xbd2   : > { %25317 = vst [vmem:[#allocation76_spill] sm:$0xff] %v22208_v54  ;;  %25318 = vst [vmem:[#allocation117_spill] sm:$0xff] %v22211_v35  ;;  %v22324_v35 = vld [vmem:[#allocation2 + $0xf8] sm:$0xff] }
 0xbd3   : > { %10397 = vrot.lane.b32.xlu0 %v10352_v13, %s14984_s8  ;;  %10787 = vrot.lane.b32.xlu1 %v10742_v11, %s14984_s8  ;;  %v10347_v13 = vrot.slane %v10333_v55, %v15240_v29  ;;  %v25326_v55 = vld [vmem:[#allocation97_spill] sm:$0xff]  ;;  %25339 = vst [vmem:[#allocation99_spill] sm:$0xff] %v22324_v35 }
 0xbd5   : > { %v22218_v31 = vpop.permute.xlu0 %9955  ;;  %v22220_v44 = vpop.permute.xlu1 %9565  ;;  %v10354_v9 = vcombine.low %v10315_v14, %v10347_v13  ;;  %v10355_v25 = vcombine.high %v10315_v14, %v10347_v13  ;;  %v25329_v13 = vld [vmem:[#allocation112_spill] sm:$0xff] }
 0xbd6   : > { %25319 = vst [vmem:[#allocation24_spill] sm:$0xff] %v22218_v31  ;;  %25320 = vst [vmem:[#allocation118_spill] sm:$0xff] %v22220_v44 }
 0xbd7   : > { %10795 = vrot.lane.b32.xlu0 %v10744_v48, %s14985_s9  ;;  %11185 = vrot.lane.b32.xlu1 %v11134_v22, %s14985_s9 }
 0xbd9   : > { %v22226_v53 = vpop.permute.xlu0 %9561  ;;  %v22228_v57 = vpop.permute.xlu1 %11773 }
 0xbda   : > { %25321 = vst [vmem:[#allocation74_spill] sm:$0xff] %v22226_v53 }
 0xbdb   : > { %10401 = vrot.lane.b32.xlu0 %v10353_v60, %s14982_s4  ;;  %10393 = vrot.lane.b32.xlu1 %v10351_v5, %s14987_s10  ;;  %v25327_v60 = vld [vmem:[#allocation119_spill] sm:$0xff] }
 0xbdc   : > { %v25328_v5 = vcombine.low %v25326_v55, %v25327_v60  ;;  %v25332_v20 = vcombine.high %v25326_v55, %v25327_v60  ;;  %v22302_v60 = vld [vmem:[#allocation2 + $0xa0] sm:$0xff] }
 0xbdd   : > { %v22234_v3 = vpop.permute.xlu0 %9167  ;;  %v22237_v11 = vpop.permute.xlu1 %11777 }
 0xbde   : > { %25322 = vst [vmem:[#allocation105_spill] sm:$0xff] %v22234_v3  ;;  %v22316_v3 = vld [vmem:[#allocation2 + $0x98] sm:$0xff] }
 0xbdf   : > { %10799 = vrot.lane.b32.xlu0 %v10745_v18, %s14983_s6  ;;  %10791 = vrot.lane.b32.xlu1 %v10743_v15, %s14982_s4  ;;  %v25330_v15 = vld [vmem:[#allocation69_spill] sm:$0xff]  ;;  %v22308_v18 = vld [vmem:[#allocation2 + $0xb8] sm:$0xff]  ;;  %25338 = vst [vmem:[#allocation20_spill] sm:$0xff] %v22316_v3 }
 0xbe0   : > { %v25331_v14 = vcombine.high %v25329_v13, %v25330_v15  ;;  %v22296_v15 = vld [vmem:[#allocation2 + $0x78] sm:$0xff]  ;;  %25337 = vst [vmem:[#allocation71_spill] sm:$0xff] %v22308_v18 }
 0xbe1   : > { %v22242_v28 = vpop.permute.xlu0 %9963  ;;  %v22244_v45 = vpop.permute.xlu1 %11578  ;;  %25335 = vst [vmem:[#allocation106_spill] sm:$0xff] %v22296_v15 }
 0xbe3   : > { %10405 = vrot.lane.b32.xlu0 %v10354_v9, %s14985_s9  ;;  %11189 = vrot.lane.b32.xlu1 %v11135_v59, %s14983_s6  ;;  %v14786_v9 = vld [vmem:[%s23874_s2 + $0x10] sm:$0xff] }
 0xbe5   : > { %v22248_v38 = vpop.permute.xlu0 %9967  ;;  %v22250_v8 = vpop.permute.xlu1 %9573 }
 0xbe7   : > { %9171 = vrot.lane.b32.xlu0 %v25325_v33, %s14982_s4  ;;  %10409 = vrot.lane.b32.xlu1 %v10355_v25, %s14983_s6 }
 0xbe9   : > { %v22257_v48 = vpop.permute.xlu0 %11781  ;;  %v22259_v22 = vpop.permute.xlu1 %11582 }
 0xbeb   : > { %9175 = vrot.lane.b32.xlu0 %v25328_v5, %s14985_s9  ;;  %9569 = vrot.lane.b32.xlu1 %v25331_v14, %s14983_s6  ;;  %v22288_v5 = vld [vmem:[#allocation2 + $0x18] sm:$0xff] }
 0xbec   : > { %25334 = vst [vmem:[#allocation46_spill] sm:$0xff] %v22288_v5 }
 0xbed   : > { %v9972_v59 = vpop.permute.xlu0 %9971  ;;  %v22280_v25 = vpop.permute.xlu1 %9577 }
 0xbef   : > { %11813 = vperm.xlu0 %14863, %v14786_v9   ;;  %9179 = vrot.lane.b32.xlu1 %v25332_v20, %s14983_s6  ;;  %v22298_v9 = vld [vmem:[#allocation2 + $0x58] sm:$0xff]  ;;  %v22304_v20 = vld [vmem:[#allocation2 + $0xe0] sm:$0xff] }
 0xbf0   : > { %25336 = vst [vmem:[#allocation11_spill] sm:$0xff] %v22298_v9 }
 0xbf1   : > { %v11786_v33 = vpop.permute.xlu0 %11785  ;;  %v22290_v13 = vpop.permute.xlu1 %11383 }
 0xbf3   : > { %14405 = vrot.lane.b32.xlu0 %v22286_v12, %s14983_s6  ;;  %14403 = vrot.lane.b32.xlu1 %v22288_v5, %s14983_s6 }
 0xbf5   : > { %v9976_v14 = vpop.permute.xlu0 %9975  ;;  %v11790_v55 = vpop.permute.xlu1 %11789 }
 0xbf7   : > { %14409 = vrot.lane.b32.xlu0 %v22296_v15, %s14983_s6  ;;  %14407 = vrot.lane.b32.xlu1 %v22298_v9, %s14983_s6 }
 0xbf9   : > { %v22314_v17 = vpop.permute.xlu0 %11586  ;;  %v22318_v2 = vpop.permute.xlu1 %9581 }
 0xbfb   : > { %14413 = vrot.lane.b32.xlu0 %v22308_v18, %s14983_s6  ;;  %14411 = vrot.lane.b32.xlu1 %v22316_v3, %s14983_s6 }
 0xbfd   : > { %v22326_v44 = vpop.permute.xlu0 %9183  ;;  %v22330_v26 = vpop.permute.xlu1 %11387 }
 0xbff   : > { %14417 = vrot.lane.b32.xlu0 %v22324_v35, %s14983_s6  ;;  %14415 = vrot.lane.b32.xlu1 %v22328_v49, %s14983_s6 }
 0xc01   : > { %v9980_v29 = vpop.permute.xlu0 %9979  ;;  %v11794_v54 = vpop.permute.xlu1 %11793 }
 0xc03   : > { %14210 = vrot.lane.b32.xlu0 %v22286_v12, %s14994_s20  ;;  %14208 = vrot.lane.b32.xlu1 %v22288_v5, %s14994_s20 }
 0xc05   : > { %v11591_v53 = vpop.permute.xlu0 %11590  ;;  %v22340_v31 = vpop.permute.xlu1 %9585 }
 0xc07   : > { %14214 = vrot.lane.b32.xlu0 %v22296_v15, %s14994_s20  ;;  %14212 = vrot.lane.b32.xlu1 %v22298_v9, %s14994_s20  ;;  %v25340_v15 = vld [vmem:[#allocation13_spill] sm:$0xff] }
 0xc08   : > { %v25342_v23 = vcombine.low %v25340_v15, %v25341_v21 }
 0xc09   : > { %v22346_v39 = vpop.permute.xlu0 %9187  ;;  %v22348_v36 = vpop.permute.xlu1 %11165 }
 0xc0a   : > { %v11800_v9 = vsel %vm1027_vm2, %v25342_v23, %v22228_v57 }
 0xc0b   : > { %14218 = vrot.lane.b32.xlu0 %v22308_v18, %s14994_s20  ;;  %14216 = vrot.lane.b32.xlu1 %v22316_v3, %s14994_s20  ;;  %v11801_v18 = vsel %vm187_vm0, %v11800_v9, %v22237_v11  ;;  %v25344_v3 = vld [vmem:[#allocation110_spill] sm:$0xff]  ;;  %v12302_v9 = vld [vmem:[#allocation2 + $0xc0] sm:$0xff] }
 0xc0c   : > { %v25345_v40 = vcombine.low %v25343_v52, %v25344_v3  ;;  %v11802_v23 = vsel %vm1030_vm3, %v11801_v18, %v22257_v48 }
 0xc0d   : > { %v9984_v12 = vpop.permute.xlu0 %9983  ;;  %v11595_v5 = vpop.permute.xlu1 %11594  ;;  %v11803_v11 = vsel %vm1032_vm4, %v11802_v23, %v11786_v33 }
 0xc0e   : > { %v9997_v61 = vsel %vm1027_vm2, %v25345_v40, %v22242_v28  ;;  %v11804_v52 = vsel %vm1034_vm5, %v11803_v11, %v11790_v55 }
 0xc0f   : > { %14222 = vrot.lane.b32.xlu0 %v22324_v35, %s14994_s20  ;;  %14220 = vrot.lane.b32.xlu1 %v22328_v49, %s14994_s20  ;;  %v12290_v35 = vld [vmem:[#allocation2] sm:$0xff]  ;;  %v9998_v21 = vsel %vm187_vm0, %v9997_v61, %v22248_v38  ;;  %v11805_v61 = vsel %vm1036_vm6, %v11804_v52, %v11794_v54  ;;  %v25346_v52 = vld [vmem:[#allocation82_spill] sm:$0xff] }
 0xc10   : > { %v9999_v15 = vsel %vm1030_vm3, %v9998_v21, %v9972_v59  ;;  %v12294_v38 = vld [vmem:[#allocation2 + $0x40] sm:$0xff] }
 0xc11   : > { %v22370_v42 = vpop.permute.xlu0 %11391  ;;  %v22376_v57 = vpop.permute.xlu1 %9191  ;;  %v10000_v40 = vsel %vm1032_vm4, %v9999_v15, %v9976_v14 }
 0xc12   : > { %v10001_v3 = vsel %vm1034_vm5, %v10000_v40, %v9980_v29  ;;  %v12298_v29 = vld [vmem:[#allocation2 + $0x80] sm:$0xff]  ;;  %v25347_v40 = vld [vmem:[#allocation127_spill] sm:$0xff] }
 0xc13   : > { %13058 = vrot.lane.b32.xlu0 %v22261_v47, %s14983_s6  ;;  %13054 = vrot.lane.b32.xlu1 %v12290_v35, %s14983_s6  ;;  %v10002_v48 = vsel %vm1036_vm6, %v10001_v3, %v9984_v12 }
 0xc15   : > { %v11798_v28 = vpop.permute.xlu0 %11797  ;;  %v9988_v18 = vpop.permute.xlu1 %9987 }
 0xc16   : > { %v11806_v59 = vsel %vm1038_vm7, %v11805_v61, %v11798_v28  ;;  %v22390_v33 = vsel %vm1038_vm7, %v10002_v48, %v9988_v18  ;;  %v25348_v61 = vcombine.low %v25346_v52, %v25347_v40  ;;  %v25349_v52 = vld [vmem:[#allocation124_spill] sm:$0xff]  ;;  %v25350_v40 = vld [vmem:[#allocation38_spill] sm:$0xff] }
 0xc17   : > { %11833 = vmatprep.subr.mxu0 %v11806_v59  ;;  %13066 = vrot.lane.b32.xlu0 %v22263_v34, %s14983_s6 }
 0xc18   : > { %11834 = vmatpush1.msra.mxu0 %v22390_v33  ;;  %13062 = vrot.lane.b32.xlu1 %v12294_v38, %s14983_s6  ;;  %v11605_v3 = vsel %vm1027_vm2, %v25348_v61, %v22244_v45  ;;  %v25351_v45 = vcombine.low %v25349_v52, %v25350_v40 }
 0xc19   : > { %v9590_v54 = vpop.permute.xlu0 %9589  ;;  %v22396_v14 = vpop.permute.xlu1 %11169  ;;  %v11606_v28 = vsel %vm187_vm0, %v11605_v3, %v22259_v22 }
 0xc1b   : > { %13074 = vrot.lane.b32.xlu0 %v22302_v60, %s14983_s6 }
 0xc1c   : > { %13070 = vrot.lane.b32.xlu1 %v12298_v29, %s14983_s6 }
 0xc1d   : > { %v11396_v12 = vpop.permute.xlu0 %11395  ;;  %v11599_v55 = vpop.permute.xlu1 %11598 }
 0xc1f   : > { %13082 = vrot.lane.b32.xlu0 %v22304_v20, %s14983_s6 }
 0xc20   : > { %13078 = vrot.lane.b32.xlu1 %v12302_v9, %s14983_s6 }
 0xc21   : > { %v9196_v21 = vpop.permute.xlu0 %9195  ;;  %v9594_v23 = vpop.permute.xlu1 %9593 }
 0xc23   : > { %12668 = vrot.lane.b32.xlu0 %v22261_v47, %s14994_s20 }
 0xc24   : > { %12664 = vrot.lane.b32.xlu1 %v12290_v35, %s14994_s20  ;;  %v11607_v35 = vsel %vm1030_vm3, %v11606_v28, %v22314_v17 }
 0xc25   : > { %v10776_v15 = vpop.permute.xlu0 %10775  ;;  %v11400_v11 = vpop.permute.xlu1 %11399  ;;  %v11608_v59 = vsel %vm1032_vm4, %v11607_v35, %v11591_v53 }
 0xc26   : > { %v11609_v61 = vsel %vm1034_vm5, %v11608_v59, %v11595_v5 }
 0xc27   : > { %12676 = vrot.lane.b32.xlu0 %v22263_v34, %s14994_s20  ;;  %v11610_v17 = vsel %vm1036_vm6, %v11609_v61, %v11599_v55 }
 0xc28   : > { %12672 = vrot.lane.b32.xlu1 %v12294_v38, %s14994_s20  ;;  %v9607_v38 = vsel %vm1027_vm2, %v25351_v45, %v22250_v8  ;;  %v25352_v45 = vld [vmem:[#allocation116_spill] sm:$0xff] }
 0xc29   : > { %v22417_v48 = vpop.permute.xlu0 %11173  ;;  %v9200_v18 = vpop.permute.xlu1 %9199  ;;  %v9608_v22 = vsel %vm187_vm0, %v9607_v38, %v22280_v25  ;;  %v25353_v38 = vld [vmem:[#allocation114_spill] sm:$0xff] }
 0xc2a   : > { %v9609_v53 = vsel %vm1030_vm3, %v9608_v22, %v22318_v2  ;;  %v25354_v61 = vcombine.low %v25352_v45, %v25353_v38 }
 0xc2b   : > { %12684 = vrot.lane.b32.xlu0 %v22302_v60, %s14994_s20  ;;  %v9610_v52 = vsel %vm1032_vm4, %v9609_v53, %v22340_v31 }
 0xc2c   : > { %12680 = vrot.lane.b32.xlu1 %v12298_v29, %s14994_s20  ;;  %v9611_v8 = vsel %vm1034_vm5, %v9610_v52, %v9590_v54  ;;  %v9217_v54 = vsel %vm1027_vm2, %v25354_v61, %v22326_v44 }
 0xc2d   : > { %v11603_v3 = vpop.permute.xlu0 %11602  ;;  %v11404_v28 = vpop.permute.xlu1 %11403  ;;  %v9612_v25 = vsel %vm1036_vm6, %v9611_v8, %v9594_v23  ;;  %v25356_v23 = vld [vmem:[#allocation62_spill] sm:$0xff] }
 0xc2e   : > { %v11611_v35 = vsel %vm1038_vm7, %v11610_v17, %v11603_v3  ;;  %v9218_v3 = vsel %vm187_vm0, %v9217_v54, %v22346_v39 }
 0xc2f   : > { %11835 = vmatprep.subr.mxu0 %v11611_v35  ;;  %12692 = vrot.lane.b32.xlu0 %v22304_v20, %s14994_s20  ;;  %v9219_v35 = vsel %vm1030_vm3, %v9218_v3, %v22376_v57  ;;  %v25363_v3 = vld [vmem:[#allocation34_spill] sm:$0xff] }
 0xc30   : > { %12688 = vrot.lane.b32.xlu1 %v12302_v9, %s14994_s20  ;;  %v25355_v9 = vld [vmem:[#allocation65_spill] sm:$0xff]  ;;  %v9220_v44 = vsel %vm1032_vm4, %v9219_v35, %v9196_v21 }
 0xc31   : > { %v9598_v5 = vpop.permute.xlu0 %9597  ;;  %v10386_v29 = vpop.permute.xlu1 %10385  ;;  %v25357_v22 = vcombine.low %v25355_v9, %v25356_v23  ;;  %v25358_v9 = vld [vmem:[#allocation14_spill] sm:$0xff] }
 0xc32   : > { %v22445_v2 = vsel %vm1038_vm7, %v9612_v25, %v9598_v5  ;;  %v25360_v23 = vld [vmem:[#allocation90_spill] sm:$0xff] }
 0xc33   : > { %11836 = vmatpush1.msra.mxu0 %v22445_v2  ;;  %v11410_v17 = vsel %vm1027_vm2, %v25357_v22, %v22290_v13  ;;  %v9221_v13 = vsel %vm1034_vm5, %v9220_v44, %v9200_v18 }
 0xc34   : > { %v11411_v53 = vsel %vm187_vm0, %v11410_v17, %v22330_v26  ;;  %v25362_v17 = vld [vmem:[#allocation17_spill] sm:$0xff] }
 0xc35   : > { %v10780_v55 = vpop.permute.xlu0 %10779  ;;  %v10784_v59 = vpop.permute.xlu1 %10783  ;;  %v11412_v8 = vsel %vm1030_vm3, %v11411_v53, %v22370_v42  ;;  %v25364_v53 = vld [vmem:[#allocation35_spill] sm:$0xff] }
 0xc36   : > { %v11413_v5 = vsel %vm1032_vm4, %v11412_v8, %v11396_v12  ;;  %v25365_v35 = vcombine.low %v25363_v3, %v25364_v53  ;;  %v25366_v8 = vcombine.low %v21864_v58, %v21850_v16  ;;  %v25372_v16 = vld [vmem:[#allocation54_spill] sm:$0xff]  ;;  %v25373_v58 = vld [vmem:[#allocation53_spill] sm:$0xff] }
 0xc37   : > { %v11414_v45 = vsel %vm1034_vm5, %v11413_v5, %v11400_v11  ;;  %v25359_v11 = vld [vmem:[#allocation88_spill] sm:$0xff] }
 0xc38   : > { %v11415_v26 = vsel %vm1036_vm6, %v11414_v45, %v11404_v28  ;;  %v25361_v22 = vcombine.low %v25359_v11, %v25360_v23  ;;  %v10809_v44 = vsel %vm1027_vm2, %v25366_v8, %v10776_v15  ;;  %v25367_v45 = vld [vmem:[#allocation111_spill] sm:$0xff]  ;;  %v25374_v15 = vcombine.low %v25372_v16, %v25373_v58 }
 0xc39   : > { %v11178_v31 = vpop.permute.xlu0 %11177  ;;  %v11182_v40 = vpop.permute.xlu1 %11181  ;;  %v10810_v5 = vsel %vm187_vm0, %v10809_v44, %v10780_v55  ;;  %v25377_v44 = vld [vmem:[#allocation27_spill] sm:$0xff] }
 0xc3a   : > { %v11192_v28 = vsel %vm1027_vm2, %v25361_v22, %v25358_v9  ;;  %v25370_v9 = vld [vmem:[#allocation98_spill] sm:$0xff]  ;;  %v11199_v22 = vsel %vm1027_vm2, %v25374_v15, %v22348_v36  ;;  %v25375_v36 = vcombine.low %v21937_v50, %v21928_v6  ;;  %v25385_v16 = vld [vmem:[#allocation123_spill] sm:$0xff] }
 0xc3b   : > { %v11200_v3 = vsel %vm187_vm0, %v11199_v22, %v22396_v14 }
 0xc3c   : > { %v11201_v53 = vsel %vm1030_vm3, %v11200_v3, %v22417_v48  ;;  %v25376_v48 = vld [vmem:[#allocation45_spill] sm:$0xff] }
 0xc3d   : > { %v9204_v52 = vpop.permute.xlu0 %9203  ;;  %v9208_v25 = vpop.permute.xlu1 %9207 }
 0xc3e   : > { %v9222_v39 = vsel %vm1036_vm6, %v9221_v13, %v9204_v52  ;;  %v10802_v52 = vsel %vm1027_vm2, %v25365_v35, %v25362_v17  ;;  %v10811_v35 = vsel %vm1030_vm3, %v10810_v5, %v10784_v59  ;;  %v25380_v5 = vld [vmem:[#allocation57_spill] sm:$0xff] }
 0xc3f   : > { %v22474_v42 = vsel %vm1038_vm7, %v9222_v39, %v9208_v25  ;;  %v10803_v39 = vsel %vm187_vm0, %v10802_v52, %v25367_v45  ;;  %v11202_v52 = vsel %vm1032_vm4, %v11201_v53, %v11178_v31  ;;  %v25378_v45 = vcombine.low %v25376_v48, %v25377_v44  ;;  %v25395_v48 = vld [vmem:[#allocation76_spill] sm:$0xff] }
 0xc40   : > { %v10804_v17 = vsel %vm1030_vm3, %v10803_v39, %v21996_v37 }
 0xc41   : > { %v11408_v38 = vpop.permute.xlu0 %11407  ;;  %v10390_v61 = vpop.permute.xlu1 %10389  ;;  %v9990_v6 = vsel %vm1027_vm2, %v25378_v45, %v22070_v1  ;;  %v25396_v45 = vld [vmem:[#allocation107_spill] sm:$0xff] }
 0xc42   : > { %v11416_v57 = vsel %vm1038_vm7, %v11415_v26, %v11408_v38  ;;  %v25368_v26 = vld [vmem:[#allocation15_spill] sm:$0xff] }
 0xc43   : > { %11837 = vmatprep.subr.mxu0 %v11416_v57  ;;  %v11193_v38 = vsel %vm187_vm0, %v11192_v28, %v25368_v26  ;;  %v25369_v57 = vld [vmem:[#allocation48_spill] sm:$0xff] }
 0xc44   : > { %11838 = vmatpush1.msra.mxu0 %v22474_v42  ;;  %v25371_v11 = vcombine.low %v25369_v57, %v25370_v9  ;;  %v11194_v55 = vsel %vm1030_vm3, %v11193_v38, %v21948_v30  ;;  %v10419_v30 = vsel %vm1027_vm2, %v25375_v36, %v10386_v29  ;;  %v25389_v36 = vld [vmem:[#allocation30_spill] sm:$0xff] }
 0xc45   : > { %v10398_v21 = vpop.permute.xlu0 %10397  ;;  %v10788_v12 = vpop.permute.xlu1 %10787 }
 0xc46   : > { %v10412_v23 = vsel %vm1027_vm2, %v25371_v11, %v21966_v7  ;;  %v10805_v7 = vsel %vm1032_vm4, %v10804_v17, %v22048_v63  ;;  %v10812_v14 = vsel %vm1032_vm4, %v10811_v35, %v10788_v12  ;;  %v11195_v63 = vsel %vm1032_vm4, %v11194_v55, %v21944_v41  ;;  %v25379_v12 = vld [vmem:[#allocation61_spill] sm:$0xff]  ;;  %v25387_v55 = vld [vmem:[#allocation92_spill] sm:$0xff] }
 0xc47   : > { %v10413_v28 = vsel %vm187_vm0, %v10412_v23, %v22038_v19  ;;  %v10420_v19 = vsel %vm187_vm0, %v10419_v30, %v10390_v61  ;;  %v11196_v59 = vsel %vm1034_vm5, %v11195_v63, %v22020_v0  ;;  %v10806_v61 = vsel %vm1034_vm5, %v10805_v7, %v22002_v24  ;;  %v25382_v11 = vld [vmem:[#allocation37_spill] sm:$0xff] }
 0xc48   : > { %v10414_v31 = vsel %vm1030_vm3, %v10413_v28, %v21972_v43  ;;  %v9991_v41 = vsel %vm187_vm0, %v9990_v6, %v22094_v27  ;;  %v25381_v1 = vcombine.low %v25379_v12, %v25380_v5  ;;  %v11197_v39 = vsel %vm1036_vm6, %v11196_v59, %v22054_v62  ;;  %v25384_v23 = vld [vmem:[#allocation73_spill] sm:$0xff] }
 0xc49   : > { %v10796_v54 = vpop.permute.xlu0 %10795  ;;  %v11186_v18 = vpop.permute.xlu1 %11185  ;;  %v9992_v0 = vsel %vm1030_vm3, %v9991_v41, %v22112_v4  ;;  %v11203_v43 = vsel %vm1034_vm5, %v11202_v52, %v11182_v40  ;;  %v10807_v40 = vsel %vm1036_vm6, %v10806_v61, %v22050_v56  ;;  %v25386_v56 = vld [vmem:[#allocation85_spill] sm:$0xff]  ;;  %v25393_v52 = vld [vmem:[#allocation24_spill] sm:$0xff] }
 0xc4a   : > { %v11204_v27 = vsel %vm1036_vm6, %v11203_v43, %v11186_v18  ;;  %v25383_v18 = vld [vmem:[#allocation83_spill] sm:$0xff]  ;;  %v10808_v22 = vsel %vm1038_vm7, %v10807_v40, %v25386_v56  ;;  %v25388_v28 = vld [vmem:[#allocation25_spill] sm:$0xff] }
 0xc4b   : > { %v25390_v30 = vld [vmem:[#allocation49_spill] sm:$0xff] }
 0xc4c   : > { %v25399_v41 = vld [vmem:[#allocation101_spill] sm:$0xff] }
 0xc4d   : > { %v10402_v25 = vpop.permute.xlu0 %10401  ;;  %v10394_v13 = vpop.permute.xlu1 %10393 }
 0xc4e   : > { %v10421_v50 = vsel %vm1030_vm3, %v10420_v19, %v10394_v13  ;;  %v9600_v13 = vsel %vm1027_vm2, %v25381_v1, %v22060_v51  ;;  %v10415_v51 = vsel %vm1032_vm4, %v10414_v31, %v22041_v46  ;;  %v25398_v31 = vld [vmem:[#allocation117_spill] sm:$0xff] }
 0xc4f   : > { %v9601_v24 = vsel %vm187_vm0, %v9600_v13, %v22130_v10  ;;  %v10422_v38 = vsel %vm1032_vm4, %v10421_v50, %v10398_v21  ;;  %v10416_v4 = vsel %vm1034_vm5, %v10415_v51, %v22072_v32  ;;  %v9993_v10 = vsel %vm1032_vm4, %v9992_v0, %v25382_v11  ;;  %v25400_v13 = vld [vmem:[#allocation105_spill] sm:$0xff] }
 0xc50   : > { %v11198_v21 = vsel %vm1038_vm7, %v11197_v39, %v25383_v18  ;;  %v9602_v46 = vsel %vm1030_vm3, %v9601_v24, %v25385_v16  ;;  %v10423_v58 = vsel %vm1034_vm5, %v10422_v38, %v10402_v25  ;;  %v9994_v3 = vsel %vm1034_vm5, %v9993_v10, %v25388_v28  ;;  %v25391_v25 = vld [vmem:[#allocation75_spill] sm:$0xff]  ;;  %v25401_v10 = vld [vmem:[#allocation9_spill] sm:$0xff] }
 0xc51   : > { %v10800_v37 = vpop.permute.xlu0 %10799  ;;  %v10792_v8 = vpop.permute.xlu1 %10791  ;;  %v9603_v17 = vsel %vm1032_vm4, %v9602_v46, %v25387_v55  ;;  %v25392_v35 = vcombine.low %v25390_v30, %v25391_v25  ;;  %v9995_v19 = vsel %vm1036_vm6, %v9994_v3, %v25393_v52 }
 0xc52   : > { %v10813_v29 = vsel %vm1034_vm5, %v10812_v14, %v10792_v8  ;;  %v25394_v14 = vld [vmem:[#allocation74_spill] sm:$0xff]  ;;  %v9996_v61 = vsel %vm1038_vm7, %v9995_v19, %v25398_v31 }
 0xc53   : > { %v10814_v9 = vsel %vm1036_vm6, %v10813_v29, %v10796_v54  ;;  %v10417_v54 = vsel %vm1036_vm6, %v10416_v4, %v25384_v23  ;;  %v9604_v8 = vsel %vm1034_vm5, %v9603_v17, %v25394_v14  ;;  %v25397_v29 = vld [vmem:[#allocation118_spill] sm:$0xff] }
 0xc54   : > { %v10815_v32 = vsel %vm1038_vm7, %v10814_v9, %v10800_v37  ;;  %v9210_v37 = vsel %vm1027_vm2, %v25392_v35, %v25389_v36  ;;  %v10418_v6 = vsel %vm1038_vm7, %v10417_v54, %v25396_v45  ;;  %v9605_v59 = vsel %vm1036_vm6, %v9604_v8, %v25397_v29  ;;  %v25402_v35 = vld [vmem:[#allocation10_spill] sm:$0xff] }
 0xc55   : > { %v10406_v26 = vpop.permute.xlu0 %10405  ;;  %v11190_v57 = vpop.permute.xlu1 %11189  ;;  %v9211_v44 = vsel %vm187_vm0, %v9210_v37, %v25395_v48 }
 0xc56   : > { %v11205_v62 = vsel %vm1038_vm7, %v11204_v27, %v11190_v57  ;;  %v10424_v7 = vsel %vm1036_vm6, %v10423_v58, %v10406_v26  ;;  %v9212_v12 = vsel %vm1030_vm3, %v9211_v44, %v25399_v41  ;;  %v14785_v26 = vld [vmem:[%s23873_s1 + $0x10] sm:$0xff] }
 0xc57   : > { %11839 = vmatprep.subr.mxu0 %v11205_v62  ;;  %v9213_v39 = vsel %vm1032_vm4, %v9212_v12, %v25400_v13 }
 0xc58   : > { %11840 = vmatpush1.msra.mxu0 %v11198_v21 }
 0xc59   : > { %v9172_v15 = vpop.permute.xlu0 %9171  ;;  %v10410_v53 = vpop.permute.xlu1 %10409  ;;  %11841 = vmatprep.subr.mxu0 %v10815_v32 }
 0xc5a   : > { %11842 = vmatpush1.msra.mxu0 %v10808_v22  ;;  %v10425_v63 = vsel %vm1038_vm7, %v10424_v7, %v10410_v53  ;;  %v9214_v0 = vsel %vm1034_vm5, %v9213_v39, %v9172_v15 }
 0xc5b   : > { %11843 = vmatprep.subr.mxu0 %v10425_v63 }
 0xc5c   : > { %11844 = vmatpush1.msra.mxu0 %v10418_v6 }
 0xc5d   : > { %v9570_v50 = vpop.permute.xlu1 %9569  ;;  %11845 = vmatprep.subr.mxu0 %v22390_v33  ;;  %v9176_v1 = vpop.permute.xlu0 %9175 }
 0xc5e   : > { %v9606_v5 = vsel %vm1038_vm7, %v9605_v59, %v9570_v50  ;;  %11846 = vmatpush1.msra.mxu0 %v9996_v61  ;;  %v9215_v33 = vsel %vm1036_vm6, %v9214_v0, %v9176_v1 }
 0xc5f   : > { %11847 = vmatprep.subr.mxu0 %v22445_v2 }
 0xc60   : > { %11848 = vmatpush1.msra.mxu0 %v9606_v5 }
 0xc61   : > { %v9180_v43 = vpop.permute.xlu1 %9179  ;;  %11849 = vmatprep.subr.mxu0 %v22474_v42 }
 0xc62   : > { %v9216_v24 = vsel %vm1038_vm7, %v9215_v33, %v9180_v43  ;;  %v25403_v33 = vld [vmem:[#allocation11_spill] sm:$0xff]  ;;  %v25404_v43 = vld [vmem:[#allocation46_spill] sm:$0xff] }
 0xc63   : > { %11850 = vmatpush1.msra.mxu0 %v9216_v24  ;;  %v25405_v24 = vld [vmem:[#allocation106_spill] sm:$0xff] }
 0xc64   : > { %14787 = vmatmul.mubr.msk.f32.vlgmr.msra.gmra.mxu0 %vm4238_vm8, %v14785_v26  ;;  %v14029_v26 = vcombine.low %v25404_v43, %v25403_v33 }
 0xc65   : > { %v14404_v27 = vpop.permute.xlu1 %14403 }
 0xc69   : > { %v14408_v2 = vpop.permute.xlu1 %14407 }
 0xc6a   : > { %v22615_v38 = vpop.permute.xlu0 %11813  ;;  %v14427_v51 = vcombine.low %v14404_v27, %v14408_v2  ;;  %v14428_v42 = vcombine.high %v14404_v27, %v14408_v2  ;;  %v25406_v27 = vld [vmem:[#allocation33_spill] sm:$0xff] }
 0xc6b   : > { %v14045_v2 = vcombine.low %v25406_v27, %v25405_v24 }
 0xc6c   : > { %v14435_v18 = vrot.slane %v14427_v51, %v25401_v10  ;;  %v22620_v58 = vrot.slane %v14428_v42, %v25401_v10 }
 0xc6d   : > { %v14412_v9 = vpop.permute.xlu1 %14411 }
 0xc6e   : > { %v14406_v57 = vpop.permute.xlu0 %14405 }
 0xc71   : > { %v14416_v4 = vpop.permute.xlu1 %14415 }
 0xc72   : > { %v14410_v62 = vpop.permute.xlu0 %14409  ;;  %v14459_v54 = vcombine.low %v14412_v9, %v14416_v4  ;;  %v14460_v46 = vcombine.high %v14412_v9, %v14416_v4 }
 0xc73   : > { %v14443_v40 = vcombine.low %v14406_v57, %v14410_v62  ;;  %v14444_v11 = vcombine.high %v14406_v57, %v14410_v62 }
 0xc74   : > { %v14467_v56 = vrot.slane %v14459_v54, %v25401_v10  ;;  %v22627_v28 = vrot.slane %v14460_v46, %v25401_v10  ;;  %v22676_v46 = vrot.slane %v14029_v26, %v25401_v10 }
 0xc75   : > { %v14451_v21 = vrot.slane %v14443_v40, %v25401_v10  ;;  %v14209_v16 = vpop.permute.xlu1 %14208  ;;  %v22623_v32 = vrot.slane %v14444_v11, %v25401_v10  ;;  %v25407_v11 = vld [vmem:[#allocation20_spill] sm:$0xff] }
 0xc76   : > { %v14414_v23 = vpop.permute.xlu0 %14413 }
 0xc77   : > { %v14491_v15 = vcombine.low %v14435_v18, %v14451_v21  ;;  %v14492_v17 = vcombine.high %v14435_v18, %v14451_v21  ;;  %v14507_v53 = vcombine.low %v22620_v58, %v22623_v32  ;;  %v14061_v18 = vcombine.low %v25407_v11, %v22328_v49  ;;  %v25408_v21 = vld [vmem:[#allocation99_spill] sm:$0xff] }
 0xc79   : > { %v14213_v55 = vpop.permute.xlu1 %14212  ;;  %v22636_v37 = vrot.slane %v14491_v15, %v25402_v35  ;;  %v14506_v63 = vrot.slane %v14492_v17, %v25402_v35  ;;  %v22646_v6 = vrot.slane %v14507_v53, %v25402_v35  ;;  %v22679_v15 = vrot.slane %v14045_v2, %v25401_v10 }
 0xc7a   : > { %v14418_v22 = vpop.permute.xlu0 %14417  ;;  %v14233_v48 = vcombine.high %v14209_v16, %v14213_v55  ;;  %v14232_v29 = vcombine.low %v14209_v16, %v14213_v55 }
 0xc7b   : > { %v14475_v3 = vcombine.low %v14414_v23, %v14418_v22  ;;  %v14476_v7 = vcombine.high %v14414_v23, %v14418_v22  ;;  %v25409_v23 = vld [vmem:[#allocation71_spill] sm:$0xff] }
 0xc7c   : > { %v14247_v1 = vrot.slane %v14233_v48, %v25401_v10  ;;  %v14240_v57 = vrot.slane %v14232_v29, %v25401_v10  ;;  %v14077_v54 = vcombine.low %v25409_v23, %v25408_v21  ;;  %v14078_v29 = vcombine.high %v25409_v23, %v25408_v21 }
 0xc7d   : > { %v14483_v36 = vrot.slane %v14475_v3, %v25401_v10  ;;  %v22633_v30 = vrot.slane %v14476_v7, %v25401_v10  ;;  %v14217_v52 = vpop.permute.xlu1 %14216 }
 0xc7e   : > { %v14211_v25 = vpop.permute.xlu0 %14210 }
 0xc7f   : > { %v14523_v19 = vcombine.low %v14467_v56, %v14483_v36  ;;  %v14524_v14 = vcombine.high %v14467_v56, %v14483_v36  ;;  %v14539_v8 = vcombine.low %v22627_v28, %v22633_v30 }
 0xc81   : > { %v22642_v44 = vrot.slane %v14523_v19, %v25402_v35  ;;  %v14538_v45 = vrot.slane %v14524_v14, %v25402_v35  ;;  %v22649_v50 = vrot.slane %v14539_v8, %v25402_v35  ;;  %v14221_v31 = vpop.permute.xlu1 %14220  ;;  %v22691_v19 = vrot.slane %v14077_v54, %v25401_v10 }
 0xc82   : > { %v14215_v59 = vpop.permute.xlu0 %14214  ;;  %v14264_v40 = vcombine.low %v14217_v52, %v14221_v31  ;;  %v14265_v42 = vcombine.high %v14217_v52, %v14221_v31  ;;  %v22688_v52 = vrot.slane %v14061_v18, %v25401_v10  ;;  %v14046_v8 = vcombine.high %v25406_v27, %v25405_v24 }
 0xc83   : > { %v14248_v61 = vcombine.low %v14211_v25, %v14215_v59  ;;  %v14249_v41 = vcombine.high %v14211_v25, %v14215_v59  ;;  %v14556_v12 = vcombine.high %v22636_v37, %v22642_v44  ;;  %v14558_v5 = vcombine.high %v14506_v63, %v14538_v45 }
 0xc84   : > { %v14557_v39 = vcombine.low %v14506_v63, %v14538_v45  ;;  %v14559_v0 = vcombine.low %v22646_v6, %v22649_v50  ;;  %v14555_v16 = vcombine.low %v22636_v37, %v22642_v44  ;;  %v14272_v3 = vrot.slane %v14264_v40, %v25401_v10 }
 0xc85   : > { %v14263_v13 = vrot.slane %v14249_v41, %v25401_v10  ;;  %14564 = vrot.lane.b32.xlu1 %v14556_v12, %s14988_s11  ;;  %14572 = vrot.lane.b32.xlu0 %v14558_v5, %s14987_s10  ;;  %v14256_v9 = vrot.slane %v14248_v61, %v25401_v10  ;;  %v22665_v62 = vpop.permute.xlu1 %13054  ;;  %v14279_v7 = vrot.slane %v14265_v42, %v25401_v10 }
 0xc86   : > { %v14219_v51 = vpop.permute.xlu0 %14218  ;;  %v14030_v25 = vcombine.high %v25404_v43, %v25403_v33  ;;  %v14062_v63 = vcombine.high %v25407_v11, %v22328_v49  ;;  %v14093_v61 = vcombine.low %v22676_v46, %v22679_v15  ;;  %v22741_v42 = vrot.slane %v14078_v29, %v25401_v10 }
 0xc87   : > { %v14313_v4 = vcombine.high %v14247_v1, %v14263_v13  ;;  %v14296_v56 = vcombine.low %v14240_v57, %v14256_v9  ;;  %v14297_v22 = vcombine.high %v14240_v57, %v14256_v9  ;;  %v14312_v14 = vcombine.low %v14247_v1, %v14263_v13 }
 0xc88   : > { %v22728_v57 = vrot.slane %v14030_v25, %v25401_v10  ;;  %v22731_v9 = vrot.slane %v14046_v8, %v25401_v10  ;;  %v22746_v21 = vrot.slane %v14093_v61, %v25402_v35  ;;  %v14094_v8 = vcombine.high %v22676_v46, %v22679_v15 }
 0xc89   : > { %14568 = vrot.lane.b32.xlu1 %v14557_v39, %s14986_s23  ;;  %14576 = vrot.lane.b32.xlu0 %v14559_v0, %s14984_s8  ;;  %v14311_v59 = vrot.slane %v14297_v22, %v25402_v35  ;;  %v22703_v31 = vrot.slane %v14296_v56, %v25402_v35  ;;  %v14320_v39 = vrot.slane %v14312_v14, %v25402_v35 }
 0xc8a   : > { %v14223_v55 = vpop.permute.xlu0 %14222  ;;  %v22681_v17 = vpop.permute.xlu1 %13062  ;;  %v14125_v0 = vcombine.low %v22688_v52, %v22691_v19  ;;  %v22717_v43 = vrot.slane %v14313_v4, %v25402_v35  ;;  %25412 = vst [vmem:[#allocation113_spill] sm:$0xff] %v22746_v21  ;;  %v14109_v46 = vcombine.low %v22728_v57, %v22731_v9 }
 0xc8b   : > { %v14280_v53 = vcombine.low %v14219_v51, %v14223_v55  ;;  %v14281_v36 = vcombine.high %v14219_v51, %v14223_v55  ;;  %25410 = vst [vmem:[#allocation100_spill] sm:$0xff] %v22703_v31  ;;  %v13103_v33 = vcombine.high %v22665_v62, %v22681_v17  ;;  %v22734_v51 = vrot.slane %v14062_v63, %v25401_v10 }
 0xc8c   : > { %v22749_v54 = vrot.slane %v14125_v0, %v25402_v35 }
 0xc8d   : > { %v14288_v48 = vrot.slane %v14280_v53, %v25401_v10  ;;  %v14295_v45 = vrot.slane %v14281_v36, %v25401_v10  ;;  %v22752_v56 = vrot.slane %v13103_v33, %v25401_v10  ;;  %v14141_v15 = vcombine.low %v22734_v51, %v22741_v42 }
 0xc8e   : > { %v22707_v41 = vpop.permute.xlu0 %13058  ;;  %v22709_v12 = vpop.permute.xlu1 %13070  ;;  %25413 = vst [vmem:[#allocation86_spill] sm:$0xff] %v22749_v54  ;;  %v14540_v33 = vcombine.high %v22627_v28, %v22633_v30 }
 0xc8f   : > { %v14328_v49 = vcombine.low %v14272_v3, %v14288_v48  ;;  %v14329_v5 = vcombine.high %v14272_v3, %v14288_v48  ;;  %v14344_v1 = vcombine.low %v14279_v7, %v14295_v45  ;;  %v14345_v13 = vcombine.high %v14279_v7, %v14295_v45 }
 0xc90   : > { %v14158_v48 = vcombine.high %v22746_v21, %v22749_v54  ;;  %v14126_v45 = vcombine.high %v22688_v52, %v22691_v19  ;;  %v22801_v0 = vrot.slane %v14141_v15, %v25402_v35 }
 0xc91   : > { %v14343_v26 = vrot.slane %v14329_v5, %v25402_v35  ;;  %v22721_v24 = vrot.slane %v14328_v49, %v25402_v35  ;;  %v14352_v27 = vrot.slane %v14344_v1, %v25402_v35  ;;  %v22725_v2 = vrot.slane %v14345_v13, %v25402_v35 }
 0xc92   : > { %v22736_v4 = vpop.permute.xlu0 %13066  ;;  %v22738_v40 = vpop.permute.xlu1 %13078  ;;  %v14108_v5 = vrot.slane %v14094_v8, %v25402_v35  ;;  %v14508_v1 = vcombine.high %v22620_v58, %v22623_v32  ;;  %v14140_v13 = vrot.slane %v14126_v45, %v25402_v35 }
 0xc93   : > { %25411 = vst [vmem:[#allocation50_spill] sm:$0xff] %v22721_v24  ;;  %v14363_v11 = vcombine.high %v14311_v59, %v14343_v26  ;;  %v14361_v18 = vcombine.high %v22703_v31, %v22721_v24  ;;  %v14364_v23 = vcombine.low %v14320_v39, %v14352_v27  ;;  %v13119_v22 = vcombine.high %v22707_v41, %v22736_v4 }
 0xc94   : > { %v14362_v55 = vcombine.low %v14311_v59, %v14343_v26  ;;  %v14367_v7 = vcombine.high %v22717_v43, %v22725_v2  ;;  %v14366_v14 = vcombine.low %v22717_v43, %v22725_v2  ;;  %v13135_v63 = vcombine.high %v22709_v12, %v22738_v40 }
 0xc95   : > { %14377 = vrot.lane.b32.xlu0 %v14363_v11, %s14987_s10  ;;  %14369 = vrot.lane.b32.xlu1 %v14361_v18, %s14988_s11  ;;  %v22763_v53 = vrot.slane %v13119_v22, %v25401_v10  ;;  %v14365_v59 = vcombine.high %v14320_v39, %v14352_v27  ;;  %v22798_v39 = vrot.slane %v14109_v46, %v25402_v35 }
 0xc96   : > { %v22765_v36 = vpop.permute.xlu0 %13074  ;;  %v22767_v25 = vpop.permute.xlu1 %12664  ;;  %v22791_v52 = vrot.slane %v13135_v63, %v25401_v10  ;;  %v14560_v26 = vcombine.high %v22646_v6, %v22649_v50  ;;  %v14159_v30 = vcombine.low %v14108_v5, %v14140_v13  ;;  %v14554_v6 = vrot.slane %v14540_v33, %v25402_v35 }
 0xc97   : > { %v13183_v29 = vcombine.high %v22752_v56, %v22763_v53  ;;  %v14161_v27 = vcombine.low %v22798_v39, %v22801_v0  ;;  %v14160_v15 = vcombine.high %v14108_v5, %v14140_v13  ;;  %v14142_v5 = vcombine.high %v22734_v51, %v22741_v42 }
 0xc99   : > { %14381 = vrot.lane.b32.xlu0 %v14364_v23, %s14984_s8  ;;  %14373 = vrot.lane.b32.xlu1 %v14362_v55, %s14986_s23  ;;  %v14522_v23 = vrot.slane %v14508_v1, %v25402_v35 }
 0xc9a   : > { %v13083_v61 = vpop.permute.xlu0 %13082  ;;  %v22787_v49 = vpop.permute.xlu1 %12672 }
 0xc9b   : > { %v13151_v19 = vcombine.high %v22765_v36, %v13083_v61  ;;  %v12713_v18 = vcombine.high %v22767_v25, %v22787_v49  ;;  %v14561_v8 = vcombine.low %v14522_v23, %v14554_v6  ;;  %v13150_v51 = vcombine.low %v22765_v36, %v13083_v61 }
 0xc9d   : > { %14385 = vrot.lane.b32.xlu0 %v14365_v59, %s14982_s4  ;;  %14166 = vrot.lane.b32.xlu1 %v14158_v48, %s14988_s11  ;;  %v13165_v58 = vrot.slane %v13151_v19, %v25401_v10  ;;  %v22822_v22 = vrot.slane %v12713_v18, %v25401_v10 }
 0xc9e   : > { %v22810_v32 = vpop.permute.xlu0 %12668  ;;  %v12681_v28 = vpop.permute.xlu1 %12680 }
 0xc9f   : > { %v13215_v11 = vcombine.high %v22791_v52, %v13165_v58 }
 0xca1   : > { %14580 = vrot.lane.b32.xlu1 %v14560_v26, %s14982_s4  ;;  %14178 = vrot.lane.b32.xlu0 %v14161_v27, %s14984_s8  ;;  %v14562_v26 = vcombine.high %v14522_v23, %v14554_v6 }
 0xca2   : > { %v12677_v50 = vpop.permute.xlu0 %12676  ;;  %v12689_v45 = vpop.permute.xlu1 %12688 }
 0xca3   : > { %v12729_v55 = vcombine.high %v22810_v32, %v12677_v50  ;;  %v12745_v46 = vcombine.high %v12681_v28, %v12689_v45 }
 0xca5   : > { %14170 = vrot.lane.b32.xlu1 %v14159_v30, %s14986_s23  ;;  %v22827_v63 = vrot.slane %v12729_v55, %v25401_v10  ;;  %v12759_v1 = vrot.slane %v12745_v46, %v25401_v10  ;;  %v14162_v30 = vcombine.high %v22798_v39, %v22801_v0  ;;  %v14110_v55 = vcombine.high %v22728_v57, %v22731_v9 }
 0xca6   : > { %v12685_v48 = vpop.permute.xlu0 %12684  ;;  %v13102_v46 = vcombine.low %v22665_v62, %v22681_v17  ;;  %v13118_v57 = vcombine.low %v22707_v41, %v22736_v4  ;;  %v13134_v9 = vcombine.low %v22709_v12, %v22738_v40  ;;  %v13182_v62 = vcombine.low %v22752_v56, %v22763_v53 }
 0xca7   : > { %v12793_v59 = vcombine.high %v22822_v22, %v22827_v63  ;;  %v22843_v13 = vrot.slane %v14110_v55, %v25402_v35  ;;  %v13214_v17 = vcombine.low %v22791_v52, %v13165_v58  ;;  %v22894_v52 = vrot.slane %v13183_v29, %v25402_v35 }
 0xca8   : > { %v22860_v42 = vrot.slane %v13102_v46, %v25401_v10  ;;  %v22879_v4 = vrot.slane %v13182_v62, %v25402_v35  ;;  %v22897_v58 = vrot.slane %v13215_v11, %v25402_v35  ;;  %v12712_v56 = vcombine.low %v22767_v25, %v22787_v49 }
 0xca9   : > { %14584 = vrot.lane.b32.xlu1 %v14561_v8, %s14985_s9  ;;  %v22846_v8 = vrot.slane %v14142_v5, %v25402_v35  ;;  %v22882_v40 = vrot.slane %v13214_v17, %v25402_v35  ;;  %v12728_v53 = vcombine.low %v22810_v32, %v12677_v50  ;;  %v12744_v29 = vcombine.low %v12681_v28, %v12689_v45 }
 0xcaa   : > { %v12693_v19 = vpop.permute.xlu0 %12692 }
 0xcab   : > { %v12761_v33 = vcombine.high %v12685_v48, %v12693_v19  ;;  %v14163_v23 = vcombine.low %v22843_v13, %v22846_v8  ;;  %v14164_v6 = vcombine.high %v22843_v13, %v22846_v8  ;;  %v12760_v11 = vcombine.low %v12685_v48, %v12693_v19 }
 0xcac   : > { %v12752_v62 = vrot.slane %v12744_v29, %v25401_v10 }
 0xcad   : > { %14174 = vrot.lane.b32.xlu1 %v14160_v15, %s14987_s10  ;;  %v12775_v27 = vrot.slane %v12761_v33, %v25401_v10  ;;  %v22863_v15 = vrot.slane %v13118_v57, %v25401_v10  ;;  %v22866_v33 = vrot.slane %v13134_v9, %v25401_v10  ;;  %v12720_v9 = vrot.slane %v12712_v56, %v25401_v10 }
 0xcae   : > { %v12768_v17 = vrot.slane %v12760_v11, %v25401_v10  ;;  %v12792_v57 = vcombine.low %v22822_v22, %v22827_v63  ;;  %v22935_v22 = vrot.slane %v12793_v59, %v25402_v35 }
 0xcaf   : > { %v12825_v18 = vcombine.high %v12759_v1, %v12775_v27  ;;  %v13166_v41 = vcombine.low %v22860_v42, %v22863_v15  ;;  %v12824_v25 = vcombine.low %v12759_v1, %v12775_v27 }
 0xcb0   : > { %v12808_v3 = vcombine.low %v12752_v62, %v12768_v17  ;;  %v12809_v55 = vcombine.high %v12752_v62, %v12768_v17  ;;  %v22929_v48 = vrot.slane %v12792_v57, %v25402_v35  ;;  %25414 = vst [vmem:[#allocation78_spill] sm:$0xff] %v22935_v22 }
 0xcb1   : > { %14588 = vrot.lane.b32.xlu1 %v14562_v26, %s14983_s6  ;;  %v22869_v26 = vrot.slane %v13150_v51, %v25401_v10  ;;  %v22885_v36 = vrot.slane %v13166_v41, %v25402_v35  ;;  %v12736_v51 = vrot.slane %v12728_v53, %v25401_v10  ;;  %v22932_v45 = vrot.slane %v12824_v25, %v25402_v35 }
 0xcb2   : > { %v22920_v32 = vrot.slane %v12808_v3, %v25402_v35  ;;  %v22926_v50 = vrot.slane %v12809_v55, %v25402_v35  ;;  %v22938_v63 = vrot.slane %v12825_v18, %v25402_v35 }
 0xcb3   : > { %v13198_v12 = vcombine.low %v22866_v33, %v22869_v26  ;;  %v12776_v41 = vcombine.low %v12720_v9, %v12736_v51 }
 0xcb4   : > { %25415 = vst [vmem:[#allocation84_spill] sm:$0xff] %v22938_v63 }
 0xcb5   : > { %v22888_v61 = vrot.slane %v13198_v12, %v25402_v35  ;;  %v12777_v12 = vcombine.high %v12720_v9, %v12736_v51  ;;  %v22917_v49 = vrot.slane %v12776_v41, %v25402_v35 }
 0xcb7   : > { %v22923_v28 = vrot.slane %v12777_v12, %v25402_v35  ;;  %v13231_v43 = vcombine.high %v22885_v36, %v22888_v61  ;;  %v12841_v0 = vcombine.high %v22917_v49, %v22920_v32 }
 0xcb9   : > { %v12842_v13 = vcombine.low %v22923_v28, %v22926_v50 }
 0xcf7   : > { %v14565_v59 = vpop.permute.xlu1 %14564  ;;  %v14573_v9 = vpop.permute.xlu0 %14572 }
 0xcf8   : > { %v14591_v51 = vsel %vm1027_vm2, %v14555_v16, %v14565_v59 }
 0xcfb   : > { %v14569_v57 = vpop.permute.xlu1 %14568  ;;  %v14577_v12 = vpop.permute.xlu0 %14576 }
 0xcfc   : > { %v14592_v62 = vsel %vm187_vm0, %v14591_v51, %v14569_v57 }
 0xcfd   : > { %v14593_v41 = vsel %vm1030_vm3, %v14592_v62, %v14573_v9 }
 0xcfe   : > { %v14594_v55 = vsel %vm1032_vm4, %v14593_v41, %v14577_v12 }
 0xd07   : > { %v22950_v56 = vpop.permute.xlu1 %14369  ;;  %v23044_v8 = vpop.permute.xlu0 %14377 }
 0xd08   : > { %25416 = vst [vmem:[#allocation19_spill] sm:$0xff] %v22950_v56  ;;  %25423 = vst [vmem:[#allocation103_spill] sm:$0xff] %v23044_v8 }
 0xd0b   : > { %v22952_v18 = vpop.permute.xlu1 %14373 }
 0xd0c   : > { %25417 = vst [vmem:[#allocation12_spill] sm:$0xff] %v22952_v18 }
 0xd0f   : > { %v22954_v53 = vpop.permute.xlu1 %14166 }
 0xd10   : > { %25418 = vst [vmem:[#allocation63_spill] sm:$0xff] %v22954_v53 }
 0xd13   : > { %v14581_v29 = vpop.permute.xlu1 %14580 }
 0xd14   : > { %v14595_v27 = vsel %vm1034_vm5, %v14594_v55, %v14581_v29 }
 0xd17   : > { %v22956_v11 = vpop.permute.xlu1 %14170 }
 0xd18   : > { %25419 = vst [vmem:[#allocation89_spill] sm:$0xff] %v22956_v11 }
 0xd1b   : > { %v14585_v17 = vpop.permute.xlu1 %14584 }
 0xd1c   : > { %v14596_v1 = vsel %vm1036_vm6, %v14595_v27, %v14585_v17 }
 0xd1f   : > { %v22964_v25 = vpop.permute.xlu1 %14174 }
 0xd20   : > { %25420 = vst [vmem:[#allocation31_spill] sm:$0xff] %v22964_v25 }
 0xd23   : > { %v14589_v3 = vpop.permute.xlu1 %14588 }
 0xd24   : > { %v14597_v46 = vsel %vm1038_vm7, %v14596_v1, %v14589_v3  ;;  %v11885_v37 = vpop.f32.mrf.mxu0  ;;  %v13167_v1 = vcombine.high %v22860_v42, %v22863_v15 }
 0xd25   : > { %14624 = vmatprep.subr.mxu1 %v14597_v46  ;;  %v11886_v44 = vadd.f32 %v11885_v37, %v22615_v38 }
 0xd26   : > { %v11887_v59 = vpop.f32.mrf.mxu0  ;;  %v13181_v2 = vrot.slane %v13167_v1, %v25402_v35 }
 0xd27   : > { %v22971_v16 = vmax.f32 %v11886_v44, 0.0  ;;  %v11888_v3 = vadd.f32 %v11887_v59, %v22615_v38  ;;  %v13234_v38 = vcombine.low %v22879_v4, %v22882_v40 }
 0xd29   : > { %25421 = vst [vmem:[#allocation32_spill] sm:$0xff] %v22971_v16  ;;  %11895 = vrot.lane.b32.xlu0 %v22971_v16, %s14983_s6  ;;  %11898 = vrot.lane.b32.xlu1 %v22971_v16, %s14985_s9  ;;  %v22986_v46 = vmax.f32 %v11888_v3, 0.0 }
 0xd2b   : > { %25422 = vst [vmem:[#allocation109_spill] sm:$0xff] %v22986_v46 }
 0xd2d   : > { %11901 = vrot.lane.b32.xlu0 %v22971_v16, %s14982_s4  ;;  %11904 = vrot.lane.b32.xlu1 %v22971_v16, %s14984_s8 }
 0xd31   : > { %11907 = vrot.lane.b32.xlu0 %v22971_v16, %s14987_s10  ;;  %11910 = vrot.lane.b32.xlu1 %v22971_v16, %s14986_s23 }
 0xd35   : > { %11913 = vrot.lane.b32.xlu0 %v22971_v16, %s14988_s11  ;;  %11917 = vrot.lane.b32.xlu1 %v22986_v46, %s14983_s6 }
 0xd39   : > { %11920 = vrot.lane.b32.xlu0 %v22986_v46, %s14985_s9  ;;  %11923 = vrot.lane.b32.xlu1 %v22986_v46, %s14982_s4 }
 0xd3d   : > { %11926 = vrot.lane.b32.xlu0 %v22986_v46, %s14984_s8  ;;  %11929 = vrot.lane.b32.xlu1 %v22986_v46, %s14987_s10 }
 0xd41   : > { %11932 = vrot.lane.b32.xlu0 %v22986_v46, %s14986_s23  ;;  %11935 = vrot.lane.b32.xlu1 %v22986_v46, %s14988_s11 }
 0xd45   : > { %14393 = vrot.lane.b32.xlu0 %v14367_v7, %s14983_s6  ;;  %14389 = vrot.lane.b32.xlu1 %v14366_v14, %s14985_s9  ;;  %v13199_v7 = vcombine.high %v22866_v33, %v22869_v26 }
 0xd47   : > { %v13213_v14 = vrot.slane %v13199_v7, %v25402_v35 }
 0xd49   : > { %14182 = vrot.lane.b32.xlu1 %v14162_v30, %s14982_s4  ;;  %13387 = vrot.lane.b32.xlu0 %v13234_v38, %s14984_s8  ;;  %v13232_v39 = vcombine.low %v13181_v2, %v13213_v14  ;;  %v13233_v30 = vcombine.high %v13181_v2, %v13213_v14 }
 0xd4d   : > { %14186 = vrot.lane.b32.xlu1 %v14163_v23, %s14985_s9  ;;  %v23046_v23 = vpop.permute.xlu0 %14381 }
 0xd4e   : > { %25424 = vst [vmem:[#allocation126_spill] sm:$0xff] %v23046_v23 }
 0xd51   : > { %14190 = vrot.lane.b32.xlu1 %v14164_v6, %s14983_s6  ;;  %v23048_v6 = vpop.permute.xlu0 %14385 }
 0xd52   : > { %25425 = vst [vmem:[#allocation68_spill] sm:$0xff] %v23048_v6 }
 0xd55   : > { %13375 = vrot.lane.b32.xlu1 %v13231_v43, %s14988_s11  ;;  %v23050_v42 = vpop.permute.xlu0 %14178 }
 0xd56   : > { %25426 = vst [vmem:[#allocation125_spill] sm:$0xff] %v23050_v42 }
 0xd59   : > { %13379 = vrot.lane.b32.xlu1 %v13232_v39, %s14986_s23 }
 0xd5d   : > { %12985 = vrot.lane.b32.xlu1 %v12841_v0, %s14988_s11 }
 0xd61   : > { %13383 = vrot.lane.b32.xlu1 %v13233_v30, %s14987_s10 }
 0xd65   : > { %12989 = vrot.lane.b32.xlu1 %v12842_v13, %s14986_s23 }
 0xd9b   : > { %v11899_v15 = vpop.permute.xlu1 %11898  ;;  %v11896_v33 = vpop.permute.xlu0 %11895 }
 0xd9c   : > { %v11938_v9 = vcombine.low %v22971_v16, %v11899_v15  ;;  %v11939_v43 = vcombine.high %v22971_v16, %v11899_v15 }
 0xd9e   : > { %v11946_v12 = vrot.slane %v11938_v9, %v25401_v10 }
 0xd9f   : > { %v11905_v26 = vpop.permute.xlu1 %11904  ;;  %v11902_v27 = vpop.permute.xlu0 %11901 }
 0xda0   : > { %v11954_v55 = vcombine.low %v11896_v33, %v11902_v27  ;;  %v11955_v59 = vcombine.high %v11896_v33, %v11902_v27  ;;  %v11953_v27 = vrot.slane %v11939_v43, %v25401_v10 }
 0xda2   : > { %v11962_v51 = vrot.slane %v11954_v55, %v25401_v10  ;;  %v11969_v13 = vrot.slane %v11955_v59, %v25401_v10 }
 0xda3   : > { %v11911_v57 = vpop.permute.xlu1 %11910  ;;  %v11908_v29 = vpop.permute.xlu0 %11907 }
 0xda4   : > { %v11970_v62 = vcombine.low %v11905_v26, %v11911_v57  ;;  %v12002_v3 = vcombine.low %v11946_v12, %v11962_v51  ;;  %v11971_v38 = vcombine.high %v11905_v26, %v11911_v57  ;;  %v12003_v55 = vcombine.high %v11946_v12, %v11962_v51 }
 0xda6   : > { %v11978_v1 = vrot.slane %v11970_v62, %v25401_v10  ;;  %v12010_v33 = vrot.slane %v12002_v3, %v25402_v35  ;;  %v12017_v12 = vrot.slane %v12003_v55, %v25402_v35 }
 0xda7   : > { %v23054_v17 = vpop.permute.xlu1 %11917  ;;  %v11914_v41 = vpop.permute.xlu0 %11913 }
 0xda8   : > { %v11986_v37 = vcombine.low %v11908_v29, %v11914_v41  ;;  %v11987_v44 = vcombine.high %v11908_v29, %v11914_v41  ;;  %v11985_v29 = vrot.slane %v11971_v38, %v25401_v10 }
 0xdaa   : > { %v11994_v7 = vrot.slane %v11986_v37, %v25401_v10  ;;  %v12001_v39 = vrot.slane %v11987_v44, %v25401_v10  ;;  %v12018_v44 = vcombine.low %v11953_v27, %v11969_v13 }
 0xdab   : > { %v11924_v2 = vpop.permute.xlu1 %11923  ;;  %v11921_v14 = vpop.permute.xlu0 %11920 }
 0xdac   : > { %v12034_v0 = vcombine.low %v11978_v1, %v11994_v7  ;;  %v12035_v30 = vcombine.high %v11978_v1, %v11994_v7  ;;  %v12050_v15 = vcombine.low %v11985_v29, %v12001_v39  ;;  %v12090_v1 = vcombine.low %v23054_v17, %v11924_v2 }
 0xdad   : > { %v12074_v51 = vcombine.low %v22986_v46, %v11921_v14  ;;  %v12051_v59 = vcombine.high %v11985_v29, %v12001_v39  ;;  %v12026_v19 = vrot.slane %v12018_v44, %v25402_v35 }
 0xdae   : > { %v12042_v26 = vrot.slane %v12034_v0, %v25402_v35  ;;  %v12049_v37 = vrot.slane %v12035_v30, %v25402_v35  ;;  %v12019_v30 = vcombine.high %v11953_v27, %v11969_v13  ;;  %v12098_v5 = vrot.slane %v12090_v1, %v25401_v10 }
 0xdaf   : > { %v11930_v57 = vpop.permute.xlu1 %11929  ;;  %v11927_v9 = vpop.permute.xlu0 %11926  ;;  %v12065_v39 = vrot.slane %v12051_v59, %v25402_v35  ;;  %v12091_v1 = vcombine.high %v23054_v17, %v11924_v2 }
 0xdb0   : > { %v12067_v62 = vcombine.high %v12010_v33, %v12042_v26  ;;  %v12066_v41 = vcombine.low %v12010_v33, %v12042_v26  ;;  %v12069_v0 = vcombine.high %v12017_v12, %v12049_v37  ;;  %v12058_v33 = vrot.slane %v12050_v15, %v25402_v35 }
 0xdb1   : > { %v12068_v26 = vcombine.low %v12017_v12, %v12049_v37  ;;  %v12033_v44 = vrot.slane %v12019_v30, %v25402_v35  ;;  %v23099_v30 = vld [vmem:[#allocation2 + $0x80] sm:$0xff] }
 0xdb2   : > { %12230 = vrot.lane.b32.xlu0 %v12067_v62, %s14992_s17  ;;  %12226 = vrot.lane.b32.xlu1 %v12066_v41, %s14992_s17  ;;  %v12082_v62 = vrot.slane %v12074_v51, %v25401_v10  ;;  %v12071_v27 = vcombine.high %v12026_v19, %v12058_v33  ;;  %v12070_v37 = vcombine.low %v12026_v19, %v12058_v33 }
 0xdb3   : > { %v11936_v3 = vpop.permute.xlu1 %11935  ;;  %v11933_v38 = vpop.permute.xlu0 %11932  ;;  %v12075_v51 = vcombine.high %v22986_v46, %v11921_v14  ;;  %v12072_v19 = vcombine.low %v12033_v44, %v12065_v39 }
 0xdb4   : > { %v12122_v7 = vcombine.low %v11930_v57, %v11936_v3  ;;  %v12106_v43 = vcombine.low %v11927_v9, %v11933_v38  ;;  %v12123_v29 = vcombine.high %v11930_v57, %v11936_v3  ;;  %v12107_v15 = vcombine.high %v11927_v9, %v11933_v38  ;;  %v23093_v38 = vld [vmem:[#allocation2] sm:$0xff] }
 0xdb5   : > { %v12138_v12 = vcombine.low %v12082_v62, %v12098_v5  ;;  %v12105_v3 = vrot.slane %v12091_v1, %v25401_v10  ;;  %v12089_v17 = vrot.slane %v12075_v51, %v25401_v10  ;;  %v12139_v2 = vcombine.high %v12082_v62, %v12098_v5 }
 0xdb6   : > { %v12130_v41 = vrot.slane %v12122_v7, %v25401_v10  ;;  %v12114_v55 = vrot.slane %v12106_v43, %v25401_v10  ;;  %12238 = vrot.lane.b32.xlu0 %v12069_v0, %s14992_s17  ;;  %12234 = vrot.lane.b32.xlu1 %v12068_v26, %s14992_s17  ;;  %v12073_v7 = vcombine.high %v12033_v44, %v12065_v39  ;;  %v23095_v0 = vld [vmem:[#allocation2 + $0x40] sm:$0xff] }
 0xdb7   : > { %v12137_v43 = vrot.slane %v12123_v29, %v25401_v10  ;;  %v12121_v57 = vrot.slane %v12107_v15, %v25401_v10  ;;  %v12146_v14 = vrot.slane %v12138_v12, %v25402_v35  ;;  %v12306_v33 = vcombine.low %v23093_v38, %v23095_v0  ;;  %v23101_v26 = vld [vmem:[#allocation2 + $0xc0] sm:$0xff] }
 0xdb8   : > { %v12170_v13 = vcombine.low %v12114_v55, %v12130_v41  ;;  %v12171_v9 = vcombine.high %v12114_v55, %v12130_v41  ;;  %v12338_v41 = vcombine.low %v23099_v30, %v23101_v26  ;;  %v12154_v29 = vcombine.low %v12089_v17, %v12105_v3 }
 0xdb9   : > { %v12186_v5 = vcombine.low %v12121_v57, %v12137_v43  ;;  %v12153_v15 = vrot.slane %v12139_v2, %v25402_v35  ;;  %v25428_v1 = vcombine.low %v22302_v60, %v22304_v20  ;;  %v12187_v12 = vcombine.high %v12121_v57, %v12137_v43 }
 0xdba   : > { %12246 = vrot.lane.b32.xlu0 %v12071_v27, %s14992_s17  ;;  %12242 = vrot.lane.b32.xlu1 %v12070_v37, %s14992_s17  ;;  %v12178_v59 = vrot.slane %v12170_v13, %v25402_v35  ;;  %v12185_v55 = vrot.slane %v12171_v9, %v25402_v35  ;;  %v23110_v13 = vrot.slane %v12306_v33, %v25401_v10 }
 0xdbb   : > { %v25427_v27 = vcombine.low %v22261_v47, %v22263_v34  ;;  %v23119_v44 = vrot.slane %v12338_v41, %v25401_v10  ;;  %v23125_v51 = vrot.slane %v25428_v1, %v25401_v10  ;;  %v12194_v9 = vrot.slane %v12186_v5, %v25402_v35 }
 0xdbc   : > { %v12203_v62 = vcombine.high %v12146_v14, %v12178_v59  ;;  %v12202_v39 = vcombine.low %v12146_v14, %v12178_v59  ;;  %v12204_v59 = vcombine.low %v12153_v15, %v12185_v55  ;;  %v12162_v2 = vrot.slane %v12154_v29, %v25402_v35  ;;  %v23151_v29 = vpop.permute.xlu1 %14389 }
 0xdbd   : > { %v23116_v37 = vrot.slane %v25427_v27, %v25401_v10  ;;  %v12402_v33 = vcombine.low %v23119_v44, %v23125_v51  ;;  %v12201_v43 = vrot.slane %v12187_v12, %v25402_v35  ;;  %25431 = vst [vmem:[#allocation40_spill] sm:$0xff] %v23151_v29 }
 0xdbe   : > { %12254 = vrot.lane.b32.xlu0 %v12073_v7, %s14992_s17  ;;  %12250 = vrot.lane.b32.xlu1 %v12072_v19, %s14992_s17  ;;  %v12205_v7 = vcombine.high %v12153_v15, %v12185_v55  ;;  %v12155_v19 = vcombine.high %v12089_v17, %v12105_v3  ;;  %v12207_v41 = vcombine.high %v12162_v2, %v12194_v9 }
 0xdbf   : > { %v12370_v14 = vcombine.low %v23110_v13, %v23116_v37  ;;  %v12206_v57 = vcombine.low %v12162_v2, %v12194_v9  ;;  %v23144_v5 = vrot.slane %v12402_v33, %v25402_v35 }
 0xdc0   : > { %v12169_v3 = vrot.slane %v12155_v19, %v25402_v35  ;;  %v23153_v15 = vpop.permute.xlu1 %14182  ;;  %v23167_v19 = vpop.permute.xlu0 %14393 }
 0xdc1   : > { %v23141_v17 = vrot.slane %v12370_v14, %v25402_v35  ;;  %25430 = vst [vmem:[#allocation115_spill] sm:$0xff] %v23144_v5  ;;  %25432 = vst [vmem:[#allocation94_spill] sm:$0xff] %v23153_v15 }
 0xdc2   : > { %12232 = vrot.lane.b32.xlu0 %v12203_v62, %s14992_s17  ;;  %12228 = vrot.lane.b32.xlu1 %v12202_v39, %s14992_s17  ;;  %v12209_v62 = vcombine.high %v12169_v3, %v12201_v43  ;;  %v12208_v55 = vcombine.low %v12169_v3, %v12201_v43  ;;  %25435 = vst [vmem:[#allocation108_spill] sm:$0xff] %v23167_v19 }
 0xdc3   : > { %25429 = vst [vmem:[#allocation64_spill] sm:$0xff] %v23141_v17  ;;  %v12435_v39 = vcombine.high %v23141_v17, %v23144_v5 }
 0xdc4   : > { %v23155_v27 = vpop.permute.xlu1 %14186  ;;  %v23169_v2 = vpop.permute.xlu0 %13387 }
 0xdc5   : > { %25433 = vst [vmem:[#allocation95_spill] sm:$0xff] %v23155_v27 }
 0xdc6   : > { %12240 = vrot.lane.b32.xlu0 %v12205_v7, %s14992_s17  ;;  %12236 = vrot.lane.b32.xlu1 %v12204_v59, %s14992_s17 }
 0xdc8   : > { %v23157_v1 = vpop.permute.xlu1 %14190 }
 0xdc9   : > { %25434 = vst [vmem:[#allocation42_spill] sm:$0xff] %v23157_v1 }
 0xdca   : > { %12248 = vrot.lane.b32.xlu0 %v12207_v41, %s14992_s17  ;;  %12244 = vrot.lane.b32.xlu1 %v12206_v57, %s14992_s17 }
 0xdcc   : > { %v23159_v12 = vpop.permute.xlu1 %13375 }
 0xdce   : > { %12256 = vrot.lane.b32.xlu0 %v12209_v62, %s14992_s17  ;;  %12252 = vrot.lane.b32.xlu1 %v12208_v55, %s14992_s17 }
 0xdd0   : > { %v23161_v7 = vpop.permute.xlu1 %13379 }
 0xdd2   : > { %12579 = vrot.lane.b32.xlu1 %v12435_v39, %s14988_s11 }
 0xdd4   : > { %v23163_v9 = vpop.permute.xlu1 %12985 }
 0xdd8   : > { %v23165_v59 = vpop.permute.xlu1 %13383 }
 0xddc   : > { %v23171_v14 = vpop.permute.xlu1 %12989 }
 0xe24   : > { %v12227_v33 = vpop.permute.xlu1 %12226  ;;  %v12231_v41 = vpop.permute.xlu0 %12230 }
 0xe25   : > { %12274 = vst.msk [vmem:[#allocation2 + $0x8] sm:$0xff] %vm602_vm1, %v12227_v33  ;;  %12276 = vst.msk [vmem:[#allocation2 + $0x28] sm:$0xff] %vm602_vm1, %v12231_v41 }
 0xe28   : > { %v12239_v43 = vpop.permute.xlu0 %12238  ;;  %v12235_v57 = vpop.permute.xlu1 %12234 }
 0xe29   : > { %12280 = vst.msk [vmem:[#allocation2 + $0x68] sm:$0xff] %vm602_vm1, %v12239_v43  ;;  %12278 = vst.msk [vmem:[#allocation2 + $0x48] sm:$0xff] %vm602_vm1, %v12235_v57 }
 0xe2c   : > { %v12247_v3 = vpop.permute.xlu0 %12246  ;;  %v12291_v62 = vld [vmem:[#allocation2 + $0x8] sm:$0xff]  ;;  %v12243_v39 = vpop.permute.xlu1 %12242 }
 0xe2d   : > { %v12293_v55 = vld [vmem:[#allocation2 + $0x28] sm:$0xff]  ;;  %12284 = vst.msk [vmem:[#allocation2 + $0xa8] sm:$0xff] %vm602_vm1, %v12247_v3  ;;  %13056 = vrot.lane.b32.xlu1 %v12291_v62, %s14983_s6  ;;  %12282 = vst.msk [vmem:[#allocation2 + $0x88] sm:$0xff] %vm602_vm1, %v12243_v39 }
 0xe2e   : > { %13060 = vrot.lane.b32.xlu0 %v12293_v55, %s14983_s6 }
 0xe30   : > { %v12255_v33 = vpop.permute.xlu0 %12254  ;;  %v12297_v41 = vld [vmem:[#allocation2 + $0x68] sm:$0xff]  ;;  %v12251_v46 = vpop.permute.xlu1 %12250 }
 0xe31   : > { %12288 = vst.msk [vmem:[#allocation2 + $0xe8] sm:$0xff] %vm602_vm1, %v12255_v33  ;;  %v12295_v43 = vld [vmem:[#allocation2 + $0x48] sm:$0xff]  ;;  %v12458_v57 = vcombine.low %v12293_v55, %v12297_v41  ;;  %v12459_v16 = vcombine.high %v12293_v55, %v12297_v41  ;;  %12286 = vst.msk [vmem:[#allocation2 + $0xc8] sm:$0xff] %vm602_vm1, %v12251_v46 }
 0xe32   : > { %13068 = vrot.lane.b32.xlu0 %v12297_v41, %s14983_s6  ;;  %v12442_v1 = vcombine.low %v12291_v62, %v12295_v43  ;;  %v12443_v3 = vcombine.high %v12291_v62, %v12295_v43  ;;  %13064 = vrot.lane.b32.xlu1 %v12295_v43, %s14983_s6 }
 0xe33   : > { %v23186_v27 = vrot.slane %v12458_v57, %v25401_v10  ;;  %v23189_v39 = vrot.slane %v12459_v16, %v25401_v10 }
 0xe34   : > { %v23192_v19 = vrot.slane %v12442_v1, %v25401_v10  ;;  %v23195_v33 = vrot.slane %v12443_v3, %v25401_v10  ;;  %v12233_v15 = vpop.permute.xlu0 %12232  ;;  %v23197_v42 = vld [vmem:[#allocation2 + $0xa8] sm:$0xff]  ;;  %v12229_v46 = vpop.permute.xlu1 %12228 }
 0xe35   : > { %12277 = vst.msk [vmem:[#allocation2 + $0x30] sm:$0xff] %vm602_vm1, %v12233_v15  ;;  %v23200_v29 = vld [vmem:[#allocation2 + $0x88] sm:$0xff]  ;;  %12275 = vst.msk [vmem:[#allocation2 + $0x10] sm:$0xff] %vm602_vm1, %v12229_v46 }
 0xe36   : > { %13076 = vrot.lane.b32.xlu0 %v23197_v42, %s14983_s6  ;;  %13072 = vrot.lane.b32.xlu1 %v23200_v29, %s14983_s6  ;;  %v12506_v1 = vcombine.low %v23192_v19, %v23186_v27 }
 0xe38   : > { %v12241_v3 = vpop.permute.xlu0 %12240  ;;  %v23215_v25 = vld [vmem:[#allocation2 + $0xe8] sm:$0xff]  ;;  %v12237_v6 = vpop.permute.xlu1 %12236 }
 0xe39   : > { %12281 = vst.msk [vmem:[#allocation2 + $0x70] sm:$0xff] %vm602_vm1, %v12241_v3  ;;  %v23218_v46 = vld [vmem:[#allocation2 + $0xc8] sm:$0xff]  ;;  %v12490_v16 = vcombine.low %v23197_v42, %v23215_v25  ;;  %12279 = vst.msk [vmem:[#allocation2 + $0x50] sm:$0xff] %vm602_vm1, %v12237_v6 }
 0xe3a   : > { %13084 = vrot.lane.b32.xlu0 %v23215_v25, %s14983_s6  ;;  %v12474_v57 = vcombine.low %v23200_v29, %v23218_v46  ;;  %13080 = vrot.lane.b32.xlu1 %v23218_v46, %s14983_s6  ;;  %v12475_v5 = vcombine.high %v23200_v29, %v23218_v46 }
 0xe3b   : > { %v23230_v15 = vrot.slane %v12490_v16, %v25401_v10 }
 0xe3c   : > { %v23233_v3 = vrot.slane %v12474_v57, %v25401_v10  ;;  %v12249_v11 = vpop.permute.xlu0 %12248  ;;  %v12245_v23 = vpop.permute.xlu1 %12244  ;;  %v23257_v57 = vld [vmem:[#allocation2 + $0x30] sm:$0xff] }
 0xe3d   : > { %12285 = vst.msk [vmem:[#allocation2 + $0xb0] sm:$0xff] %vm602_vm1, %v12249_v11  ;;  %12283 = vst.msk [vmem:[#allocation2 + $0x90] sm:$0xff] %vm602_vm1, %v12245_v23 }
 0xe3e   : > { %12670 = vrot.lane.b32.xlu0 %v12293_v55, %s14994_s20  ;;  %12666 = vrot.lane.b32.xlu1 %v12291_v62, %s14994_s20  ;;  %v12538_v6 = vcombine.low %v23233_v3, %v23230_v15  ;;  %v23253_v62 = vrot.slane %v12506_v1, %v25402_v35  ;;  %v23255_v55 = vld [vmem:[#allocation2 + $0x10] sm:$0xff] }
 0xe40   : > { %v12257_v53 = vpop.permute.xlu0 %12256  ;;  %v12253_v8 = vpop.permute.xlu1 %12252  ;;  %v23244_v16 = vrot.slane %v12538_v6, %v25402_v35  ;;  %v23248_v11 = vld [vmem:[#allocation2 + $0x50] sm:$0xff] }
 0xe41   : > { %12289 = vst.msk [vmem:[#allocation2 + $0xf0] sm:$0xff] %vm602_vm1, %v12257_v53  ;;  %12287 = vst.msk [vmem:[#allocation2 + $0xd0] sm:$0xff] %vm602_vm1, %v12253_v8  ;;  %v23250_v23 = vld [vmem:[#allocation2 + $0x70] sm:$0xff]  ;;  %v13452_v53 = vcombine.low %v23255_v55, %v23248_v11 }
 0xe42   : > { %12678 = vrot.lane.b32.xlu0 %v12297_v41, %s14994_s20  ;;  %12674 = vrot.lane.b32.xlu1 %v12295_v43, %s14994_s20  ;;  %v13468_v8 = vcombine.low %v23257_v57, %v23250_v23 }
 0xe43   : > { %v23272_v6 = vrot.slane %v13452_v53, %v25401_v10 }
 0xe44   : > { %v13449_v43 = vld [vmem:[#allocation2 + $0xb0] sm:$0xff]  ;;  %v23275_v18 = vrot.slane %v13468_v8, %v25401_v10 }
 0xe45   : > { %v13448_v21 = vld [vmem:[#allocation2 + $0x90] sm:$0xff] }
 0xe46   : > { %12686 = vrot.lane.b32.xlu0 %v23197_v42, %s14994_s20  ;;  %12682 = vrot.lane.b32.xlu1 %v23200_v29, %s14994_s20  ;;  %v13516_v53 = vcombine.low %v23272_v6, %v23275_v18  ;;  %v12539_v29 = vcombine.high %v23233_v3, %v23230_v15 }
 0xe48   : > { %v13451_v1 = vld [vmem:[#allocation2 + $0xf0] sm:$0xff] }
 0xe49   : > { %v13450_v54 = vld [vmem:[#allocation2 + $0xd0] sm:$0xff]  ;;  %v13500_v24 = vcombine.low %v13449_v43, %v13451_v1 }
 0xe4a   : > { %12694 = vrot.lane.b32.xlu0 %v23215_v25, %s14994_s20  ;;  %12690 = vrot.lane.b32.xlu1 %v23218_v46, %s14994_s20  ;;  %v13484_v41 = vcombine.low %v13448_v21, %v13450_v54  ;;  %v13501_v46 = vcombine.high %v13449_v43, %v13451_v1 }
 0xe4b   : > { %v23280_v31 = vrot.slane %v13500_v24, %v25401_v10  ;;  %v23299_v24 = vrot.slane %v13516_v53, %v25402_v35  ;;  %v12371_v53 = vcombine.high %v23110_v13, %v23116_v37  ;;  %v12491_v13 = vcombine.high %v23197_v42, %v23215_v25 }
 0xe4c   : > { %v23283_v56 = vrot.slane %v13484_v41, %v25401_v10  ;;  %v25436_v41 = vcombine.high %v22879_v4, %v22882_v40  ;;  %v12844_v37 = vcombine.low %v22929_v48, %v22932_v45  ;;  %v25437_v4 = vcombine.high %v22923_v28, %v22926_v50 }
 0xe4d   : > { %v12385_v22 = vrot.slane %v12371_v53, %v25402_v35  ;;  %v13485_v42 = vcombine.high %v13448_v21, %v13450_v54  ;;  %v12553_v53 = vrot.slane %v12539_v29, %v25402_v35  ;;  %v13453_v28 = vcombine.high %v23255_v55, %v23248_v11 }
 0xe4e   : > { %13828 = vrot.lane.b32.xlu0 %v23257_v57, %s14983_s6  ;;  %13826 = vrot.lane.b32.xlu1 %v23255_v55, %s14983_s6  ;;  %v13548_v8 = vcombine.low %v23283_v56, %v23280_v31  ;;  %v13469_v50 = vcombine.high %v23257_v57, %v23250_v23  ;;  %v13515_v3 = vrot.slane %v13501_v46, %v25401_v10 }
 0xe4f   : > { %v13499_v15 = vrot.slane %v13485_v42, %v25401_v10  ;;  %v12339_v42 = vcombine.high %v23099_v30, %v23101_v26  ;;  %v25443_v30 = vcombine.high %v22302_v60, %v22304_v20 }
 0xe50   : > { %v23294_v63 = vrot.slane %v13548_v8, %v25402_v35  ;;  %v12403_v8 = vcombine.high %v23119_v44, %v23125_v51  ;;  %v12489_v51 = vrot.slane %v12475_v5, %v25401_v10 }
 0xe51   : > { %v12369_v26 = vrot.slane %v25443_v30, %v25401_v10 }
 0xe52   : > { %13832 = vrot.lane.b32.xlu0 %v23250_v23, %s14983_s6  ;;  %13830 = vrot.lane.b32.xlu1 %v23248_v11, %s14983_s6  ;;  %v12417_v17 = vrot.slane %v12403_v8, %v25402_v35 }
 0xe54   : > { %v12437_v44 = vcombine.high %v12385_v22, %v12417_v17  ;;  %v12436_v40 = vcombine.low %v12385_v22, %v12417_v17  ;;  %v25438_v22 = vcombine.low %v22894_v52, %v22897_v58  ;;  %v12571_v17 = vcombine.high %v23253_v62, %v23244_v16 }
 0xe56   : > { %13836 = vrot.lane.b32.xlu0 %v13449_v43, %s14983_s6  ;;  %13834 = vrot.lane.b32.xlu1 %v13448_v21, %s14983_s6 }
 0xe5a   : > { %13840 = vrot.lane.b32.xlu0 %v13451_v1, %s14983_s6  ;;  %13838 = vrot.lane.b32.xlu1 %v13450_v54, %s14983_s6 }
 0xe5e   : > { %13633 = vrot.lane.b32.xlu0 %v23257_v57, %s14994_s20  ;;  %13631 = vrot.lane.b32.xlu1 %v23255_v55, %s14994_s20  ;;  %v13467_v55 = vrot.slane %v13453_v28, %v25401_v10  ;;  %v13565_v28 = vcombine.high %v13499_v15, %v13515_v3 }
 0xe62   : > { %13637 = vrot.lane.b32.xlu0 %v23250_v23, %s14994_s20  ;;  %13635 = vrot.lane.b32.xlu1 %v23248_v11, %s14994_s20  ;;  %v13549_v23 = vcombine.high %v23283_v56, %v23280_v31  ;;  %v13564_v56 = vcombine.low %v13499_v15, %v13515_v3 }
 0xe64   : > { %v13563_v31 = vrot.slane %v13549_v23, %v25402_v35 }
 0xe66   : > { %13641 = vrot.lane.b32.xlu0 %v13449_v43, %s14994_s20  ;;  %13639 = vrot.lane.b32.xlu1 %v13448_v21, %s14994_s20  ;;  %v25439_v21 = vcombine.high %v23192_v19, %v23186_v27  ;;  %v13483_v27 = vrot.slane %v13469_v50, %v25401_v10  ;;  %v25440_v19 = vcombine.low %v23195_v33, %v23189_v39 }
 0xe67   : > { %v13517_v43 = vcombine.high %v23272_v6, %v23275_v18  ;;  %v25441_v18 = vcombine.high %v23195_v33, %v23189_v39  ;;  %v12353_v33 = vrot.slane %v12339_v42, %v25401_v10 }
 0xe68   : > { %v12530_v57 = vrot.slane %v25440_v19, %v25402_v35  ;;  %v13533_v39 = vcombine.high %v13467_v55, %v13483_v27 }
 0xe69   : > { %v12537_v6 = vrot.slane %v25441_v18, %v25402_v35 }
 0xe6a   : > { %13391 = vrot.lane.b32.xlu0 %v25436_v41, %s14982_s4  ;;  %13643 = vrot.lane.b32.xlu1 %v13450_v54, %s14994_s20  ;;  %v12505_v41 = vrot.slane %v12491_v13, %v25401_v10  ;;  %v12521_v54 = vrot.slane %v25439_v21, %v25402_v35 }
 0xe6c   : > { %v12554_v25 = vcombine.low %v12489_v51, %v12505_v41  ;;  %v12573_v11 = vcombine.high %v12521_v54, %v12553_v53  ;;  %v12555_v8 = vcombine.high %v12489_v51, %v12505_v41  ;;  %v12307_v51 = vcombine.high %v23093_v38, %v23095_v0 }
 0xe6d   : > { %v25442_v38 = vcombine.high %v22261_v47, %v22263_v34  ;;  %v13581_v47 = vcombine.high %v23299_v24, %v23294_v63 }
 0xe6e   : > { %12997 = vrot.lane.b32.xlu0 %v12844_v37, %s14984_s8  ;;  %12993 = vrot.lane.b32.xlu1 %v25437_v4, %s14987_s10  ;;  %v12562_v5 = vrot.slane %v12554_v25, %v25402_v35  ;;  %v13531_v37 = vrot.slane %v13517_v43, %v25402_v35  ;;  %v13572_v25 = vrot.slane %v13564_v56, %v25402_v35 }
 0xe6f   : > { %v12321_v50 = vrot.slane %v12307_v51, %v25401_v10  ;;  %v12337_v0 = vrot.slane %v25442_v38, %v25401_v10 }
 0xe70   : > { %v12574_v13 = vcombine.low %v12530_v57, %v12562_v5  ;;  %v12575_v4 = vcombine.high %v12530_v57, %v12562_v5  ;;  %v13583_v29 = vcombine.high %v13531_v37, %v13563_v31  ;;  %v12418_v5 = vcombine.low %v12353_v33, %v12369_v26 }
 0xe71   : > { %v12386_v34 = vcombine.low %v12321_v50, %v12337_v0  ;;  %v13582_v3 = vcombine.low %v13531_v37, %v13563_v31 }
 0xe72   : > { %12587 = vrot.lane.b32.xlu0 %v12437_v44, %s14987_s10  ;;  %12583 = vrot.lane.b32.xlu1 %v12436_v40, %s14986_s23  ;;  %v13532_v44 = vcombine.low %v13467_v55, %v13483_v27  ;;  %v12569_v40 = vrot.slane %v12555_v8, %v25402_v35  ;;  %v23418_v20 = vrot.slane %v12418_v5, %v25402_v35 }
 0xe73   : > { %v23415_v60 = vrot.slane %v12386_v34, %v25402_v35  ;;  %v12387_v55 = vcombine.high %v12321_v50, %v12337_v0  ;;  %v12419_v27 = vcombine.high %v12353_v33, %v12369_v26 }
 0xe74   : > { %v13540_v41 = vrot.slane %v13532_v44, %v25402_v35  ;;  %v12576_v46 = vcombine.low %v12537_v6, %v12569_v40 }
 0xe75   : > { %v23427_v19 = vrot.slane %v12387_v55, %v25402_v35  ;;  %v23430_v57 = vrot.slane %v12419_v27, %v25402_v35 }
 0xe76   : > { %13645 = vrot.lane.b32.xlu0 %v13451_v1, %s14994_s20  ;;  %13395 = vrot.lane.b32.xlu1 %v25438_v22, %s14985_s9  ;;  %v12572_v1 = vcombine.low %v12521_v54, %v12553_v53  ;;  %v13584_v53 = vcombine.low %v13540_v41, %v13572_v25  ;;  %v12577_v22 = vcombine.high %v12537_v6, %v12569_v40 }
 0xe77   : > { %v13585_v21 = vcombine.high %v13540_v41, %v13572_v25  ;;  %v13579_v54 = vrot.slane %v13565_v28, %v25402_v35 }
 0xe7a   : > { %12607 = vrot.lane.b32.xlu0 %v12571_v17, %s14988_s11  ;;  %12615 = vrot.lane.b32.xlu1 %v12573_v11, %s14987_s10  ;;  %v13547_v17 = vrot.slane %v13533_v39, %v25402_v35 }
 0xe7c   : > { %v13587_v15 = vcombine.high %v13547_v17, %v13579_v54  ;;  %v13586_v43 = vcombine.low %v13547_v17, %v13579_v54 }
 0xe7e   : > { %12611 = vrot.lane.b32.xlu0 %v12572_v1, %s14986_s23  ;;  %12619 = vrot.lane.b32.xlu1 %v12574_v13, %s14984_s8  ;;  %v23437_v13 = vpop.permute.xlu1 %12579 }
 0xe82   : > { %12623 = vrot.lane.b32.xlu0 %v12575_v4, %s14982_s4  ;;  %13597 = vrot.lane.b32.xlu1 %v13583_v29, %s14987_s10 }
 0xe86   : > { %12627 = vrot.lane.b32.xlu0 %v12576_v46, %s14985_s9  ;;  %13601 = vrot.lane.b32.xlu1 %v13584_v53, %s14984_s8 }
 0xe8a   : > { %12631 = vrot.lane.b32.xlu0 %v12577_v22, %s14983_s6  ;;  %13605 = vrot.lane.b32.xlu1 %v13585_v21, %s14982_s4 }
 0xe8e   : > { %13589 = vrot.lane.b32.xlu0 %v13581_v47, %s14988_s11  ;;  %13613 = vrot.lane.b32.xlu1 %v13587_v15, %s14983_s6 }
 0xe92   : > { %13593 = vrot.lane.b32.xlu0 %v13582_v3, %s14986_s23 }
 0xe96   : > { %13609 = vrot.lane.b32.xlu0 %v13586_v43, %s14985_s9 }
 0xe9f   : > { %v13057_v31 = vpop.permute.xlu1 %13056 }
 0xea0   : > { %v13061_v56 = vpop.permute.xlu0 %13060 }
 0xea4   : > { %v13069_v37 = vpop.permute.xlu0 %13068  ;;  %v13065_v44 = vpop.permute.xlu1 %13064 }
 0xea5   : > { %v13238_v4 = vcombine.low %v13057_v31, %v13065_v44  ;;  %v13254_v40 = vcombine.low %v13061_v56, %v13069_v37 }
 0xea7   : > { %v13246_v18 = vrot.slane %v13238_v4, %v25401_v10  ;;  %v13262_v6 = vrot.slane %v13254_v40, %v25401_v10 }
 0xea8   : > { %v13077_v29 = vpop.permute.xlu0 %13076  ;;  %v13073_v25 = vpop.permute.xlu1 %13072 }
 0xea9   : > { %v13302_v28 = vcombine.low %v13246_v18, %v13262_v6  ;;  %v13303_v30 = vcombine.high %v13246_v18, %v13262_v6  ;;  %v13239_v18 = vcombine.high %v13057_v31, %v13065_v44  ;;  %v13255_v6 = vcombine.high %v13061_v56, %v13069_v37 }
 0xeab   : > { %v23448_v26 = vrot.slane %v13302_v28, %v25402_v35  ;;  %v13317_v34 = vrot.slane %v13303_v30, %v25402_v35  ;;  %v13269_v31 = vrot.slane %v13255_v6, %v25401_v10 }
 0xeac   : > { %v13085_v51 = vpop.permute.xlu0 %13084  ;;  %v13081_v41 = vpop.permute.xlu1 %13080 }
 0xead   : > { %v13286_v42 = vcombine.low %v13077_v29, %v13085_v51  ;;  %v13270_v46 = vcombine.low %v13073_v25, %v13081_v41  ;;  %v13271_v55 = vcombine.high %v13073_v25, %v13081_v41  ;;  %v13287_v27 = vcombine.high %v13077_v29, %v13085_v51 }
 0xeaf   : > { %v13294_v53 = vrot.slane %v13286_v42, %v25401_v10  ;;  %v13278_v50 = vrot.slane %v13270_v46, %v25401_v10  ;;  %v13285_v28 = vrot.slane %v13271_v55, %v25401_v10 }
 0xeb0   : > { %v23443_v39 = vpop.permute.xlu0 %12670  ;;  %v23445_v38 = vpop.permute.xlu1 %12666 }
 0xeb1   : > { %v13334_v0 = vcombine.low %v13278_v50, %v13294_v53  ;;  %v13335_v33 = vcombine.high %v13278_v50, %v13294_v53  ;;  %v13301_v50 = vrot.slane %v13287_v27, %v25401_v10 }
 0xeb3   : > { %v23451_v22 = vrot.slane %v13334_v0, %v25402_v35  ;;  %v13349_v17 = vrot.slane %v13335_v33, %v25402_v35  ;;  %v13253_v0 = vrot.slane %v13239_v18, %v25401_v10 }
 0xeb4   : > { %v12679_v21 = vpop.permute.xlu0 %12678  ;;  %v12675_v54 = vpop.permute.xlu1 %12674 }
 0xeb5   : > { %v13367_v47 = vcombine.high %v23448_v26, %v23451_v22  ;;  %v12848_v5 = vcombine.low %v23445_v38, %v12675_v54  ;;  %v12864_v15 = vcombine.low %v23443_v39, %v12679_v21  ;;  %v13368_v40 = vcombine.low %v13317_v34, %v13349_v17 }
 0xeb6   : > { %v13369_v41 = vcombine.high %v13317_v34, %v13349_v17  ;;  %v13318_v27 = vcombine.low %v13253_v0, %v13269_v31  ;;  %v12865_v18 = vcombine.high %v23443_v39, %v12679_v21 }
 0xeb7   : > { %13403 = vrot.lane.b32.xlu0 %v13367_v47, %s14988_s11  ;;  %v12856_v42 = vrot.slane %v12848_v5, %v25401_v10  ;;  %v12872_v46 = vrot.slane %v12864_v15, %v25401_v10  ;;  %v13350_v47 = vcombine.low %v13285_v28, %v13301_v50 }
 0xeb8   : > { %v12687_v3 = vpop.permute.xlu0 %12686  ;;  %v12683_v43 = vpop.permute.xlu1 %12682 }
 0xeb9   : > { %v12912_v37 = vcombine.low %v12856_v42, %v12872_v46  ;;  %v12913_v44 = vcombine.high %v12856_v42, %v12872_v46 }
 0xebb   : > { %13407 = vrot.lane.b32.xlu0 %v13368_v40, %s14986_s23  ;;  %v12849_v40 = vcombine.high %v23445_v38, %v12675_v54  ;;  %v23479_v6 = vrot.slane %v12912_v37, %v25402_v35  ;;  %v12927_v42 = vrot.slane %v12913_v44, %v25402_v35  ;;  %v12879_v37 = vrot.slane %v12865_v18, %v25401_v10 }
 0xebc   : > { %v12695_v53 = vpop.permute.xlu0 %12694  ;;  %v12691_v25 = vpop.permute.xlu1 %12690 }
 0xebd   : > { %v12896_v29 = vcombine.low %v12687_v3, %v12695_v53  ;;  %v12880_v51 = vcombine.low %v12683_v43, %v12691_v25  ;;  %v12881_v15 = vcombine.high %v12683_v43, %v12691_v25  ;;  %v12897_v55 = vcombine.high %v12687_v3, %v12695_v53 }
 0xebe   : > { %v13351_v3 = vcombine.high %v13285_v28, %v13301_v50  ;;  %v13358_v43 = vrot.slane %v13350_v47, %v25402_v35  ;;  %v13319_v25 = vcombine.high %v13253_v0, %v13269_v31 }
 0xebf   : > { %v12904_v56 = vrot.slane %v12896_v29, %v25401_v10  ;;  %v12888_v33 = vrot.slane %v12880_v51, %v25401_v10  ;;  %13411 = vrot.lane.b32.xlu0 %v13369_v41, %s14987_s10  ;;  %v12895_v38 = vrot.slane %v12881_v15, %v25401_v10  ;;  %v12911_v39 = vrot.slane %v12897_v55, %v25401_v10 }
 0xec0   : > { %v23472_v30 = vpop.permute.xlu0 %13828  ;;  %v23474_v5 = vpop.permute.xlu1 %13826  ;;  %v13326_v41 = vrot.slane %v13318_v27, %v25402_v35 }
 0xec1   : > { %v12944_v17 = vcombine.low %v12888_v33, %v12904_v56  ;;  %v12945_v34 = vcombine.high %v12888_v33, %v12904_v56  ;;  %v12863_v56 = vrot.slane %v12849_v40, %v25401_v10  ;;  %v13365_v33 = vrot.slane %v13351_v3, %v25402_v35 }
 0xec2   : > { %v12960_v0 = vcombine.low %v12895_v38, %v12911_v39  ;;  %v13371_v31 = vcombine.high %v13326_v41, %v13358_v43  ;;  %v13370_v55 = vcombine.low %v13326_v41, %v13358_v43  ;;  %v12961_v8 = vcombine.high %v12895_v38, %v12911_v39 }
 0xec3   : > { %v23483_v46 = vrot.slane %v12944_v17, %v25402_v35  ;;  %v12959_v29 = vrot.slane %v12945_v34, %v25402_v35  ;;  %v13333_v17 = vrot.slane %v13319_v25, %v25402_v35  ;;  %v12928_v34 = vcombine.low %v12863_v56, %v12879_v37 }
 0xec4   : > { %v23486_v51 = vpop.permute.xlu0 %13832  ;;  %v23489_v53 = vpop.permute.xlu1 %13830  ;;  %v12968_v3 = vrot.slane %v12960_v0, %v25402_v35  ;;  %v12929_v11 = vcombine.high %v12863_v56, %v12879_v37  ;;  %v25444_v38 = vcombine.low %v22885_v36, %v22888_v61 }
 0xec5   : > { %v12978_v21 = vcombine.low %v12927_v42, %v12959_v29  ;;  %v12977_v54 = vcombine.high %v23479_v6, %v23483_v46  ;;  %v13850_v47 = vcombine.low %v23474_v5, %v23489_v53  ;;  %v13866_v15 = vcombine.low %v23472_v30, %v23486_v51 }
 0xec6   : > { %v12979_v41 = vcombine.high %v12927_v42, %v12959_v29  ;;  %v13430_v39 = vsel %vm1027_vm2, %v25444_v38, %v23159_v12  ;;  %v12943_v37 = vrot.slane %v12929_v11, %v25402_v35 }
 0xec7   : > { %13017 = vrot.lane.b32.xlu0 %v12978_v21, %s14986_s23  ;;  %13013 = vrot.lane.b32.xlu1 %v12977_v54, %s14988_s11  ;;  %v13372_v54 = vcombine.low %v13333_v17, %v13365_v33  ;;  %v13858_v44 = vrot.slane %v13850_v47, %v25401_v10  ;;  %v13874_v43 = vrot.slane %v13866_v15, %v25401_v10 }
 0xec8   : > { %v23500_v28 = vpop.permute.xlu0 %13836  ;;  %v23502_v50 = vpop.permute.xlu1 %13834 }
 0xec9   : > { %v13914_v23 = vcombine.low %v13858_v44, %v13874_v43 }
 0xecb   : > { %13419 = vrot.lane.b32.xlu0 %v13371_v31, %s14982_s4  ;;  %13415 = vrot.lane.b32.xlu1 %v13370_v55, %s14984_s8  ;;  %v12936_v31 = vrot.slane %v12928_v34, %v25402_v35  ;;  %v23544_v56 = vrot.slane %v13914_v23, %v25402_v35 }
 0xecc   : > { %v13841_v27 = vpop.permute.xlu0 %13840  ;;  %v13839_v40 = vpop.permute.xlu1 %13838 }
 0xecd   : > { %v13898_v18 = vcombine.low %v23500_v28, %v13841_v27  ;;  %v13882_v21 = vcombine.low %v23502_v50, %v13839_v40  ;;  %v12981_v47 = vcombine.high %v12936_v31, %v12968_v3  ;;  %v12980_v15 = vcombine.low %v12936_v31, %v12968_v3 }
 0xece   : > { %v13899_v11 = vcombine.high %v23500_v28, %v13841_v27  ;;  %v25445_v31 = vcombine.low %v22917_v49, %v22920_v32  ;;  %v13867_v28 = vcombine.high %v23472_v30, %v23486_v51  ;;  %v13915_v27 = vcombine.high %v13858_v44, %v13874_v43 }
 0xecf   : > { %v13906_v25 = vrot.slane %v13898_v18, %v25401_v10  ;;  %v13890_v4 = vrot.slane %v13882_v21, %v25401_v10  ;;  %13423 = vrot.lane.b32.xlu0 %v13372_v54, %s14985_s9  ;;  %13021 = vrot.lane.b32.xlu1 %v12979_v41, %s14987_s10  ;;  %v12975_v18 = vrot.slane %v12961_v8, %v25402_v35 }
 0xed0   : > { %v23523_v55 = vpop.permute.xlu0 %13633  ;;  %v23526_v0 = vpop.permute.xlu1 %13631  ;;  %v13373_v21 = vcombine.high %v13333_v17, %v13365_v33  ;;  %v13913_v49 = vrot.slane %v13899_v11, %v25401_v10 }
 0xed1   : > { %v13946_v1 = vcombine.low %v13890_v4, %v13906_v25  ;;  %v12982_v61 = vcombine.low %v12943_v37, %v12975_v18  ;;  %v13947_v54 = vcombine.high %v13890_v4, %v13906_v25  ;;  %v12983_v41 = vcombine.high %v12943_v37, %v12975_v18 }
 0xed2   : > { %v13881_v18 = vrot.slane %v13867_v28, %v25401_v10 }
 0xed3   : > { %13029 = vrot.lane.b32.xlu0 %v12981_v47, %s14982_s4  ;;  %v23532_v29 = vrot.slane %v13946_v1, %v25402_v35  ;;  %13025 = vrot.lane.b32.xlu1 %v12980_v15, %s14984_s8  ;;  %v13431_v1 = vsel %vm187_vm0, %v13430_v39, %v23161_v7  ;;  %v13040_v47 = vsel %vm1027_vm2, %v25445_v31, %v23163_v9 }
 0xed4   : > { %v23529_v42 = vpop.permute.xlu0 %13637  ;;  %v23535_v34 = vpop.permute.xlu1 %13635  ;;  %v13432_v8 = vsel %vm1030_vm3, %v13431_v1, %v23165_v59  ;;  %v13883_v59 = vcombine.high %v23502_v50, %v13839_v40  ;;  %v13041_v4 = vsel %vm187_vm0, %v13040_v47, %v23171_v14  ;;  %v25446_v50 = vld [vmem:[#allocation115_spill] sm:$0xff]  ;;  %v25447_v40 = vld [vmem:[#allocation64_spill] sm:$0xff] }
 0xed5   : > { %v13978_v36 = vcombine.low %v23544_v56, %v23532_v29  ;;  %v13433_v12 = vsel %vm1032_vm4, %v13432_v8, %v23169_v2  ;;  %v13851_v2 = vcombine.high %v23474_v5, %v23489_v53  ;;  %v12434_v25 = vcombine.low %v25447_v40, %v25446_v50 }
 0xed6   : > { %v13897_v9 = vrot.slane %v13883_v59, %v25401_v10  ;;  %v13961_v5 = vrot.slane %v13947_v54, %v25402_v35  ;;  %v13979_v30 = vcombine.high %v23544_v56, %v23532_v29  ;;  %v13655_v51 = vcombine.low %v23526_v0, %v23535_v34 }
 0xed7   : > { %13427 = vrot.lane.b32.xlu0 %v13373_v21, %s14983_s6  ;;  %v13671_v14 = vcombine.low %v23523_v55, %v23529_v42  ;;  %v13865_v43 = vrot.slane %v13851_v2, %v25401_v10  ;;  %v13929_v21 = vrot.slane %v13915_v27, %v25402_v35  ;;  %v12634_v39 = vsel %vm1027_vm2, %v12434_v25, %v23437_v13 }
 0xed8   : > { %v23550_v3 = vpop.permute.xlu0 %13641  ;;  %v23554_v33 = vpop.permute.xlu1 %13639  ;;  %v13962_v37 = vcombine.low %v13897_v9, %v13913_v49  ;;  %v13656_v25 = vcombine.high %v23526_v0, %v23535_v34 }
 0xed9   : > { %v13930_v54 = vcombine.low %v13865_v43, %v13881_v18  ;;  %v13981_v27 = vcombine.high %v13929_v21, %v13961_v5 }
 0xeda   : > { %v13970_v47 = vrot.slane %v13962_v37, %v25402_v35 }
 0xedb   : > { %13033 = vrot.lane.b32.xlu0 %v12982_v61, %s14985_s9  ;;  %v13980_v61 = vcombine.low %v13929_v21, %v13961_v5  ;;  %v13938_v40 = vrot.slane %v13930_v54, %v25402_v35  ;;  %v25448_v21 = vcombine.low %v23253_v62, %v23244_v16 }
 0xedc   : > { %v13392_v7 = vpop.permute.xlu0 %13391  ;;  %v23562_v23 = vpop.permute.xlu1 %13643 }
 0xedd   : > { %v13434_v17 = vsel %vm1034_vm5, %v13433_v12, %v13392_v7  ;;  %v13663_v12 = vrot.slane %v13655_v51, %v25401_v10  ;;  %v13679_v7 = vrot.slane %v13671_v14, %v25401_v10  ;;  %v13687_v11 = vcombine.low %v23554_v33, %v23562_v23 }
 0xede   : > { %v13963_v51 = vcombine.high %v13897_v9, %v13913_v49  ;;  %v13982_v34 = vcombine.low %v13938_v40, %v13970_v47 }
 0xedf   : > { %13037 = vrot.lane.b32.xlu0 %v12983_v41, %s14983_s6 }
 0xee0   : > { %v12998_v15 = vpop.permute.xlu0 %12997  ;;  %v12994_v32 = vpop.permute.xlu1 %12993  ;;  %v13977_v37 = vrot.slane %v13963_v51, %v25402_v35 }
 0xee1   : > { %v13042_v53 = vsel %vm1030_vm3, %v13041_v4, %v12994_v32  ;;  %v13695_v4 = vrot.slane %v13687_v11, %v25401_v10  ;;  %v13672_v32 = vcombine.high %v23523_v55, %v23529_v42 }
 0xee2   : > { %v23591_v44 = vsel %vm1032_vm4, %v13042_v53, %v12998_v15  ;;  %v13719_v15 = vcombine.low %v13663_v12, %v13679_v7 }
 0xee3   : > { %13987 = vrot.lane.b32.xlu0 %v13979_v30, %s14988_s11  ;;  %v13686_v49 = vrot.slane %v13672_v32, %v25401_v10 }
 0xee4   : > { %v12588_v38 = vpop.permute.xlu0 %12587  ;;  %v12584_v1 = vpop.permute.xlu1 %12583  ;;  %v23630_v55 = vrot.slane %v13719_v15, %v25402_v35 }
 0xee5   : > { %v12635_v8 = vsel %vm187_vm0, %v12634_v39, %v12584_v1 }
 0xee6   : > { %v23605_v59 = vsel %vm1030_vm3, %v12635_v8, %v12588_v38  ;;  %v13720_v38 = vcombine.high %v13663_v12, %v13679_v7 }
 0xee7   : > { %13991 = vrot.lane.b32.xlu0 %v13980_v61, %s14986_s23  ;;  %v13983_v61 = vcombine.high %v13938_v40, %v13970_v47 }
 0xee8   : > { %v13646_v41 = vpop.permute.xlu0 %13645  ;;  %v13396_v13 = vpop.permute.xlu1 %13395  ;;  %v13734_v12 = vrot.slane %v13720_v38, %v25402_v35 }
 0xee9   : > { %v13703_v31 = vcombine.low %v23550_v3, %v13646_v41  ;;  %v23611_v2 = vsel %vm1036_vm6, %v13434_v17, %v13396_v13  ;;  %v13704_v28 = vcombine.high %v23550_v3, %v13646_v41  ;;  %v13688_v17 = vcombine.high %v23554_v33, %v23562_v23 }
 0xeea   : > { %v13931_v33 = vcombine.high %v13865_v43, %v13881_v18  ;;  %v13670_v23 = vrot.slane %v13656_v25, %v25401_v10 }
 0xeeb   : > { %v13711_v50 = vrot.slane %v13703_v31, %v25401_v10  ;;  %13995 = vrot.lane.b32.xlu0 %v13981_v27, %s14987_s10  ;;  %v13718_v14 = vrot.slane %v13704_v28, %v25401_v10  ;;  %v13702_v9 = vrot.slane %v13688_v17, %v25401_v10 }
 0xeec   : > { %v12608_v3 = vpop.permute.xlu0 %12607  ;;  %v12616_v30 = vpop.permute.xlu1 %12615  ;;  %v13945_v11 = vrot.slane %v13931_v33, %v25402_v35  ;;  %v13735_v54 = vcombine.low %v13670_v23, %v13686_v49  ;;  %v13736_v15 = vcombine.high %v13670_v23, %v13686_v49 }
 0xeed   : > { %v13751_v5 = vcombine.low %v13695_v4, %v13711_v50  ;;  %v13752_v53 = vcombine.high %v13695_v4, %v13711_v50  ;;  %v12641_v0 = vsel %vm1027_vm2, %v25448_v21, %v12608_v3  ;;  %v13767_v8 = vcombine.low %v13702_v9, %v13718_v14 }
 0xeee   : > { %v13768_v28 = vcombine.high %v13702_v9, %v13718_v14  ;;  %v13984_v27 = vcombine.low %v13945_v11, %v13977_v37  ;;  %v13743_v4 = vrot.slane %v13735_v54, %v25402_v35 }
 0xeef   : > { %v23633_v42 = vrot.slane %v13751_v5, %v25402_v35  ;;  %13999 = vrot.lane.b32.xlu0 %v13982_v34, %s14984_s8  ;;  %v13766_v62 = vrot.slane %v13752_v53, %v25402_v35  ;;  %v13775_v47 = vrot.slane %v13767_v8, %v25402_v35  ;;  %v13750_v5 = vrot.slane %v13736_v15, %v25402_v35 }
 0xef0   : > { %v12612_v16 = vpop.permute.xlu0 %12611  ;;  %v12620_v43 = vpop.permute.xlu1 %12619  ;;  %v13782_v32 = vrot.slane %v13768_v28, %v25402_v35  ;;  %v25449_v34 = vcombine.low %v23299_v24, %v23294_v63  ;;  %v13985_v35 = vcombine.high %v13945_v11, %v13977_v37  ;;  %v25451_v24 = vcombine.high %v22894_v52, %v22897_v58 }
 0xef1   : > { %v12642_v39 = vsel %vm187_vm0, %v12641_v0, %v12612_v16  ;;  %v13784_v1 = vcombine.high %v23630_v55, %v23633_v42  ;;  %v13783_v7 = vcombine.low %v23630_v55, %v23633_v42  ;;  %v13785_v31 = vcombine.low %v13734_v12, %v13766_v62 }
 0xef2   : > { %v12643_v18 = vsel %vm1030_vm3, %v12642_v39, %v12616_v30  ;;  %v13786_v25 = vcombine.high %v13734_v12, %v13766_v62  ;;  %v13788_v17 = vcombine.high %v13743_v4, %v13775_v47  ;;  %v13787_v51 = vcombine.low %v13743_v4, %v13775_v47 }
 0xef3   : > { %13792 = vrot.lane.b32.xlu1 %v13784_v1, %s14988_s11  ;;  %v12644_v10 = vsel %vm1032_vm4, %v12643_v18, %v12620_v43  ;;  %14003 = vrot.lane.b32.xlu0 %v13983_v61, %s14982_s4  ;;  %v13789_v14 = vcombine.low %v13750_v5, %v13782_v32  ;;  %v13790_v33 = vcombine.high %v13750_v5, %v13782_v32 }
 0xef4   : > { %v12624_v41 = vpop.permute.xlu0 %12623  ;;  %v13598_v3 = vpop.permute.xlu1 %13597  ;;  %v25450_v62 = vcombine.high %v22929_v48, %v22932_v45  ;;  %v25452_v8 = vcombine.low %v23415_v60, %v23418_v20  ;;  %v25453_v48 = vld [vmem:[#allocation78_spill] sm:$0xff]  ;;  %v25454_v45 = vld [vmem:[#allocation84_spill] sm:$0xff]  ;;  %v25456_v52 = vcombine.high %v23415_v60, %v23418_v20  ;;  %v25458_v18 = vcombine.low %v23427_v19, %v23430_v57 }
 0xef5   : > { %v12645_v13 = vsel %vm1034_vm5, %v12644_v10, %v12624_v41  ;;  %v25455_v43 = vcombine.low %v25453_v48, %v25454_v45  ;;  %v25457_v58 = vcombine.high %v25453_v48, %v25454_v45  ;;  %v25459_v61 = vcombine.high %v23427_v19, %v23430_v57  ;;  %v14789_v60 = vld [vmem:[%s23874_s2 + $0x18] sm:$0xff]  ;;  %v25470_v45 = vld [vmem:[#allocation126_spill] sm:$0xff] }
 0xef6   : > { %v25460_v12 = vcombine.low %v23448_v26, %v23451_v22 }
 0xef7   : > { %13796 = vrot.lane.b32.xlu1 %v13785_v31, %s14986_s23  ;;  %14007 = vrot.lane.b32.xlu0 %v13984_v27, %s14985_s9 }
 0xef8   : > { %v12628_v50 = vpop.permute.xlu0 %12627  ;;  %v13602_v0 = vpop.permute.xlu1 %13601 }
 0xef9   : > { %v12646_v40 = vsel %vm1036_vm6, %v12645_v13, %v12628_v50 }
 0xefb   : > { %13800 = vrot.lane.b32.xlu1 %v13786_v25, %s14987_s10  ;;  %13808 = vrot.lane.b32.xlu0 %v13788_v17, %s14982_s4  ;;  %s186_s10 = scalar_lea.vmem [#allocation6], %s14779_s30 }
 0xefc   : > { %v12632_v53 = vpop.permute.xlu0 %12631  ;;  %v13606_v16 = vpop.permute.xlu1 %13605  ;;  %s14702_s11 = sshll.u32 %s186_s10, 4  ;;  %s14703_s11 = int_to_ptr.vmem [resolvable:$true] %s14702_s11 }
 0xefd   : > { %v23663_v30 = vsel %vm1038_vm7, %v12646_v40, %v12632_v53  ;;  %s14915_s22 = scalar_lea.vmem %s14703_s11, 256 }
 0xefe   : > { %p14916_p10 = scmp.ne.s32.totalorder %s14703_s11, %s14915_s22 }
 0xeff   : > { %13804 = vrot.lane.b32.xlu1 %v13787_v51, %s14984_s8  ;;  %13812 = vrot.lane.b32.xlu0 %v13789_v14, %s14985_s9  ;;  %v25461_v51 = vld [vmem:[#allocation19_spill] sm:$0xff]  ;;  %v25462_v14 = vld [vmem:[#allocation100_spill] sm:$0xff] }
 0xf00   : > { %v13590_v21 = vpop.permute.xlu0 %13589  ;;  %v23729_v27 = vpop.permute.xlu1 %13613  ;;  %p14917_p12 = pnand %p14916_p10, %p25487_p11 }
 0xf01   : > { %v13616_v38 = vsel %vm1027_vm2, %v25449_v34, %v13590_v21  ;;  %v25463_v21 = vld [vmem:[#allocation50_spill] sm:$0xff] }
 0xf02   : > { %p14918_p0 = pneg %p14917_p12 }
 0xf03   : > { %14011 = vrot.lane.b32.xlu1 %v13985_v35, %s14983_s6  ;;  %13816 = vrot.lane.b32.xlu0 %v13790_v33, %s14983_s6  ;;  %v25466_v35 = vld [vmem:[#allocation113_spill] sm:$0xff] }
 0xf04   : > { %v13594_v23 = vpop.permute.xlu0 %13593 }
 0xf05   : > { %v13617_v49 = vsel %vm187_vm0, %v13616_v38, %v13594_v23  ;;  %v25465_v38 = vld [vmem:[#allocation86_spill] sm:$0xff] }
 0xf06   : > { %v13618_v9 = vsel %vm1030_vm3, %v13617_v49, %v13598_v3  ;;  %v14157_v33 = vcombine.low %v25466_v35, %v25465_v38  ;;  %v25467_v49 = vld [vmem:[#allocation12_spill] sm:$0xff]  ;;  %v25477_v35 = vld [vmem:[#allocation94_spill] sm:$0xff] }
 0xf07   : > { %13001 = vrot.lane.b32.xlu1 %v25450_v62, %s14982_s4  ;;  %v13619_v63 = vsel %vm1032_vm4, %v13618_v9, %v13602_v0  ;;  %13399 = vrot.lane.b32.xlu0 %v25451_v24, %s14983_s6  ;;  %v25464_v0 = vcombine.low %v25462_v14, %v25463_v21  ;;  %v25468_v62 = vld [vmem:[#allocation103_spill] sm:$0xff] }
 0xf08   : > { %v13620_v39 = vsel %vm1034_vm5, %v13619_v63, %v13606_v16  ;;  %v13610_v1 = vpop.permute.xlu0 %13609  ;;  %v25469_v24 = vld [vmem:[#allocation63_spill] sm:$0xff] }
 0xf09   : > { %v23686_v37 = vsel %vm1036_vm6, %v13620_v39, %v13610_v1  ;;  %v14396_v34 = vsel %vm1027_vm2, %v25464_v0, %v25461_v51  ;;  %v14193_v39 = vsel %vm1027_vm2, %v14157_v33, %v25469_v24  ;;  %v25476_v0 = vld [vmem:[#allocation125_spill] sm:$0xff]  ;;  %v25480_v24 = vld [vmem:[#allocation42_spill] sm:$0xff] }
 0xf0a   : > { %v14397_v9 = vsel %vm187_vm0, %v14396_v34, %v25467_v49 }
 0xf0b   : > { %12591 = vrot.lane.b32.xlu1 %v25452_v8, %s14984_s8  ;;  %13005 = vrot.lane.b32.xlu0 %v25455_v43, %s14985_s9  ;;  %v14398_v63 = vsel %vm1030_vm3, %v14397_v9, %v25468_v62 }
 0xf0c   : > { %v14399_v43 = vsel %vm1032_vm4, %v14398_v63, %v25470_v45 }
 0xf0f   : > { %12595 = vrot.lane.b32.xlu1 %v25456_v52, %s14982_s4  ;;  %13009 = vrot.lane.b32.xlu0 %v25457_v58, %s14983_s6  ;;  %v25471_v52 = vld [vmem:[#allocation89_spill] sm:$0xff] }
 0xf10   : > { %v14194_v58 = vsel %vm187_vm0, %v14193_v39, %v25471_v52  ;;  %v13622_v39 = vsel %vm1038_vm7, %v23686_v37, %v23729_v27 }
 0xf13   : > { %12599 = vrot.lane.b32.xlu1 %v25458_v18, %s14985_s9  ;;  %12603 = vrot.lane.b32.xlu0 %v25459_v61, %s14983_s6  ;;  %s14797_s9 = sshll.u32 %s15043_s16, 8  ;;  %s15001_s16 = smov [#allocation6]  }
 0xf14   : > { %s14700_s20 = scalar_lea.hbm %s23875_s3, %s14797_s9  ;;  %s14919_s30 = sshll.u32 %s15001_s16, 4  ;;  %s14920_s30 = int_to_ptr.vmem [resolvable:$false] %s14919_s30 }
 0xf15   : > { %s14921_s26 = scalar_lea.vmem %s14920_s30, 512  ;;  %p14922_p2 = scmp.lt.s32.totalorder %s14703_s11, %s14920_s30 }
 0xf16   : > { %p14923_p7 = scmp.lt.s32.totalorder %s14921_s26, %s14915_s22 }
 0xf17   : > { %14604 = vperm.xlu1 %14864, %v14789_v60  }
 0xf18   : > { %p14924_p8 = por %p14923_p7, %p14922_p2 }
 0xf1a   : > { %p14925_p9 = pnand %p14924_p8, %p14918_p0 }
 0xf29   : > { %v13404_v20 = vpop.permute.xlu0 %13403 }
 0xf2a   : > { %v13437_v10 = vsel %vm1027_vm2, %v25460_v12, %v13404_v20 }
 0xf2d   : > { %v13408_v11 = vpop.permute.xlu0 %13407 }
 0xf2e   : > { %v13438_v54 = vsel %vm187_vm0, %v13437_v10, %v13408_v11  ;;  %v25472_v10 = vld [vmem:[#allocation68_spill] sm:$0xff] }
 0xf2f   : > { %v14400_v11 = vsel %vm1034_vm5, %v14399_v43, %v25472_v10  ;;  %v25483_v10 = vld [vmem:[#allocation79_spill] sm:$0xff] }
 0xf31   : > { %v13412_v41 = vpop.permute.xlu0 %13411 }
 0xf32   : > { %v13439_v13 = vsel %vm1030_vm3, %v13438_v54, %v13412_v41  ;;  %v25473_v54 = vld [vmem:[#allocation31_spill] sm:$0xff]  ;;  %v25474_v41 = vld [vmem:[#allocation40_spill] sm:$0xff] }
 0xf33   : > { %v14195_v29 = vsel %vm1030_vm3, %v14194_v58, %v25473_v54  ;;  %v14788_v58 = vld [vmem:[%s23873_s1 + $0x18] sm:$0xff] }
 0xf39   : > { %v13018_v31 = vpop.permute.xlu0 %13017  ;;  %v13014_v22 = vpop.permute.xlu1 %13013 }
 0xf3d   : > { %v23721_v19 = vpop.permute.xlu0 %13419  ;;  %v13416_v4 = vpop.permute.xlu1 %13415 }
 0xf41   : > { %v23723_v57 = vpop.permute.xlu0 %13423  ;;  %v13022_v25 = vpop.permute.xlu1 %13021 }
 0xf45   : > { %v23725_v28 = vpop.permute.xlu0 %13029  ;;  %v13026_v17 = vpop.permute.xlu1 %13025 }
 0xf49   : > { %v23727_v47 = vpop.permute.xlu0 %13427 }
 0xf4d   : > { %v23731_v26 = vpop.permute.xlu0 %13033 }
 0xf51   : > { %v23733_v15 = vpop.permute.xlu0 %13037 }
 0xf55   : > { %v13988_v50 = vpop.permute.xlu0 %13987 }
 0xf56   : > { %v14014_v18 = vsel %vm1027_vm2, %v13978_v36, %v13988_v50  ;;  %v14401_v50 = vsel %vm1036_vm6, %v14400_v11, %v25474_v41  ;;  %v25485_v41 = vld [vmem:[#allocation102_spill] sm:$0xff] }
 0xf59   : > { %v13992_v40 = vpop.permute.xlu0 %13991 }
 0xf5a   : > { %v14015_v60 = vsel %vm187_vm0, %v14014_v18, %v13992_v40  ;;  %v25475_v40 = vcombine.low %v23479_v6, %v23483_v46  ;;  %v13440_v46 = vsel %vm1032_vm4, %v13439_v13, %v13416_v4 }
 0xf5b   : > { %v13441_v13 = vsel %vm1034_vm5, %v13440_v46, %v23721_v19 }
 0xf5d   : > { %v13996_v32 = vpop.permute.xlu0 %13995 }
 0xf5e   : > { %v14016_v42 = vsel %vm1030_vm3, %v14015_v60, %v13996_v32  ;;  %v13047_v32 = vsel %vm1027_vm2, %v25475_v40, %v13014_v22  ;;  %v25478_v22 = vld [vmem:[#allocation108_spill] sm:$0xff]  ;;  %v25481_v60 = vld [vmem:[#allocation51_spill] sm:$0xff] }
 0xf5f   : > { %v13048_v6 = vsel %vm187_vm0, %v13047_v32, %v13018_v31 }
 0xf60   : > { %v13049_v9 = vsel %vm1030_vm3, %v13048_v6, %v13022_v25  ;;  %v13442_v25 = vsel %vm1036_vm6, %v13441_v13, %v23723_v57 }
 0xf61   : > { %v14000_v3 = vpop.permute.xlu0 %13999  ;;  %v13050_v62 = vsel %vm1032_vm4, %v13049_v9, %v13026_v17 }
 0xf62   : > { %v14017_v56 = vsel %vm1032_vm4, %v14016_v42, %v14000_v3  ;;  %v14196_v3 = vsel %vm1032_vm4, %v14195_v29, %v25476_v0  ;;  %v13051_v17 = vsel %vm1034_vm5, %v13050_v62, %v23725_v28  ;;  %v25482_v42 = vld [vmem:[#allocation91_spill] sm:$0xff]  ;;  %v25484_v29 = vld [vmem:[#allocation32_spill] sm:$0xff] }
 0xf63   : > { %v14197_v33 = vsel %vm1034_vm5, %v14196_v3, %v25477_v35  ;;  %v13052_v19 = vsel %vm1036_vm6, %v13051_v17, %v23731_v26 }
 0xf65   : > { %v13793_v5 = vpop.permute.xlu1 %13792  ;;  %v14004_v53 = vpop.permute.xlu0 %14003 }
 0xf66   : > { %v13819_v48 = vsel %vm1027_vm2, %v13783_v7, %v13793_v5  ;;  %v14018_v5 = vsel %vm1034_vm5, %v14017_v56, %v14004_v53  ;;  %v14402_v53 = vsel %vm1038_vm7, %v14401_v50, %v25478_v22 }
 0xf69   : > { %v13797_v23 = vpop.permute.xlu1 %13796  ;;  %v14008_v16 = vpop.permute.xlu0 %14007 }
 0xf6a   : > { %v13820_v61 = vsel %vm187_vm0, %v13819_v48, %v13797_v23  ;;  %v14019_v51 = vsel %vm1036_vm6, %v14018_v5, %v14008_v16  ;;  %v25479_v23 = vld [vmem:[#allocation95_spill] sm:$0xff]  ;;  %v13053_v48 = vsel %vm1038_vm7, %v13052_v19, %v23733_v15  ;;  %v25486_v5 = vld [vmem:[#allocation109_spill] sm:$0xff] }
 0xf6b   : > { %v14198_v49 = vsel %vm1036_vm6, %v14197_v33, %v25479_v23 }
 0xf6c   : > { %v14199_v31 = vsel %vm1038_vm7, %v14198_v49, %v25480_v24 }
 0xf6d   : > { %v13801_v1 = vpop.permute.xlu1 %13800  ;;  %v13809_v8 = vpop.permute.xlu0 %13808 }
 0xf6e   : > { %v13821_v20 = vsel %vm1030_vm3, %v13820_v61, %v13801_v1  ;;  %v13443_v1 = vsel %vm1038_vm7, %v13442_v25, %v23727_v47  ;;  %v14885_v61 = vld [vmem:[%s15125_s7] sm:$0xff] }
 0xf71   : > { %v13805_v55 = vpop.permute.xlu1 %13804  ;;  %v13813_v12 = vpop.permute.xlu0 %13812 }
 0xf72   : > { %v13822_v7 = vsel %vm1032_vm4, %v13821_v20, %v13805_v55  ;;  %v4315_v20 = vadd.f32 %v14885_v61, %v25481_v60 }
 0xf73   : > { %v13823_v36 = vsel %vm1034_vm5, %v13822_v7, %v13809_v8 }
 0xf74   : > { %v13824_v14 = vsel %vm1036_vm6, %v13823_v36, %v13813_v12  ;;  %v8404_v7 = vadd.f32 %v25482_v42, %v4315_v20  ;;  %v14886_v12 = vld [vmem:[%s15125_s7 + $0x8] sm:$0xff] }
 0xf75   : > { %v14012_v21 = vpop.permute.xlu1 %14011  ;;  %v13817_v38 = vpop.permute.xlu0 %13816  ;;  %v4316_v11 = vadd.f32 %v14886_v12, %v25483_v10 }
 0xf76   : > { %v14020_v34 = vsel %vm1038_vm7, %v14019_v51, %v14012_v21  ;;  %v13825_v16 = vsel %vm1038_vm7, %v13824_v14, %v13817_v38  ;;  %v11892_v56 = vadd.f32 %v25484_v29, %v8404_v7 }
 0xf77   : > { %14625 = vmatpush1.msra.mxu1 %v14020_v34  ;;  %v8405_v50 = vadd.f32 %v25485_v41, %v4316_v11 }
 0xf78   : > { %14626 = vmatprep.subr.mxu1 %v14402_v53 }
 0xf79   : > { %v13002_v63 = vpop.permute.xlu1 %13001  ;;  %14627 = vmatpush1.msra.mxu1 %v13825_v16  ;;  %v13400_v4 = vpop.permute.xlu0 %13399  ;;  %v11893_v51 = vadd.f32 %v25486_v5, %v8405_v50 }
 0xf7a   : > { %14628 = vmatprep.subr.mxu1 %v14199_v31  ;;  %v13044_v28 = vsel %vm1034_vm5, %v23591_v44, %v13002_v63  ;;  %v13436_v47 = vsel %vm1038_vm7, %v23611_v2, %v13400_v4 }
 0xf7b   : > { %14629 = vmatpush1.msra.mxu1 %v13622_v39 }
 0xf7c   : > { %14630 = vmatprep.subr.mxu1 %v14020_v34 }
 0xf7d   : > { %v12592_v8 = vpop.permute.xlu1 %12591  ;;  %14631 = vmatpush1.msra.mxu1 %v13443_v1  ;;  %v13006_v37 = vpop.permute.xlu0 %13005 }
 0xf7e   : > { %14632 = vmatprep.subr.mxu1 %v13825_v16  ;;  %v13045_v26 = vsel %vm1036_vm6, %v13044_v28, %v13006_v37  ;;  %v12637_v15 = vsel %vm1032_vm4, %v23605_v59, %v12592_v8 }
 0xf7f   : > { %14633 = vmatpush1.msra.mxu1 %v13053_v48 }
 0xf80   : > { %14634 = vmatprep.subr.mxu1 %v13622_v39 }
 0xf81   : > { %v12596_v57 = vpop.permute.xlu1 %12595  ;;  %14635 = vmatpush1.msra.mxu1 %v23663_v30  ;;  %v13010_v27 = vpop.permute.xlu0 %13009 }
 0xf82   : > { %14636 = vmatprep.subr.mxu1 %v13443_v1  ;;  %v13046_v45 = vsel %vm1038_vm7, %v13045_v26, %v13010_v27  ;;  %v12638_v43 = vsel %vm1034_vm5, %v12637_v15, %v12596_v57 }
 0xf83   : > { %14637 = vmatpush1.msra.mxu1 %v13436_v47 }
 0xf84   : > { %14638 = vmatprep.subr.mxu1 %v13053_v48 }
 0xf85   : > { %v12600_v52 = vpop.permute.xlu1 %12599  ;;  %14639 = vmatpush1.msra.mxu1 %v13046_v45  ;;  %v12604_v2 = vpop.permute.xlu0 %12603 }
 0xf86   : > { %v12639_v44 = vsel %vm1036_vm6, %v12638_v43, %v12600_v52  ;;  %14640 = vmatprep.subr.mxu1 %v23663_v30 }
 0xf87   : > { %v12640_v18 = vsel %vm1038_vm7, %v12639_v44, %v12604_v2 }
 0xf88   : > { %14641 = vmatpush1.msra.mxu1 %v12640_v18 }
 0xf89   : > { %14790 = vmatmul.mubr.msk.f32.vlgmr.msra.gmra.mxu1 %vm4238_vm8, %v14788_v58 }
 0xf92   : > { %v14605_v59 = vpop.permute.xlu1 %14604 }
0x1049   : > { %v14676_v55 = vpop.f32.mrf.mxu1 }
0x104a   : > { %v14677_v30 = vadd.f32 %v14676_v55, %v14605_v59 }
0x104b   : > { %v14678_v54 = vpop.f32.mrf.mxu1 }
0x104c   : > { %v14681_v36 = vmax.f32 %v14677_v30, 0.0  ;;  %v14679_v40 = vadd.f32 %v14678_v54, %v14605_v59 }
0x104e   : > { %v14683_v32 = vadd.f32 %v14681_v36, %v11892_v56  ;;  %v14682_v14 = vmax.f32 %v14679_v40, 0.0 }
0x1050   : > { %14685 = vst [vmem:[%s186_s10] sm:$0xff] %v14683_v32  ;;  %v14684_v21 = vadd.f32 %v14682_v14, %v11893_v51 }
0x1052   : > { %14686 = vst [vmem:[%s186_s10 + $0x8] sm:$0xff] %v14684_v21 }
0x1053   : > { %14928 = shalt.err (!%p14925_p9)
}
0x1054   : > { %s14929_s27 = scalar_lea.hbm %s14700_s20, 256  ;;  %s14933_s5 = scalar_lea.hbm %s23875_s3, 1024 }
0x1055   : > { %p14930_p1 = scmp.ne.s32.totalorder %s14700_s20, %s14929_s27  ;;  %p14934_p5 = scmp.lt.s32.totalorder %s14700_s20, %s23875_s3 }
0x1056   : > { %p14935_p13 = scmp.lt.s32.totalorder %s14933_s5, %s14929_s27 }
0x1057   : > { %p14931_p3 = pnand %p14930_p1, %p25487_p11 }
0x1058   : > { %p14936_p6 = por %p14935_p13, %p14934_p5 }
0x1059   : > { %p14932_p4 = pneg %p14931_p3 }
0x105b   : > { %p14937_p10 = pnand %p14936_p6, %p14932_p4 }
0x105d   : > { %14940 = shalt.err (!%p14937_p10)
}
0x105e   : > { %14800 = dma.vmem_to_hbm [thread:$0]  (%p25487_p11), %s14703_s11, 256, %s14700_s20, %s14688_s19  }
0x105f PF: > { %p14811_p12 = scmp.ge.s32.totalorder %s14979_s15, 2  ;;  %s14714_s4 = sand.u32 1, %s14967_s12  }
0x1060   : > { %p25488_p0 = scmp.ne.s32.totalorder %s24343_s25, 0  ;;  %s14715_s6 = scalar_lea.sflag [#allocation5], %s14714_s4 }
0x1062   : > { %p14807_p2 = pnand %p14811_p12, %p25488_p0 }
0x1064   : > { %p14808_p7 = pneg %p14807_p2 }
0x1066   : > { %14962 = dma.done.wait (%p14808_p7), %s14715_s6, 256  }
0x1067   : > { %14964 = vsyncadd (%p14808_p7), %s14715_s6, 4294967040  ;;  %p16_p8 = scmp.ge.s32.totalorder %s15047_s18, 6   ;;  %s25489_s12 = smov %s14971_s13 }
0x1068   : > { %s25490_s13 = smov %s14975_s14  ;;  %s25491_s14 = smov %s15059_s21 }
0x1069   : > { %s25492_s15 = smov %s15047_s18  ;;  %18 = sbr.rel (!%p16_p8) target bundleno = 5 (0x5), region = 83 }
0x106e   :  { %14720 = vsyncpa [#allocation4], 1 }
0x106f   :  { %14722 = vsyncpa [#allocation4 + $0x1], 1 }
0x1070   :  { %14723 = vsyncpa [#allocation5], 1 }
0x1071   :  { %14725 = vsyncpa [#allocation5 + $0x1], 1 }

</bundles_post_ra>
